<compile_context>
chip_gen: v7x
topology: tpu7x:2x2x1
jax: 0.10.0
libtpu: 0.0.40
codegen_flags: <defaults>
</compile_context>

<pallas_src>
import functools

import jax
import jax.numpy as jnp
from jax.experimental import pallas as pl
from jax.experimental.pallas import tpu as pltpu

FEAT = 1536          # inceptionresnetv2 feature width entering the fc head
TK = 512             # layer-1 reduction block: 1536 = 3 * 512
LANE = 128           # lane quantum
BATCH_PAD = 16       # bf16 sublane quantum


def _round_up(x, m):
    return ((x + m - 1) // m) * m


def _codes_to_bf16(q):
    # int8 codes (|q| <= 127) are exactly representable in bf16; go via f32 for a
    # portable cast path (both converts are plain VPU ops).
    return q.astype(jnp.float32).astype(jnp.bfloat16)


# --------------------------------------------------------------------------
# Fused fc-head kernel.
#   Grid axis 0 walks the layer-1 reduction dim (FEAT) in TK blocks so the W1
#   stream overlaps compute; W2 is prefetched by manual DMA under that loop.
#   feat : (bp, FEAT) bf16   pooled backbone features (blocked along FEAT)
#   qK   : int8 weight codes (BN of the previous stage folded in)
#   sK   : (1, out) f32 per-output-channel quant scales (applied post-matmul)
#   bK   : (1, out) f32 biases (BN shift folded in)
#   o    : (bp, n_pad) f32
# --------------------------------------------------------------------------
def head_kernel(feat_ref, q1_ref, s1_ref, b1_ref, s2_ref, b2_ref,
                q3_ref, s3_ref, b3_ref, q4_ref, s4_ref, b4_ref,
                w2_hbm_ref, o_ref, w2_buf, dma_sem, acc_ref):
    k = pl.program_id(0)
    last = pl.num_programs(0) - 1

    @pl.when(k == 0)
    def _init():
        acc_ref[...] = jnp.zeros_like(acc_ref)
        # W2 is only needed at the last grid step: start its HBM->VMEM copy now so
        # it streams underneath the layer-1 K loop instead of gating the prologue.
        pltpu.make_async_copy(w2_hbm_ref, w2_buf, dma_sem.at[0]).start()

    # Layer-1 partial product for this K block; f32 accumulation in VMEM scratch.
    acc_ref[...] += jnp.dot(feat_ref[...], _codes_to_bf16(q1_ref[...]),
                            preferred_element_type=jnp.float32)

    @pl.when(k == last)
    def _finish():
        pltpu.make_async_copy(w2_hbm_ref, w2_buf, dma_sem.at[0]).wait()

        # Layer 1 epilogue: quant-scale + bias (BN folded), ReLU.
        z = acc_ref[...] * s1_ref[...] + b1_ref[...]
        h = jnp.maximum(z, 0.0).astype(jnp.bfloat16)

        # Layer 2 (weights arrived via the manual prefetch above).
        z = jnp.dot(h, _codes_to_bf16(w2_buf[...]),
                    preferred_element_type=jnp.float32) * s2_ref[...] + b2_ref[...]
        h = jnp.maximum(z, 0.0).astype(jnp.bfloat16)

        # Layer 3.
        z = jnp.dot(h, _codes_to_bf16(q3_ref[...]),
                    preferred_element_type=jnp.float32) * s3_ref[...] + b3_ref[...]
        h = jnp.maximum(z, 0.0).astype(jnp.bfloat16)

        # Layer 4 (output width padded to a full 128-lane tile -> unmasked stores).
        z = jnp.dot(h, _codes_to_bf16(q4_ref[...]),
                    preferred_element_type=jnp.float32) * s4_ref[...] + b4_ref[...]
        o_ref[...] = z


# --------------------------------------------------------------------------
# Forward wrapper
# --------------------------------------------------------------------------
@functools.partial(jax.jit, static_argnames=("num_classes",))
def model_qa_forward(x_nchw, params, num_classes):
    B, C, H, W = x_nchw.shape
    assert C == FEAT
    (q1, s1, b1), (q2, s2, b2), (q3, s3, b3), (q4, s4, b4) = params
    n1, n2, n3 = q1.shape[1], q2.shape[1], q3.shape[1]
    n_pad = q4.shape[1]

    # Global average pool of the backbone output, done in XLA directly on NCHW
    # (no transpose, no HW-expanded padding): kernel input is just (bp, FEAT).
    feat = jnp.mean(x_nchw, axis=(2, 3))
    bp = _round_up(max(B, BATCH_PAD), BATCH_PAD)
    feat_p = jnp.pad(feat, ((0, bp - B), (0, 0))).astype(jnp.bfloat16)

    n_k = FEAT // TK
    const = lambda k: (0, 0)

    out = pl.pallas_call(
        head_kernel,
        out_shape=jax.ShapeDtypeStruct((bp, n_pad), jnp.float32),
        grid_spec=pltpu.PrefetchScalarGridSpec(
            num_scalar_prefetch=0,
            grid=(n_k,),
            in_specs=[
                pl.BlockSpec((bp, TK), lambda k: (0, k)),   # pooled features
                pl.BlockSpec((TK, n1), lambda k: (k, 0)),   # W1 int8 (streamed)
                pl.BlockSpec((1, n1), const),               # s1
                pl.BlockSpec((1, n1), const),               # b1
                pl.BlockSpec((1, n2), const),               # s2
                pl.BlockSpec((1, n2), const),               # b2
                pl.BlockSpec((n2, n3), const),              # W3 int8
                pl.BlockSpec((1, n3), const),               # s3
                pl.BlockSpec((1, n3), const),               # b3
                pl.BlockSpec((n3, n_pad), const),           # W4 int8
                pl.BlockSpec((1, n_pad), const),            # s4
                pl.BlockSpec((1, n_pad), const),            # b4
                pl.BlockSpec(memory_space=pl.ANY),          # W2 int8 stays in HBM
            ],
            out_specs=pl.BlockSpec((bp, n_pad), const),
            scratch_shapes=[
                pltpu.VMEM((n1, n2), jnp.int8),             # W2 landing buffer
                pltpu.SemaphoreType.DMA((1,)),              # W2 prefetch semaphore
                pltpu.VMEM((bp, n1), jnp.float32),          # layer-1 accumulator
            ],
        ),
        compiler_params=pltpu.CompilerParams(
            dimension_semantics=("arbitrary",),             # K is a reduction axis
            vmem_limit_bytes=32 * 1024 * 1024,              # ~16 MiB peak live
        ),
    )(feat_p, q1, s1, b1, s2, b2, q3, s3, b3, q4, s4, b4, q2)

    return out[:B, :num_classes]


# --------------------------------------------------------------------------
# Parameter construction (deterministic, synthetic) + BN folding + int8 quant
# --------------------------------------------------------------------------
def make_raw_params(key, num_classes):
    """Synthetic eval-mode parameters in the original (unfolded) f32 form."""
    dims = [(FEAT, 2048), (2048, 1024), (1024, 256), (256, num_classes)]
    raw = []
    for i, (k_in, k_out) in enumerate(dims):
        key, kw, kb, kg, kbe, km, kv = jax.random.split(key, 7)
        w = jax.random.normal(kw, (k_in, k_out), jnp.float32) / jnp.sqrt(float(k_in))
        b = 0.01 * jax.random.normal(kb, (k_out,), jnp.float32)
        if i < 3:   # followed by ReLU + BatchNorm1d (+ Dropout, identity in eval)
            gamma = 1.0 + 0.1 * jax.random.normal(kg, (k_out,), jnp.float32)
            beta = 0.1 * jax.random.normal(kbe, (k_out,), jnp.float32)
            rmean = 0.1 * jax.random.normal(km, (k_out,), jnp.float32)
            rvar = 1.0 + 0.1 * jax.random.uniform(kv, (k_out,), jnp.float32)
            eps = 1e-5
            scale = gamma / jnp.sqrt(rvar + eps)      # BN eval: y = x*scale + shift
            shift = beta - rmean * scale
        else:
            scale, shift = None, None
        raw.append((w, b, scale, shift))
    return raw


def _quantize_per_column(w):
    """Symmetric per-output-channel int8: w ~= q * scale (scale is a f32 row)."""
    amax = jnp.max(jnp.abs(w), axis=0)
    scale = jnp.where(amax > 0, amax / 127.0, 1.0)
    q = jnp.clip(jnp.round(w / scale), -127.0, 127.0).astype(jnp.int8)
    return q, scale


def fold_and_quantize_params(raw, num_classes):
    """Fold each ReLU->BN affine into the NEXT Linear (W' = diag(s)W, b' = t@W + b),
    pad the final layer's width to a 128-lane tile, then int8-quantize each weight
    per output channel.  Returns [(q_int8, scale_row_f32, bias_row_f32), ...]."""
    folded = []
    prev_scale, prev_shift = None, None
    for (w, b, scale, shift) in raw:
        if prev_scale is not None:
            b = b + prev_shift @ w
            w = prev_scale[:, None] * w
        folded.append([w, b])
        prev_scale, prev_shift = scale, shift

    n_pad = _round_up(max(num_classes, LANE), LANE)
    w_last, b_last = folded[-1]
    folded[-1] = [jnp.pad(w_last, ((0, 0), (0, n_pad - num_classes))),
                  jnp.pad(b_last, ((0, n_pad - num_classes),))]

    out = []
    for w, b in folded:
        q, s = _quantize_per_column(w)
        out.append((q,
                    s.reshape(1, -1).astype(jnp.float32),
                    b.reshape(1, -1).astype(jnp.float32)))
    return out


# --------------------------------------------------------------------------
# Pure-JAX references
# --------------------------------------------------------------------------
def reference_same_precision(x_nchw, qparams, num_classes):
    """Exactly the kernel's math: f32 GAP, bf16 activations, int8-code matmul in
    bf16 with f32 accumulation and post-matmul per-channel scale + bias."""
    h = jnp.mean(x_nchw, axis=(2, 3)).astype(jnp.bfloat16)
    z = None
    for i, (q, s, b) in enumerate(qparams):
        z = jnp.dot(h, q.astype(jnp.bfloat16),
                    preferred_element_type=jnp.float32) * s + b
        if i < len(qparams) - 1:
            h = jnp.maximum(z, 0.0).astype(jnp.bfloat16)
    return z[:, :num_classes]


def reference_semantics(x_nchw, raw_params, num_classes):
    """Original eval-mode math: f32 Linear -> ReLU -> BatchNorm1d (running stats)."""
    h = jnp.mean(x_nchw, axis=(2, 3))
    for (w, b, scale, shift) in raw_params:
        h = h @ w + b
        if scale is not None:
            h = jnp.maximum(h, 0.0) * scale + shift
    return h


if __name__ == "__main__":
    num_classes = 10
    B, H, W = 2, 4, 4

    key = jax.random.PRNGKey(0)
    kx, kp = jax.random.split(key)
    # Stand-in for the (unreproduced) conv backbone's pre-pool feature map.
    x = jax.random.normal(kx, (B, FEAT, H, W), jnp.float32)
    raw = make_raw_params(kp, num_classes)
    params = fold_and_quantize_params(raw, num_classes)

    out = model_qa_forward(x, params, num_classes)
    out = jax.block_until_ready(out)
    assert out.shape == (B, num_classes)

    # Tight check: kernel vs identical quantized pure-JAX computation.
    ref1 = reference_same_precision(x, params, num_classes)
    assert jnp.allclose(out, ref1, atol=1e-2, rtol=1e-2), "mismatch vs same-precision reference"

    # Loose check: kernel vs original f32 eval-mode semantics (unfolded BN);
    # differences come only from int8/bf16 quantization of the head weights.
    ref2 = reference_semantics(x, raw, num_classes)
    assert jnp.allclose(out, ref2, atol=1.5e-1, rtol=1.5e-1), "mismatch vs f32 semantic reference"

    print("KERNEL_OK")
</pallas_src>

<mosaic_0001>
module attributes {stable_mosaic.version = 11 : i64} {
  func.func @head_kernel(%arg0: i32, %arg1: memref<16x512xbf16, #tpu.memory_space<vmem>>, %arg2: memref<512x2048xi8, #tpu.memory_space<vmem>>, %arg3: memref<1x2048xf32, #tpu.memory_space<vmem>>, %arg4: memref<1x2048xf32, #tpu.memory_space<vmem>>, %arg5: memref<1x1024xf32, #tpu.memory_space<vmem>>, %arg6: memref<1x1024xf32, #tpu.memory_space<vmem>>, %arg7: memref<1024x256xi8, #tpu.memory_space<vmem>>, %arg8: memref<1x256xf32, #tpu.memory_space<vmem>>, %arg9: memref<1x256xf32, #tpu.memory_space<vmem>>, %arg10: memref<256x128xi8, #tpu.memory_space<vmem>>, %arg11: memref<1x128xf32, #tpu.memory_space<vmem>>, %arg12: memref<1x128xf32, #tpu.memory_space<vmem>>, %arg13: memref<2048x1024xi8, #tpu.memory_space<any>>, %arg14: memref<16x128xf32, #tpu.memory_space<vmem>>, %arg15: memref<2048x1024xi8, #tpu.memory_space<vmem>>, %arg16: memref<1x!tpu.dma_semaphore, #tpu.memory_space<semaphore_mem>>, %arg17: memref<16x2048xf32, #tpu.memory_space<vmem>>) attributes {dimension_semantics = [#tpu.dimension_semantics<arbitrary>], iteration_bounds = array<i64: 3>, scalar_prefetch = 0 : i64, scratch_operands = 3 : i64, tpu.core_type = #tpu.core_type<tc>, window_params = [{transform_indices = @transform_0, window_bounds = array<i64: 16, 512>}, {transform_indices = @transform_1, window_bounds = array<i64: 512, 2048>}, {pipeline_mode = #tpu.pipeline_mode<synchronous>, transform_indices = @transform_2, window_bounds = array<i64: 1, 2048>}, {pipeline_mode = #tpu.pipeline_mode<synchronous>, transform_indices = @transform_3, window_bounds = array<i64: 1, 2048>}, {pipeline_mode = #tpu.pipeline_mode<synchronous>, transform_indices = @transform_4, window_bounds = array<i64: 1, 1024>}, {pipeline_mode = #tpu.pipeline_mode<synchronous>, transform_indices = @transform_5, window_bounds = array<i64: 1, 1024>}, {pipeline_mode = #tpu.pipeline_mode<synchronous>, transform_indices = @transform_6, window_bounds = array<i64: 1024, 256>}, {pipeline_mode = #tpu.pipeline_mode<synchronous>, transform_indices = @transform_7, window_bounds = array<i64: 1, 256>}, {pipeline_mode = #tpu.pipeline_mode<synchronous>, transform_indices = @transform_8, window_bounds = array<i64: 1, 256>}, {pipeline_mode = #tpu.pipeline_mode<synchronous>, transform_indices = @transform_9, window_bounds = array<i64: 256, 128>}, {pipeline_mode = #tpu.pipeline_mode<synchronous>, transform_indices = @transform_10, window_bounds = array<i64: 1, 128>}, {pipeline_mode = #tpu.pipeline_mode<synchronous>, transform_indices = @transform_11, window_bounds = array<i64: 1, 128>}, {}, {pipeline_mode = #tpu.pipeline_mode<synchronous>, transform_indices = @transform_13, window_bounds = array<i64: 16, 128>}]} {
    %c0_i32 = arith.constant 0 : i32
    %0 = arith.cmpi eq, %arg0, %c0_i32 : i32
    %1 = arith.extui %0 : i1 to i32
    %c0_i32_0 = arith.constant 0 : i32
    %2 = arith.cmpi ne, %1, %c0_i32_0 : i32
    scf.if %2 {
      %cst_9 = arith.constant 0.000000e+00 : f32
      %14 = vector.broadcast %cst_9 : f32 to vector<16x2048xf32>
      %c0_10 = arith.constant 0 : index
      %c0_11 = arith.constant 0 : index
      %15 = vector.load %arg17[%c0_10, %c0_11] : memref<16x2048xf32, #tpu.memory_space<vmem>>, vector<16x2048xf32>
      tpu.vector_store %arg17[%c0_10, %c0_11], %14 {strides = array<i32>} : memref<16x2048xf32, #tpu.memory_space<vmem>>, vector<16x2048xf32>,
      %c0_i32_12 = arith.constant 0 : i32
      %16 = tpu.memref_slice %arg16[%c0_i32_12] : memref<1x!tpu.dma_semaphore, #tpu.memory_space<semaphore_mem>> -> memref<1x!tpu.dma_semaphore, #tpu.memory_space<semaphore_mem>>
      %17 = tpu.memref_squeeze %16 : memref<1x!tpu.dma_semaphore, #tpu.memory_space<semaphore_mem>> -> memref<!tpu.dma_semaphore, #tpu.memory_space<semaphore_mem>>
      tpu.enqueue_dma source(%arg13 : memref<2048x1024xi8, #tpu.memory_space<any>>) target(%arg15 : memref<2048x1024xi8, #tpu.memory_space<vmem>>) target_semaphore(%17 : memref<!tpu.dma_semaphore, #tpu.memory_space<semaphore_mem>>)
    } else {
    }
    %c0 = arith.constant 0 : index
    %c0_1 = arith.constant 0 : index
    %3 = vector.load %arg17[%c0, %c0_1] : memref<16x2048xf32, #tpu.memory_space<vmem>>, vector<16x2048xf32>
    %c0_2 = arith.constant 0 : index
    %c0_3 = arith.constant 0 : index
    %4 = vector.load %arg1[%c0_2, %c0_3] : memref<16x512xbf16, #tpu.memory_space<vmem>>, vector<16x512xbf16>
    %c0_4 = arith.constant 0 : index
    %c0_5 = arith.constant 0 : index
    %5 = vector.load %arg2[%c0_4, %c0_5] : memref<512x2048xi8, #tpu.memory_space<vmem>>, vector<512x2048xi8>
    %6 = arith.sitofp %5 : vector<512x2048xi8> to vector<512x2048xf32>
    %7 = arith.truncf %6 : vector<512x2048xf32> to vector<512x2048xbf16>
    %cst = arith.constant dense<0.000000e+00> : vector<16x2048xf32>
    %8 = tpu.matmul %4, %7, %cst {dimension_numbers = #tpu.dot_dimension_numbers<[1], [0], [0], [1], [0, 0, 1, 1], [], []>} : vector<16x512xbf16>, vector<512x2048xbf16>, vector<16x2048xf32> -> vector<16x2048xf32>
    %9 = arith.addf %3, %8 : vector<16x2048xf32>
    %c0_6 = arith.constant 0 : index
    %c0_7 = arith.constant 0 : index
    %10 = vector.load %arg17[%c0_6, %c0_7] : memref<16x2048xf32, #tpu.memory_space<vmem>>, vector<16x2048xf32>
    tpu.vector_store %arg17[%c0_6, %c0_7], %9 {strides = array<i32>} : memref<16x2048xf32, #tpu.memory_space<vmem>>, vector<16x2048xf32>,
    %c2_i32 = arith.constant 2 : i32
    %11 = arith.cmpi eq, %arg0, %c2_i32 : i32
    %12 = arith.extui %11 : i1 to i32
    %c0_i32_8 = arith.constant 0 : i32
    %13 = arith.cmpi ne, %12, %c0_i32_8 : i32
    scf.if %13 {
      %c0_i32_9 = arith.constant 0 : i32
      %14 = tpu.memref_slice %arg16[%c0_i32_9] : memref<1x!tpu.dma_semaphore, #tpu.memory_space<semaphore_mem>> -> memref<1x!tpu.dma_semaphore, #tpu.memory_space<semaphore_mem>>
      %15 = tpu.memref_squeeze %14 : memref<1x!tpu.dma_semaphore, #tpu.memory_space<semaphore_mem>> -> memref<!tpu.dma_semaphore, #tpu.memory_space<semaphore_mem>>
      tpu.wait_dma2 semaphore(%15 : memref<!tpu.dma_semaphore, #tpu.memory_space<semaphore_mem>>) src(%arg13 : memref<2048x1024xi8, #tpu.memory_space<any>>) dst(%arg15 : memref<2048x1024xi8, #tpu.memory_space<vmem>>)
      %c0_10 = arith.constant 0 : index
      %c0_11 = arith.constant 0 : index
      %16 = vector.load %arg17[%c0_10, %c0_11] : memref<16x2048xf32, #tpu.memory_space<vmem>>, vector<16x2048xf32>
      %c0_12 = arith.constant 0 : index
      %c0_13 = arith.constant 0 : index
      %17 = vector.load %arg3[%c0_12, %c0_13] : memref<1x2048xf32, #tpu.memory_space<vmem>>, vector<1x2048xf32>
      %18 = vector.broadcast %17 : vector<1x2048xf32> to vector<16x2048xf32>
      %19 = arith.mulf %16, %18 : vector<16x2048xf32>
      %c0_14 = arith.constant 0 : index
      %c0_15 = arith.constant 0 : index
      %20 = vector.load %arg4[%c0_14, %c0_15] : memref<1x2048xf32, #tpu.memory_space<vmem>>, vector<1x2048xf32>
      %21 = vector.broadcast %20 : vector<1x2048xf32> to vector<16x2048xf32>
      %22 = arith.addf %19, %21 : vector<16x2048xf32>
      %cst_16 = arith.constant 0.000000e+00 : f32
      %23 = vector.broadcast %cst_16 : f32 to vector<16x2048xf32>
      %24 = arith.maximumf %22, %23 : vector<16x2048xf32>
      %25 = arith.truncf %24 : vector<16x2048xf32> to vector<16x2048xbf16>
      %c0_17 = arith.constant 0 : index
      %c0_18 = arith.constant 0 : index
      %26 = vector.load %arg15[%c0_17, %c0_18] : memref<2048x1024xi8, #tpu.memory_space<vmem>>, vector<2048x1024xi8>
      %27 = arith.sitofp %26 : vector<2048x1024xi8> to vector<2048x1024xf32>
      %28 = arith.truncf %27 : vector<2048x1024xf32> to vector<2048x1024xbf16>
      %cst_19 = arith.constant dense<0.000000e+00> : vector<16x1024xf32>
      %29 = tpu.matmul %25, %28, %cst_19 {dimension_numbers = #tpu.dot_dimension_numbers<[1], [0], [0], [1], [0, 0, 1, 1], [], []>} : vector<16x2048xbf16>, vector<2048x1024xbf16>, vector<16x1024xf32> -> vector<16x1024xf32>
      %c0_20 = arith.constant 0 : index
      %c0_21 = arith.constant 0 : index
      %30 = vector.load %arg5[%c0_20, %c0_21] : memref<1x1024xf32, #tpu.memory_space<vmem>>, vector<1x1024xf32>
      %31 = vector.broadcast %30 : vector<1x1024xf32> to vector<16x1024xf32>
      %32 = arith.mulf %29, %31 : vector<16x1024xf32>
      %c0_22 = arith.constant 0 : index
      %c0_23 = arith.constant 0 : index
      %33 = vector.load %arg6[%c0_22, %c0_23] : memref<1x1024xf32, #tpu.memory_space<vmem>>, vector<1x1024xf32>
      %34 = vector.broadcast %33 : vector<1x1024xf32> to vector<16x1024xf32>
      %35 = arith.addf %32, %34 : vector<16x1024xf32>
      %cst_24 = arith.constant 0.000000e+00 : f32
      %36 = vector.broadcast %cst_24 : f32 to vector<16x1024xf32>
      %37 = arith.maximumf %35, %36 : vector<16x1024xf32>
      %38 = arith.truncf %37 : vector<16x1024xf32> to vector<16x1024xbf16>
      %c0_25 = arith.constant 0 : index
      %c0_26 = arith.constant 0 : index
      %39 = vector.load %arg7[%c0_25, %c0_26] : memref<1024x256xi8, #tpu.memory_space<vmem>>, vector<1024x256xi8>
      %40 = arith.sitofp %39 : vector<1024x256xi8> to vector<1024x256xf32>
      %41 = arith.truncf %40 : vector<1024x256xf32> to vector<1024x256xbf16>
      %cst_27 = arith.constant dense<0.000000e+00> : vector<16x256xf32>
      %42 = tpu.matmul %38, %41, %cst_27 {dimension_numbers = #tpu.dot_dimension_numbers<[1], [0], [0], [1], [0, 0, 1, 1], [], []>} : vector<16x1024xbf16>, vector<1024x256xbf16>, vector<16x256xf32> -> vector<16x256xf32>
      %c0_28 = arith.constant 0 : index
      %c0_29 = arith.constant 0 : index
      %43 = vector.load %arg8[%c0_28, %c0_29] : memref<1x256xf32, #tpu.memory_space<vmem>>, vector<1x256xf32>
      %44 = vector.broadcast %43 : vector<1x256xf32> to vector<16x256xf32>
      %45 = arith.mulf %42, %44 : vector<16x256xf32>
      %c0_30 = arith.constant 0 : index
      %c0_31 = arith.constant 0 : index
      %46 = vector.load %arg9[%c0_30, %c0_31] : memref<1x256xf32, #tpu.memory_space<vmem>>, vector<1x256xf32>
      %47 = vector.broadcast %46 : vector<1x256xf32> to vector<16x256xf32>
      %48 = arith.addf %45, %47 : vector<16x256xf32>
      %cst_32 = arith.constant 0.000000e+00 : f32
      %49 = vector.broadcast %cst_32 : f32 to vector<16x256xf32>
      %50 = arith.maximumf %48, %49 : vector<16x256xf32>
      %51 = arith.truncf %50 : vector<16x256xf32> to vector<16x256xbf16>
      %c0_33 = arith.constant 0 : index
      %c0_34 = arith.constant 0 : index
      %52 = vector.load %arg10[%c0_33, %c0_34] : memref<256x128xi8, #tpu.memory_space<vmem>>, vector<256x128xi8>
      %53 = arith.sitofp %52 : vector<256x128xi8> to vector<256x128xf32>
      %54 = arith.truncf %53 : vector<256x128xf32> to vector<256x128xbf16>
      %cst_35 = arith.constant dense<0.000000e+00> : vector<16x128xf32>
      %55 = tpu.matmul %51, %54, %cst_35 {dimension_numbers = #tpu.dot_dimension_numbers<[1], [0], [0], [1], [0, 0, 1, 1], [], []>} : vector<16x256xbf16>, vector<256x128xbf16>, vector<16x128xf32> -> vector<16x128xf32>
      %c0_36 = arith.constant 0 : index
      %c0_37 = arith.constant 0 : index
      %56 = vector.load %arg11[%c0_36, %c0_37] : memref<1x128xf32, #tpu.memory_space<vmem>>, vector<1x128xf32>
      %57 = vector.broadcast %56 : vector<1x128xf32> to vector<16x128xf32>
      %58 = arith.mulf %55, %57 : vector<16x128xf32>
      %c0_38 = arith.constant 0 : index
      %c0_39 = arith.constant 0 : index
      %59 = vector.load %arg12[%c0_38, %c0_39] : memref<1x128xf32, #tpu.memory_space<vmem>>, vector<1x128xf32>
      %60 = vector.broadcast %59 : vector<1x128xf32> to vector<16x128xf32>
      %61 = arith.addf %58, %60 : vector<16x128xf32>
      %c0_40 = arith.constant 0 : index
      %c0_41 = arith.constant 0 : index
      %62 = vector.load %arg14[%c0_40, %c0_41] : memref<16x128xf32, #tpu.memory_space<vmem>>, vector<16x128xf32>
      tpu.vector_store %arg14[%c0_40, %c0_41], %61 {strides = array<i32>} : memref<16x128xf32, #tpu.memory_space<vmem>>, vector<16x128xf32>,
    } else {
    }
    return
  }
  func.func @transform_0(%arg0: i32) -> (i32, i32) {
    %c0_i32 = arith.constant 0 : i32
    %c0_i32_0 = arith.constant 0 : i32
    return %c0_i32, %arg0 : i32, i32
  }
  func.func @transform_1(%arg0: i32) -> (i32, i32) {
    %c0_i32 = arith.constant 0 : i32
    %c0_i32_0 = arith.constant 0 : i32
    return %arg0, %c0_i32 : i32, i32
  }
  func.func @transform_2(%arg0: i32) -> (i32, i32) {
    %c0_i32 = arith.constant 0 : i32
    %c0_i32_0 = arith.constant 0 : i32
    %c0_i32_1 = arith.constant 0 : i32
    return %c0_i32, %c0_i32_0 : i32, i32
  }
  func.func @transform_3(%arg0: i32) -> (i32, i32) {
    %c0_i32 = arith.constant 0 : i32
    %c0_i32_0 = arith.constant 0 : i32
    %c0_i32_1 = arith.constant 0 : i32
    return %c0_i32, %c0_i32_0 : i32, i32
  }
  func.func @transform_4(%arg0: i32) -> (i32, i32) {
    %c0_i32 = arith.constant 0 : i32
    %c0_i32_0 = arith.constant 0 : i32
    %c0_i32_1 = arith.constant 0 : i32
    return %c0_i32, %c0_i32_0 : i32, i32
  }
  func.func @transform_5(%arg0: i32) -> (i32, i32) {
    %c0_i32 = arith.constant 0 : i32
    %c0_i32_0 = arith.constant 0 : i32
    %c0_i32_1 = arith.constant 0 : i32
    return %c0_i32, %c0_i32_0 : i32, i32
  }
  func.func @transform_6(%arg0: i32) -> (i32, i32) {
    %c0_i32 = arith.constant 0 : i32
    %c0_i32_0 = arith.constant 0 : i32
    %c0_i32_1 = arith.constant 0 : i32
    return %c0_i32, %c0_i32_0 : i32, i32
  }
  func.func @transform_7(%arg0: i32) -> (i32, i32) {
    %c0_i32 = arith.constant 0 : i32
    %c0_i32_0 = arith.constant 0 : i32
    %c0_i32_1 = arith.constant 0 : i32
    return %c0_i32, %c0_i32_0 : i32, i32
  }
  func.func @transform_8(%arg0: i32) -> (i32, i32) {
    %c0_i32 = arith.constant 0 : i32
    %c0_i32_0 = arith.constant 0 : i32
    %c0_i32_1 = arith.constant 0 : i32
    return %c0_i32, %c0_i32_0 : i32, i32
  }
  func.func @transform_9(%arg0: i32) -> (i32, i32) {
    %c0_i32 = arith.constant 0 : i32
    %c0_i32_0 = arith.constant 0 : i32
    %c0_i32_1 = arith.constant 0 : i32
    return %c0_i32, %c0_i32_0 : i32, i32
  }
  func.func @transform_10(%arg0: i32) -> (i32, i32) {
    %c0_i32 = arith.constant 0 : i32
    %c0_i32_0 = arith.constant 0 : i32
    %c0_i32_1 = arith.constant 0 : i32
    return %c0_i32, %c0_i32_0 : i32, i32
  }
  func.func @transform_11(%arg0: i32) -> (i32, i32) {
    %c0_i32 = arith.constant 0 : i32
    %c0_i32_0 = arith.constant 0 : i32
    %c0_i32_1 = arith.constant 0 : i32
    return %c0_i32, %c0_i32_0 : i32, i32
  }
  func.func @transform_13(%arg0: i32) -> (i32, i32) {
    %c0_i32 = arith.constant 0 : i32
    %c0_i32_0 = arith.constant 0 : i32
    %c0_i32_1 = arith.constant 0 : i32
    return %c0_i32, %c0_i32_0 : i32, i32
  }
}

</mosaic_0001>

<bundles_post_ra>
// kernel: model_qa_forward.1
= control target key start
LH: loop header
LB: loop body
LE: loop exit
PB: predicated region body
PF: predicated region fallthrough
CT: control target
= control target key end

     0   :  { %s8052_s0 = inlined_call_operand.vmem [shape: bf16[16,1536], index: 0, kind: input, shape index: {}]   ;;  %s8053_s1 = inlined_call_operand.hbm [shape: s8[1536,2048], index: 1, kind: input, shape index: {}]   ;;  %s8054_s2 = inlined_call_operand.hbm [shape: f32[1,2048], index: 2, kind: input, shape index: {}]   ;;  %s8055_s3 = inlined_call_operand.hbm [shape: f32[1,2048], index: 3, kind: input, shape index: {}]   ;;  %s8056_s4 = inlined_call_operand.hbm [shape: f32[1,1024], index: 4, kind: input, shape index: {}]   ;;  %s8057_s5 = inlined_call_operand.hbm [shape: f32[1,1024], index: 5, kind: input, shape index: {}]   ;;  %s8058_s6 = inlined_call_operand.hbm [shape: s8[1024,256], index: 6, kind: input, shape index: {}]   ;;  %s8059_s7 = inlined_call_operand.hbm [shape: f32[1,256], index: 7, kind: input, shape index: {}]   ;;  %s8060_s8 = inlined_call_operand.hbm [shape: f32[1,256], index: 8, kind: input, shape index: {}]   ;;  %s8061_s9 = inlined_call_operand.hbm [shape: s8[256,128], index: 9, kind: input, shape index: {}]   ;;  %s8062_s10 = inlined_call_operand.hbm [shape: f32[1,128], index: 10, kind: input, shape index: {}]   ;;  %s8063_s11 = inlined_call_operand.hbm [shape: f32[1,128], index: 11, kind: input, shape index: {}]   ;;  %s8064_s12 = inlined_call_operand.hbm [shape: s8[2048,1024], index: 12, kind: input, shape index: {}]   ;;  %s8065_s13 = inlined_call_operand.vmem [shape: f32[16,128], index: 13, kind: output, shape index: {}]  }
   0x1   :  { %8080 = sst [smem:[#allocation40_spill]] %s8054_s2 }
   0x2   :  { %8081 = sst [smem:[#allocation41_spill]] %s8056_s4 }
   0x3   :  { %8082 = sst [smem:[#allocation42_spill]] %s8064_s12 }
   0x4   :  { %8083 = sst [smem:[#allocation43_spill]] %s8065_s13 }
   0x5   :  { %18 = vsyncpa [#allocation7], 0 }
   0x6   :  { %20 = vsyncpa [#allocation7 + $0x1], 0 }
   0x7   :  { %21 = vsyncpa [#allocation9], 0 }
   0x8   :  { %22 = vsyncpa [#allocation12], 0 }
   0x9   :  { %23 = vsyncpa [#allocation15], 0 }
   0xa   :  { %24 = vsyncpa [#allocation18], 0 }
   0xb   :  { %25 = vsyncpa [#allocation21], 0  ;;  %s7100_s25 = smov 0   ;;  %s7102_s26 = smov 0  }
   0xc   :  { %s7104_s27 = smov 0   ;;  %s7106_s28 = smov 0  }
   0xd LB: > { %8084 = sst [smem:[#allocation34_spill]] %s7001_s26  ;;  %s7119_s29 = sadd.s32 4294967295, %s7009_s28   ;;  %s7009_s28 = sphi %s7106_s28, %s8119_s28   ;;  %s7005_s27 = sphi %s7104_s27, %s8123_s27   ;;  %s7001_s26 = sphi %s7102_s26, %s8122_s26   ;;  %s6997_s25 = sphi %s7100_s25, %s8120_s25  }
   0xe   : > { %8085 = sst [smem:[#allocation35_spill]] %s7119_s29  ;;  %s7122_s30 = sadd.s32 1, %s7009_s28  }
   0xf   : > { %8086 = sst [smem:[#allocation36_spill]] %s7122_s30  ;;  %s35_s14 = ssub.s32 %s7009_s28, %s7122_s30 }
  0x10   : > { %s38_s15 = sadd.s32 1, %s7005_s27  ;;  %p36_p0 = scmp.eq.s32.totalorder %s35_s14, 0 }
  0x11   : > { %p45_p1 = scmp.ne.s32.totalorder %s7005_s27, %s7001_s26  ;;  %p46_p2 = scmp.eq.s32.totalorder %s7009_s28, 0 }
  0x12   : > { %p77_p3 = scmp.ne.s32.totalorder %s7001_s26, %s6997_s25  ;;  %p8070_p5 = scmp.eq.s32.totalorder %s7119_s29, 0 }
  0x13   : > { %s7132_s16 = scalar_select %p36_p0, %s7005_s27, %s38_s15  }
  0x14   : > { %p7134_p4 = por %p46_p2, %p45_p1  ;;  %p6240_p6 = scmp.ge.s32.totalorder %s7009_s28, 1 }
  0x15   : > { %8087 = sst [smem:[#allocation37_spill]] %s7132_s16  ;;  %p319_p7 = scmp.lt.s32.totalorder %s7009_s28, 4 }
  0x16   : > { %s8088_s17 = scalar_select %p7134_p4, 1, 0 }
  0x17   : > { %p7143_p8 = por %p8070_p5, %p77_p3  ;;  %p7148_p10 = pnand %p6240_p6, %p319_p7 }
  0x18   : > { %s7011_s20 = smov [#allocation8]   ;;  %s7012_s22 = smov [#allocation11]  }
  0x19   : > { %s8089_s18 = scalar_select %p7143_p8, 1, 0 }
  0x1a   : > { %s8091_s19 = scalar_select %p7148_p10, 1, 0 }
  0x1b   : > { %8090 = sst [smem:[#allocation38_spill]] %s8089_s18  ;;  %s332_s21 = sshll.u32 %s7011_s20, 4  ;;  %s333_s21 = int_to_ptr.vmem [resolvable:$true] %s332_s21 }
  0x1c   : > { %8092 = sst [smem:[#allocation39_spill]] %s8091_s19  ;;  %p6506_p11 = pneg %p7148_p10 }
  0x1d   : > { %s354_s23 = sshll.u32 %s7012_s22, 4  ;;  %s7013_s25 = smov [#allocation14]   ;;  %s7160_s23 = int_to_ptr.vmem [resolvable:$true] %s354_s23 }
  0x1e   : > { %p7156_p12 = pnand %p6506_p11, %p8070_p5  ;;  %s375_s14 = sshll.u32 %s7013_s25, 4  ;;  %s7162_s14 = int_to_ptr.vmem [resolvable:$true] %s375_s14 }
  0x1f   : > { %s8094_s2 = sld [smem:[#allocation40_spill]] }
  0x20   : > { %p7172_p0 = pneg %p7156_p12 }
  0x25   : > { %s6623_s20 = scalar_lea.hbm %s8094_s2, 256 }
  0x26   : > { %p6624_p13 = scmp.ne.s32.totalorder %s8094_s2, %s6623_s20  ;;  %p6630_p3 = scmp.lt.u32.totalorder %s6623_s20, %s8094_s2 }
  0x28   : > { %p6626_p1 = pnand %p7172_p0, %p6624_p13 }
  0x2a   : > { %p6627_p2 = pneg %p6626_p1 }
  0x2c   : > { %p6632_p6 = pnand %p6630_p3, %p6627_p2 }
  0x2e   : > { %6635 = shalt.err (!%p6632_p6)
}
  0x2f   : > { %s6636_s16 = scalar_lea.vmem %s333_s21, 256  ;;  %p6644_p5 = scmp.lt.s32.totalorder %s333_s21, %s333_s21 }
  0x30   : > { %p6637_p7 = scmp.ne.s32.totalorder %s333_s21, %s6636_s16  ;;  %p6645_p8 = scmp.lt.s32.totalorder %s6636_s16, %s6636_s16 }
  0x32   : > { %p6639_p11 = pnand %p6637_p7, %p7172_p0  ;;  %p6646_p10 = por %p6645_p8, %p6644_p5 }
  0x34   : > { %p6640_p9 = pneg %p6639_p11 }
  0x36   : > { %p6647_p4 = pnand %p6646_p10, %p6640_p9 }
  0x38   : > { %6650 = shalt.err (!%p6647_p4)
}
  0x39   : > { %6509 = dma.hbm_to_vmem [thread:$0]  (!%p7156_p12), %s8094_s2, 256, %s333_s21, [#allocation9]  }
  0x3a   : > { %s8096_s4 = sld [smem:[#allocation41_spill]] }
  0x40   : > { %s6651_s20 = scalar_lea.hbm %s8096_s4, 128 }
  0x41   : > { %p6652_p13 = scmp.ne.s32.totalorder %s8096_s4, %s6651_s20  ;;  %p6658_p4 = scmp.lt.u32.totalorder %s6651_s20, %s8096_s4 }
  0x43   : > { %p6654_p1 = pnand %p6652_p13, %p7172_p0 }
  0x45   : > { %p6655_p5 = pneg %p6654_p1 }
  0x47   : > { %p6660_p8 = pnand %p6658_p4, %p6655_p5 }
  0x49   : > { %6663 = shalt.err (!%p6660_p8)
}
  0x4a   : > { %s6664_s21 = scalar_lea.vmem %s7160_s23, 128  ;;  %p6672_p3 = scmp.lt.s32.totalorder %s7160_s23, %s7160_s23 }
  0x4b   : > { %p6665_p9 = scmp.ne.s32.totalorder %s7160_s23, %s6664_s21  ;;  %p6673_p6 = scmp.lt.s32.totalorder %s6664_s21, %s6664_s21 }
  0x4d   : > { %p6667_p10 = pnand %p6665_p9, %p7172_p0  ;;  %p6674_p7 = por %p6673_p6, %p6672_p3 }
  0x4f   : > { %p6668_p2 = pneg %p6667_p10 }
  0x51   : > { %p6675_p11 = pnand %p6674_p7, %p6668_p2 }
  0x53   : > { %6678 = shalt.err (!%p6675_p11)
}
  0x54   : > { %6515 = dma.hbm_to_vmem [thread:$0]  (!%p7156_p12), %s8096_s4, 128, %s7160_s23, [#allocation12]  }
  0x55   : > { %s6679_s12 = scalar_lea.hbm %s8058_s6, 8192 }
  0x56   : > { %p6680_p13 = scmp.ne.s32.totalorder %s8058_s6, %s6679_s12  ;;  %p6686_p4 = scmp.lt.u32.totalorder %s6679_s12, %s8058_s6 }
  0x58   : > { %p6682_p1 = pnand %p6680_p13, %p7172_p0 }
  0x5a   : > { %p6683_p5 = pneg %p6682_p1 }
  0x5c   : > { %p6688_p8 = pnand %p6686_p4, %p6683_p5 }
  0x5e   : > { %6691 = shalt.err (!%p6688_p8)
}
  0x5f   : > { %s6692_s23 = scalar_lea.vmem %s7162_s14, 8192  ;;  %p6700_p3 = scmp.lt.s32.totalorder %s7162_s14, %s7162_s14 }
  0x60   : > { %p6693_p9 = scmp.ne.s32.totalorder %s7162_s14, %s6692_s23  ;;  %p6701_p6 = scmp.lt.s32.totalorder %s6692_s23, %s6692_s23 }
  0x62   : > { %p6695_p10 = pnand %p6693_p9, %p7172_p0  ;;  %p6702_p7 = por %p6701_p6, %p6700_p3 }
  0x64   : > { %p6696_p2 = pneg %p6695_p10 }
  0x66   : > { %p6703_p11 = pnand %p6702_p7, %p6696_p2 }
  0x68   : > { %6706 = shalt.err (!%p6703_p11)
}
  0x69   : > { %s7014_s21 = smov 256   ;;  %s7015_s29 = smov 16  }
  0x6a   : > { %6521 = dma.hbm_to_vmem [thread:$0]  (!%p7156_p12), %s8058_s6, 8192, %s7162_s14, [#allocation15], %s7014_s21, %s7014_s21, %s7015_s29  }
  0x6b   : > { %s7016_s30 = smov [#allocation17]   ;;  %s7017_s15 = smov [#allocation20]  }
  0x6c   : > { %s400_s12 = sshll.u32 %s7016_s30, 4  ;;  %s424_s20 = sshll.u32 %s7017_s15, 4  ;;  %s401_s12 = int_to_ptr.vmem [resolvable:$true] %s400_s12  ;;  %s425_s20 = int_to_ptr.vmem [resolvable:$true] %s424_s20 }
  0x6d   : > { %s6707_s23 = scalar_lea.hbm %s8060_s8, 32 }
  0x6e   : > { %p6708_p13 = scmp.ne.s32.totalorder %s8060_s8, %s6707_s23  ;;  %p6714_p4 = scmp.lt.u32.totalorder %s6707_s23, %s8060_s8 }
  0x70   : > { %p6710_p1 = pnand %p6708_p13, %p7172_p0 }
  0x72   : > { %p6711_p5 = pneg %p6710_p1 }
  0x74   : > { %p6716_p8 = pnand %p6714_p4, %p6711_p5 }
  0x76   : > { %6719 = shalt.err (!%p6716_p8)
}
  0x77   : > { %s6720_s14 = scalar_lea.vmem %s401_s12, 32  ;;  %p6728_p3 = scmp.lt.s32.totalorder %s401_s12, %s401_s12 }
  0x78   : > { %p6721_p9 = scmp.ne.s32.totalorder %s401_s12, %s6720_s14  ;;  %p6729_p6 = scmp.lt.s32.totalorder %s6720_s14, %s6720_s14 }
  0x7a   : > { %p6723_p10 = pnand %p6721_p9, %p7172_p0  ;;  %p6730_p7 = por %p6729_p6, %p6728_p3 }
  0x7c   : > { %p6724_p2 = pneg %p6723_p10 }
  0x7e   : > { %p6731_p11 = pnand %p6730_p7, %p6724_p2 }
  0x80   : > { %6734 = shalt.err (!%p6731_p11)
}
  0x81   : > { %6527 = dma.hbm_to_vmem [thread:$0]  (!%p7156_p12), %s8060_s8, 32, %s401_s12, [#allocation18]  }
  0x82   : > { %s6735_s21 = scalar_lea.hbm %s8062_s10, 16 }
  0x83   : > { %p6736_p13 = scmp.ne.s32.totalorder %s8062_s10, %s6735_s21  ;;  %p6742_p4 = scmp.lt.u32.totalorder %s6735_s21, %s8062_s10 }
  0x85   : > { %p6738_p1 = pnand %p6736_p13, %p7172_p0 }
  0x87   : > { %p6739_p5 = pneg %p6738_p1 }
  0x89   : > { %p6744_p8 = pnand %p6742_p4, %p6739_p5 }
  0x8b   : > { %6747 = shalt.err (!%p6744_p8)
}
  0x8c   : > { %s6748_s15 = scalar_lea.vmem %s425_s20, 16  ;;  %s6755_s12 = scalar_lea.vmem %s425_s20, 32 }
  0x8d   : > { %p6749_p9 = scmp.ne.s32.totalorder %s425_s20, %s6748_s15  ;;  %p6756_p3 = scmp.lt.s32.totalorder %s425_s20, %s425_s20 }
  0x8e   : > { %p6757_p6 = scmp.lt.s32.totalorder %s6755_s12, %s6748_s15 }
  0x8f   : > { %p6751_p10 = pnand %p6749_p9, %p7172_p0 }
  0x90   : > { %p6758_p7 = por %p6757_p6, %p6756_p3 }
  0x91   : > { %p6752_p2 = pneg %p6751_p10 }
  0x93   : > { %p6759_p11 = pnand %p6758_p7, %p6752_p2 }
  0x95   : > { %6762 = shalt.err (!%p6759_p11)
}
  0x96   : > { %6533 = dma.hbm_to_vmem [thread:$0]  (!%p7156_p12), %s8062_s10, 16, %s425_s20, [#allocation21]  }
  0x97   : > { %s7018_s23 = smov [#allocation10]   ;;  %s7019_s2 = smov [#allocation13]  }
  0x98   : > { %s343_s14 = sshll.u32 %s7018_s23, 4  ;;  %s365_s4 = sshll.u32 %s7019_s2, 4  ;;  %s344_s14 = int_to_ptr.vmem [resolvable:$true] %s343_s14  ;;  %s366_s4 = int_to_ptr.vmem [resolvable:$true] %s365_s4 }
  0x99   : > { %s6763_s21 = scalar_lea.hbm %s8055_s3, 256 }
  0x9a   : > { %p6764_p13 = scmp.ne.s32.totalorder %s8055_s3, %s6763_s21  ;;  %p6770_p4 = scmp.lt.u32.totalorder %s6763_s21, %s8055_s3 }
  0x9c   : > { %p6766_p1 = pnand %p6764_p13, %p7172_p0 }
  0x9e   : > { %p6767_p5 = pneg %p6766_p1 }
  0xa0   : > { %p6772_p8 = pnand %p6770_p4, %p6767_p5 }
  0xa2   : > { %6775 = shalt.err (!%p6772_p8)
}
  0xa3   : > { %s6776_s20 = scalar_lea.vmem %s344_s14, 256  ;;  %p6784_p3 = scmp.lt.s32.totalorder %s344_s14, %s344_s14 }
  0xa4   : > { %p6777_p9 = scmp.ne.s32.totalorder %s344_s14, %s6776_s20  ;;  %p6785_p6 = scmp.lt.s32.totalorder %s6776_s20, %s6776_s20 }
  0xa6   : > { %p6779_p10 = pnand %p6777_p9, %p7172_p0  ;;  %p6786_p7 = por %p6785_p6, %p6784_p3 }
  0xa8   : > { %p6780_p2 = pneg %p6779_p10 }
  0xaa   : > { %p6787_p11 = pnand %p6786_p7, %p6780_p2 }
  0xac   : > { %6790 = shalt.err (!%p6787_p11)
}
  0xad   : > { %6512 = dma.hbm_to_vmem [thread:$0]  (!%p7156_p12), %s8055_s3, 256, %s344_s14, [#allocation9]  }
  0xae   : > { %s6791_s23 = scalar_lea.hbm %s8057_s5, 128 }
  0xaf   : > { %p6792_p13 = scmp.ne.s32.totalorder %s8057_s5, %s6791_s23  ;;  %p6798_p4 = scmp.lt.u32.totalorder %s6791_s23, %s8057_s5 }
  0xb1   : > { %p6794_p1 = pnand %p6792_p13, %p7172_p0 }
  0xb3   : > { %p6795_p5 = pneg %p6794_p1 }
  0xb5   : > { %p6800_p8 = pnand %p6798_p4, %p6795_p5 }
  0xb7   : > { %6803 = shalt.err (!%p6800_p8)
}
  0xb8   : > { %s6804_s29 = scalar_lea.vmem %s366_s4, 128  ;;  %p6812_p3 = scmp.lt.s32.totalorder %s366_s4, %s366_s4 }
  0xb9   : > { %p6805_p9 = scmp.ne.s32.totalorder %s366_s4, %s6804_s29  ;;  %p6813_p6 = scmp.lt.s32.totalorder %s6804_s29, %s6804_s29 }
  0xbb   : > { %p6807_p10 = pnand %p6805_p9, %p7172_p0  ;;  %p6814_p7 = por %p6813_p6, %p6812_p3 }
  0xbd   : > { %p6808_p2 = pneg %p6807_p10 }
  0xbf   : > { %p6815_p11 = pnand %p6814_p7, %p6808_p2 }
  0xc1   : > { %6818 = shalt.err (!%p6815_p11)
}
  0xc2   : > { %6518 = dma.hbm_to_vmem [thread:$0]  (!%p7156_p12), %s8057_s5, 128, %s366_s4, [#allocation12]  }
  0xc3   : > { %s7020_s13 = smov [#allocation16]   ;;  %s7021_s20 = smov [#allocation19]  }
  0xc4   : > { %s389_s30 = sshll.u32 %s7020_s13, 4  ;;  %s410_s15 = sshll.u32 %s7021_s20, 4  ;;  %s390_s30 = int_to_ptr.vmem [resolvable:$true] %s389_s30  ;;  %s411_s15 = int_to_ptr.vmem [resolvable:$true] %s410_s15 }
  0xc5   : > { %s6819_s16 = scalar_lea.hbm %s8059_s7, 32 }
  0xc6   : > { %p6820_p13 = scmp.ne.s32.totalorder %s8059_s7, %s6819_s16  ;;  %p6826_p4 = scmp.lt.u32.totalorder %s6819_s16, %s8059_s7 }
  0xc8   : > { %p6822_p1 = pnand %p6820_p13, %p7172_p0 }
  0xca   : > { %p6823_p5 = pneg %p6822_p1 }
  0xcc   : > { %p6828_p8 = pnand %p6826_p4, %p6823_p5 }
  0xce   : > { %6831 = shalt.err (!%p6828_p8)
}
  0xcf   : > { %s6832_s4 = scalar_lea.vmem %s390_s30, 32  ;;  %p6840_p3 = scmp.lt.s32.totalorder %s390_s30, %s390_s30 }
  0xd0   : > { %p6833_p9 = scmp.ne.s32.totalorder %s390_s30, %s6832_s4  ;;  %p6841_p6 = scmp.lt.s32.totalorder %s6832_s4, %s6832_s4 }
  0xd2   : > { %p6835_p10 = pnand %p6833_p9, %p7172_p0  ;;  %p6842_p7 = por %p6841_p6, %p6840_p3 }
  0xd4   : > { %p6836_p2 = pneg %p6835_p10 }
  0xd6   : > { %p6843_p11 = pnand %p6842_p7, %p6836_p2 }
  0xd8   : > { %6846 = shalt.err (!%p6843_p11)
}
  0xd9   : > { %6524 = dma.hbm_to_vmem [thread:$0]  (!%p7156_p12), %s8059_s7, 32, %s390_s30, [#allocation15]  }
  0xda   : > { %s6847_s13 = scalar_lea.hbm %s8061_s9, 1024 }
  0xdb   : > { %p6848_p13 = scmp.ne.s32.totalorder %s8061_s9, %s6847_s13  ;;  %p6854_p4 = scmp.lt.u32.totalorder %s6847_s13, %s8061_s9 }
  0xdd   : > { %p6850_p1 = pnand %p6848_p13, %p7172_p0 }
  0xdf   : > { %p6851_p5 = pneg %p6850_p1 }
  0xe1   : > { %p6856_p8 = pnand %p6854_p4, %p6851_p5 }
  0xe3   : > { %6859 = shalt.err (!%p6856_p8)
}
  0xe4   : > { %s6860_s23 = scalar_lea.vmem %s411_s15, 1024  ;;  %p6868_p3 = scmp.lt.s32.totalorder %s411_s15, %s411_s15 }
  0xe5   : > { %p6861_p9 = scmp.ne.s32.totalorder %s411_s15, %s6860_s23  ;;  %p6869_p6 = scmp.lt.s32.totalorder %s6860_s23, %s6860_s23 }
  0xe7   : > { %p6863_p10 = pnand %p6861_p9, %p7172_p0  ;;  %p6870_p7 = por %p6869_p6, %p6868_p3 }
  0xe9   : > { %p6864_p2 = pneg %p6863_p10 }
  0xeb   : > { %p6871_p11 = pnand %p6870_p7, %p6864_p2 }
  0xed   : > { %6874 = shalt.err (!%p6871_p11)
}
  0xee   : > { %s7022_s30 = smov 128   ;;  %s7023_s2 = smov 8  }
  0xef   : > { %6530 = dma.hbm_to_vmem [thread:$0]  (!%p7156_p12), %s8061_s9, 1024, %s411_s15, [#allocation18], %s7022_s30, %s7022_s30, %s7023_s2  }
  0xf0   : > { %s7024_s4 = smov [#allocation22]   ;;  %s6875_s18 = scalar_lea.hbm %s8063_s11, 16 }
  0xf1   : > { %s435_s21 = sshll.u32 %s7024_s4, 4  ;;  %p6876_p13 = scmp.ne.s32.totalorder %s8063_s11, %s6875_s18  ;;  %s436_s21 = int_to_ptr.vmem [resolvable:$true] %s435_s21 }
  0xf2   : > { %p6882_p4 = scmp.lt.u32.totalorder %s6875_s18, %s8063_s11 }
  0xf3   : > { %p6878_p1 = pnand %p6876_p13, %p7172_p0 }
  0xf5   : > { %p6879_p5 = pneg %p6878_p1 }
  0xf7   : > { %p6884_p8 = pnand %p6882_p4, %p6879_p5 }
  0xf9   : > { %6887 = shalt.err (!%p6884_p8)
}
  0xfa   : > { %s6888_s15 = scalar_lea.vmem %s436_s21, 16  ;;  %s6895_s16 = scalar_lea.vmem %s436_s21, 32 }
  0xfb   : > { %p6889_p9 = scmp.ne.s32.totalorder %s436_s21, %s6888_s15  ;;  %p6896_p3 = scmp.lt.s32.totalorder %s436_s21, %s436_s21 }
  0xfc   : > { %p6897_p6 = scmp.lt.s32.totalorder %s6895_s16, %s6888_s15 }
  0xfd   : > { %p6891_p10 = pnand %p6889_p9, %p7172_p0 }
  0xfe   : > { %p6898_p7 = por %p6897_p6, %p6896_p3 }
  0xff   : > { %p6892_p2 = pneg %p6891_p10 }
 0x101   : > { %p6899_p11 = pnand %p6898_p7, %p6892_p2 }
 0x103   : > { %6902 = shalt.err (!%p6899_p11)
}
 0x104   : > { %6536 = dma.hbm_to_vmem [thread:$0]  (!%p7156_p12), %s8063_s11, 16, %s436_s21, [#allocation21]  }
 0x105   : > { %p6251_p13 = scmp.ge.s32.totalorder %s7009_s28, 3 }
 0x106   : > { %p8097_p1 = scmp.ne.s32.totalorder (!%p6251_p13), %s8088_s17, 0 }
 0x107   : > { %442 = sbr.rel (%p6251_p13) target bundleno = 304 (0x130), region = 56 }
 0x10e   : > { %445 = sbr.rel (!%p8097_p1) target bundleno = 277 (0x115), region = 60  ;;  %s447_s22 = sand.u32 (%p8097_p1), 1, %s7005_s27  }
 0x10f   : > { %s6283_s2 = sshll.u32 (%p8097_p1), %s7009_s28, 4  ;;  %s6252_s26 = sshll.u32 (%p8097_p1), %s447_s22, 5 }
 0x110   : > { %s452_s29 = scalar_lea.vmem (%p8097_p1), %s8052_s0, %s6283_s2  ;;  %s449_s24 = scalar_lea.vmem (%p8097_p1), [#allocation5], %s6252_s26 }
 0x111   : > { %v465_v0 = vld [vmem:[%s452_s29] sm:$0xff] (%p8097_p1)  ;;  %v467_v1 = vld [vmem:[%s452_s29 + $0x8] sm:$0xff] (%p8097_p1)  ;;  %v469_v2 = vld [vmem:[%s452_s29 + $0x30] sm:$0xff] (%p8097_p1) }
 0x112   : > { %466 = vst [vmem:[%s449_s24] sm:$0xff] (%p8097_p1), %v465_v0  ;;  %468 = vst [vmem:[%s449_s24 + $0x8] sm:$0xff] (%p8097_p1), %v467_v1  ;;  %v471_v3 = vld [vmem:[%s452_s29 + $0x38] sm:$0xff] (%p8097_p1) }
 0x113   : > { %470 = vst [vmem:[%s449_s24 + $0x10] sm:$0xff] (%p8097_p1), %v469_v2  ;;  %472 = vst [vmem:[%s449_s24 + $0x18] sm:$0xff] (%p8097_p1), %v471_v3 }
 0x115 PF: > { %s479_s21 = sand.u32 1, %s7005_s27   ;;  %s6285_s14 = sshll.u32 %s7009_s28, 15 }
 0x116   : > { %s6255_s18 = sshll.u32 %s479_s21, 11  ;;  %s7373_s12 = scalar_lea.hbm %s8053_s1, %s6285_s14 }
 0x117   : > { %s483_s25 = scalar_lea.vmem [#allocation6], %s6255_s18  ;;  %s7377_s16 = scalar_lea.sflag [#allocation7], %s479_s21 }
 0x118   : > { %s491_s15 = sshll.u32 %s483_s25, 4  ;;  %s6903_s23 = scalar_lea.hbm %s7373_s12, 32768  ;;  %s7375_s15 = int_to_ptr.vmem [resolvable:$true] %s491_s15 }
 0x119   : > { %p6904_p12 = scmp.ne.s32.totalorder %s7373_s12, %s6903_s23  ;;  %p8098_p0 = scmp.ne.s32.totalorder %s8088_s17, 0 }
 0x11a   : > { %s6907_s22 = scalar_lea.hbm %s8053_s1, 98304  ;;  %p6908_p8 = scmp.lt.u32.totalorder %s7373_s12, %s8053_s1 }
 0x11b   : > { %p6905_p5 = pnand %p6904_p12, %p8098_p0  ;;  %p6909_p9 = scmp.lt.u32.totalorder %s6907_s22, %s6903_s23 }
 0x11c   : > { %p6911_p2 = scmp.lt.u32.totalorder %s6903_s23, %s7373_s12 }
 0x11d   : > { %p6906_p4 = pneg %p6905_p5  ;;  %p6910_p10 = por %p6909_p9, %p6908_p8 }
 0x11f   : > { %p6912_p3 = por %p6911_p2, %p6910_p10 }
 0x121   : > { %p6913_p6 = pnand %p6912_p3, %p6906_p4 }
 0x123   : > { %6916 = shalt.err (!%p6913_p6)
}
 0x124   : > { %s6917_s19 = scalar_lea.vmem %s7375_s15, 32768  ;;  %s7025_s4 = smov [#allocation6]  }
 0x125   : > { %p6918_p7 = scmp.ne.s32.totalorder %s7375_s15, %s6917_s19  ;;  %s6921_s29 = sshll.u32 %s7025_s4, 4  ;;  %s6922_s29 = int_to_ptr.vmem [resolvable:$false] %s6921_s29 }
 0x126   : > { %s6923_s24 = scalar_lea.vmem %s6922_s29, 65536  ;;  %p6924_p1 = scmp.lt.s32.totalorder %s7375_s15, %s6922_s29 }
 0x127   : > { %p6919_p11 = pnand %p6918_p7, %p8098_p0  ;;  %p6925_p12 = scmp.lt.s32.totalorder %s6923_s24, %s6917_s19 }
 0x129   : > { %p6920_p13 = pneg %p6919_p11  ;;  %p6926_p5 = por %p6925_p12, %p6924_p1 }
 0x12b   : > { %p6927_p8 = pnand %p6926_p5, %p6920_p13 }
 0x12d   : > { %6930 = shalt.err (!%p6927_p8)
}
 0x12e   : > { %s7026_s21 = smov 2048   ;;  %s7027_s14 = smov 128  }
 0x12f   : > { %6484 = dma.hbm_to_vmem [thread:$0]  (%p8098_p0), %s7373_s12, 32768, %s7375_s15, %s7377_s16, %s7026_s21, %s7026_s21, %s7027_s14  }
 0x130 PF: > { %s8099_s18 = sld [smem:[#allocation39_spill]] }
 0x136   : > { %p8100_p4 = scmp.ne.s32.totalorder %s8099_s18, 0 }
 0x137   : > { %s8101_s13 = sld [smem:[#allocation34_spill]] (!%p8100_p4)  ;;  %s8102_s20 = sld [smem:[#allocation38_spill]] (!%p8100_p4) }
 0x138   : > { %503 = sbr.rel (%p8100_p4) target bundleno = 2930 (0xb72), region = 87 }
 0x13d   : > { %s506_s25 = sand.u32 (!%p8100_p4), 1, %s8101_s13   ;;  %p8103_p9 = scmp.ne.s32.totalorder (!%p8100_p4), %s8102_s20, 0 }
 0x13e   : > { %s6260_s23 = sshll.u32 (!%p8100_p4), %s506_s25, 5  ;;  %s6261_s28 = sshll.u32 (!%p8100_p4), %s506_s25, 11 }
 0x13f   : > { %s7404_s30 = scalar_lea.vmem [#allocation5], %s6260_s23  ;;  %s513_s22 = scalar_lea.sflag [#allocation7], %s506_s25 }
 0x140   : > { %s7406_s2 = scalar_lea.vmem [#allocation6], %s6261_s28 }
 0x141   : > { %6970 = dma.done.wait (%p8103_p9), %s513_s22, 32768  }
 0x142   : > { %6972 = vsyncadd (%p8103_p9), %s513_s22, 4294934528  ;;  %s8104_s17 = sld [smem:[#allocation35_spill]] }
 0x148   : > { %p8105_p0 = scmp.eq.s32.totalorder %s8104_s17, 0 }
 0x14a   : > { %6974 = dma.done.wait (%p8105_p0), [#allocation9], 512   ;;  %p8106_p10 = pmov %p8105_p0 }
 0x14b   : > { %p8107_p2 = pmov %p8105_p0 }
 0x14c   : > { %6976 = vsyncadd (%p8106_p10), [#allocation9], 4294966784 }
 0x14d   : > { %6978 = dma.done.wait (%p8107_p2), [#allocation12], 256   ;;  %p8108_p3 = pmov %p8105_p0 }
 0x14e   : > { %p8109_p6 = pmov %p8105_p0 }
 0x14f   : > { %6980 = vsyncadd (%p8108_p3), [#allocation12], 4294967040 }
 0x150   : > { %6982 = dma.done.wait (%p8109_p6), [#allocation15], 8224   ;;  %p8110_p7 = pmov %p8105_p0 }
 0x151   : > { %p8111_p11 = pmov %p8105_p0 }
 0x152   : > { %6984 = vsyncadd (%p8110_p7), [#allocation15], 4294959072 }
 0x153   : > { %6986 = dma.done.wait (%p8111_p11), [#allocation18], 1056   ;;  %p8112_p13 = pmov %p8105_p0 }
 0x154   : > { %p8113_p1 = pmov %p8105_p0 }
 0x155   : > { %6988 = vsyncadd (%p8112_p13), [#allocation18], 4294966240 }
 0x156   : > { %6990 = dma.done.wait (%p8113_p1), [#allocation21], 32   ;;  %p8114_p12 = pmov %p8105_p0 }
 0x157   : > { %p8115_p5 = scmp.ne.s32.totalorder %s8104_s17, 0 }
 0x158   : > { %6992 = vsyncadd (%p8114_p12), [#allocation21], 4294967264  ;;  %v7028_v4 = vmov (!%p8115_p5), 0.0   ;;  %s7029_s12 = smov (!%p8115_p5), [#allocation2]   ;;  %s8116_s19 = sld [smem:[#allocation42_spill]] (!%p8115_p5) }
 0x159   : > { %602 = sbr.rel (%p8115_p5) target bundleno = 371 (0x173), region = 139  ;;  %603 = vst [vmem:[#allocation4] sm:$0xff] (!%p8115_p5), %v7028_v4  ;;  %604 = vst [vmem:[#allocation4 + $0x8] sm:$0xff] (!%p8115_p5), %v7028_v4  ;;  %s642_s15 = sshll.u32 (!%p8115_p5), %s7029_s12, 4  ;;  %s643_s15 = int_to_ptr.vmem [resolvable:$true] %s642_s15 }
 0x15a   : > { %605 = vst [vmem:[#allocation4 + $0x10] sm:$0xff] (!%p8115_p5), %v7028_v4  ;;  %606 = vst [vmem:[#allocation4 + $0x18] sm:$0xff] (!%p8115_p5), %v7028_v4 }
 0x15b   : > { %607 = vst [vmem:[#allocation4 + $0x20] sm:$0xff] (!%p8115_p5), %v7028_v4  ;;  %608 = vst [vmem:[#allocation4 + $0x28] sm:$0xff] (!%p8115_p5), %v7028_v4 }
 0x15c   : > { %609 = vst [vmem:[#allocation4 + $0x30] sm:$0xff] (!%p8115_p5), %v7028_v4  ;;  %610 = vst [vmem:[#allocation4 + $0x38] sm:$0xff] (!%p8115_p5), %v7028_v4 }
 0x15d   : > { %611 = vst [vmem:[#allocation4 + $0x40] sm:$0xff] (!%p8115_p5), %v7028_v4  ;;  %612 = vst [vmem:[#allocation4 + $0x48] sm:$0xff] (!%p8115_p5), %v7028_v4 }
 0x15e   : > { %613 = vst [vmem:[#allocation4 + $0x50] sm:$0xff] (!%p8115_p5), %v7028_v4  ;;  %614 = vst [vmem:[#allocation4 + $0x58] sm:$0xff] (!%p8115_p5), %v7028_v4  ;;  %s6931_s4 = scalar_lea.hbm (!%p8115_p5), %s8116_s19, 65536 }
 0x15f   : > { %615 = vst [vmem:[#allocation4 + $0x60] sm:$0xff] (!%p8115_p5), %v7028_v4  ;;  %616 = vst [vmem:[#allocation4 + $0x68] sm:$0xff] (!%p8115_p5), %v7028_v4  ;;  %p6932_p8 = scmp.ne.s32.totalorder (!%p8115_p5), %s8116_s19, %s6931_s4  ;;  %p6935_p4 = scmp.lt.u32.totalorder (!%p8115_p5), %s6931_s4, %s8116_s19 }
 0x160   : > { %617 = vst [vmem:[#allocation4 + $0x70] sm:$0xff] %v7028_v4  ;;  %618 = vst [vmem:[#allocation4 + $0x78] sm:$0xff] %v7028_v4 }
 0x161   : > { %619 = vst [vmem:[#allocation4 + $0x80] sm:$0xff] %v7028_v4  ;;  %620 = vst [vmem:[#allocation4 + $0x88] sm:$0xff] %v7028_v4  ;;  %p6937_p9 = pnand %p6935_p4, %p6932_p8 }
 0x162   : > { %621 = vst [vmem:[#allocation4 + $0x90] sm:$0xff] %v7028_v4  ;;  %622 = vst [vmem:[#allocation4 + $0x98] sm:$0xff] %v7028_v4 }
 0x163   : > { %623 = vst [vmem:[#allocation4 + $0xa0] sm:$0xff] %v7028_v4  ;;  %624 = vst [vmem:[#allocation4 + $0xa8] sm:$0xff] %v7028_v4 }
 0x164   : > { %625 = vst [vmem:[#allocation4 + $0xb0] sm:$0xff] %v7028_v4  ;;  %626 = vst [vmem:[#allocation4 + $0xb8] sm:$0xff] %v7028_v4 }
 0x165   : > { %627 = vst [vmem:[#allocation4 + $0xc0] sm:$0xff] %v7028_v4  ;;  %628 = vst [vmem:[#allocation4 + $0xc8] sm:$0xff] %v7028_v4 }
 0x166   : > { %629 = vst [vmem:[#allocation4 + $0xd0] sm:$0xff] %v7028_v4  ;;  %630 = vst [vmem:[#allocation4 + $0xd8] sm:$0xff] %v7028_v4 }
 0x167   : > { %631 = vst [vmem:[#allocation4 + $0xe0] sm:$0xff] %v7028_v4  ;;  %632 = vst [vmem:[#allocation4 + $0xe8] sm:$0xff] %v7028_v4 }
 0x168   : > { %633 = vst [vmem:[#allocation4 + $0xf0] sm:$0xff] %v7028_v4  ;;  %634 = vst [vmem:[#allocation4 + $0xf8] sm:$0xff] %v7028_v4 }
 0x169   : > { %6940 = shalt.err (!%p6937_p9)  }
 0x16a   : > { %s6941_s18 = scalar_lea.vmem %s643_s15, 65536  ;;  %p6946_p10 = scmp.lt.s32.totalorder %s643_s15, %s643_s15 }
 0x16b   : > { %p6942_p0 = scmp.ne.s32.totalorder %s643_s15, %s6941_s18  ;;  %p6947_p2 = scmp.lt.s32.totalorder %s6941_s18, %s6941_s18 }
 0x16d   : > { %p6948_p3 = por %p6947_p2, %p6946_p10 }
 0x16f   : > { %p6949_p6 = pnand %p6948_p3, %p6942_p0 }
 0x171   : > { %6952 = shalt.err (!%p6949_p6)  }
 0x172   : > { %645 = dma.hbm_to_vmem [thread:$0]  %s8116_s19, 65536, %s643_s15, [#allocation3] }
 0x173 PF: > { %v683_v5 = vld [vmem:[%s7406_s2 + $0x8] sm:$0xff]  ;;  %v685_v6 = vld [vmem:[%s7406_s2 + $0x18] sm:$0xff]  ;;  %v682_v7 = vld [vmem:[%s7406_s2] sm:$0xff]  ;;  %s8117_s25 = sld [smem:[#allocation35_spill]] }
 0x174   : > { %v939_v8 = vunpack.c.l.s8.bf16 %v683_v5  ;;  %v955_v9 = vunpack.c.h.s8.bf16 %v683_v5  ;;  %v941_v10 = vunpack.c.l.s8.bf16 %v685_v6  ;;  %v957_v11 = vunpack.c.h.s8.bf16 %v685_v6  ;;  %v684_v12 = vld [vmem:[%s7406_s2 + $0x10] sm:$0xff]  ;;  %v699_v15 = vld [vmem:[%s7406_s2 + $0x88] sm:$0xff]  ;;  %v701_v16 = vld [vmem:[%s7406_s2 + $0x98] sm:$0xff] }
 0x175   : > { %v938_v13 = vunpack.c.l.s8.bf16 %v682_v7  ;;  %v940_v14 = vunpack.c.l.s8.bf16 %v684_v12  ;;  %v954_v17 = vunpack.c.h.s8.bf16 %v682_v7  ;;  %v956_v18 = vunpack.c.h.s8.bf16 %v684_v12  ;;  %v698_v21 = vld [vmem:[%s7406_s2 + $0x80] sm:$0xff]  ;;  %v700_v22 = vld [vmem:[%s7406_s2 + $0x90] sm:$0xff]  ;;  %v715_v27 = vld [vmem:[%s7406_s2 + $0x108] sm:$0xff] }
 0x176   : > { %1470 = vmatprep.subr.bf16.mxu0 %v939_v8  ;;  %1556 = vmatprep.subr.bf16.mxu1 %v941_v10  ;;  %v971_v19 = vunpack.c.l.s8.bf16 %v699_v15  ;;  %v973_v20 = vunpack.c.l.s8.bf16 %v701_v16  ;;  %v970_v23 = vunpack.c.l.s8.bf16 %v698_v21  ;;  %v972_v24 = vunpack.c.l.s8.bf16 %v700_v22  ;;  %v717_v28 = vld [vmem:[%s7406_s2 + $0x118] sm:$0xff]  ;;  %v7457_v29 = vld [vmem:[%s7404_s30 + $0x4] ss:$16 sps:$4 sm:$0xff]   ;;  %v731_v40 = vld [vmem:[%s7406_s2 + $0x188] sm:$0xff] }
 0x177   : > { %1471 = vmatpush1.bf16.msra.mxu0 %v938_v13  ;;  %1557 = vmatpush1.bf16.msra.mxu1 %v940_v14  ;;  %v987_v25 = vunpack.c.h.s8.bf16 %v699_v15  ;;  %v989_v26 = vunpack.c.h.s8.bf16 %v701_v16  ;;  %v986_v30 = vunpack.c.h.s8.bf16 %v698_v21  ;;  %v988_v31 = vunpack.c.h.s8.bf16 %v700_v22  ;;  %v714_v34 = vld [vmem:[%s7406_s2 + $0x100] sm:$0xff]  ;;  %v716_v35 = vld [vmem:[%s7406_s2 + $0x110] sm:$0xff]  ;;  %v733_v41 = vld [vmem:[%s7406_s2 + $0x198] sm:$0xff] }
 0x178   : > { %1472 = vmatprep.subr.bf16.mxu0 %v955_v9  ;;  %1558 = vmatprep.subr.bf16.mxu1 %v957_v11  ;;  %v1003_v32 = vunpack.c.l.s8.bf16 %v715_v27  ;;  %v1005_v33 = vunpack.c.l.s8.bf16 %v717_v28  ;;  %v1002_v36 = vunpack.c.l.s8.bf16 %v714_v34  ;;  %v1004_v37 = vunpack.c.l.s8.bf16 %v716_v35  ;;  %v730_v46 = vld [vmem:[%s7406_s2 + $0x180] sm:$0xff]  ;;  %v732_v47 = vld [vmem:[%s7406_s2 + $0x190] sm:$0xff]  ;;  %v747_v52 = vld [vmem:[%s7406_s2 + $0x208] sm:$0xff] }
 0x179   : > { %1502 = vmatprep.mubr.bf16.mxu0 %v7457_v29  ;;  %1588 = vmatprep.mubr.bf16.mxu1 %v7457_v29  ;;  %v1019_v38 = vunpack.c.h.s8.bf16 %v715_v27  ;;  %v1021_v39 = vunpack.c.h.s8.bf16 %v717_v28  ;;  %v1018_v42 = vunpack.c.h.s8.bf16 %v714_v34  ;;  %v1020_v43 = vunpack.c.h.s8.bf16 %v716_v35  ;;  %v749_v53 = vld [vmem:[%s7406_s2 + $0x218] sm:$0xff]  ;;  %v746_v58 = vld [vmem:[%s7406_s2 + $0x200] sm:$0xff]  ;;  %v748_v59 = vld [vmem:[%s7406_s2 + $0x210] sm:$0xff]  ;;  %p6277_p7 = scmp.ne.s32.totalorder %s8117_s25, 2 }
 0x17a   : > { %v1035_v44 = vunpack.c.l.s8.bf16 %v731_v40  ;;  %v1037_v45 = vunpack.c.l.s8.bf16 %v733_v41  ;;  %v1034_v48 = vunpack.c.l.s8.bf16 %v730_v46  ;;  %v1036_v49 = vunpack.c.l.s8.bf16 %v732_v47  ;;  %v763_v0 = vld [vmem:[%s7406_s2 + $0x288] sm:$0xff]  ;;  %v765_v1 = vld [vmem:[%s7406_s2 + $0x298] sm:$0xff]  ;;  %v762_v6 = vld [vmem:[%s7406_s2 + $0x280] sm:$0xff] }
 0x17b   : > { %1473 = vmatpush1.bf16.msra.mxu0 %v954_v17  ;;  %1559 = vmatpush1.bf16.msra.mxu1 %v956_v18  ;;  %v1051_v50 = vunpack.c.h.s8.bf16 %v731_v40  ;;  %v1053_v51 = vunpack.c.h.s8.bf16 %v733_v41  ;;  %v1050_v54 = vunpack.c.h.s8.bf16 %v730_v46  ;;  %v1052_v55 = vunpack.c.h.s8.bf16 %v732_v47  ;;  %v764_v7 = vld [vmem:[%s7406_s2 + $0x290] sm:$0xff]  ;;  %v779_v12 = vld [vmem:[%s7406_s2 + $0x308] sm:$0xff]  ;;  %v781_v13 = vld [vmem:[%s7406_s2 + $0x318] sm:$0xff] }
 0x17c   : > { %1474 = vmatprep.subr.bf16.mxu0 %v971_v19  ;;  %1560 = vmatprep.subr.bf16.mxu1 %v973_v20  ;;  %v1067_v56 = vunpack.c.l.s8.bf16 %v747_v52  ;;  %v1069_v57 = vunpack.c.l.s8.bf16 %v749_v53  ;;  %v1066_v60 = vunpack.c.l.s8.bf16 %v746_v58  ;;  %v1068_v61 = vunpack.c.l.s8.bf16 %v748_v59  ;;  %v778_v18 = vld [vmem:[%s7406_s2 + $0x300] sm:$0xff]  ;;  %v780_v19 = vld [vmem:[%s7406_s2 + $0x310] sm:$0xff] }
 0x17d   : > { %v1083_v62 = vunpack.c.h.s8.bf16 %v747_v52  ;;  %v1085_v63 = vunpack.c.h.s8.bf16 %v749_v53  ;;  %v1082_v2 = vunpack.c.h.s8.bf16 %v746_v58  ;;  %v1084_v3 = vunpack.c.h.s8.bf16 %v748_v59  ;;  %v7493_v52 = vld [vmem:[%s7404_s30 + $0xc] ss:$16 sps:$4 sm:$0xff]   ;;  %v828_v58 = vld [vmem:[%s7406_s2 + $0x490] sm:$0xff] }
 0x17e   : > { %v1099_v4 = vunpack.c.l.s8.bf16 %v763_v0  ;;  %v1101_v5 = vunpack.c.l.s8.bf16 %v765_v1  ;;  %v1098_v8 = vunpack.c.l.s8.bf16 %v762_v6  ;;  %v1100_v9 = vunpack.c.l.s8.bf16 %v764_v7 }
 0x17f   : > { %1475 = vmatpush1.bf16.msra.mxu0 %v970_v23  ;;  %1561 = vmatpush1.bf16.msra.mxu1 %v972_v24  ;;  %v1115_v10 = vunpack.c.h.s8.bf16 %v763_v0  ;;  %v1117_v11 = vunpack.c.h.s8.bf16 %v765_v1  ;;  %v1114_v14 = vunpack.c.h.s8.bf16 %v762_v6  ;;  %v1116_v15 = vunpack.c.h.s8.bf16 %v764_v7  ;;  %v795_v24 = vld [vmem:[%s7406_s2 + $0x388] sm:$0xff]  ;;  %v845_v0 = vld [vmem:[%s7406_s2 + $0x518] sm:$0xff]  ;;  %v844_v6 = vld [vmem:[%s7406_s2 + $0x510] sm:$0xff] }
 0x180   : > { %1476 = vmatprep.subr.bf16.mxu0 %v987_v25  ;;  %1562 = vmatprep.subr.bf16.mxu1 %v989_v26  ;;  %v1131_v16 = vunpack.c.l.s8.bf16 %v779_v12  ;;  %v1133_v17 = vunpack.c.l.s8.bf16 %v781_v13  ;;  %v1130_v20 = vunpack.c.l.s8.bf16 %v778_v18  ;;  %v1132_v21 = vunpack.c.l.s8.bf16 %v780_v19  ;;  %v797_v25 = vld [vmem:[%s7406_s2 + $0x398] sm:$0xff] }
 0x181   : > { %v1147_v22 = vunpack.c.h.s8.bf16 %v779_v12  ;;  %v1149_v23 = vunpack.c.h.s8.bf16 %v781_v13  ;;  %v1146_v26 = vunpack.c.h.s8.bf16 %v778_v18  ;;  %v1148_v27 = vunpack.c.h.s8.bf16 %v780_v19  ;;  %v861_v12 = vld [vmem:[%s7406_s2 + $0x598] sm:$0xff]  ;;  %v860_v18 = vld [vmem:[%s7406_s2 + $0x590] sm:$0xff] }
 0x182   : > { %v1163_v28 = vunpack.c.l.s8.bf16 %v795_v24  ;;  %v1179_v35 = vunpack.c.h.s8.bf16 %v795_v24  ;;  %v877_v24 = vld [vmem:[%s7406_s2 + $0x618] sm:$0xff] }
 0x183   : > { %1477 = vmatpush1.bf16.msra.mxu0 %v986_v30  ;;  %1563 = vmatpush1.bf16.msra.mxu1 %v988_v31  ;;  %v1165_v30 = vunpack.c.l.s8.bf16 %v797_v25  ;;  %v794_v31 = vld [vmem:[%s7406_s2 + $0x380] sm:$0xff] }
 0x184   : > { %1478 = vmatprep.subr.bf16.mxu0 %v1003_v32  ;;  %1564 = vmatprep.subr.bf16.mxu1 %v1005_v33  ;;  %v796_v32 = vld [vmem:[%s7406_s2 + $0x390] sm:$0xff]  ;;  %v1162_v33 = vunpack.c.l.s8.bf16 %v794_v31 }
 0x185   : > { %v1164_v34 = vunpack.c.l.s8.bf16 %v796_v32  ;;  %v1180_v40 = vunpack.c.h.s8.bf16 %v796_v32 }
 0x187   : > { %1479 = vmatpush1.bf16.msra.mxu0 %v1002_v36  ;;  %1565 = vmatpush1.bf16.msra.mxu1 %v1004_v37  ;;  %v1181_v36 = vunpack.c.h.s8.bf16 %v797_v25  ;;  %v811_v37 = vld [vmem:[%s7406_s2 + $0x408] sm:$0xff] }
 0x188   : > { %1480 = vmatprep.subr.bf16.mxu0 %v1019_v38  ;;  %1566 = vmatprep.subr.bf16.mxu1 %v1021_v39  ;;  %v813_v38 = vld [vmem:[%s7406_s2 + $0x418] sm:$0xff]  ;;  %v1178_v39 = vunpack.c.h.s8.bf16 %v794_v31  ;;  %v1195_v41 = vunpack.c.l.s8.bf16 %v811_v37  ;;  %v876_v31 = vld [vmem:[%s7406_s2 + $0x610] sm:$0xff] }
 0x18b   : > { %1481 = vmatpush1.bf16.msra.mxu0 %v1018_v42  ;;  %1567 = vmatpush1.bf16.msra.mxu1 %v1020_v43  ;;  %v1197_v42 = vunpack.c.l.s8.bf16 %v813_v38  ;;  %v810_v43 = vld [vmem:[%s7406_s2 + $0x400] sm:$0xff] }
 0x18c   : > { %1482 = vmatprep.subr.bf16.mxu0 %v1035_v44  ;;  %1568 = vmatprep.subr.bf16.mxu1 %v1037_v45  ;;  %v812_v44 = vld [vmem:[%s7406_s2 + $0x410] sm:$0xff]  ;;  %v1194_v46 = vunpack.c.l.s8.bf16 %v810_v43  ;;  %v1210_v53 = vunpack.c.h.s8.bf16 %v810_v43 }
 0x18d   : > { %v7488_v45 = vld [vmem:[%s7404_s30] ss:$16 sps:$4 sm:$0xff]   ;;  %v1196_v47 = vunpack.c.l.s8.bf16 %v812_v44 }
 0x18e   : > { %v892_v43 = vld [vmem:[%s7406_s2 + $0x690] sm:$0xff] }
 0x18f   : > { %1483 = vmatpush1.bf16.msra.mxu0 %v1034_v48  ;;  %1569 = vmatpush1.bf16.msra.mxu1 %v1036_v49  ;;  %v1211_v48 = vunpack.c.h.s8.bf16 %v811_v37  ;;  %v1213_v49 = vunpack.c.h.s8.bf16 %v813_v38  ;;  %v893_v37 = vld [vmem:[%s7406_s2 + $0x698] sm:$0xff] }
 0x190   : > { %1484 = vmatprep.subr.bf16.mxu0 %v1051_v50  ;;  %1570 = vmatprep.subr.bf16.mxu1 %v1053_v51  ;;  %v827_v50 = vld [vmem:[%s7406_s2 + $0x488] sm:$0xff]  ;;  %v829_v51 = vld [vmem:[%s7406_s2 + $0x498] sm:$0xff] }
 0x193   : > { %1485 = vmatpush1.bf16.msra.mxu0 %v1050_v54  ;;  %1571 = vmatpush1.bf16.msra.mxu1 %v1052_v55  ;;  %v1212_v54 = vunpack.c.h.s8.bf16 %v812_v44  ;;  %v1227_v55 = vunpack.c.l.s8.bf16 %v827_v50 }
 0x194   : > { %1486 = vmatprep.subr.bf16.mxu0 %v1067_v56  ;;  %1572 = vmatprep.subr.bf16.mxu1 %v1069_v57  ;;  %v1229_v56 = vunpack.c.l.s8.bf16 %v829_v51  ;;  %v826_v57 = vld [vmem:[%s7406_s2 + $0x480] sm:$0xff] }
 0x195   : > { %v1226_v59 = vunpack.c.l.s8.bf16 %v826_v57  ;;  %v1242_v1 = vunpack.c.h.s8.bf16 %v826_v57  ;;  %v908_v57 = vld [vmem:[%s7406_s2 + $0x710] sm:$0xff] }
 0x197   : > { %1487 = vmatpush1.bf16.msra.mxu0 %v1066_v60  ;;  %1573 = vmatpush1.bf16.msra.mxu1 %v1068_v61  ;;  %v1228_v60 = vunpack.c.l.s8.bf16 %v828_v58  ;;  %v1243_v61 = vunpack.c.h.s8.bf16 %v827_v50  ;;  %v909_v50 = vld [vmem:[%s7406_s2 + $0x718] sm:$0xff] }
 0x198   : > { %1488 = vmatprep.subr.bf16.mxu0 %v1083_v62  ;;  %1574 = vmatprep.subr.bf16.mxu1 %v1085_v63  ;;  %v1245_v62 = vunpack.c.h.s8.bf16 %v829_v51  ;;  %v843_v63 = vld [vmem:[%s7406_s2 + $0x508] sm:$0xff] }
 0x19b   : > { %1489 = vmatpush1.bf16.msra.mxu0 %v1082_v2  ;;  %1575 = vmatpush1.bf16.msra.mxu1 %v1084_v3  ;;  %v1244_v2 = vunpack.c.h.s8.bf16 %v828_v58  ;;  %v1259_v3 = vunpack.c.l.s8.bf16 %v843_v63 }
 0x19c   : > { %1490 = vmatprep.subr.bf16.mxu0 %v1099_v4  ;;  %1576 = vmatprep.subr.bf16.mxu1 %v1101_v5  ;;  %v1261_v4 = vunpack.c.l.s8.bf16 %v845_v0  ;;  %v842_v5 = vld [vmem:[%s7406_s2 + $0x500] sm:$0xff] }
 0x19d   : > { %v1258_v7 = vunpack.c.l.s8.bf16 %v842_v5  ;;  %v1274_v13 = vunpack.c.h.s8.bf16 %v842_v5  ;;  %v924_v5 = vld [vmem:[%s7406_s2 + $0x790] sm:$0xff] }
 0x19f   : > { %1491 = vmatpush1.bf16.msra.mxu0 %v1098_v8  ;;  %1577 = vmatpush1.bf16.msra.mxu1 %v1100_v9  ;;  %v1260_v8 = vunpack.c.l.s8.bf16 %v844_v6  ;;  %v1275_v9 = vunpack.c.h.s8.bf16 %v843_v63  ;;  %v925_v63 = vld [vmem:[%s7406_s2 + $0x798] sm:$0xff] }
 0x1a0   : > { %1492 = vmatprep.subr.bf16.mxu0 %v1115_v10  ;;  %1578 = vmatprep.subr.bf16.mxu1 %v1117_v11  ;;  %v1277_v10 = vunpack.c.h.s8.bf16 %v845_v0  ;;  %v859_v11 = vld [vmem:[%s7406_s2 + $0x588] sm:$0xff] }
 0x1a3   : > { %1493 = vmatpush1.bf16.msra.mxu0 %v1114_v14  ;;  %1579 = vmatpush1.bf16.msra.mxu1 %v1116_v15  ;;  %v1276_v14 = vunpack.c.h.s8.bf16 %v844_v6  ;;  %v1291_v15 = vunpack.c.l.s8.bf16 %v859_v11 }
 0x1a4   : > { %1494 = vmatprep.subr.bf16.mxu0 %v1131_v16  ;;  %1580 = vmatprep.subr.bf16.mxu1 %v1133_v17  ;;  %v1293_v16 = vunpack.c.l.s8.bf16 %v861_v12  ;;  %v858_v17 = vld [vmem:[%s7406_s2 + $0x580] sm:$0xff] }
 0x1a5   : > { %v1290_v19 = vunpack.c.l.s8.bf16 %v858_v17  ;;  %v1306_v25 = vunpack.c.h.s8.bf16 %v858_v17  ;;  %v688_v17 = vld [vmem:[%s7406_s2 + $0x30] sm:$0xff] }
 0x1a7   : > { %1495 = vmatpush1.bf16.msra.mxu0 %v1130_v20  ;;  %1581 = vmatpush1.bf16.msra.mxu1 %v1132_v21  ;;  %v1292_v20 = vunpack.c.l.s8.bf16 %v860_v18  ;;  %v1307_v21 = vunpack.c.h.s8.bf16 %v859_v11  ;;  %v689_v11 = vld [vmem:[%s7406_s2 + $0x38] sm:$0xff] }
 0x1a8   : > { %1496 = vmatprep.subr.bf16.mxu0 %v1147_v22  ;;  %1582 = vmatprep.subr.bf16.mxu1 %v1149_v23  ;;  %v1309_v22 = vunpack.c.h.s8.bf16 %v861_v12  ;;  %v875_v23 = vld [vmem:[%s7406_s2 + $0x608] sm:$0xff] }
 0x1ab   : > { %1497 = vmatpush1.bf16.msra.mxu0 %v1146_v26  ;;  %1583 = vmatpush1.bf16.msra.mxu1 %v1148_v27  ;;  %v1308_v26 = vunpack.c.h.s8.bf16 %v860_v18  ;;  %v1323_v27 = vunpack.c.l.s8.bf16 %v875_v23  ;;  %v7530_v18 = vld [vmem:[%s7404_s30 + $0x8] ss:$16 sps:$4 sm:$0xff]  }
 0x1ac   : > { %1498 = vmatprep.subr.bf16.mxu0 %v1163_v28  ;;  %1584 = vmatprep.subr.bf16.mxu1 %v1165_v30  ;;  %v1325_v28 = vunpack.c.l.s8.bf16 %v877_v24  ;;  %v874_v30 = vld [vmem:[%s7406_s2 + $0x600] sm:$0xff] }
 0x1ad   : > { %v1322_v32 = vunpack.c.l.s8.bf16 %v874_v30  ;;  %v1338_v38 = vunpack.c.h.s8.bf16 %v874_v30  ;;  %v702_v30 = vld [vmem:[%s7406_s2 + $0xa0] sm:$0xff] }
 0x1af   : > { %1499 = vmatpush1.bf16.msra.mxu0 %v1162_v33  ;;  %1585 = vmatpush1.bf16.msra.mxu1 %v1164_v34  ;;  %v1324_v33 = vunpack.c.l.s8.bf16 %v876_v31  ;;  %v1339_v34 = vunpack.c.h.s8.bf16 %v875_v23  ;;  %v703_v23 = vld [vmem:[%s7406_s2 + $0xa8] sm:$0xff] }
 0x1b0   : > { %1500 = vmatprep.subr.bf16.mxu0 %v1179_v35  ;;  %1586 = vmatprep.subr.bf16.mxu1 %v1181_v36  ;;  %v1341_v35 = vunpack.c.h.s8.bf16 %v877_v24  ;;  %v891_v36 = vld [vmem:[%s7406_s2 + $0x688] sm:$0xff]  ;;  %v705_v24 = vld [vmem:[%s7406_s2 + $0xb8] sm:$0xff] }
 0x1b3   : > { %1501 = vmatpush1.bf16.msra.mxu0 %v1178_v39  ;;  %1587 = vmatpush1.bf16.msra.mxu1 %v1180_v40  ;;  %v1340_v39 = vunpack.c.h.s8.bf16 %v876_v31  ;;  %v1355_v40 = vunpack.c.l.s8.bf16 %v891_v36  ;;  %v704_v31 = vld [vmem:[%s7406_s2 + $0xb0] sm:$0xff] }
 0x1b4   : > { %1513 = vmatprep.subr.bf16.mxu0 %v1195_v41  ;;  %1599 = vmatprep.subr.bf16.mxu1 %v1197_v42  ;;  %v1357_v41 = vunpack.c.l.s8.bf16 %v893_v37  ;;  %v890_v42 = vld [vmem:[%s7406_s2 + $0x680] sm:$0xff] }
 0x1b5   : > { %v1354_v44 = vunpack.c.l.s8.bf16 %v890_v42  ;;  %v1370_v51 = vunpack.c.h.s8.bf16 %v890_v42  ;;  %v720_v42 = vld [vmem:[%s7406_s2 + $0x130] sm:$0xff] }
 0x1b6   : > { %1503 = vmatmul.mubr.bf16.vlgmr.msra.gmra.mrb[0].mxu0 %v7488_v45  ;;  %1589 = vmatmul.mubr.bf16.vlgmr.msra.gmra.mrb[0].mxu1 %v7488_v45 }
 0x1b7   : > { %1514 = vmatpush1.bf16.msra.mxu0 %v1194_v46  ;;  %1600 = vmatpush1.bf16.msra.mxu1 %v1196_v47  ;;  %v1356_v46 = vunpack.c.l.s8.bf16 %v892_v43  ;;  %v1371_v47 = vunpack.c.h.s8.bf16 %v891_v36  ;;  %v719_v36 = vld [vmem:[%s7406_s2 + $0x128] sm:$0xff] }
 0x1b8   : > { %1515 = vmatprep.subr.bf16.mxu0 %v1211_v48  ;;  %1601 = vmatprep.subr.bf16.mxu1 %v1213_v49  ;;  %v1373_v48 = vunpack.c.h.s8.bf16 %v893_v37  ;;  %v907_v49 = vld [vmem:[%s7406_s2 + $0x708] sm:$0xff]  ;;  %v721_v37 = vld [vmem:[%s7406_s2 + $0x138] sm:$0xff] }
 0x1b9   : > { %1545 = vmatprep.mubr.bf16.mxu0 %v7493_v52  ;;  %1631 = vmatprep.mubr.bf16.mxu1 %v7493_v52 }
 0x1bb   : > { %1516 = vmatpush1.bf16.msra.mxu0 %v1210_v53  ;;  %1602 = vmatpush1.bf16.msra.mxu1 %v1212_v54  ;;  %v1372_v53 = vunpack.c.h.s8.bf16 %v892_v43  ;;  %v1387_v54 = vunpack.c.l.s8.bf16 %v907_v49 }
 0x1bc   : > { %1517 = vmatprep.subr.bf16.mxu0 %v1227_v55  ;;  %1603 = vmatprep.subr.bf16.mxu1 %v1229_v56  ;;  %v1389_v55 = vunpack.c.l.s8.bf16 %v909_v50  ;;  %v906_v56 = vld [vmem:[%s7406_s2 + $0x700] sm:$0xff] }
 0x1bd   : > { %v1386_v58 = vunpack.c.l.s8.bf16 %v906_v56  ;;  %v1402_v0 = vunpack.c.h.s8.bf16 %v906_v56  ;;  %v736_v56 = vld [vmem:[%s7406_s2 + $0x1b0] sm:$0xff] }
 0x1bf   : > { %1518 = vmatpush1.bf16.msra.mxu0 %v1226_v59  ;;  %1604 = vmatpush1.bf16.msra.mxu1 %v1228_v60  ;;  %v1388_v59 = vunpack.c.l.s8.bf16 %v908_v57  ;;  %v1403_v60 = vunpack.c.h.s8.bf16 %v907_v49  ;;  %v737_v49 = vld [vmem:[%s7406_s2 + $0x1b8] sm:$0xff] }
 0x1c0   : > { %1519 = vmatprep.subr.bf16.mxu0 %v1243_v61  ;;  %1605 = vmatprep.subr.bf16.mxu1 %v1245_v62  ;;  %v1405_v61 = vunpack.c.h.s8.bf16 %v909_v50  ;;  %v923_v62 = vld [vmem:[%s7406_s2 + $0x788] sm:$0xff] }
 0x1c3   : > { %1520 = vmatpush1.bf16.msra.mxu0 %v1242_v1  ;;  %1606 = vmatpush1.bf16.msra.mxu1 %v1244_v2  ;;  %v1404_v1 = vunpack.c.h.s8.bf16 %v908_v57  ;;  %v1419_v2 = vunpack.c.l.s8.bf16 %v923_v62 }
 0x1c4   : > { %1521 = vmatprep.subr.bf16.mxu0 %v1259_v3  ;;  %1607 = vmatprep.subr.bf16.mxu1 %v1261_v4  ;;  %v1421_v3 = vunpack.c.l.s8.bf16 %v925_v63  ;;  %v922_v4 = vld [vmem:[%s7406_s2 + $0x780] sm:$0xff] }
 0x1c5   : > { %v1418_v6 = vunpack.c.l.s8.bf16 %v922_v4  ;;  %v1434_v12 = vunpack.c.h.s8.bf16 %v922_v4  ;;  %v752_v4 = vld [vmem:[%s7406_s2 + $0x230] sm:$0xff] }
 0x1c7   : > { %1522 = vmatpush1.bf16.msra.mxu0 %v1258_v7  ;;  %1608 = vmatpush1.bf16.msra.mxu1 %v1260_v8  ;;  %v1420_v7 = vunpack.c.l.s8.bf16 %v924_v5  ;;  %v1435_v8 = vunpack.c.h.s8.bf16 %v923_v62  ;;  %v753_v62 = vld [vmem:[%s7406_s2 + $0x238] sm:$0xff] }
 0x1c8   : > { %1523 = vmatprep.subr.bf16.mxu0 %v1275_v9  ;;  %1609 = vmatprep.subr.bf16.mxu1 %v1277_v10  ;;  %v1437_v9 = vunpack.c.h.s8.bf16 %v925_v63  ;;  %v687_v10 = vld [vmem:[%s7406_s2 + $0x28] sm:$0xff] }
 0x1cb   : > { %1524 = vmatpush1.bf16.msra.mxu0 %v1274_v13  ;;  %1610 = vmatpush1.bf16.msra.mxu1 %v1276_v14  ;;  %v1436_v13 = vunpack.c.h.s8.bf16 %v924_v5  ;;  %v943_v14 = vunpack.c.l.s8.bf16 %v687_v10 }
 0x1cc   : > { %1525 = vmatprep.subr.bf16.mxu0 %v1291_v15  ;;  %1611 = vmatprep.subr.bf16.mxu1 %v1293_v16  ;;  %v945_v15 = vunpack.c.l.s8.bf16 %v689_v11  ;;  %v686_v16 = vld [vmem:[%s7406_s2 + $0x20] sm:$0xff] }
 0x1cf   : > { %1526 = vmatpush1.bf16.msra.mxu0 %v1290_v19  ;;  %1612 = vmatpush1.bf16.msra.mxu1 %v1292_v20  ;;  %v942_v19 = vunpack.c.l.s8.bf16 %v686_v16  ;;  %v944_v20 = vunpack.c.l.s8.bf16 %v688_v17 }
 0x1d0   : > { %1527 = vmatprep.subr.bf16.mxu0 %v1307_v21  ;;  %1613 = vmatprep.subr.bf16.mxu1 %v1309_v22  ;;  %v959_v21 = vunpack.c.h.s8.bf16 %v687_v10  ;;  %v961_v22 = vunpack.c.h.s8.bf16 %v689_v11  ;;  %v769_v10 = vld [vmem:[%s7406_s2 + $0x2b8] sm:$0xff] }
 0x1d3   : > { %1528 = vmatpush1.bf16.msra.mxu0 %v1306_v25  ;;  %1614 = vmatpush1.bf16.msra.mxu1 %v1308_v26  ;;  %v958_v25 = vunpack.c.h.s8.bf16 %v686_v16  ;;  %v960_v26 = vunpack.c.h.s8.bf16 %v688_v17  ;;  %v768_v16 = vld [vmem:[%s7406_s2 + $0x2b0] sm:$0xff] }
 0x1d4   : > { %1529 = vmatprep.subr.bf16.mxu0 %v1323_v27  ;;  %1615 = vmatprep.subr.bf16.mxu1 %v1325_v28  ;;  %v975_v27 = vunpack.c.l.s8.bf16 %v703_v23  ;;  %v977_v28 = vunpack.c.l.s8.bf16 %v705_v24 }
 0x1d7   : > { %1530 = vmatpush1.bf16.msra.mxu0 %v1322_v32  ;;  %1616 = vmatpush1.bf16.msra.mxu1 %v1324_v33  ;;  %v974_v32 = vunpack.c.l.s8.bf16 %v702_v30  ;;  %v976_v33 = vunpack.c.l.s8.bf16 %v704_v31 }
 0x1d8   : > { %1531 = vmatprep.subr.bf16.mxu0 %v1339_v34  ;;  %1617 = vmatprep.subr.bf16.mxu1 %v1341_v35  ;;  %v991_v34 = vunpack.c.h.s8.bf16 %v703_v23  ;;  %v993_v35 = vunpack.c.h.s8.bf16 %v705_v24  ;;  %v785_v23 = vld [vmem:[%s7406_s2 + $0x338] sm:$0xff] }
 0x1db   : > { %1532 = vmatpush1.bf16.msra.mxu0 %v1338_v38  ;;  %1618 = vmatpush1.bf16.msra.mxu1 %v1340_v39  ;;  %v990_v38 = vunpack.c.h.s8.bf16 %v702_v30  ;;  %v992_v39 = vunpack.c.h.s8.bf16 %v704_v31  ;;  %v784_v30 = vld [vmem:[%s7406_s2 + $0x330] sm:$0xff] }
 0x1dc   : > { %1533 = vmatprep.subr.bf16.mxu0 %v1355_v40  ;;  %1619 = vmatprep.subr.bf16.mxu1 %v1357_v41  ;;  %v1009_v40 = vunpack.c.l.s8.bf16 %v721_v37  ;;  %v718_v41 = vld [vmem:[%s7406_s2 + $0x120] sm:$0xff] }
 0x1dd   : > { %v1006_v43 = vunpack.c.l.s8.bf16 %v718_v41  ;;  %v1022_v50 = vunpack.c.h.s8.bf16 %v718_v41  ;;  %v800_v41 = vld [vmem:[%s7406_s2 + $0x3b0] sm:$0xff] }
 0x1df   : > { %1534 = vmatpush1.bf16.msra.mxu0 %v1354_v44  ;;  %1620 = vmatpush1.bf16.msra.mxu1 %v1356_v46  ;;  %v1008_v44 = vunpack.c.l.s8.bf16 %v720_v42  ;;  %v1023_v46 = vunpack.c.h.s8.bf16 %v719_v36 }
 0x1e0   : > { %1535 = vmatprep.subr.bf16.mxu0 %v1371_v47  ;;  %1621 = vmatprep.subr.bf16.mxu1 %v1373_v48  ;;  %v1025_v47 = vunpack.c.h.s8.bf16 %v721_v37  ;;  %v735_v48 = vld [vmem:[%s7406_s2 + $0x1a8] sm:$0xff] }
 0x1e3   : > { %1536 = vmatpush1.bf16.msra.mxu0 %v1370_v51  ;;  %1622 = vmatpush1.bf16.msra.mxu1 %v1372_v53  ;;  %v1024_v51 = vunpack.c.h.s8.bf16 %v720_v42  ;;  %v1039_v53 = vunpack.c.l.s8.bf16 %v735_v48 }
 0x1e4   : > { %1537 = vmatprep.subr.bf16.mxu0 %v1387_v54  ;;  %1623 = vmatprep.subr.bf16.mxu1 %v1389_v55  ;;  %v1041_v54 = vunpack.c.l.s8.bf16 %v737_v49  ;;  %v734_v55 = vld [vmem:[%s7406_s2 + $0x1a0] sm:$0xff] }
 0x1e5   : > { %v1038_v57 = vunpack.c.l.s8.bf16 %v734_v55  ;;  %v1054_v63 = vunpack.c.h.s8.bf16 %v734_v55  ;;  %v816_v55 = vld [vmem:[%s7406_s2 + $0x430] sm:$0xff] }
 0x1e7   : > { %1538 = vmatpush1.bf16.msra.mxu0 %v1386_v58  ;;  %1624 = vmatpush1.bf16.msra.mxu1 %v1388_v59  ;;  %v1040_v58 = vunpack.c.l.s8.bf16 %v736_v56  ;;  %v1055_v59 = vunpack.c.h.s8.bf16 %v735_v48  ;;  %v817_v48 = vld [vmem:[%s7406_s2 + $0x438] sm:$0xff] }
 0x1e8   : > { %1539 = vmatprep.subr.bf16.mxu0 %v1403_v60  ;;  %1625 = vmatprep.subr.bf16.mxu1 %v1405_v61  ;;  %v1057_v60 = vunpack.c.h.s8.bf16 %v737_v49  ;;  %v751_v61 = vld [vmem:[%s7406_s2 + $0x228] sm:$0xff] }
 0x1eb   : > { %1540 = vmatpush1.bf16.msra.mxu0 %v1402_v0  ;;  %1626 = vmatpush1.bf16.msra.mxu1 %v1404_v1  ;;  %v1056_v0 = vunpack.c.h.s8.bf16 %v736_v56  ;;  %v1071_v1 = vunpack.c.l.s8.bf16 %v751_v61 }
 0x1ec   : > { %1541 = vmatprep.subr.bf16.mxu0 %v1419_v2  ;;  %1627 = vmatprep.subr.bf16.mxu1 %v1421_v3  ;;  %v1073_v2 = vunpack.c.l.s8.bf16 %v753_v62  ;;  %v750_v3 = vld [vmem:[%s7406_s2 + $0x220] sm:$0xff] }
 0x1ed   : > { %v1070_v5 = vunpack.c.l.s8.bf16 %v750_v3  ;;  %v1086_v11 = vunpack.c.h.s8.bf16 %v750_v3  ;;  %v832_v3 = vld [vmem:[%s7406_s2 + $0x4b0] sm:$0xff] }
 0x1ef   : > { %1542 = vmatpush1.bf16.msra.mxu0 %v1418_v6  ;;  %1628 = vmatpush1.bf16.msra.mxu1 %v1420_v7  ;;  %v1072_v6 = vunpack.c.l.s8.bf16 %v752_v4  ;;  %v1087_v7 = vunpack.c.h.s8.bf16 %v751_v61  ;;  %v833_v61 = vld [vmem:[%s7406_s2 + $0x4b8] sm:$0xff] }
 0x1f0   : > { %1543 = vmatprep.subr.bf16.mxu0 %v1435_v8  ;;  %1629 = vmatprep.subr.bf16.mxu1 %v1437_v9  ;;  %v1089_v8 = vunpack.c.h.s8.bf16 %v753_v62  ;;  %v767_v9 = vld [vmem:[%s7406_s2 + $0x2a8] sm:$0xff] }
 0x1f3   : > { %1544 = vmatpush1.bf16.msra.mxu0 %v1434_v12  ;;  %1630 = vmatpush1.bf16.msra.mxu1 %v1436_v13  ;;  %v1088_v12 = vunpack.c.h.s8.bf16 %v752_v4  ;;  %v1103_v13 = vunpack.c.l.s8.bf16 %v767_v9 }
 0x1f4   : > { %1642 = vmatprep.subr.bf16.mxu0 %v943_v14  ;;  %1728 = vmatprep.subr.bf16.mxu1 %v945_v15  ;;  %v1105_v14 = vunpack.c.l.s8.bf16 %v769_v10  ;;  %v766_v15 = vld [vmem:[%s7406_s2 + $0x2a0] sm:$0xff] }
 0x1f5   : > { %v1102_v17 = vunpack.c.l.s8.bf16 %v766_v15  ;;  %v1118_v24 = vunpack.c.h.s8.bf16 %v766_v15 }
 0x1f6   : > { %1546 = vmatmul.mubr.bf16.vlgmr.msra.gmra.mrb[0].mxu0 %v7530_v18  ;;  %1632 = vmatmul.mubr.bf16.vlgmr.msra.gmra.mrb[0].mxu1 %v7530_v18 }
 0x1f7   : > { %1643 = vmatpush1.bf16.msra.mxu0 %v942_v19  ;;  %1729 = vmatpush1.bf16.msra.mxu1 %v944_v20  ;;  %v1104_v19 = vunpack.c.l.s8.bf16 %v768_v16  ;;  %v1119_v20 = vunpack.c.h.s8.bf16 %v767_v9 }
 0x1f8   : > { %1644 = vmatprep.subr.bf16.mxu0 %v959_v21  ;;  %1730 = vmatprep.subr.bf16.mxu1 %v961_v22  ;;  %v1121_v21 = vunpack.c.h.s8.bf16 %v769_v10  ;;  %v783_v22 = vld [vmem:[%s7406_s2 + $0x328] sm:$0xff]  ;;  %v1248_v10 = vunpack.c.h.s8.bf16 %v832_v3 }
 0x1f9   : > { %1674 = vmatprep.mubr.bf16.mxu0 %v7457_v29  ;;  %1760 = vmatprep.mubr.bf16.mxu1 %v7457_v29  ;;  %v1007_v29 = vunpack.c.l.s8.bf16 %v719_v36  ;;  %v801_v36 = vld [vmem:[%s7406_s2 + $0x3b8] sm:$0xff] }
 0x1fb   : > { %1645 = vmatpush1.bf16.msra.mxu0 %v958_v25  ;;  %1731 = vmatpush1.bf16.msra.mxu1 %v960_v26  ;;  %v1120_v25 = vunpack.c.h.s8.bf16 %v768_v16  ;;  %v1135_v26 = vunpack.c.l.s8.bf16 %v783_v22 }
 0x1fc   : > { %1646 = vmatprep.subr.bf16.mxu0 %v975_v27  ;;  %1732 = vmatprep.subr.bf16.mxu1 %v977_v28  ;;  %v1137_v27 = vunpack.c.l.s8.bf16 %v785_v23  ;;  %v782_v28 = vld [vmem:[%s7406_s2 + $0x320] sm:$0xff] }
 0x1fd   : > { %v1134_v31 = vunpack.c.l.s8.bf16 %v782_v28  ;;  %v1150_v37 = vunpack.c.h.s8.bf16 %v782_v28 }
 0x1ff   : > { %1647 = vmatpush1.bf16.msra.mxu0 %v974_v32  ;;  %1733 = vmatpush1.bf16.msra.mxu1 %v976_v33  ;;  %v1136_v32 = vunpack.c.l.s8.bf16 %v784_v30  ;;  %v1151_v33 = vunpack.c.h.s8.bf16 %v783_v22 }
 0x200   : > { %1648 = vmatprep.subr.bf16.mxu0 %v991_v34  ;;  %1734 = vmatprep.subr.bf16.mxu1 %v993_v35  ;;  %v1153_v34 = vunpack.c.h.s8.bf16 %v785_v23  ;;  %v799_v35 = vld [vmem:[%s7406_s2 + $0x3a8] sm:$0xff] }
 0x203   : > { %1649 = vmatpush1.bf16.msra.mxu0 %v990_v38  ;;  %1735 = vmatpush1.bf16.msra.mxu1 %v992_v39  ;;  %v1152_v38 = vunpack.c.h.s8.bf16 %v784_v30  ;;  %v1167_v39 = vunpack.c.l.s8.bf16 %v799_v35 }
 0x204   : > { %1650 = vmatprep.subr.bf16.mxu0 %v1007_v29  ;;  %1736 = vmatprep.subr.bf16.mxu1 %v1009_v40  ;;  %v1169_v29 = vunpack.c.l.s8.bf16 %v801_v36  ;;  %v798_v40 = vld [vmem:[%s7406_s2 + $0x3a0] sm:$0xff] }
 0x205   : > { %v1166_v42 = vunpack.c.l.s8.bf16 %v798_v40  ;;  %v1182_v49 = vunpack.c.h.s8.bf16 %v798_v40 }
 0x207   : > { %1651 = vmatpush1.bf16.msra.mxu0 %v1006_v43  ;;  %1737 = vmatpush1.bf16.msra.mxu1 %v1008_v44  ;;  %v1168_v43 = vunpack.c.l.s8.bf16 %v800_v41  ;;  %v1183_v44 = vunpack.c.h.s8.bf16 %v799_v35 }
 0x208   : > { %1652 = vmatprep.subr.bf16.mxu0 %v1023_v46  ;;  %1738 = vmatprep.subr.bf16.mxu1 %v1025_v47  ;;  %v1185_v46 = vunpack.c.h.s8.bf16 %v801_v36  ;;  %v815_v47 = vld [vmem:[%s7406_s2 + $0x428] sm:$0xff] }
 0x20b   : > { %1653 = vmatpush1.bf16.msra.mxu0 %v1022_v50  ;;  %1739 = vmatpush1.bf16.msra.mxu1 %v1024_v51  ;;  %v1184_v50 = vunpack.c.h.s8.bf16 %v800_v41  ;;  %v1199_v51 = vunpack.c.l.s8.bf16 %v815_v47 }
 0x20c   : > { %1654 = vmatprep.subr.bf16.mxu0 %v1039_v53  ;;  %1740 = vmatprep.subr.bf16.mxu1 %v1041_v54  ;;  %v1201_v53 = vunpack.c.l.s8.bf16 %v817_v48  ;;  %v814_v54 = vld [vmem:[%s7406_s2 + $0x420] sm:$0xff] }
 0x20d   : > { %v1198_v56 = vunpack.c.l.s8.bf16 %v814_v54  ;;  %v1214_v62 = vunpack.c.h.s8.bf16 %v814_v54 }
 0x20f   : > { %1655 = vmatpush1.bf16.msra.mxu0 %v1038_v57  ;;  %1741 = vmatpush1.bf16.msra.mxu1 %v1040_v58  ;;  %v1200_v57 = vunpack.c.l.s8.bf16 %v816_v55  ;;  %v1215_v58 = vunpack.c.h.s8.bf16 %v815_v47 }
 0x210   : > { %1656 = vmatprep.subr.bf16.mxu0 %v1055_v59  ;;  %1742 = vmatprep.subr.bf16.mxu1 %v1057_v60  ;;  %v1217_v59 = vunpack.c.h.s8.bf16 %v817_v48  ;;  %v831_v60 = vld [vmem:[%s7406_s2 + $0x4a8] sm:$0xff] }
 0x213   : > { %1657 = vmatpush1.bf16.msra.mxu0 %v1054_v63  ;;  %1743 = vmatpush1.bf16.msra.mxu1 %v1056_v0  ;;  %v1216_v63 = vunpack.c.h.s8.bf16 %v816_v55  ;;  %v1231_v0 = vunpack.c.l.s8.bf16 %v831_v60 }
 0x214   : > { %1658 = vmatprep.subr.bf16.mxu0 %v1071_v1  ;;  %1744 = vmatprep.subr.bf16.mxu1 %v1073_v2  ;;  %v1233_v1 = vunpack.c.l.s8.bf16 %v833_v61  ;;  %v830_v2 = vld [vmem:[%s7406_s2 + $0x4a0] sm:$0xff] }
 0x215   : > { %v1230_v4 = vunpack.c.l.s8.bf16 %v830_v2  ;;  %v1246_v9 = vunpack.c.h.s8.bf16 %v830_v2 }
 0x217   : > { %1659 = vmatpush1.bf16.msra.mxu0 %v1070_v5  ;;  %1745 = vmatpush1.bf16.msra.mxu1 %v1072_v6  ;;  %v1247_v5 = vunpack.c.h.s8.bf16 %v831_v60  ;;  %v1249_v6 = vunpack.c.h.s8.bf16 %v833_v61 }
 0x218   : > { %1660 = vmatprep.subr.bf16.mxu0 %v1087_v7  ;;  %1746 = vmatprep.subr.bf16.mxu1 %v1089_v8  ;;  %v847_v7 = vld [vmem:[%s7406_s2 + $0x528] sm:$0xff]  ;;  %v849_v8 = vld [vmem:[%s7406_s2 + $0x538] sm:$0xff] }
 0x219   : > { %v1279_v16 = vunpack.c.h.s8.bf16 %v847_v7 }
 0x21b   : > { %1661 = vmatpush1.bf16.msra.mxu0 %v1086_v11  ;;  %1747 = vmatpush1.bf16.msra.mxu1 %v1088_v12  ;;  %v1265_v11 = vunpack.c.l.s8.bf16 %v849_v8  ;;  %v846_v12 = vld [vmem:[%s7406_s2 + $0x520] sm:$0xff] }
 0x21c   : > { %1662 = vmatprep.subr.bf16.mxu0 %v1103_v13  ;;  %1748 = vmatprep.subr.bf16.mxu1 %v1105_v14  ;;  %v848_v13 = vld [vmem:[%s7406_s2 + $0x530] sm:$0xff]  ;;  %v1262_v14 = vunpack.c.l.s8.bf16 %v846_v12 }
 0x21d   : > { %v1264_v15 = vunpack.c.l.s8.bf16 %v848_v13  ;;  %v1280_v22 = vunpack.c.h.s8.bf16 %v848_v13 }
 0x21f   : > { %1663 = vmatpush1.bf16.msra.mxu0 %v1102_v17  ;;  %1749 = vmatpush1.bf16.msra.mxu1 %v1104_v19  ;;  %v1281_v17 = vunpack.c.h.s8.bf16 %v849_v8  ;;  %v863_v19 = vld [vmem:[%s7406_s2 + $0x5a8] sm:$0xff] }
 0x220   : > { %1664 = vmatprep.subr.bf16.mxu0 %v1119_v20  ;;  %1750 = vmatprep.subr.bf16.mxu1 %v1121_v21  ;;  %v865_v20 = vld [vmem:[%s7406_s2 + $0x5b8] sm:$0xff]  ;;  %v1278_v21 = vunpack.c.h.s8.bf16 %v846_v12  ;;  %v1295_v23 = vunpack.c.l.s8.bf16 %v863_v19  ;;  %v1311_v30 = vunpack.c.h.s8.bf16 %v863_v19 }
 0x223   : > { %1665 = vmatpush1.bf16.msra.mxu0 %v1118_v24  ;;  %1751 = vmatpush1.bf16.msra.mxu1 %v1120_v25  ;;  %v1297_v24 = vunpack.c.l.s8.bf16 %v865_v20  ;;  %v862_v25 = vld [vmem:[%s7406_s2 + $0x5a0] sm:$0xff] }
 0x224   : > { %1666 = vmatprep.subr.bf16.mxu0 %v1135_v26  ;;  %1752 = vmatprep.subr.bf16.mxu1 %v1137_v27  ;;  %v864_v26 = vld [vmem:[%s7406_s2 + $0x5b0] sm:$0xff]  ;;  %v1294_v27 = vunpack.c.l.s8.bf16 %v862_v25 }
 0x225   : > { %v1296_v28 = vunpack.c.l.s8.bf16 %v864_v26  ;;  %v1312_v35 = vunpack.c.h.s8.bf16 %v864_v26 }
 0x227   : > { %1667 = vmatpush1.bf16.msra.mxu0 %v1134_v31  ;;  %1753 = vmatpush1.bf16.msra.mxu1 %v1136_v32  ;;  %v1313_v31 = vunpack.c.h.s8.bf16 %v865_v20  ;;  %v879_v32 = vld [vmem:[%s7406_s2 + $0x628] sm:$0xff] }
 0x228   : > { %1668 = vmatprep.subr.bf16.mxu0 %v1151_v33  ;;  %1754 = vmatprep.subr.bf16.mxu1 %v1153_v34  ;;  %v881_v33 = vld [vmem:[%s7406_s2 + $0x638] sm:$0xff]  ;;  %v1310_v34 = vunpack.c.h.s8.bf16 %v862_v25  ;;  %v1327_v36 = vunpack.c.l.s8.bf16 %v879_v32  ;;  %v1343_v41 = vunpack.c.h.s8.bf16 %v879_v32 }
 0x22b   : > { %1669 = vmatpush1.bf16.msra.mxu0 %v1150_v37  ;;  %1755 = vmatpush1.bf16.msra.mxu1 %v1152_v38  ;;  %v1329_v37 = vunpack.c.l.s8.bf16 %v881_v33  ;;  %v878_v38 = vld [vmem:[%s7406_s2 + $0x620] sm:$0xff] }
 0x22c   : > { %1670 = vmatprep.subr.bf16.mxu0 %v1167_v39  ;;  %1756 = vmatprep.subr.bf16.mxu1 %v1169_v29  ;;  %v880_v39 = vld [vmem:[%s7406_s2 + $0x630] sm:$0xff]  ;;  %v1326_v29 = vunpack.c.l.s8.bf16 %v878_v38 }
 0x22d   : > { %v1328_v40 = vunpack.c.l.s8.bf16 %v880_v39  ;;  %v1344_v47 = vunpack.c.h.s8.bf16 %v880_v39 }
 0x22f   : > { %1671 = vmatpush1.bf16.msra.mxu0 %v1166_v42  ;;  %1757 = vmatpush1.bf16.msra.mxu1 %v1168_v43  ;;  %v1345_v42 = vunpack.c.h.s8.bf16 %v881_v33  ;;  %v895_v43 = vld [vmem:[%s7406_s2 + $0x6a8] sm:$0xff] }
 0x230   : > { %1672 = vmatprep.subr.bf16.mxu0 %v1183_v44  ;;  %1758 = vmatprep.subr.bf16.mxu1 %v1185_v46  ;;  %v897_v44 = vld [vmem:[%s7406_s2 + $0x6b8] sm:$0xff]  ;;  %v1342_v46 = vunpack.c.h.s8.bf16 %v878_v38  ;;  %v1359_v48 = vunpack.c.l.s8.bf16 %v895_v43  ;;  %v1375_v55 = vunpack.c.h.s8.bf16 %v895_v43 }
 0x233   : > { %1673 = vmatpush1.bf16.msra.mxu0 %v1182_v49  ;;  %1759 = vmatpush1.bf16.msra.mxu1 %v1184_v50  ;;  %v1361_v49 = vunpack.c.l.s8.bf16 %v897_v44  ;;  %v894_v50 = vld [vmem:[%s7406_s2 + $0x6a0] sm:$0xff] }
 0x234   : > { %1685 = vmatprep.subr.bf16.mxu0 %v1199_v51  ;;  %1771 = vmatprep.subr.bf16.mxu1 %v1201_v53  ;;  %v896_v51 = vld [vmem:[%s7406_s2 + $0x6b0] sm:$0xff]  ;;  %v1358_v53 = vunpack.c.l.s8.bf16 %v894_v50 }
 0x235   : > { %v1360_v54 = vunpack.c.l.s8.bf16 %v896_v51  ;;  %v1376_v60 = vunpack.c.h.s8.bf16 %v896_v51 }
 0x236   : > { %1675 = vmatmul.mubr.bf16.vlgmr.msra.gmra.mrb[4].mxu0 %v7488_v45  ;;  %1761 = vmatmul.mubr.bf16.vlgmr.msra.gmra.mrb[4].mxu1 %v7488_v45  ;;  %v1232_v45 = vunpack.c.l.s8.bf16 %v832_v3 }
 0x237   : > { %1686 = vmatpush1.bf16.msra.mxu0 %v1198_v56  ;;  %1772 = vmatpush1.bf16.msra.mxu1 %v1200_v57  ;;  %v1377_v56 = vunpack.c.h.s8.bf16 %v897_v44  ;;  %v911_v57 = vld [vmem:[%s7406_s2 + $0x728] sm:$0xff] }
 0x238   : > { %1687 = vmatprep.subr.bf16.mxu0 %v1215_v58  ;;  %1773 = vmatprep.subr.bf16.mxu1 %v1217_v59  ;;  %v913_v58 = vld [vmem:[%s7406_s2 + $0x738] sm:$0xff]  ;;  %v1374_v59 = vunpack.c.h.s8.bf16 %v894_v50  ;;  %v1391_v61 = vunpack.c.l.s8.bf16 %v911_v57  ;;  %v1407_v3 = vunpack.c.h.s8.bf16 %v911_v57 }
 0x239   : > { %1717 = vmatprep.mubr.bf16.mxu0 %v7493_v52  ;;  %1803 = vmatprep.mubr.bf16.mxu1 %v7493_v52  ;;  %v1263_v52 = vunpack.c.l.s8.bf16 %v847_v7 }
 0x23b   : > { %1688 = vmatpush1.bf16.msra.mxu0 %v1214_v62  ;;  %1774 = vmatpush1.bf16.msra.mxu1 %v1216_v63  ;;  %v1393_v62 = vunpack.c.l.s8.bf16 %v913_v58  ;;  %v910_v63 = vld [vmem:[%s7406_s2 + $0x720] sm:$0xff] }
 0x23c   : > { %1689 = vmatprep.subr.bf16.mxu0 %v1231_v0  ;;  %1775 = vmatprep.subr.bf16.mxu1 %v1233_v1  ;;  %v912_v0 = vld [vmem:[%s7406_s2 + $0x730] sm:$0xff]  ;;  %v1390_v1 = vunpack.c.l.s8.bf16 %v910_v63 }
 0x23d   : > { %v1392_v2 = vunpack.c.l.s8.bf16 %v912_v0  ;;  %v1408_v7 = vunpack.c.h.s8.bf16 %v912_v0 }
 0x23f   : > { %1690 = vmatpush1.bf16.msra.mxu0 %v1230_v4  ;;  %1776 = vmatpush1.bf16.msra.mxu1 %v1232_v45  ;;  %v1409_v4 = vunpack.c.h.s8.bf16 %v913_v58  ;;  %v927_v45 = vld [vmem:[%s7406_s2 + $0x7a8] sm:$0xff] }
 0x240   : > { %1691 = vmatprep.subr.bf16.mxu0 %v1247_v5  ;;  %1777 = vmatprep.subr.bf16.mxu1 %v1249_v6  ;;  %v929_v5 = vld [vmem:[%s7406_s2 + $0x7b8] sm:$0xff]  ;;  %v1406_v6 = vunpack.c.h.s8.bf16 %v910_v63  ;;  %v1423_v8 = vunpack.c.l.s8.bf16 %v927_v45  ;;  %v1439_v13 = vunpack.c.h.s8.bf16 %v927_v45 }
 0x243   : > { %1692 = vmatpush1.bf16.msra.mxu0 %v1246_v9  ;;  %1778 = vmatpush1.bf16.msra.mxu1 %v1248_v10  ;;  %v1425_v9 = vunpack.c.l.s8.bf16 %v929_v5  ;;  %v926_v10 = vld [vmem:[%s7406_s2 + $0x7a0] sm:$0xff] }
 0x244   : > { %1693 = vmatprep.subr.bf16.mxu0 %v1263_v52  ;;  %1779 = vmatprep.subr.bf16.mxu1 %v1265_v11  ;;  %v928_v52 = vld [vmem:[%s7406_s2 + $0x7b0] sm:$0xff]  ;;  %v1422_v11 = vunpack.c.l.s8.bf16 %v926_v10 }
 0x245   : > { %v1424_v12 = vunpack.c.l.s8.bf16 %v928_v52  ;;  %v1440_v19 = vunpack.c.h.s8.bf16 %v928_v52 }
 0x247   : > { %1694 = vmatpush1.bf16.msra.mxu0 %v1262_v14  ;;  %1780 = vmatpush1.bf16.msra.mxu1 %v1264_v15  ;;  %v1441_v14 = vunpack.c.h.s8.bf16 %v929_v5  ;;  %v691_v15 = vld [vmem:[%s7406_s2 + $0x48] sm:$0xff] }
 0x248   : > { %1695 = vmatprep.subr.bf16.mxu0 %v1279_v16  ;;  %1781 = vmatprep.subr.bf16.mxu1 %v1281_v17  ;;  %v693_v16 = vld [vmem:[%s7406_s2 + $0x58] sm:$0xff]  ;;  %v1438_v17 = vunpack.c.h.s8.bf16 %v926_v10  ;;  %v947_v20 = vunpack.c.l.s8.bf16 %v691_v15  ;;  %v963_v26 = vunpack.c.h.s8.bf16 %v691_v15 }
 0x24b   : > { %1696 = vmatpush1.bf16.msra.mxu0 %v1278_v21  ;;  %1782 = vmatpush1.bf16.msra.mxu1 %v1280_v22  ;;  %v949_v21 = vunpack.c.l.s8.bf16 %v693_v16  ;;  %v690_v22 = vld [vmem:[%s7406_s2 + $0x40] sm:$0xff] }
 0x24c   : > { %1697 = vmatprep.subr.bf16.mxu0 %v1295_v23  ;;  %1783 = vmatprep.subr.bf16.mxu1 %v1297_v24  ;;  %v692_v23 = vld [vmem:[%s7406_s2 + $0x50] sm:$0xff]  ;;  %v946_v24 = vunpack.c.l.s8.bf16 %v690_v22 }
 0x24d   : > { %v948_v25 = vunpack.c.l.s8.bf16 %v692_v23  ;;  %v964_v32 = vunpack.c.h.s8.bf16 %v692_v23 }
 0x24f   : > { %1698 = vmatpush1.bf16.msra.mxu0 %v1294_v27  ;;  %1784 = vmatpush1.bf16.msra.mxu1 %v1296_v28  ;;  %v965_v27 = vunpack.c.h.s8.bf16 %v693_v16  ;;  %v707_v28 = vld [vmem:[%s7406_s2 + $0xc8] sm:$0xff] }
 0x250   : > { %1699 = vmatprep.subr.bf16.mxu0 %v1311_v30  ;;  %1785 = vmatprep.subr.bf16.mxu1 %v1313_v31  ;;  %v709_v30 = vld [vmem:[%s7406_s2 + $0xd8] sm:$0xff]  ;;  %v962_v31 = vunpack.c.h.s8.bf16 %v690_v22  ;;  %v979_v33 = vunpack.c.l.s8.bf16 %v707_v28  ;;  %v995_v39 = vunpack.c.h.s8.bf16 %v707_v28 }
 0x253   : > { %1700 = vmatpush1.bf16.msra.mxu0 %v1310_v34  ;;  %1786 = vmatpush1.bf16.msra.mxu1 %v1312_v35  ;;  %v981_v34 = vunpack.c.l.s8.bf16 %v709_v30  ;;  %v706_v35 = vld [vmem:[%s7406_s2 + $0xc0] sm:$0xff] }
 0x254   : > { %1701 = vmatprep.subr.bf16.mxu0 %v1327_v36  ;;  %1787 = vmatprep.subr.bf16.mxu1 %v1329_v37  ;;  %v708_v36 = vld [vmem:[%s7406_s2 + $0xd0] sm:$0xff] }
 0x255   : > { %v7611_v37 = vld [vmem:[%s7404_s30 + $0x4] ss:$16 sps:$4 sm:$0xff]   ;;  %v980_v38 = vunpack.c.l.s8.bf16 %v708_v36  ;;  %v996_v43 = vunpack.c.h.s8.bf16 %v708_v36 }
 0x257   : > { %1702 = vmatpush1.bf16.msra.mxu0 %v1326_v29  ;;  %1788 = vmatpush1.bf16.msra.mxu1 %v1328_v40  ;;  %v997_v29 = vunpack.c.h.s8.bf16 %v709_v30  ;;  %v723_v40 = vld [vmem:[%s7406_s2 + $0x148] sm:$0xff] }
 0x258   : > { %1703 = vmatprep.subr.bf16.mxu0 %v1343_v41  ;;  %1789 = vmatprep.subr.bf16.mxu1 %v1345_v42  ;;  %v725_v41 = vld [vmem:[%s7406_s2 + $0x158] sm:$0xff]  ;;  %v994_v42 = vunpack.c.h.s8.bf16 %v706_v35  ;;  %v1011_v44 = vunpack.c.l.s8.bf16 %v723_v40  ;;  %v1027_v51 = vunpack.c.h.s8.bf16 %v723_v40 }
 0x25b   : > { %1704 = vmatpush1.bf16.msra.mxu0 %v1342_v46  ;;  %1790 = vmatpush1.bf16.msra.mxu1 %v1344_v47  ;;  %v1013_v46 = vunpack.c.l.s8.bf16 %v725_v41  ;;  %v722_v47 = vld [vmem:[%s7406_s2 + $0x140] sm:$0xff] }
 0x25c   : > { %1705 = vmatprep.subr.bf16.mxu0 %v1359_v48  ;;  %1791 = vmatprep.subr.bf16.mxu1 %v1361_v49  ;;  %v724_v48 = vld [vmem:[%s7406_s2 + $0x150] sm:$0xff]  ;;  %v1010_v49 = vunpack.c.l.s8.bf16 %v722_v47 }
 0x25d   : > { %v1012_v50 = vunpack.c.l.s8.bf16 %v724_v48  ;;  %v1028_v57 = vunpack.c.h.s8.bf16 %v724_v48 }
 0x25f   : > { %1706 = vmatpush1.bf16.msra.mxu0 %v1358_v53  ;;  %1792 = vmatpush1.bf16.msra.mxu1 %v1360_v54  ;;  %v1029_v53 = vunpack.c.h.s8.bf16 %v725_v41  ;;  %v739_v54 = vld [vmem:[%s7406_s2 + $0x1c8] sm:$0xff] }
 0x260   : > { %1707 = vmatprep.subr.bf16.mxu0 %v1375_v55  ;;  %1793 = vmatprep.subr.bf16.mxu1 %v1377_v56  ;;  %v741_v55 = vld [vmem:[%s7406_s2 + $0x1d8] sm:$0xff]  ;;  %v1026_v56 = vunpack.c.h.s8.bf16 %v722_v47  ;;  %v1043_v58 = vunpack.c.l.s8.bf16 %v739_v54  ;;  %v1059_v0 = vunpack.c.h.s8.bf16 %v739_v54 }
 0x263   : > { %1708 = vmatpush1.bf16.msra.mxu0 %v1374_v59  ;;  %1794 = vmatpush1.bf16.msra.mxu1 %v1376_v60  ;;  %v1045_v59 = vunpack.c.l.s8.bf16 %v741_v55  ;;  %v738_v60 = vld [vmem:[%s7406_s2 + $0x1c0] sm:$0xff] }
 0x264   : > { %1709 = vmatprep.subr.bf16.mxu0 %v1391_v61  ;;  %1795 = vmatprep.subr.bf16.mxu1 %v1393_v62  ;;  %v740_v61 = vld [vmem:[%s7406_s2 + $0x1d0] sm:$0xff]  ;;  %v1042_v62 = vunpack.c.l.s8.bf16 %v738_v60 }
 0x265   : > { %v1044_v63 = vunpack.c.l.s8.bf16 %v740_v61  ;;  %v1060_v45 = vunpack.c.h.s8.bf16 %v740_v61 }
 0x267   : > { %1710 = vmatpush1.bf16.msra.mxu0 %v1390_v1  ;;  %1796 = vmatpush1.bf16.msra.mxu1 %v1392_v2  ;;  %v1061_v1 = vunpack.c.h.s8.bf16 %v741_v55  ;;  %v755_v2 = vld [vmem:[%s7406_s2 + $0x248] sm:$0xff] }
 0x268   : > { %1711 = vmatprep.subr.bf16.mxu0 %v1407_v3  ;;  %1797 = vmatprep.subr.bf16.mxu1 %v1409_v4  ;;  %v757_v3 = vld [vmem:[%s7406_s2 + $0x258] sm:$0xff]  ;;  %v1058_v4 = vunpack.c.h.s8.bf16 %v738_v60  ;;  %v1075_v5 = vunpack.c.l.s8.bf16 %v755_v2  ;;  %v1091_v52 = vunpack.c.h.s8.bf16 %v755_v2 }
 0x26b   : > { %1712 = vmatpush1.bf16.msra.mxu0 %v1406_v6  ;;  %1798 = vmatpush1.bf16.msra.mxu1 %v1408_v7  ;;  %v1077_v6 = vunpack.c.l.s8.bf16 %v757_v3  ;;  %v754_v7 = vld [vmem:[%s7406_s2 + $0x240] sm:$0xff] }
 0x26c   : > { %1713 = vmatprep.subr.bf16.mxu0 %v1423_v8  ;;  %1799 = vmatprep.subr.bf16.mxu1 %v1425_v9  ;;  %v756_v8 = vld [vmem:[%s7406_s2 + $0x250] sm:$0xff]  ;;  %v1074_v9 = vunpack.c.l.s8.bf16 %v754_v7 }
 0x26d   : > { %v1076_v10 = vunpack.c.l.s8.bf16 %v756_v8  ;;  %v1092_v15 = vunpack.c.h.s8.bf16 %v756_v8 }
 0x26f   : > { %1714 = vmatpush1.bf16.msra.mxu0 %v1422_v11  ;;  %1800 = vmatpush1.bf16.msra.mxu1 %v1424_v12  ;;  %v1093_v11 = vunpack.c.h.s8.bf16 %v757_v3  ;;  %v771_v12 = vld [vmem:[%s7406_s2 + $0x2c8] sm:$0xff] }
 0x270   : > { %1715 = vmatprep.subr.bf16.mxu0 %v1439_v13  ;;  %1801 = vmatprep.subr.bf16.mxu1 %v1441_v14  ;;  %v773_v13 = vld [vmem:[%s7406_s2 + $0x2d8] sm:$0xff]  ;;  %v1090_v14 = vunpack.c.h.s8.bf16 %v754_v7  ;;  %v1107_v16 = vunpack.c.l.s8.bf16 %v771_v12  ;;  %v1123_v23 = vunpack.c.h.s8.bf16 %v771_v12 }
 0x271   : > { %v7653_v7 = vld [vmem:[%s7404_s30 + $0xc] ss:$16 sps:$4 sm:$0xff]  }
 0x272   : > { %v853_v12 = vld [vmem:[%s7406_s2 + $0x558] sm:$0xff] }
 0x273   : > { %1716 = vmatpush1.bf16.msra.mxu0 %v1438_v17  ;;  %1802 = vmatpush1.bf16.msra.mxu1 %v1440_v19  ;;  %v1109_v17 = vunpack.c.l.s8.bf16 %v773_v13  ;;  %v770_v19 = vld [vmem:[%s7406_s2 + $0x2c0] sm:$0xff] }
 0x274   : > { %1814 = vmatprep.subr.bf16.mxu0 %v947_v20  ;;  %1900 = vmatprep.subr.bf16.mxu1 %v949_v21  ;;  %v772_v20 = vld [vmem:[%s7406_s2 + $0x2d0] sm:$0xff]  ;;  %v1106_v21 = vunpack.c.l.s8.bf16 %v770_v19 }
 0x275   : > { %v1108_v22 = vunpack.c.l.s8.bf16 %v772_v20  ;;  %v1124_v28 = vunpack.c.h.s8.bf16 %v772_v20 }
 0x276   : > { %1718 = vmatmul.mubr.bf16.vlgmr.msra.gmra.mrb[4].mxu0 %v7530_v18  ;;  %1804 = vmatmul.mubr.bf16.vlgmr.msra.gmra.mrb[4].mxu1 %v7530_v18  ;;  %v978_v18 = vunpack.c.l.s8.bf16 %v706_v35 }
 0x277   : > { %1815 = vmatpush1.bf16.msra.mxu0 %v946_v24  ;;  %1901 = vmatpush1.bf16.msra.mxu1 %v948_v25  ;;  %v1125_v24 = vunpack.c.h.s8.bf16 %v773_v13  ;;  %v787_v25 = vld [vmem:[%s7406_s2 + $0x348] sm:$0xff] }
 0x278   : > { %1816 = vmatprep.subr.bf16.mxu0 %v963_v26  ;;  %1902 = vmatprep.subr.bf16.mxu1 %v965_v27  ;;  %v789_v26 = vld [vmem:[%s7406_s2 + $0x358] sm:$0xff]  ;;  %v1122_v27 = vunpack.c.h.s8.bf16 %v770_v19  ;;  %v1139_v30 = vunpack.c.l.s8.bf16 %v787_v25  ;;  %v1155_v36 = vunpack.c.h.s8.bf16 %v787_v25  ;;  %v852_v19 = vld [vmem:[%s7406_s2 + $0x550] sm:$0xff] }
 0x279   : > { %1846 = vmatprep.mubr.bf16.mxu0 %v7611_v37  ;;  %1932 = vmatprep.mubr.bf16.mxu1 %v7611_v37  ;;  %v869_v25 = vld [vmem:[%s7406_s2 + $0x5d8] sm:$0xff] }
 0x27b   : > { %1817 = vmatpush1.bf16.msra.mxu0 %v962_v31  ;;  %1903 = vmatpush1.bf16.msra.mxu1 %v964_v32  ;;  %v1141_v31 = vunpack.c.l.s8.bf16 %v789_v26  ;;  %v786_v32 = vld [vmem:[%s7406_s2 + $0x340] sm:$0xff] }
 0x27c   : > { %1818 = vmatprep.subr.bf16.mxu0 %v979_v33  ;;  %1904 = vmatprep.subr.bf16.mxu1 %v981_v34  ;;  %v788_v33 = vld [vmem:[%s7406_s2 + $0x350] sm:$0xff]  ;;  %v1138_v34 = vunpack.c.l.s8.bf16 %v786_v32 }
 0x27d   : > { %v1140_v35 = vunpack.c.l.s8.bf16 %v788_v33  ;;  %v1156_v40 = vunpack.c.h.s8.bf16 %v788_v33 }
 0x27f   : > { %1819 = vmatpush1.bf16.msra.mxu0 %v978_v18  ;;  %1905 = vmatpush1.bf16.msra.mxu1 %v980_v38  ;;  %v1157_v18 = vunpack.c.h.s8.bf16 %v789_v26  ;;  %v803_v38 = vld [vmem:[%s7406_s2 + $0x3c8] sm:$0xff]  ;;  %v646_v26 = vld [vmem:[#allocation4] sm:$0xff] }
 0x280   : > { %1820 = vmatprep.subr.bf16.mxu0 %v995_v39  ;;  %1906 = vmatprep.subr.bf16.mxu1 %v997_v29  ;;  %v805_v39 = vld [vmem:[%s7406_s2 + $0x3d8] sm:$0xff]  ;;  %v1154_v29 = vunpack.c.h.s8.bf16 %v786_v32  ;;  %v1171_v41 = vunpack.c.l.s8.bf16 %v803_v38  ;;  %v1187_v48 = vunpack.c.h.s8.bf16 %v803_v38 }
 0x281   : > { %v649_v32 = vld [vmem:[#allocation4 + $0x18] sm:$0xff] }
 0x283   : > { %1821 = vmatpush1.bf16.msra.mxu0 %v994_v42  ;;  %1907 = vmatpush1.bf16.msra.mxu1 %v996_v43  ;;  %v1173_v42 = vunpack.c.l.s8.bf16 %v805_v39  ;;  %v802_v43 = vld [vmem:[%s7406_s2 + $0x3c0] sm:$0xff] }
 0x284   : > { %1822 = vmatprep.subr.bf16.mxu0 %v1011_v44  ;;  %1908 = vmatprep.subr.bf16.mxu1 %v1013_v46  ;;  %v804_v44 = vld [vmem:[%s7406_s2 + $0x3d0] sm:$0xff]  ;;  %v1170_v46 = vunpack.c.l.s8.bf16 %v802_v43 }
 0x285   : > { %v1172_v47 = vunpack.c.l.s8.bf16 %v804_v44  ;;  %v1188_v54 = vunpack.c.h.s8.bf16 %v804_v44  ;;  %v663_v44 = vld [vmem:[#allocation4 + $0x88] sm:$0xff] }
 0x287   : > { %1823 = vmatpush1.bf16.msra.mxu0 %v1010_v49  ;;  %1909 = vmatpush1.bf16.msra.mxu1 %v1012_v50  ;;  %v1189_v49 = vunpack.c.h.s8.bf16 %v805_v39  ;;  %v819_v50 = vld [vmem:[%s7406_s2 + $0x448] sm:$0xff]  ;;  %v662_v39 = vld [vmem:[#allocation4 + $0x80] sm:$0xff] }
 0x288   : > { %1824 = vmatprep.subr.bf16.mxu0 %v1027_v51  ;;  %1910 = vmatprep.subr.bf16.mxu1 %v1029_v53  ;;  %v821_v51 = vld [vmem:[%s7406_s2 + $0x458] sm:$0xff]  ;;  %v1186_v53 = vunpack.c.h.s8.bf16 %v802_v43  ;;  %v1203_v55 = vunpack.c.l.s8.bf16 %v819_v50  ;;  %v1219_v61 = vunpack.c.h.s8.bf16 %v819_v50 }
 0x28b   : > { %1825 = vmatpush1.bf16.msra.mxu0 %v1026_v56  ;;  %1911 = vmatpush1.bf16.msra.mxu1 %v1028_v57  ;;  %v1205_v56 = vunpack.c.l.s8.bf16 %v821_v51  ;;  %v818_v57 = vld [vmem:[%s7406_s2 + $0x440] sm:$0xff] }
 0x28c   : > { %1826 = vmatprep.subr.bf16.mxu0 %v1043_v58  ;;  %1912 = vmatprep.subr.bf16.mxu1 %v1045_v59  ;;  %v820_v58 = vld [vmem:[%s7406_s2 + $0x450] sm:$0xff]  ;;  %v1202_v59 = vunpack.c.l.s8.bf16 %v818_v57  ;;  %v1218_v2 = vunpack.c.h.s8.bf16 %v818_v57 }
 0x28d   : > { %v1204_v60 = vunpack.c.l.s8.bf16 %v820_v58  ;;  %v1220_v3 = vunpack.c.h.s8.bf16 %v820_v58 }
 0x28f   : > { %1827 = vmatpush1.bf16.msra.mxu0 %v1042_v62  ;;  %1913 = vmatpush1.bf16.msra.mxu1 %v1044_v63  ;;  %v1221_v62 = vunpack.c.h.s8.bf16 %v821_v51  ;;  %v835_v63 = vld [vmem:[%s7406_s2 + $0x4c8] sm:$0xff] }
 0x290   : > { %1828 = vmatprep.subr.bf16.mxu0 %v1059_v0  ;;  %1914 = vmatprep.subr.bf16.mxu1 %v1061_v1  ;;  %v837_v0 = vld [vmem:[%s7406_s2 + $0x4d8] sm:$0xff]  ;;  %v7646_v1 = vld [vmem:[%s7404_s30] ss:$16 sps:$4 sm:$0xff]  }
 0x293   : > { %1829 = vmatpush1.bf16.msra.mxu0 %v1058_v4  ;;  %1915 = vmatpush1.bf16.msra.mxu1 %v1060_v45  ;;  %v1235_v4 = vunpack.c.l.s8.bf16 %v835_v63  ;;  %v1237_v45 = vunpack.c.l.s8.bf16 %v837_v0 }
 0x294   : > { %1830 = vmatprep.subr.bf16.mxu0 %v1075_v5  ;;  %1916 = vmatprep.subr.bf16.mxu1 %v1077_v6  ;;  %v834_v5 = vld [vmem:[%s7406_s2 + $0x4c0] sm:$0xff]  ;;  %v836_v6 = vld [vmem:[%s7406_s2 + $0x4d0] sm:$0xff] }
 0x295   : > { %v1234_v8 = vunpack.c.l.s8.bf16 %v834_v5  ;;  %v1250_v13 = vunpack.c.h.s8.bf16 %v834_v5  ;;  %v884_v5 = vld [vmem:[%s7406_s2 + $0x650] sm:$0xff] }
 0x297   : > { %1831 = vmatpush1.bf16.msra.mxu0 %v1074_v9  ;;  %1917 = vmatpush1.bf16.msra.mxu1 %v1076_v10  ;;  %v1236_v9 = vunpack.c.l.s8.bf16 %v836_v6  ;;  %v1251_v10 = vunpack.c.h.s8.bf16 %v835_v63  ;;  %v885_v63 = vld [vmem:[%s7406_s2 + $0x658] sm:$0xff] }
 0x298   : > { %1832 = vmatprep.subr.bf16.mxu0 %v1091_v52  ;;  %1918 = vmatprep.subr.bf16.mxu1 %v1093_v11  ;;  %v1253_v52 = vunpack.c.h.s8.bf16 %v837_v0  ;;  %v851_v11 = vld [vmem:[%s7406_s2 + $0x548] sm:$0xff] }
 0x29b   : > { %1833 = vmatpush1.bf16.msra.mxu0 %v1090_v14  ;;  %1919 = vmatpush1.bf16.msra.mxu1 %v1092_v15  ;;  %v1252_v14 = vunpack.c.h.s8.bf16 %v836_v6  ;;  %v1267_v15 = vunpack.c.l.s8.bf16 %v851_v11 }
 0x29c   : > { %1834 = vmatprep.subr.bf16.mxu0 %v1107_v16  ;;  %1920 = vmatprep.subr.bf16.mxu1 %v1109_v17  ;;  %v1269_v16 = vunpack.c.l.s8.bf16 %v853_v12  ;;  %v850_v17 = vld [vmem:[%s7406_s2 + $0x540] sm:$0xff] }
 0x29d   : > { %v1266_v20 = vunpack.c.l.s8.bf16 %v850_v17 }
 0x29f   : > { %1835 = vmatpush1.bf16.msra.mxu0 %v1106_v21  ;;  %1921 = vmatpush1.bf16.msra.mxu1 %v1108_v22  ;;  %v1268_v21 = vunpack.c.l.s8.bf16 %v852_v19  ;;  %v1283_v22 = vunpack.c.h.s8.bf16 %v851_v11  ;;  %v901_v11 = vld [vmem:[%s7406_s2 + $0x6d8] sm:$0xff] }
 0x2a0   : > { %1836 = vmatprep.subr.bf16.mxu0 %v1123_v23  ;;  %1922 = vmatprep.subr.bf16.mxu1 %v1125_v24  ;;  %v1285_v23 = vunpack.c.h.s8.bf16 %v853_v12  ;;  %v867_v24 = vld [vmem:[%s7406_s2 + $0x5c8] sm:$0xff] }
 0x2a1   : > { %v1299_v33 = vunpack.c.l.s8.bf16 %v867_v24  ;;  %v1315_v58 = vunpack.c.h.s8.bf16 %v867_v24  ;;  %v917_v24 = vld [vmem:[%s7406_s2 + $0x758] sm:$0xff] }
 0x2a3   : > { %1837 = vmatpush1.bf16.msra.mxu0 %v1122_v27  ;;  %1923 = vmatpush1.bf16.msra.mxu1 %v1124_v28  ;;  %v648_v27 = vld [vmem:[#allocation4 + $0x10] sm:$0xff]  ;;  %v647_v28 = vld [vmem:[#allocation4 + $0x8] sm:$0xff] }
 0x2a4   : > { %1838 = vmatprep.subr.bf16.mxu0 %v1139_v30  ;;  %1924 = vmatprep.subr.bf16.mxu1 %v1141_v31  ;;  %v1282_v30 = vunpack.c.h.s8.bf16 %v850_v17  ;;  %v1284_v31 = vunpack.c.h.s8.bf16 %v852_v19  ;;  %v900_v17 = vld [vmem:[%s7406_s2 + $0x6d0] sm:$0xff] }
 0x2a7   : > { %1839 = vmatpush1.bf16.msra.mxu0 %v1138_v34  ;;  %1925 = vmatpush1.bf16.msra.mxu1 %v1140_v35  ;;  %v1301_v34 = vunpack.c.l.s8.bf16 %v869_v25  ;;  %v866_v35 = vld [vmem:[%s7406_s2 + $0x5c0] sm:$0xff] }
 0x2a8   : > { %1840 = vmatprep.subr.bf16.mxu0 %v1155_v36  ;;  %1926 = vmatprep.subr.bf16.mxu1 %v1157_v18  ;;  %v868_v36 = vld [vmem:[%s7406_s2 + $0x5d0] sm:$0xff]  ;;  %v1298_v51 = vunpack.c.l.s8.bf16 %v866_v35  ;;  %v1314_v0 = vunpack.c.h.s8.bf16 %v866_v35  ;;  %v1413_v35 = vunpack.c.h.s8.bf16 %v917_v24 }
 0x2ab   : > { %1841 = vmatpush1.bf16.msra.mxu0 %v1154_v29  ;;  %1927 = vmatpush1.bf16.msra.mxu1 %v1156_v40  ;;  %v664_v29 = vld [vmem:[#allocation4 + $0x90] sm:$0xff] }
 0x2ac   : > { %1842 = vmatprep.subr.bf16.mxu0 %v1171_v41  ;;  %1928 = vmatprep.subr.bf16.mxu1 %v1173_v42 }
 0x2af   : > { %1843 = vmatpush1.bf16.msra.mxu0 %v1170_v46  ;;  %1929 = vmatpush1.bf16.msra.mxu1 %v1172_v47  ;;  %v665_v46 = vld [vmem:[#allocation4 + $0x98] sm:$0xff] }
 0x2b0   : > { %1844 = vmatprep.subr.bf16.mxu0 %v1187_v48  ;;  %1930 = vmatprep.subr.bf16.mxu1 %v1189_v49 }
 0x2b3   : > { %1845 = vmatpush1.bf16.msra.mxu0 %v1186_v53  ;;  %1931 = vmatpush1.bf16.msra.mxu1 %v1188_v54  ;;  %v1300_v53 = vunpack.c.l.s8.bf16 %v868_v36 }
 0x2b4   : > { %1857 = vmatprep.subr.bf16.mxu0 %v1203_v55  ;;  %1943 = vmatprep.subr.bf16.mxu1 %v1205_v56 }
 0x2b6   : > { %1847 = vmatmul.mubr.bf16.vlgmr.msra.gmra.mrb[8].mxu0 %v7646_v1  ;;  %1933 = vmatmul.mubr.bf16.vlgmr.msra.gmra.mrb[8].mxu1 %v7646_v1 }
 0x2b7   : > { %1858 = vmatpush1.bf16.msra.mxu0 %v1202_v59  ;;  %1944 = vmatpush1.bf16.msra.mxu1 %v1204_v60  ;;  %v1317_v59 = vunpack.c.h.s8.bf16 %v869_v25 }
 0x2b8   : > { %1859 = vmatprep.subr.bf16.mxu0 %v1219_v61  ;;  %1945 = vmatprep.subr.bf16.mxu1 %v1221_v62  ;;  %v883_v62 = vld [vmem:[%s7406_s2 + $0x648] sm:$0xff] }
 0x2b9   : > { %1889 = vmatprep.mubr.bf16.mxu0 %v7653_v7  ;;  %1975 = vmatprep.mubr.bf16.mxu1 %v7653_v7 }
 0x2bb   : > { %1860 = vmatpush1.bf16.msra.mxu0 %v1218_v2  ;;  %1946 = vmatpush1.bf16.msra.mxu1 %v1220_v3  ;;  %v1316_v2 = vunpack.c.h.s8.bf16 %v868_v36  ;;  %v1331_v3 = vunpack.c.l.s8.bf16 %v883_v62  ;;  %v931_v36 = vld [vmem:[%s7406_s2 + $0x7c8] sm:$0xff] }
 0x2bc   : > { %1861 = vmatprep.subr.bf16.mxu0 %v1235_v4  ;;  %1947 = vmatprep.subr.bf16.mxu1 %v1237_v45  ;;  %v1333_v4 = vunpack.c.l.s8.bf16 %v885_v63  ;;  %v882_v45 = vld [vmem:[%s7406_s2 + $0x640] sm:$0xff] }
 0x2bd   : > { %v1330_v6 = vunpack.c.l.s8.bf16 %v882_v45  ;;  %v1346_v12 = vunpack.c.h.s8.bf16 %v882_v45  ;;  %v710_v45 = vld [vmem:[%s7406_s2 + $0xe0] sm:$0xff] }
 0x2bf   : > { %1862 = vmatpush1.bf16.msra.mxu0 %v1234_v8  ;;  %1948 = vmatpush1.bf16.msra.mxu1 %v1236_v9  ;;  %v1332_v8 = vunpack.c.l.s8.bf16 %v884_v5  ;;  %v1347_v9 = vunpack.c.h.s8.bf16 %v883_v62  ;;  %v713_v62 = vld [vmem:[%s7406_s2 + $0xf8] sm:$0xff] }
 0x2c0   : > { %1863 = vmatprep.subr.bf16.mxu0 %v1251_v10  ;;  %1949 = vmatprep.subr.bf16.mxu1 %v1253_v52  ;;  %v1349_v10 = vunpack.c.h.s8.bf16 %v885_v63  ;;  %v899_v52 = vld [vmem:[%s7406_s2 + $0x6c8] sm:$0xff] }
 0x2c1   : > { %v7688_v63 = vld [vmem:[%s7404_s30 + $0x8] ss:$16 sps:$4 sm:$0xff]  }
 0x2c3   : > { %1864 = vmatpush1.bf16.msra.mxu0 %v1250_v13  ;;  %1950 = vmatpush1.bf16.msra.mxu1 %v1252_v14  ;;  %v1348_v13 = vunpack.c.h.s8.bf16 %v884_v5  ;;  %v1363_v14 = vunpack.c.l.s8.bf16 %v899_v52  ;;  %v712_v5 = vld [vmem:[%s7406_s2 + $0xf0] sm:$0xff] }
 0x2c4   : > { %1865 = vmatprep.subr.bf16.mxu0 %v1267_v15  ;;  %1951 = vmatprep.subr.bf16.mxu1 %v1269_v16  ;;  %v1365_v15 = vunpack.c.l.s8.bf16 %v901_v11  ;;  %v898_v16 = vld [vmem:[%s7406_s2 + $0x6c0] sm:$0xff] }
 0x2c5   : > { %v1362_v19 = vunpack.c.l.s8.bf16 %v898_v16  ;;  %v1378_v25 = vunpack.c.h.s8.bf16 %v898_v16  ;;  %v728_v16 = vld [vmem:[%s7406_s2 + $0x170] sm:$0xff] }
 0x2c7   : > { %1866 = vmatpush1.bf16.msra.mxu0 %v1266_v20  ;;  %1952 = vmatpush1.bf16.msra.mxu1 %v1268_v21  ;;  %v1364_v20 = vunpack.c.l.s8.bf16 %v900_v17  ;;  %v1379_v21 = vunpack.c.h.s8.bf16 %v899_v52  ;;  %v727_v52 = vld [vmem:[%s7406_s2 + $0x168] sm:$0xff] }
 0x2c8   : > { %1867 = vmatprep.subr.bf16.mxu0 %v1283_v22  ;;  %1953 = vmatprep.subr.bf16.mxu1 %v1285_v23  ;;  %v1381_v22 = vunpack.c.h.s8.bf16 %v901_v11  ;;  %v915_v23 = vld [vmem:[%s7406_s2 + $0x748] sm:$0xff]  ;;  %v729_v11 = vld [vmem:[%s7406_s2 + $0x178] sm:$0xff] }
 0x2c9   : > { %v1547_v18 = vpop.f32.mrb[0].mxu0  ;;  %v1633_v38 = vpop.f32.mrb[0].mxu1 }
 0x2ca   : > { %v2158_v40 = vadd.f32 %v1547_v18, %v646_v26  ;;  %v2160_v41 = vadd.f32 %v1633_v38, %v648_v27  ;;  %v1549_v42 = vpop.f32.mrb[1].mxu0  ;;  %v1635_v43 = vpop.f32.mrb[1].mxu1  ;;  %v1380_v26 = vunpack.c.h.s8.bf16 %v900_v17  ;;  %v1395_v27 = vunpack.c.l.s8.bf16 %v915_v23  ;;  %v933_v18 = vld [vmem:[%s7406_s2 + $0x7d8] sm:$0xff] }
 0x2cb   : > { %v2159_v47 = vadd.f32 %v1549_v42, %v647_v28  ;;  %v2161_v48 = vadd.f32 %v1635_v43, %v649_v32  ;;  %v1551_v49 = vpop.f32.mrb[2].mxu0  ;;  %v1637_v50 = vpop.f32.mrb[2].mxu1  ;;  %1868 = vmatpush1.bf16.msra.mxu0 %v1282_v30  ;;  %1954 = vmatpush1.bf16.msra.mxu1 %v1284_v31  ;;  %v1397_v28 = vunpack.c.l.s8.bf16 %v917_v24  ;;  %v914_v30 = vld [vmem:[%s7406_s2 + $0x740] sm:$0xff]  ;;  %v916_v31 = vld [vmem:[%s7406_s2 + $0x750] sm:$0xff] }
 0x2cc   : > { %2190 = vst [vmem:[#allocation4] sm:$0xff] %v2158_v40  ;;  %2192 = vst [vmem:[#allocation4 + $0x10] sm:$0xff] %v2160_v41  ;;  %v2174_v54 = vadd.f32 %v1551_v49, %v662_v39  ;;  %v2176_v55 = vadd.f32 %v1637_v50, %v664_v29  ;;  %v1553_v56 = vpop.f32.mrb[3].mxu0  ;;  %v1639_v57 = vpop.f32.mrb[3].mxu1  ;;  %1869 = vmatprep.subr.bf16.mxu0 %v1299_v33  ;;  %1955 = vmatprep.subr.bf16.mxu1 %v1301_v34  ;;  %v1394_v32 = vunpack.c.l.s8.bf16 %v914_v30  ;;  %v930_v41 = vld [vmem:[%s7406_s2 + $0x7c0] sm:$0xff]  ;;  %v932_v42 = vld [vmem:[%s7406_s2 + $0x7d0] sm:$0xff] }
 0x2cd   : > { %2191 = vst [vmem:[#allocation4 + $0x8] sm:$0xff] %v2159_v47  ;;  %2193 = vst [vmem:[#allocation4 + $0x18] sm:$0xff] %v2161_v48  ;;  %v2175_v60 = vadd.f32 %v1553_v56, %v663_v44  ;;  %v2177_v61 = vadd.f32 %v1639_v57, %v665_v46  ;;  %v1396_v33 = vunpack.c.l.s8.bf16 %v916_v31  ;;  %v1411_v34 = vunpack.c.h.s8.bf16 %v915_v23  ;;  %v695_v48 = vld [vmem:[%s7406_s2 + $0x68] sm:$0xff]  ;;  %v697_v49 = vld [vmem:[%s7406_s2 + $0x78] sm:$0xff] }
 0x2ce   : > { %2206 = vst [vmem:[#allocation4 + $0x80] sm:$0xff] %v2174_v54  ;;  %2208 = vst [vmem:[#allocation4 + $0x90] sm:$0xff] %v2176_v55  ;;  %v1410_v38 = vunpack.c.h.s8.bf16 %v914_v30  ;;  %v1412_v39 = vunpack.c.h.s8.bf16 %v916_v31  ;;  %v1427_v29 = vunpack.c.l.s8.bf16 %v931_v36  ;;  %v1429_v40 = vunpack.c.l.s8.bf16 %v933_v18  ;;  %v694_v55 = vld [vmem:[%s7406_s2 + $0x60] sm:$0xff]  ;;  %v696_v56 = vld [vmem:[%s7406_s2 + $0x70] sm:$0xff] }
 0x2cf   : > { %2207 = vst [vmem:[#allocation4 + $0x88] sm:$0xff] %v2175_v60  ;;  %2209 = vst [vmem:[#allocation4 + $0x98] sm:$0xff] %v2177_v61  ;;  %1870 = vmatpush1.bf16.msra.mxu0 %v1298_v51  ;;  %1956 = vmatpush1.bf16.msra.mxu1 %v1300_v53  ;;  %v1426_v43 = vunpack.c.l.s8.bf16 %v930_v41  ;;  %v1428_v44 = vunpack.c.l.s8.bf16 %v932_v42  ;;  %v1443_v46 = vunpack.c.h.s8.bf16 %v931_v36  ;;  %v1445_v47 = vunpack.c.h.s8.bf16 %v933_v18  ;;  %v711_v61 = vld [vmem:[%s7406_s2 + $0xe8] sm:$0xff]  ;;  %v745_v23 = vld [vmem:[%s7406_s2 + $0x1f8] sm:$0xff] }
 0x2d0   : > { %1871 = vmatprep.subr.bf16.mxu0 %v1315_v58  ;;  %1957 = vmatprep.subr.bf16.mxu1 %v1317_v59  ;;  %v1442_v50 = vunpack.c.h.s8.bf16 %v930_v41  ;;  %v1444_v51 = vunpack.c.h.s8.bf16 %v932_v42  ;;  %v951_v53 = vunpack.c.l.s8.bf16 %v695_v48  ;;  %v953_v54 = vunpack.c.l.s8.bf16 %v697_v49  ;;  %v744_v30 = vld [vmem:[%s7406_s2 + $0x1f0] sm:$0xff]  ;;  %v761_v36 = vld [vmem:[%s7406_s2 + $0x278] sm:$0xff] }
 0x2d1   : > { %v950_v57 = vunpack.c.l.s8.bf16 %v694_v55  ;;  %v952_v58 = vunpack.c.l.s8.bf16 %v696_v56  ;;  %v967_v59 = vunpack.c.h.s8.bf16 %v695_v48  ;;  %v969_v60 = vunpack.c.h.s8.bf16 %v697_v49  ;;  %v760_v41 = vld [vmem:[%s7406_s2 + $0x270] sm:$0xff]  ;;  %v777_v48 = vld [vmem:[%s7406_s2 + $0x2f8] sm:$0xff] }
 0x2d3   : > { %1872 = vmatpush1.bf16.msra.mxu0 %v1314_v0  ;;  %1958 = vmatpush1.bf16.msra.mxu1 %v1316_v2  ;;  %v966_v0 = vunpack.c.h.s8.bf16 %v694_v55  ;;  %v968_v2 = vunpack.c.h.s8.bf16 %v696_v56  ;;  %v776_v55 = vld [vmem:[%s7406_s2 + $0x2f0] sm:$0xff] }
 0x2d4   : > { %1873 = vmatprep.subr.bf16.mxu0 %v1331_v3  ;;  %1959 = vmatprep.subr.bf16.mxu1 %v1333_v4  ;;  %v983_v3 = vunpack.c.l.s8.bf16 %v711_v61  ;;  %v985_v4 = vunpack.c.l.s8.bf16 %v713_v62 }
 0x2d7   : > { %1874 = vmatpush1.bf16.msra.mxu0 %v1330_v6  ;;  %1960 = vmatpush1.bf16.msra.mxu1 %v1332_v8  ;;  %v982_v6 = vunpack.c.l.s8.bf16 %v710_v45  ;;  %v984_v8 = vunpack.c.l.s8.bf16 %v712_v5 }
 0x2d8   : > { %1875 = vmatprep.subr.bf16.mxu0 %v1347_v9  ;;  %1961 = vmatprep.subr.bf16.mxu1 %v1349_v10  ;;  %v999_v9 = vunpack.c.h.s8.bf16 %v711_v61  ;;  %v1001_v10 = vunpack.c.h.s8.bf16 %v713_v62  ;;  %v793_v61 = vld [vmem:[%s7406_s2 + $0x378] sm:$0xff] }
 0x2db   : > { %1876 = vmatpush1.bf16.msra.mxu0 %v1346_v12  ;;  %1962 = vmatpush1.bf16.msra.mxu1 %v1348_v13  ;;  %v998_v12 = vunpack.c.h.s8.bf16 %v710_v45  ;;  %v1000_v13 = vunpack.c.h.s8.bf16 %v712_v5  ;;  %v792_v45 = vld [vmem:[%s7406_s2 + $0x370] sm:$0xff] }
 0x2dc   : > { %1877 = vmatprep.subr.bf16.mxu0 %v1363_v14  ;;  %1963 = vmatprep.subr.bf16.mxu1 %v1365_v15  ;;  %v1017_v14 = vunpack.c.l.s8.bf16 %v729_v11  ;;  %v726_v15 = vld [vmem:[%s7406_s2 + $0x160] sm:$0xff] }
 0x2dd   : > { %v1014_v17 = vunpack.c.l.s8.bf16 %v726_v15  ;;  %v1030_v24 = vunpack.c.h.s8.bf16 %v726_v15  ;;  %v808_v15 = vld [vmem:[%s7406_s2 + $0x3f0] sm:$0xff] }
 0x2df   : > { %1878 = vmatpush1.bf16.msra.mxu0 %v1362_v19  ;;  %1964 = vmatpush1.bf16.msra.mxu1 %v1364_v20  ;;  %v1016_v19 = vunpack.c.l.s8.bf16 %v728_v16  ;;  %v1031_v20 = vunpack.c.h.s8.bf16 %v727_v52 }
 0x2e0   : > { %1879 = vmatprep.subr.bf16.mxu0 %v1379_v21  ;;  %1965 = vmatprep.subr.bf16.mxu1 %v1381_v22  ;;  %v1033_v21 = vunpack.c.h.s8.bf16 %v729_v11  ;;  %v743_v22 = vld [vmem:[%s7406_s2 + $0x1e8] sm:$0xff] }
 0x2e3   : > { %1880 = vmatpush1.bf16.msra.mxu0 %v1378_v25  ;;  %1966 = vmatpush1.bf16.msra.mxu1 %v1380_v26  ;;  %v1032_v25 = vunpack.c.h.s8.bf16 %v728_v16  ;;  %v1047_v26 = vunpack.c.l.s8.bf16 %v743_v22 }
 0x2e4   : > { %1881 = vmatprep.subr.bf16.mxu0 %v1395_v27  ;;  %1967 = vmatprep.subr.bf16.mxu1 %v1397_v28  ;;  %v1049_v27 = vunpack.c.l.s8.bf16 %v745_v23  ;;  %v742_v28 = vld [vmem:[%s7406_s2 + $0x1e0] sm:$0xff] }
 0x2e5   : > { %v1046_v31 = vunpack.c.l.s8.bf16 %v742_v28  ;;  %v1062_v18 = vunpack.c.h.s8.bf16 %v742_v28  ;;  %v824_v28 = vld [vmem:[%s7406_s2 + $0x470] sm:$0xff] }
 0x2e7   : > { %1882 = vmatpush1.bf16.msra.mxu0 %v1394_v32  ;;  %1968 = vmatpush1.bf16.msra.mxu1 %v1396_v33  ;;  %v1048_v32 = vunpack.c.l.s8.bf16 %v744_v30  ;;  %v1063_v33 = vunpack.c.h.s8.bf16 %v743_v22  ;;  %v825_v22 = vld [vmem:[%s7406_s2 + $0x478] sm:$0xff] }
 0x2e8   : > { %1883 = vmatprep.subr.bf16.mxu0 %v1411_v34  ;;  %1969 = vmatprep.subr.bf16.mxu1 %v1413_v35  ;;  %v1065_v34 = vunpack.c.h.s8.bf16 %v745_v23  ;;  %v759_v35 = vld [vmem:[%s7406_s2 + $0x268] sm:$0xff] }
 0x2eb   : > { %1884 = vmatpush1.bf16.msra.mxu0 %v1410_v38  ;;  %1970 = vmatpush1.bf16.msra.mxu1 %v1412_v39  ;;  %v1064_v38 = vunpack.c.h.s8.bf16 %v744_v30  ;;  %v1079_v39 = vunpack.c.l.s8.bf16 %v759_v35 }
 0x2ec   : > { %1885 = vmatprep.subr.bf16.mxu0 %v1427_v29  ;;  %1971 = vmatprep.subr.bf16.mxu1 %v1429_v40  ;;  %v1081_v29 = vunpack.c.l.s8.bf16 %v761_v36  ;;  %v758_v40 = vld [vmem:[%s7406_s2 + $0x260] sm:$0xff] }
 0x2ed   : > { %v1078_v42 = vunpack.c.l.s8.bf16 %v758_v40  ;;  %v1094_v49 = vunpack.c.h.s8.bf16 %v758_v40  ;;  %v840_v40 = vld [vmem:[%s7406_s2 + $0x4f0] sm:$0xff] }
 0x2ef   : > { %1886 = vmatpush1.bf16.msra.mxu0 %v1426_v43  ;;  %1972 = vmatpush1.bf16.msra.mxu1 %v1428_v44  ;;  %v1080_v43 = vunpack.c.l.s8.bf16 %v760_v41  ;;  %v1095_v44 = vunpack.c.h.s8.bf16 %v759_v35  ;;  %v841_v35 = vld [vmem:[%s7406_s2 + $0x4f8] sm:$0xff] }
 0x2f0   : > { %1887 = vmatprep.subr.bf16.mxu0 %v1443_v46  ;;  %1973 = vmatprep.subr.bf16.mxu1 %v1445_v47  ;;  %v1097_v46 = vunpack.c.h.s8.bf16 %v761_v36  ;;  %v775_v47 = vld [vmem:[%s7406_s2 + $0x2e8] sm:$0xff] }
 0x2f3   : > { %1888 = vmatpush1.bf16.msra.mxu0 %v1442_v50  ;;  %1974 = vmatpush1.bf16.msra.mxu1 %v1444_v51  ;;  %v1096_v50 = vunpack.c.h.s8.bf16 %v760_v41  ;;  %v1111_v51 = vunpack.c.l.s8.bf16 %v775_v47 }
 0x2f4   : > { %1986 = vmatprep.subr.bf16.mxu0 %v951_v53  ;;  %2072 = vmatprep.subr.bf16.mxu1 %v953_v54  ;;  %v1113_v53 = vunpack.c.l.s8.bf16 %v777_v48  ;;  %v774_v54 = vld [vmem:[%s7406_s2 + $0x2e0] sm:$0xff] }
 0x2f5   : > { %v1110_v56 = vunpack.c.l.s8.bf16 %v774_v54  ;;  %v1126_v62 = vunpack.c.h.s8.bf16 %v774_v54 }
 0x2f6   : > { %1890 = vmatmul.mubr.bf16.vlgmr.msra.gmra.mrb[8].mxu0 %v7688_v63  ;;  %1976 = vmatmul.mubr.bf16.vlgmr.msra.gmra.mrb[8].mxu1 %v7688_v63 }
 0x2f7   : > { %1987 = vmatpush1.bf16.msra.mxu0 %v950_v57  ;;  %2073 = vmatpush1.bf16.msra.mxu1 %v952_v58  ;;  %v1112_v57 = vunpack.c.l.s8.bf16 %v776_v55  ;;  %v1127_v58 = vunpack.c.h.s8.bf16 %v775_v47 }
 0x2f8   : > { %1988 = vmatprep.subr.bf16.mxu0 %v967_v59  ;;  %2074 = vmatprep.subr.bf16.mxu1 %v969_v60  ;;  %v1129_v59 = vunpack.c.h.s8.bf16 %v777_v48  ;;  %v791_v60 = vld [vmem:[%s7406_s2 + $0x368] sm:$0xff]  ;;  %v1256_v48 = vunpack.c.h.s8.bf16 %v840_v40 }
 0x2f9   : > { %2018 = vmatprep.mubr.bf16.mxu0 %v7611_v37  ;;  %2104 = vmatprep.mubr.bf16.mxu1 %v7611_v37  ;;  %v1015_v37 = vunpack.c.l.s8.bf16 %v727_v52  ;;  %v809_v52 = vld [vmem:[%s7406_s2 + $0x3f8] sm:$0xff] }
 0x2fb   : > { %1989 = vmatpush1.bf16.msra.mxu0 %v966_v0  ;;  %2075 = vmatpush1.bf16.msra.mxu1 %v968_v2  ;;  %v1128_v0 = vunpack.c.h.s8.bf16 %v776_v55  ;;  %v1143_v2 = vunpack.c.l.s8.bf16 %v791_v60 }
 0x2fc   : > { %1990 = vmatprep.subr.bf16.mxu0 %v983_v3  ;;  %2076 = vmatprep.subr.bf16.mxu1 %v985_v4  ;;  %v1145_v3 = vunpack.c.l.s8.bf16 %v793_v61  ;;  %v790_v4 = vld [vmem:[%s7406_s2 + $0x360] sm:$0xff] }
 0x2fd   : > { %v1142_v5 = vunpack.c.l.s8.bf16 %v790_v4  ;;  %v1158_v11 = vunpack.c.h.s8.bf16 %v790_v4 }
 0x2ff   : > { %1991 = vmatpush1.bf16.msra.mxu0 %v982_v6  ;;  %2077 = vmatpush1.bf16.msra.mxu1 %v984_v8  ;;  %v1144_v6 = vunpack.c.l.s8.bf16 %v792_v45  ;;  %v1159_v8 = vunpack.c.h.s8.bf16 %v791_v60  ;;  %v652_v60 = vld [vmem:[#allocation4 + $0x30] sm:$0xff] }
 0x300   : > { %1992 = vmatprep.subr.bf16.mxu0 %v999_v9  ;;  %2078 = vmatprep.subr.bf16.mxu1 %v1001_v10  ;;  %v1161_v9 = vunpack.c.h.s8.bf16 %v793_v61  ;;  %v807_v10 = vld [vmem:[%s7406_s2 + $0x3e8] sm:$0xff] }
 0x301   : > { %v651_v61 = vld [vmem:[#allocation4 + $0x28] sm:$0xff] }
 0x303   : > { %1993 = vmatpush1.bf16.msra.mxu0 %v998_v12  ;;  %2079 = vmatpush1.bf16.msra.mxu1 %v1000_v13  ;;  %v1160_v12 = vunpack.c.h.s8.bf16 %v792_v45  ;;  %v1175_v13 = vunpack.c.l.s8.bf16 %v807_v10  ;;  %v870_v45 = vld [vmem:[%s7406_s2 + $0x5e0] sm:$0xff] }
 0x304   : > { %1994 = vmatprep.subr.bf16.mxu0 %v1015_v37  ;;  %2080 = vmatprep.subr.bf16.mxu1 %v1017_v14  ;;  %v1177_v37 = vunpack.c.l.s8.bf16 %v809_v52  ;;  %v806_v14 = vld [vmem:[%s7406_s2 + $0x3e0] sm:$0xff] }
 0x305   : > { %v1174_v16 = vunpack.c.l.s8.bf16 %v806_v14  ;;  %v1190_v23 = vunpack.c.h.s8.bf16 %v806_v14  ;;  %v669_v14 = vld [vmem:[#allocation4 + $0xb8] sm:$0xff] }
 0x307   : > { %1995 = vmatpush1.bf16.msra.mxu0 %v1014_v17  ;;  %2081 = vmatpush1.bf16.msra.mxu1 %v1016_v19  ;;  %v1176_v17 = vunpack.c.l.s8.bf16 %v808_v15  ;;  %v1191_v19 = vunpack.c.h.s8.bf16 %v807_v10  ;;  %v668_v10 = vld [vmem:[#allocation4 + $0xb0] sm:$0xff] }
 0x308   : > { %1996 = vmatprep.subr.bf16.mxu0 %v1031_v20  ;;  %2082 = vmatprep.subr.bf16.mxu1 %v1033_v21  ;;  %v1193_v20 = vunpack.c.h.s8.bf16 %v809_v52  ;;  %v823_v21 = vld [vmem:[%s7406_s2 + $0x468] sm:$0xff] }
 0x30b   : > { %1997 = vmatpush1.bf16.msra.mxu0 %v1030_v24  ;;  %2083 = vmatpush1.bf16.msra.mxu1 %v1032_v25  ;;  %v1192_v24 = vunpack.c.h.s8.bf16 %v808_v15  ;;  %v1207_v25 = vunpack.c.l.s8.bf16 %v823_v21 }
 0x30c   : > { %1998 = vmatprep.subr.bf16.mxu0 %v1047_v26  ;;  %2084 = vmatprep.subr.bf16.mxu1 %v1049_v27  ;;  %v1209_v26 = vunpack.c.l.s8.bf16 %v825_v22  ;;  %v822_v27 = vld [vmem:[%s7406_s2 + $0x460] sm:$0xff] }
 0x30d   : > { %v1206_v30 = vunpack.c.l.s8.bf16 %v822_v27  ;;  %v1222_v36 = vunpack.c.h.s8.bf16 %v822_v27 }
 0x30f   : > { %1999 = vmatpush1.bf16.msra.mxu0 %v1046_v31  ;;  %2085 = vmatpush1.bf16.msra.mxu1 %v1048_v32  ;;  %v1208_v31 = vunpack.c.l.s8.bf16 %v824_v28  ;;  %v1223_v32 = vunpack.c.h.s8.bf16 %v823_v21 }
 0x310   : > { %2000 = vmatprep.subr.bf16.mxu0 %v1063_v33  ;;  %2086 = vmatprep.subr.bf16.mxu1 %v1065_v34  ;;  %v1225_v33 = vunpack.c.h.s8.bf16 %v825_v22  ;;  %v839_v34 = vld [vmem:[%s7406_s2 + $0x4e8] sm:$0xff] }
 0x313   : > { %2001 = vmatpush1.bf16.msra.mxu0 %v1062_v18  ;;  %2087 = vmatpush1.bf16.msra.mxu1 %v1064_v38  ;;  %v1224_v18 = vunpack.c.h.s8.bf16 %v824_v28  ;;  %v1239_v38 = vunpack.c.l.s8.bf16 %v839_v34 }
 0x314   : > { %2002 = vmatprep.subr.bf16.mxu0 %v1079_v39  ;;  %2088 = vmatprep.subr.bf16.mxu1 %v1081_v29  ;;  %v1241_v39 = vunpack.c.l.s8.bf16 %v841_v35  ;;  %v838_v29 = vld [vmem:[%s7406_s2 + $0x4e0] sm:$0xff] }
 0x315   : > { %v1238_v41 = vunpack.c.l.s8.bf16 %v838_v29  ;;  %v1254_v47 = vunpack.c.h.s8.bf16 %v838_v29 }
 0x317   : > { %2003 = vmatpush1.bf16.msra.mxu0 %v1078_v42  ;;  %2089 = vmatpush1.bf16.msra.mxu1 %v1080_v43  ;;  %v1255_v42 = vunpack.c.h.s8.bf16 %v839_v34  ;;  %v1257_v43 = vunpack.c.h.s8.bf16 %v841_v35 }
 0x318   : > { %2004 = vmatprep.subr.bf16.mxu0 %v1095_v44  ;;  %2090 = vmatprep.subr.bf16.mxu1 %v1097_v46  ;;  %v855_v44 = vld [vmem:[%s7406_s2 + $0x568] sm:$0xff]  ;;  %v857_v46 = vld [vmem:[%s7406_s2 + $0x578] sm:$0xff] }
 0x319   : > { %v1287_v55 = vunpack.c.h.s8.bf16 %v855_v44 }
 0x31b   : > { %2005 = vmatpush1.bf16.msra.mxu0 %v1094_v49  ;;  %2091 = vmatpush1.bf16.msra.mxu1 %v1096_v50  ;;  %v1273_v49 = vunpack.c.l.s8.bf16 %v857_v46  ;;  %v854_v50 = vld [vmem:[%s7406_s2 + $0x560] sm:$0xff] }
 0x31c   : > { %2006 = vmatprep.subr.bf16.mxu0 %v1111_v51  ;;  %2092 = vmatprep.subr.bf16.mxu1 %v1113_v53  ;;  %v856_v51 = vld [vmem:[%s7406_s2 + $0x570] sm:$0xff]  ;;  %v1270_v53 = vunpack.c.l.s8.bf16 %v854_v50 }
 0x31d   : > { %v1272_v54 = vunpack.c.l.s8.bf16 %v856_v51 }
 0x31f   : > { %2007 = vmatpush1.bf16.msra.mxu0 %v1110_v56  ;;  %2093 = vmatpush1.bf16.msra.mxu1 %v1112_v57  ;;  %v1289_v56 = vunpack.c.h.s8.bf16 %v857_v46  ;;  %v871_v57 = vld [vmem:[%s7406_s2 + $0x5e8] sm:$0xff] }
 0x320   : > { %2008 = vmatprep.subr.bf16.mxu0 %v1127_v58  ;;  %2094 = vmatprep.subr.bf16.mxu1 %v1129_v59  ;;  %v873_v58 = vld [vmem:[%s7406_s2 + $0x5f8] sm:$0xff]  ;;  %v650_v59 = vld [vmem:[#allocation4 + $0x20] sm:$0xff] }
 0x321   : > { %v1305_v4 = vunpack.c.l.s8.bf16 %v873_v58  ;;  %v1321_v27 = vunpack.c.h.s8.bf16 %v873_v58 }
 0x323   : > { %2009 = vmatpush1.bf16.msra.mxu0 %v1126_v62  ;;  %2095 = vmatpush1.bf16.msra.mxu1 %v1128_v0  ;;  %v1286_v62 = vunpack.c.h.s8.bf16 %v854_v50  ;;  %v1288_v0 = vunpack.c.h.s8.bf16 %v856_v51 }
 0x324   : > { %2010 = vmatprep.subr.bf16.mxu0 %v1143_v2  ;;  %2096 = vmatprep.subr.bf16.mxu1 %v1145_v3  ;;  %v653_v2 = vld [vmem:[#allocation4 + $0x38] sm:$0xff]  ;;  %v1303_v3 = vunpack.c.l.s8.bf16 %v871_v57 }
 0x327   : > { %2011 = vmatpush1.bf16.msra.mxu0 %v1142_v5  ;;  %2097 = vmatpush1.bf16.msra.mxu1 %v1144_v6  ;;  %v872_v5 = vld [vmem:[%s7406_s2 + $0x5f0] sm:$0xff] }
 0x328   : > { %2012 = vmatprep.subr.bf16.mxu0 %v1159_v8  ;;  %2098 = vmatprep.subr.bf16.mxu1 %v1161_v9  ;;  %v666_v9 = vld [vmem:[#allocation4 + $0xa0] sm:$0xff]  ;;  %v1304_v21 = vunpack.c.l.s8.bf16 %v872_v5  ;;  %v1320_v34 = vunpack.c.h.s8.bf16 %v872_v5 }
 0x32b   : > { %2013 = vmatpush1.bf16.msra.mxu0 %v1158_v11  ;;  %2099 = vmatpush1.bf16.msra.mxu1 %v1160_v12 }
 0x32c   : > { %2014 = vmatprep.subr.bf16.mxu0 %v1175_v13  ;;  %2100 = vmatprep.subr.bf16.mxu1 %v1177_v37  ;;  %v667_v37 = vld [vmem:[#allocation4 + $0xa8] sm:$0xff] }
 0x32f   : > { %2015 = vmatpush1.bf16.msra.mxu0 %v1174_v16  ;;  %2101 = vmatpush1.bf16.msra.mxu1 %v1176_v17 }
 0x330   : > { %2016 = vmatprep.subr.bf16.mxu0 %v1191_v19  ;;  %2102 = vmatprep.subr.bf16.mxu1 %v1193_v20  ;;  %v1302_v20 = vunpack.c.l.s8.bf16 %v870_v45 }
 0x333   : > { %2017 = vmatpush1.bf16.msra.mxu0 %v1190_v23  ;;  %2103 = vmatpush1.bf16.msra.mxu1 %v1192_v24 }
 0x334   : > { %2029 = vmatprep.subr.bf16.mxu0 %v1207_v25  ;;  %2115 = vmatprep.subr.bf16.mxu1 %v1209_v26  ;;  %v1319_v26 = vunpack.c.h.s8.bf16 %v871_v57 }
 0x336   : > { %2019 = vmatmul.mubr.bf16.vlgmr.msra.gmra.mrb[12].mxu0 %v7646_v1  ;;  %2105 = vmatmul.mubr.bf16.vlgmr.msra.gmra.mrb[12].mxu1 %v7646_v1  ;;  %v1240_v1 = vunpack.c.l.s8.bf16 %v840_v40 }
 0x337   : > { %2030 = vmatpush1.bf16.msra.mxu0 %v1206_v30  ;;  %2116 = vmatpush1.bf16.msra.mxu1 %v1208_v31  ;;  %v887_v31 = vld [vmem:[%s7406_s2 + $0x668] sm:$0xff] }
 0x338   : > { %2031 = vmatprep.subr.bf16.mxu0 %v1223_v32  ;;  %2117 = vmatprep.subr.bf16.mxu1 %v1225_v33  ;;  %v889_v32 = vld [vmem:[%s7406_s2 + $0x678] sm:$0xff]  ;;  %v1318_v33 = vunpack.c.h.s8.bf16 %v870_v45  ;;  %v1335_v35 = vunpack.c.l.s8.bf16 %v887_v31  ;;  %v1351_v40 = vunpack.c.h.s8.bf16 %v887_v31 }
 0x339   : > { %2061 = vmatprep.mubr.bf16.mxu0 %v7653_v7  ;;  %2147 = vmatprep.mubr.bf16.mxu1 %v7653_v7  ;;  %v1271_v7 = vunpack.c.l.s8.bf16 %v855_v44  ;;  %v937_v45 = vld [vmem:[%s7406_s2 + $0x7f8] sm:$0xff] }
 0x33a   : > { %v673_v31 = vld [vmem:[#allocation4 + $0xd8] sm:$0xff] }
 0x33b   : > { %2032 = vmatpush1.bf16.msra.mxu0 %v1222_v36  ;;  %2118 = vmatpush1.bf16.msra.mxu1 %v1224_v18  ;;  %v1337_v36 = vunpack.c.l.s8.bf16 %v889_v32  ;;  %v886_v18 = vld [vmem:[%s7406_s2 + $0x660] sm:$0xff] }
 0x33c   : > { %2033 = vmatprep.subr.bf16.mxu0 %v1239_v38  ;;  %2119 = vmatprep.subr.bf16.mxu1 %v1241_v39  ;;  %v888_v38 = vld [vmem:[%s7406_s2 + $0x670] sm:$0xff]  ;;  %v1334_v39 = vunpack.c.l.s8.bf16 %v886_v18 }
 0x33d   : > { %v1336_v29 = vunpack.c.l.s8.bf16 %v888_v38  ;;  %v1352_v44 = vunpack.c.h.s8.bf16 %v888_v38 }
 0x33f   : > { %2034 = vmatpush1.bf16.msra.mxu0 %v1238_v41  ;;  %2120 = vmatpush1.bf16.msra.mxu1 %v1240_v1  ;;  %v1353_v41 = vunpack.c.h.s8.bf16 %v889_v32  ;;  %v903_v1 = vld [vmem:[%s7406_s2 + $0x6e8] sm:$0xff] }
 0x340   : > { %2035 = vmatprep.subr.bf16.mxu0 %v1255_v42  ;;  %2121 = vmatprep.subr.bf16.mxu1 %v1257_v43  ;;  %v905_v42 = vld [vmem:[%s7406_s2 + $0x6f8] sm:$0xff]  ;;  %v1350_v43 = vunpack.c.h.s8.bf16 %v886_v18  ;;  %v1367_v46 = vunpack.c.l.s8.bf16 %v903_v1  ;;  %v1383_v51 = vunpack.c.h.s8.bf16 %v903_v1  ;;  %v659_v1 = vld [vmem:[#allocation4 + $0x68] sm:$0xff] }
 0x343   : > { %2036 = vmatpush1.bf16.msra.mxu0 %v1254_v47  ;;  %2122 = vmatpush1.bf16.msra.mxu1 %v1256_v48  ;;  %v1369_v47 = vunpack.c.l.s8.bf16 %v905_v42  ;;  %v902_v48 = vld [vmem:[%s7406_s2 + $0x6e0] sm:$0xff] }
 0x344   : > { %2037 = vmatprep.subr.bf16.mxu0 %v1271_v7  ;;  %2123 = vmatprep.subr.bf16.mxu1 %v1273_v49  ;;  %v904_v7 = vld [vmem:[%s7406_s2 + $0x6f0] sm:$0xff]  ;;  %v1366_v49 = vunpack.c.l.s8.bf16 %v902_v48 }
 0x345   : > { %v1368_v50 = vunpack.c.l.s8.bf16 %v904_v7  ;;  %v1384_v57 = vunpack.c.h.s8.bf16 %v904_v7 }
 0x347   : > { %2038 = vmatpush1.bf16.msra.mxu0 %v1270_v53  ;;  %2124 = vmatpush1.bf16.msra.mxu1 %v1272_v54  ;;  %v1385_v53 = vunpack.c.h.s8.bf16 %v905_v42  ;;  %v919_v54 = vld [vmem:[%s7406_s2 + $0x768] sm:$0xff]  ;;  %v661_v42 = vld [vmem:[#allocation4 + $0x78] sm:$0xff] }
 0x348   : > { %2039 = vmatprep.subr.bf16.mxu0 %v1287_v55  ;;  %2125 = vmatprep.subr.bf16.mxu1 %v1289_v56  ;;  %v921_v55 = vld [vmem:[%s7406_s2 + $0x778] sm:$0xff]  ;;  %v1382_v56 = vunpack.c.h.s8.bf16 %v902_v48  ;;  %v1399_v58 = vunpack.c.l.s8.bf16 %v919_v54 }
 0x349   : > { %v1719_v6 = vpop.f32.mrb[4].mxu0  ;;  %v1805_v8 = vpop.f32.mrb[4].mxu1 }
 0x34a   : > { %v2162_v52 = vadd.f32 %v1719_v6, %v650_v59  ;;  %v2164_v11 = vadd.f32 %v1805_v8, %v652_v60  ;;  %v1721_v12 = vpop.f32.mrb[5].mxu0  ;;  %v1807_v13 = vpop.f32.mrb[5].mxu1  ;;  %v1401_v59 = vunpack.c.l.s8.bf16 %v921_v55  ;;  %v918_v60 = vld [vmem:[%s7406_s2 + $0x760] sm:$0xff] }
 0x34b   : > { %v2163_v15 = vadd.f32 %v1721_v12, %v651_v61  ;;  %v2165_v16 = vadd.f32 %v1807_v13, %v653_v2  ;;  %v1723_v17 = vpop.f32.mrb[6].mxu0  ;;  %v1809_v19 = vpop.f32.mrb[6].mxu1  ;;  %2040 = vmatpush1.bf16.msra.mxu0 %v1286_v62  ;;  %2126 = vmatpush1.bf16.msra.mxu1 %v1288_v0  ;;  %v920_v61 = vld [vmem:[%s7406_s2 + $0x770] sm:$0xff]  ;;  %v1398_v62 = vunpack.c.l.s8.bf16 %v918_v60  ;;  %v1415_v2 = vunpack.c.h.s8.bf16 %v919_v54 }
 0x34c   : > { %2194 = vst [vmem:[#allocation4 + $0x20] sm:$0xff] %v2162_v52  ;;  %2196 = vst [vmem:[#allocation4 + $0x30] sm:$0xff] %v2164_v11  ;;  %v2178_v22 = vadd.f32 %v1723_v17, %v666_v9  ;;  %v2180_v23 = vadd.f32 %v1809_v19, %v668_v10  ;;  %v1725_v24 = vpop.f32.mrb[7].mxu0  ;;  %v1811_v25 = vpop.f32.mrb[7].mxu1  ;;  %2041 = vmatprep.subr.bf16.mxu0 %v1303_v3  ;;  %2127 = vmatprep.subr.bf16.mxu1 %v1305_v4  ;;  %v1400_v0 = vunpack.c.l.s8.bf16 %v920_v61  ;;  %v935_v4 = vld [vmem:[%s7406_s2 + $0x7e8] sm:$0xff]  ;;  %v934_v10 = vld [vmem:[%s7406_s2 + $0x7e0] sm:$0xff] }
 0x34d   : > { %2195 = vst [vmem:[#allocation4 + $0x28] sm:$0xff] %v2163_v15  ;;  %2197 = vst [vmem:[#allocation4 + $0x38] sm:$0xff] %v2165_v16  ;;  %v2179_v28 = vadd.f32 %v1725_v24, %v667_v37  ;;  %v2181_v30 = vadd.f32 %v1811_v25, %v669_v14  ;;  %v1417_v3 = vunpack.c.h.s8.bf16 %v921_v55  ;;  %v1414_v5 = vunpack.c.h.s8.bf16 %v918_v60  ;;  %v936_v52 = vld [vmem:[%s7406_s2 + $0x7f0] sm:$0xff]  ;;  %v654_v16 = vld [vmem:[#allocation4 + $0x40] sm:$0xff] }
 0x34e   : > { %2210 = vst [vmem:[#allocation4 + $0xa0] sm:$0xff] %v2178_v22  ;;  %2212 = vst [vmem:[#allocation4 + $0xb0] sm:$0xff] %v2180_v23  ;;  %v1416_v6 = vunpack.c.h.s8.bf16 %v920_v61  ;;  %v1431_v8 = vunpack.c.l.s8.bf16 %v935_v4  ;;  %v1433_v9 = vunpack.c.l.s8.bf16 %v937_v45  ;;  %v1430_v11 = vunpack.c.l.s8.bf16 %v934_v10  ;;  %v656_v17 = vld [vmem:[#allocation4 + $0x50] sm:$0xff]  ;;  %v655_v19 = vld [vmem:[#allocation4 + $0x48] sm:$0xff] }
 0x34f   : > { %2211 = vst [vmem:[#allocation4 + $0xa8] sm:$0xff] %v2179_v28  ;;  %2213 = vst [vmem:[#allocation4 + $0xb8] sm:$0xff] %v2181_v30  ;;  %2042 = vmatpush1.bf16.msra.mxu0 %v1302_v20  ;;  %2128 = vmatpush1.bf16.msra.mxu1 %v1304_v21  ;;  %v1432_v12 = vunpack.c.l.s8.bf16 %v936_v52  ;;  %v1447_v13 = vunpack.c.h.s8.bf16 %v935_v4  ;;  %v1449_v37 = vunpack.c.h.s8.bf16 %v937_v45  ;;  %v1446_v14 = vunpack.c.h.s8.bf16 %v934_v10  ;;  %v657_v20 = vld [vmem:[#allocation4 + $0x58] sm:$0xff]  ;;  %v670_v23 = vld [vmem:[#allocation4 + $0xc0] sm:$0xff] }
 0x350   : > { %2043 = vmatprep.subr.bf16.mxu0 %v1319_v26  ;;  %2129 = vmatprep.subr.bf16.mxu1 %v1321_v27  ;;  %v1448_v15 = vunpack.c.h.s8.bf16 %v936_v52  ;;  %v672_v24 = vld [vmem:[#allocation4 + $0xd0] sm:$0xff]  ;;  %v671_v30 = vld [vmem:[#allocation4 + $0xc8] sm:$0xff] }
 0x353   : > { %2044 = vmatpush1.bf16.msra.mxu0 %v1318_v33  ;;  %2130 = vmatpush1.bf16.msra.mxu1 %v1320_v34 }
 0x354   : > { %2045 = vmatprep.subr.bf16.mxu0 %v1335_v35  ;;  %2131 = vmatprep.subr.bf16.mxu1 %v1337_v36 }
 0x357   : > { %2046 = vmatpush1.bf16.msra.mxu0 %v1334_v39  ;;  %2132 = vmatpush1.bf16.msra.mxu1 %v1336_v29 }
 0x358   : > { %2047 = vmatprep.subr.bf16.mxu0 %v1351_v40  ;;  %2133 = vmatprep.subr.bf16.mxu1 %v1353_v41  ;;  %v658_v40 = vld [vmem:[#allocation4 + $0x60] sm:$0xff]  ;;  %v660_v41 = vld [vmem:[#allocation4 + $0x70] sm:$0xff] }
 0x35b   : > { %2048 = vmatpush1.bf16.msra.mxu0 %v1350_v43  ;;  %2134 = vmatpush1.bf16.msra.mxu1 %v1352_v44 }
 0x35c   : > { %2049 = vmatprep.subr.bf16.mxu0 %v1367_v46  ;;  %2135 = vmatprep.subr.bf16.mxu1 %v1369_v47  ;;  %v674_v46 = vld [vmem:[#allocation4 + $0xe0] sm:$0xff]  ;;  %v676_v47 = vld [vmem:[#allocation4 + $0xf0] sm:$0xff] }
 0x35f   : > { %2050 = vmatpush1.bf16.msra.mxu0 %v1366_v49  ;;  %2136 = vmatpush1.bf16.msra.mxu1 %v1368_v50 }
 0x360   : > { %2051 = vmatprep.subr.bf16.mxu0 %v1383_v51  ;;  %2137 = vmatprep.subr.bf16.mxu1 %v1385_v53  ;;  %v675_v51 = vld [vmem:[#allocation4 + $0xe8] sm:$0xff]  ;;  %v677_v53 = vld [vmem:[#allocation4 + $0xf8] sm:$0xff] }
 0x363   : > { %2052 = vmatpush1.bf16.msra.mxu0 %v1382_v56  ;;  %2138 = vmatpush1.bf16.msra.mxu1 %v1384_v57 }
 0x364   : > { %2053 = vmatprep.subr.bf16.mxu0 %v1399_v58  ;;  %2139 = vmatprep.subr.bf16.mxu1 %v1401_v59 }
 0x367   : > { %2054 = vmatpush1.bf16.msra.mxu0 %v1398_v62  ;;  %2140 = vmatpush1.bf16.msra.mxu1 %v1400_v0 }
 0x368   : > { %2055 = vmatprep.subr.bf16.mxu0 %v1415_v2  ;;  %2141 = vmatprep.subr.bf16.mxu1 %v1417_v3 }
 0x36b   : > { %2056 = vmatpush1.bf16.msra.mxu0 %v1414_v5  ;;  %2142 = vmatpush1.bf16.msra.mxu1 %v1416_v6 }
 0x36c   : > { %2057 = vmatprep.subr.bf16.mxu0 %v1431_v8  ;;  %2143 = vmatprep.subr.bf16.mxu1 %v1433_v9 }
 0x36f   : > { %2058 = vmatpush1.bf16.msra.mxu0 %v1430_v11  ;;  %2144 = vmatpush1.bf16.msra.mxu1 %v1432_v12 }
 0x370   : > { %2059 = vmatprep.subr.bf16.mxu0 %v1447_v13  ;;  %2145 = vmatprep.subr.bf16.mxu1 %v1449_v37 }
 0x373   : > { %2060 = vmatpush1.bf16.msra.mxu0 %v1446_v14  ;;  %2146 = vmatpush1.bf16.msra.mxu1 %v1448_v15 }
 0x376   : > { %2062 = vmatmul.mubr.bf16.vlgmr.msra.gmra.mrb[12].mxu0 %v7688_v63  ;;  %2148 = vmatmul.mubr.bf16.vlgmr.msra.gmra.mrb[12].mxu1 %v7688_v63 }
 0x3c9   : > { %v1891_v21 = vpop.f32.mrb[8].mxu0  ;;  %v1977_v22 = vpop.f32.mrb[8].mxu1 }
 0x3ca   : > { %v2166_v25 = vadd.f32 %v1891_v21, %v654_v16  ;;  %v2168_v26 = vadd.f32 %v1977_v22, %v656_v17  ;;  %v1893_v27 = vpop.f32.mrb[9].mxu0  ;;  %v1979_v28 = vpop.f32.mrb[9].mxu1 }
 0x3cb   : > { %v2167_v32 = vadd.f32 %v1893_v27, %v655_v19  ;;  %v2169_v33 = vadd.f32 %v1979_v28, %v657_v20  ;;  %v1895_v34 = vpop.f32.mrb[10].mxu0  ;;  %v1981_v35 = vpop.f32.mrb[10].mxu1 }
 0x3cc   : > { %2198 = vst [vmem:[#allocation4 + $0x40] sm:$0xff] %v2166_v25  ;;  %2200 = vst [vmem:[#allocation4 + $0x50] sm:$0xff] %v2168_v26  ;;  %v2182_v63 = vadd.f32 %v1895_v34, %v670_v23  ;;  %v2184_v36 = vadd.f32 %v1981_v35, %v672_v24  ;;  %v1897_v18 = vpop.f32.mrb[11].mxu0  ;;  %v1983_v38 = vpop.f32.mrb[11].mxu1 }
 0x3cd   : > { %2199 = vst [vmem:[#allocation4 + $0x48] sm:$0xff] %v2167_v32  ;;  %2201 = vst [vmem:[#allocation4 + $0x58] sm:$0xff] %v2169_v33  ;;  %v2183_v39 = vadd.f32 %v1897_v18, %v671_v30  ;;  %v2185_v29 = vadd.f32 %v1983_v38, %v673_v31 }
 0x3ce   : > { %2214 = vst [vmem:[#allocation4 + $0xc0] sm:$0xff] %v2182_v63  ;;  %2216 = vst [vmem:[#allocation4 + $0xd0] sm:$0xff] %v2184_v36 }
 0x3cf   : > { %2215 = vst [vmem:[#allocation4 + $0xc8] sm:$0xff] %v2183_v39  ;;  %2217 = vst [vmem:[#allocation4 + $0xd8] sm:$0xff] %v2185_v29 }
 0x449   : > { %v2063_v43 = vpop.f32.mrb[12].mxu0  ;;  %v2149_v44 = vpop.f32.mrb[12].mxu1  ;;  %2225 = sbr.rel (%p6277_p7) target bundleno = 2930 (0xb72), region = 147 }
 0x44a   : > { %v2170_v48 = vadd.f32 %v2063_v43, %v658_v40  ;;  %v2172_v7 = vadd.f32 %v2149_v44, %v660_v41  ;;  %v2065_v49 = vpop.f32.mrb[13].mxu0  ;;  %v2151_v50 = vpop.f32.mrb[13].mxu1 }
 0x44b   : > { %v2171_v54 = vadd.f32 %v2065_v49, %v659_v1  ;;  %v2173_v55 = vadd.f32 %v2151_v50, %v661_v42  ;;  %v2067_v56 = vpop.f32.mrb[14].mxu0  ;;  %v2153_v57 = vpop.f32.mrb[14].mxu1 }
 0x44c   : > { %2202 = vst [vmem:[#allocation4 + $0x60] sm:$0xff] %v2170_v48  ;;  %2204 = vst [vmem:[#allocation4 + $0x70] sm:$0xff] %v2172_v7  ;;  %v2186_v58 = vadd.f32 %v2067_v56, %v674_v46  ;;  %v2188_v59 = vadd.f32 %v2153_v57, %v676_v47  ;;  %v2069_v60 = vpop.f32.mrb[15].mxu0  ;;  %v2155_v61 = vpop.f32.mrb[15].mxu1 }
 0x44d   : > { %2203 = vst [vmem:[#allocation4 + $0x68] sm:$0xff] %v2171_v54  ;;  %2205 = vst [vmem:[#allocation4 + $0x78] sm:$0xff] %v2173_v55  ;;  %v2187_v62 = vadd.f32 %v2069_v60, %v675_v51  ;;  %v2189_v0 = vadd.f32 %v2155_v61, %v677_v53 }
 0x44e   : > { %2218 = vst [vmem:[#allocation4 + $0xe0] sm:$0xff] %v2186_v58  ;;  %2220 = vst [vmem:[#allocation4 + $0xf0] sm:$0xff] %v2188_v59 }
 0x44f   : > { %2219 = vst [vmem:[#allocation4 + $0xe8] sm:$0xff] %v2187_v62  ;;  %2221 = vst [vmem:[#allocation4 + $0xf8] sm:$0xff] %v2189_v0 }
 0x450   : > { %6993 = dma.done.wait [#allocation3], 65536 }
 0x451   : > { %6994 = vsyncadd [#allocation3], 4294901760  ;;  %v2543_v2 = vld [vmem:[#allocation2 + $0x8] sm:$0xff]  ;;  %v2542_v4 = vld [vmem:[#allocation2] sm:$0xff]  ;;  %v2266_v19 = vlaneseq  ;;  %s8118_s30 = sld [smem:[#allocation43_spill]] }
 0x452   : > { %v2671_v3 = vld [vmem:[#allocation2 + $0x408] sm:$0xff]  ;;  %v3055_v45 = vunpack.c.l.s8.bf16 %v2543_v2  ;;  %v3063_v5 = vunpack.c.h.s8.bf16 %v2543_v2  ;;  %v2670_v9 = vld [vmem:[#allocation2 + $0x400] sm:$0xff]  ;;  %v3054_v10 = vunpack.c.l.s8.bf16 %v2542_v4  ;;  %v3062_v13 = vunpack.c.h.s8.bf16 %v2542_v4  ;;  %v7769_v36 = vld [vmem:[#allocation10] sm:$0xff] }
 0x453   : > { %v3311_v6 = vunpack.c.l.s8.bf16 %v2671_v3  ;;  %v3319_v8 = vunpack.c.h.s8.bf16 %v2671_v3  ;;  %v3310_v52 = vunpack.c.l.s8.bf16 %v2670_v9  ;;  %v2551_v11 = vld [vmem:[#allocation2 + $0x48] sm:$0xff]  ;;  %v3318_v37 = vunpack.c.h.s8.bf16 %v2670_v9  ;;  %v2550_v16 = vld [vmem:[#allocation2 + $0x40] sm:$0xff] }
 0x454   : > { %v2679_v12 = vld [vmem:[#allocation2 + $0x448] sm:$0xff]  ;;  %4078 = vmatprep.subr.bf16.mxu1 %v3055_v45  ;;  %v3071_v14 = vunpack.c.l.s8.bf16 %v2551_v11  ;;  %v2678_v17 = vld [vmem:[#allocation2 + $0x440] sm:$0xff]  ;;  %v3070_v20 = vunpack.c.l.s8.bf16 %v2550_v16  ;;  %v3079_v22 = vunpack.c.h.s8.bf16 %v2551_v11  ;;  %v7759_v24 = vshrl.u32 %v2266_v19, 7 }
 0x455   : > { %4164 = vmatprep.subr.bf16.mxu0 %v3311_v6  ;;  %4079 = vmatpush1.bf16.msra.mxu1 %v3054_v10  ;;  %v3327_v15 = vunpack.c.l.s8.bf16 %v2679_v12  ;;  %v3326_v21 = vunpack.c.l.s8.bf16 %v2678_v17  ;;  %v3335_v23 = vunpack.c.h.s8.bf16 %v2679_v12  ;;  %v2559_v25 = vld [vmem:[#allocation2 + $0x88] sm:$0xff]  ;;  %v3078_v27 = vunpack.c.h.s8.bf16 %v2550_v16  ;;  %v2558_v32 = vld [vmem:[#allocation2 + $0x80] sm:$0xff] }
 0x456   : > { %4165 = vmatpush1.bf16.msra.mxu0 %v3310_v52  ;;  %4080 = vmatprep.subr.bf16.mxu1 %v3063_v5  ;;  %v2687_v26 = vld [vmem:[#allocation2 + $0x488] sm:$0xff]  ;;  %v3334_v28 = vunpack.c.h.s8.bf16 %v2678_v17  ;;  %v3087_v30 = vunpack.c.l.s8.bf16 %v2559_v25  ;;  %v2686_v33 = vld [vmem:[#allocation2 + $0x480] sm:$0xff]  ;;  %v7762_v34 = vsub.s32 1, %v7759_v24  ;;  %v7765_v35 = vsub.s32 5, %v7759_v24 }
 0x457   : > { %4166 = vmatprep.subr.bf16.mxu0 %v3319_v8  ;;  %v3343_v31 = vunpack.c.l.s8.bf16 %v2687_v26  ;;  %v7767_v63 = vld [vmem:[#allocation8] sm:$0xff]  ;;  %v2231_v18 = vld [vmem:[#allocation4 + $0x8] sm:$0xff]  ;;  %v3086_v38 = vunpack.c.l.s8.bf16 %v2558_v32  ;;  %v3342_v39 = vunpack.c.l.s8.bf16 %v2686_v33  ;;  %v3095_v29 = vunpack.c.h.s8.bf16 %v2559_v25 }
 0x458   : > { %v2247_v40 = vld [vmem:[#allocation4 + $0x88] sm:$0xff]  ;;  %v3351_v42 = vunpack.c.h.s8.bf16 %v2687_v26  ;;  %v2273_v44 = vrot.slane %v7767_v63, %v7762_v34  ;;  %v2389_v46 = vrot.slane %v7769_v36, %v7762_v34  ;;  %v2289_v47 = vrot.slane %v7767_v63, %v7765_v35  ;;  %v2566_v58 = vld [vmem:[#allocation2 + $0xc0] sm:$0xff] }
 0x459   : > { %4081 = vmatpush1.bf16.msra.mxu1 %v3062_v13  ;;  %v2235_v41 = vld [vmem:[#allocation4 + $0x28] sm:$0xff]  ;;  %v2405_v7 = vrot.slane %v7769_v36, %v7765_v35  ;;  %v3094_v54 = vunpack.c.h.s8.bf16 %v2558_v32  ;;  %v3350_v55 = vunpack.c.h.s8.bf16 %v2686_v33  ;;  %v2694_v59 = vld [vmem:[#allocation2 + $0x4c0] sm:$0xff]  ;;  %v3102_v45 = vunpack.c.l.s8.bf16 %v2566_v58 }
 0x45a   : > { %4167 = vmatpush1.bf16.msra.mxu0 %v3318_v37  ;;  %4082 = vmatprep.subr.bf16.mxu1 %v3071_v14  ;;  %v2251_v1 = vld [vmem:[#allocation4 + $0xa8] sm:$0xff]  ;;  %v2347_v49 = vmul.f32 %v2273_v44, %v2231_v18  ;;  %v2363_v50 = vmul.f32 %v2273_v44, %v2247_v40  ;;  %v2351_v51 = vmul.f32 %v2289_v47, %v2235_v41  ;;  %v3358_v5 = vunpack.c.l.s8.bf16 %v2694_v59  ;;  %v2574_v16 = vld [vmem:[#allocation2 + $0x100] sm:$0xff] }
 0x45b   : > { %4168 = vmatprep.subr.bf16.mxu0 %v3327_v15  ;;  %v2567_v43 = vld [vmem:[#allocation2 + $0xc8] sm:$0xff]  ;;  %v2367_v53 = vmul.f32 %v2289_v47, %v2251_v1  ;;  %v3110_v13 = vunpack.c.h.s8.bf16 %v2566_v58  ;;  %v3366_v37 = vunpack.c.h.s8.bf16 %v2694_v59  ;;  %v2702_v17 = vld [vmem:[#allocation2 + $0x500] sm:$0xff]  ;;  %v3118_v19 = vunpack.c.l.s8.bf16 %v2574_v16  ;;  %v2232_v1 = vld [vmem:[#allocation4 + $0x10] sm:$0xff] }
 0x45c   : > { %v2695_v48 = vld [vmem:[#allocation2 + $0x4c8] sm:$0xff]  ;;  %v3103_v56 = vunpack.c.l.s8.bf16 %v2567_v43  ;;  %v2463_v60 = vadd.f32 %v2389_v46, %v2347_v49  ;;  %v2479_v61 = vadd.f32 %v2389_v46, %v2363_v50  ;;  %v2467_v62 = vadd.f32 %v2405_v7, %v2351_v51  ;;  %v2710_v32 = vld [vmem:[#allocation2 + $0x540] sm:$0xff]  ;;  %v2248_v46 = vld [vmem:[#allocation4 + $0x90] sm:$0xff] }
 0x45d   : > { %4083 = vmatpush1.bf16.msra.mxu1 %v3070_v20  ;;  %v3359_v57 = vunpack.c.l.s8.bf16 %v2695_v48  ;;  %v2483_v0 = vadd.f32 %v2405_v7, %v2367_v53  ;;  %v3111_v8 = vunpack.c.h.s8.bf16 %v2567_v43  ;;  %v3367_v9 = vunpack.c.h.s8.bf16 %v2695_v48  ;;  %v2575_v52 = vld [vmem:[#allocation2 + $0x108] sm:$0xff]  ;;  %v7795_v43 = vld [vmem:[#allocation2 + $0x180] sm:$0xff] }
 0x45e   : > { %4169 = vmatpush1.bf16.msra.mxu0 %v3326_v21  ;;  %4084 = vmatprep.subr.bf16.mxu1 %v3079_v22  ;;  %v2495_v2 = vmax.f32 %v2463_v60, 0.0  ;;  %v2511_v3 = vmax.f32 %v2479_v61, 0.0  ;;  %v2499_v4 = vmax.f32 %v2467_v62, 0.0  ;;  %v2703_v11 = vld [vmem:[#allocation2 + $0x508] sm:$0xff]  ;;  %v3119_v14 = vunpack.c.l.s8.bf16 %v2575_v52  ;;  %v7807_v49 = vld [vmem:[#allocation2 + $0x580] sm:$0xff]  ;;  %v2236_v61 = vld [vmem:[#allocation4 + $0x30] sm:$0xff] }
 0x45f   : > { %4170 = vmatprep.subr.bf16.mxu0 %v3335_v23  ;;  %v2515_v6 = vmax.f32 %v2483_v0, 0.0  ;;  %v3375_v15 = vunpack.c.l.s8.bf16 %v2703_v11  ;;  %v3374_v20 = vunpack.c.l.s8.bf16 %v2702_v17  ;;  %v3127_v21 = vunpack.c.h.s8.bf16 %v2575_v52  ;;  %v2583_v23 = vld [vmem:[#allocation2 + $0x148] sm:$0xff]  ;;  %v2230_v62 = vld [vmem:[#allocation4] sm:$0xff] }
 0x460   : > { %v7779_v10 = vpack.c.bf16 %v2511_v3, %v2495_v2  ;;  %v3383_v22 = vunpack.c.h.s8.bf16 %v2703_v11  ;;  %v2711_v25 = vld [vmem:[#allocation2 + $0x548] sm:$0xff]  ;;  %v3126_v26 = vunpack.c.h.s8.bf16 %v2574_v16  ;;  %v7786_v33 = vsub.s32 2, %v7759_v24  ;;  %v2246_v0 = vld [vmem:[#allocation4 + $0x80] sm:$0xff] }
 0x461   : > { %4085 = vmatpush1.bf16.msra.mxu1 %v3078_v27  ;;  %v7781_v12 = vpack.c.bf16 %v2515_v6, %v2499_v4  ;;  %v3382_v27 = vunpack.c.h.s8.bf16 %v2702_v17  ;;  %v7788_v40 = vld [vmem:[#allocation2 + $0x188] sm:$0xff]  ;;  %v7791_v41 = vsub.s32 0, %v7759_v24  ;;  %v7798_v44 = vsub.s32 4, %v7759_v24  ;;  %v2252_v4 = vld [vmem:[#allocation4 + $0xb0] sm:$0xff] }
 0x462   : > { %4171 = vmatpush1.bf16.msra.mxu0 %v3334_v28  ;;  %4086 = vmatprep.subr.bf16.mxu1 %v3087_v30  ;;  %v3135_v28 = vunpack.c.l.s8.bf16 %v2583_v23  ;;  %v3391_v30 = vunpack.c.l.s8.bf16 %v2711_v25  ;;  %v2277_v47 = vrot.slane %v7767_v63, %v7786_v33  ;;  %v2393_v48 = vrot.slane %v7769_v36, %v7786_v33  ;;  %v2599_v16 = vld [vmem:[#allocation2 + $0x1c8] sm:$0xff] }
 0x463   : > { %4172 = vmatprep.subr.bf16.mxu0 %v3343_v31  ;;  %4110 = vmatprep.mubr.bf16.mxu1 %v7779_v10  ;;  %v2582_v31 = vld [vmem:[#allocation2 + $0x140] sm:$0xff]  ;;  %v7805_v7 = vsub.s32 6, %v7759_v24  ;;  %v7810_v50 = vsub.s32 3, %v7759_v24  ;;  %v7813_v51 = vsub.s32 7, %v7759_v24  ;;  %v3150_v58 = vunpack.c.l.s8.bf16 %v7795_v43  ;;  %v2727_v17 = vld [vmem:[#allocation2 + $0x5c8] sm:$0xff] }
 0x464   : > { %4196 = vmatprep.mubr.bf16.mxu0 %v7781_v12  ;;  %v3134_v18 = vunpack.c.l.s8.bf16 %v2582_v31  ;;  %v3142_v53 = vunpack.c.h.s8.bf16 %v2582_v31  ;;  %v2269_v59 = vrot.slane %v7767_v63, %v7791_v41  ;;  %v2364_v60 = vmul.f32 %v2277_v47, %v2248_v46  ;;  %v2726_v46 = vld [vmem:[#allocation2 + $0x5c0] sm:$0xff] }
 0x465   : > { %4087 = vmatpush1.bf16.msra.mxu1 %v3086_v38  ;;  %v3390_v38 = vunpack.c.l.s8.bf16 %v2710_v32  ;;  %v3406_v24 = vunpack.c.l.s8.bf16 %v7807_v49  ;;  %v2285_v2 = vrot.slane %v7767_v63, %v7798_v44  ;;  %v2409_v52 = vrot.slane %v7769_v36, %v7805_v7 }
 0x466   : > { %4173 = vmatpush1.bf16.msra.mxu0 %v3342_v39  ;;  %4088 = vmatprep.subr.bf16.mxu1 %v3095_v29  ;;  %v3143_v39 = vunpack.c.h.s8.bf16 %v2583_v23  ;;  %v3399_v29 = vunpack.c.h.s8.bf16 %v2711_v25  ;;  %v3158_v11 = vunpack.c.h.s8.bf16 %v7795_v43  ;;  %v2233_v25 = vld [vmem:[#allocation4 + $0x18] sm:$0xff]  ;;  %v2401_v31 = vrot.slane %v7769_v36, %v7798_v44 }
 0x467   : > { %4174 = vmatprep.subr.bf16.mxu0 %v3351_v42  ;;  %v7793_v42 = vld [vmem:[#allocation2 + $0x588] sm:$0xff] }
 0x468   : > { %v3415_v6 = vunpack.c.h.s8.bf16 %v7793_v42 }
 0x469   : > { %4089 = vmatpush1.bf16.msra.mxu1 %v3094_v54  ;;  %v3398_v54 = vunpack.c.h.s8.bf16 %v2710_v32  ;;  %v2249_v32 = vld [vmem:[#allocation4 + $0x98] sm:$0xff] }
 0x46a   : > { %4175 = vmatpush1.bf16.msra.mxu0 %v3350_v55  ;;  %4090 = vmatprep.subr.bf16.mxu1 %v3103_v56  ;;  %v3151_v55 = vunpack.c.l.s8.bf16 %v7788_v40  ;;  %v2348_v56 = vmul.f32 %v2277_v47, %v2232_v1  ;;  %v3167_v1 = vunpack.c.l.s8.bf16 %v2599_v16 }
 0x46b   : > { %4176 = vmatprep.subr.bf16.mxu0 %v3359_v57  ;;  %v3407_v57 = vunpack.c.l.s8.bf16 %v7793_v42  ;;  %v3423_v42 = vunpack.c.l.s8.bf16 %v2727_v17 }
 0x46c   : > { %v2464_v3 = vadd.f32 %v2393_v48, %v2348_v56 }
 0x46d   : > { %4091 = vmatpush1.bf16.msra.mxu1 %v3102_v45  ;;  %v2293_v45 = vrot.slane %v7767_v63, %v7805_v7 }
 0x46e   : > { %4177 = vmatpush1.bf16.msra.mxu0 %v3358_v5  ;;  %4092 = vmatprep.subr.bf16.mxu1 %v3111_v8  ;;  %v3159_v5 = vunpack.c.h.s8.bf16 %v7788_v40  ;;  %v2234_v8 = vld [vmem:[#allocation4 + $0x20] sm:$0xff]  ;;  %v3414_v40 = vunpack.c.h.s8.bf16 %v7807_v49 }
 0x46f   : > { %4178 = vmatprep.subr.bf16.mxu0 %v3367_v9  ;;  %v2480_v9 = vadd.f32 %v2393_v48, %v2364_v60  ;;  %v2350_v23 = vmul.f32 %v2285_v2, %v2234_v8  ;;  %v2397_v48 = vrot.slane %v7769_v36, %v7810_v50 }
 0x471   : > { %4093 = vmatpush1.bf16.msra.mxu1 %v3110_v13  ;;  %v2385_v13 = vrot.slane %v7769_v36, %v7791_v41 }
 0x472   : > { %4179 = vmatpush1.bf16.msra.mxu0 %v3366_v37  ;;  %4094 = vmatprep.subr.bf16.mxu1 %v3119_v14  ;;  %v2250_v37 = vld [vmem:[#allocation4 + $0xa0] sm:$0xff]  ;;  %v2496_v14 = vmax.f32 %v2464_v3, 0.0  ;;  %v2607_v3 = vld [vmem:[#allocation2 + $0x208] sm:$0xff] }
 0x473   : > { %4180 = vmatprep.subr.bf16.mxu0 %v3375_v15  ;;  %v2352_v15 = vmul.f32 %v2293_v45, %v2236_v61 }
 0x475   : > { %4095 = vmatpush1.bf16.msra.mxu1 %v3118_v19  ;;  %v2346_v19 = vmul.f32 %v2269_v59, %v2230_v62  ;;  %v3422_v62 = vunpack.c.l.s8.bf16 %v2726_v46 }
 0x476   : > { %4181 = vmatpush1.bf16.msra.mxu0 %v3374_v20  ;;  %4096 = vmatprep.subr.bf16.mxu1 %v3127_v21  ;;  %v2362_v20 = vmul.f32 %v2269_v59, %v2246_v0  ;;  %v2512_v21 = vmax.f32 %v2480_v9, 0.0  ;;  %v2466_v59 = vadd.f32 %v2401_v31, %v2350_v23  ;;  %v3175_v0 = vunpack.c.h.s8.bf16 %v2599_v16  ;;  %v2606_v16 = vld [vmem:[#allocation2 + $0x200] sm:$0xff] }
 0x477   : > { %4182 = vmatprep.subr.bf16.mxu0 %v3383_v22  ;;  %v2368_v22 = vmul.f32 %v2293_v45, %v2252_v4  ;;  %v2462_v47 = vadd.f32 %v2385_v13, %v2346_v19 }
 0x478   : > { %v2478_v49 = vadd.f32 %v2385_v13, %v2362_v20 }
 0x479   : > { %4097 = vmatpush1.bf16.msra.mxu1 %v3126_v26  ;;  %v2281_v26 = vrot.slane %v7767_v63, %v7810_v50  ;;  %v2494_v8 = vmax.f32 %v2462_v47, 0.0 }
 0x47a   : > { %4183 = vmatpush1.bf16.msra.mxu0 %v3382_v27  ;;  %4098 = vmatprep.subr.bf16.mxu1 %v3135_v28  ;;  %v2297_v27 = vrot.slane %v7767_v63, %v7813_v51  ;;  %v2468_v28 = vadd.f32 %v2409_v52, %v2352_v15  ;;  %v2598_v63 = vld [vmem:[#allocation2 + $0x1c0] sm:$0xff]  ;;  %v2510_v9 = vmax.f32 %v2478_v49, 0.0 }
 0x47b   : > { %4184 = vmatprep.subr.bf16.mxu0 %v3391_v30  ;;  %v2366_v30 = vmul.f32 %v2285_v2, %v2250_v37  ;;  %v2365_v56 = vmul.f32 %v2281_v26, %v2249_v32  ;;  %v3431_v2 = vunpack.c.h.s8.bf16 %v2727_v17  ;;  %v3430_v37 = vunpack.c.h.s8.bf16 %v2726_v46  ;;  %v2734_v17 = vld [vmem:[#allocation2 + $0x600] sm:$0xff]  ;;  %v2743_v32 = vld [vmem:[#allocation2 + $0x648] sm:$0xff] }
 0x47c   : > { %v2500_v43 = vmax.f32 %v2468_v28, 0.0  ;;  %v7847_v23 = vpack.c.bf16 %v2510_v9, %v2494_v8  ;;  %v3191_v28 = vunpack.c.h.s8.bf16 %v2607_v3  ;;  %v2630_v8 = vld [vmem:[#allocation2 + $0x2c0] sm:$0xff] }
 0x47d   : > { %4099 = vmatpush1.bf16.msra.mxu1 %v3134_v18  ;;  %v7838_v18 = vpack.c.bf16 %v2512_v21, %v2496_v14  ;;  %v2482_v60 = vadd.f32 %v2401_v31, %v2366_v30  ;;  %v2481_v45 = vadd.f32 %v2397_v48, %v2365_v56  ;;  %v3183_v14 = vunpack.c.l.s8.bf16 %v2607_v3  ;;  %v2615_v31 = vld [vmem:[#allocation2 + $0x248] sm:$0xff]  ;;  %v2758_v9 = vld [vmem:[#allocation2 + $0x6c0] sm:$0xff] }
 0x47e   : > { %4185 = vmatpush1.bf16.msra.mxu0 %v3390_v38  ;;  %4100 = vmatprep.subr.bf16.mxu1 %v3143_v39  ;;  %v2237_v38 = vld [vmem:[#allocation4 + $0x38] sm:$0xff]  ;;  %v2631_v3 = vld [vmem:[#allocation2 + $0x2c8] sm:$0xff] }
 0x47f   : > { %4186 = vmatprep.subr.bf16.mxu0 %v3399_v29  ;;  %v2253_v39 = vld [vmem:[#allocation4 + $0xb8] sm:$0xff]  ;;  %v2484_v29 = vadd.f32 %v2409_v52, %v2368_v22  ;;  %v2498_v52 = vmax.f32 %v2466_v59, 0.0  ;;  %v2514_v13 = vmax.f32 %v2482_v60, 0.0  ;;  %v2513_v20 = vmax.f32 %v2481_v45, 0.0  ;;  %v2622_v59 = vld [vmem:[#allocation2 + $0x280] sm:$0xff] }
 0x480   : > { %v2750_v60 = vld [vmem:[#allocation2 + $0x680] sm:$0xff] }
 0x481   : > { %4101 = vmatpush1.bf16.msra.mxu1 %v3142_v53  ;;  %v2413_v53 = vrot.slane %v7769_v36, %v7813_v51  ;;  %v2735_v36 = vld [vmem:[#allocation2 + $0x608] sm:$0xff]  ;;  %v3478_v45 = vunpack.c.h.s8.bf16 %v2750_v60 }
 0x482   : > { %4187 = vmatpush1.bf16.msra.mxu0 %v3398_v54  ;;  %4102 = vmatprep.subr.bf16.mxu1 %v3151_v55  ;;  %v2516_v54 = vmax.f32 %v2484_v29, 0.0  ;;  %v2349_v55 = vmul.f32 %v2281_v26, %v2233_v25  ;;  %v3439_v15 = vunpack.c.l.s8.bf16 %v2735_v36  ;;  %v7849_v25 = vpack.c.bf16 %v2514_v13, %v2498_v52 }
 0x483   : > { %4188 = vmatprep.subr.bf16.mxu0 %v3407_v57  ;;  %v2353_v57 = vmul.f32 %v2297_v27, %v2237_v38  ;;  %v3182_v26 = vunpack.c.l.s8.bf16 %v2606_v16  ;;  %v3447_v30 = vunpack.c.h.s8.bf16 %v2735_v36  ;;  %v3190_v29 = vunpack.c.h.s8.bf16 %v2606_v16  ;;  %v2759_v36 = vld [vmem:[#allocation2 + $0x6c8] sm:$0xff] }
 0x484   : > { %v7845_v61 = vpack.c.bf16 %v2516_v54, %v2500_v43  ;;  %v2465_v4 = vadd.f32 %v2397_v48, %v2349_v55  ;;  %v2614_v43 = vld [vmem:[#allocation2 + $0x240] sm:$0xff]  ;;  %v3207_v48 = vunpack.c.h.s8.bf16 %v2615_v31  ;;  %v2623_v54 = vld [vmem:[#allocation2 + $0x288] sm:$0xff]  ;;  %v3230_v52 = vunpack.c.l.s8.bf16 %v2630_v8 }
 0x485   : > { %4103 = vmatpush1.bf16.msra.mxu1 %v3150_v58  ;;  %v2369_v58 = vmul.f32 %v2297_v27, %v2253_v39  ;;  %v3438_v27 = vunpack.c.l.s8.bf16 %v2734_v17  ;;  %v3198_v46 = vunpack.c.l.s8.bf16 %v2614_v43  ;;  %v2751_v55 = vld [vmem:[#allocation2 + $0x688] sm:$0xff]  ;;  %v3206_v56 = vunpack.c.h.s8.bf16 %v2614_v43  ;;  %v2646_v43 = vld [vmem:[#allocation2 + $0x340] sm:$0xff] }
 0x486   : > { %4189 = vmatpush1.bf16.msra.mxu0 %v3406_v24  ;;  %4104 = vmatprep.subr.bf16.mxu1 %v3159_v5  ;;  %v3166_v24 = vunpack.c.l.s8.bf16 %v2598_v63  ;;  %v2469_v5 = vadd.f32 %v2413_v53, %v2353_v57  ;;  %v2497_v19 = vmax.f32 %v2465_v4, 0.0  ;;  %v3471_v49 = vunpack.c.l.s8.bf16 %v2751_v55 }
 0x487   : > { %4190 = vmatprep.subr.bf16.mxu0 %v3415_v6  ;;  %v2485_v6 = vadd.f32 %v2413_v53, %v2369_v58  ;;  %v3463_v53 = vunpack.c.h.s8.bf16 %v2743_v32  ;;  %v3215_v58 = vunpack.c.l.s8.bf16 %v2623_v54  ;;  %v3222_v4 = vunpack.c.h.s8.bf16 %v2622_v59 }
 0x488   : > { %v2501_v21 = vmax.f32 %v2469_v5, 0.0  ;;  %v7851_v38 = vpack.c.bf16 %v2513_v20, %v2497_v19  ;;  %v3231_v5 = vunpack.c.l.s8.bf16 %v2631_v3  ;;  %v3486_v13 = vunpack.c.l.s8.bf16 %v2758_v9 }
 0x489   : > { %4105 = vmatpush1.bf16.msra.mxu1 %v3158_v11  ;;  %v3174_v11 = vunpack.c.h.s8.bf16 %v2598_v63  ;;  %v2517_v22 = vmax.f32 %v2485_v6, 0.0  ;;  %v2742_v63 = vld [vmem:[#allocation2 + $0x640] sm:$0xff]  ;;  %v3487_v6 = vunpack.c.l.s8.bf16 %v2759_v36  ;;  %v3238_v16 = vunpack.c.h.s8.bf16 %v2630_v8  ;;  %v7863_v8 = vld [vmem:[#allocation10 + $0x8] sm:$0xff] }
 0x48a   : > { %4191 = vmatpush1.bf16.msra.mxu0 %v3414_v40  ;;  %4106 = vmatprep.subr.bf16.mxu1 %v3167_v1  ;;  %v3446_v40 = vunpack.c.h.s8.bf16 %v2734_v17  ;;  %v3199_v1 = vunpack.c.l.s8.bf16 %v2615_v31  ;;  %v3454_v47 = vunpack.c.l.s8.bf16 %v2742_v63  ;;  %v3462_v57 = vunpack.c.h.s8.bf16 %v2742_v63  ;;  %v2647_v31 = vld [vmem:[#allocation2 + $0x348] sm:$0xff]  ;;  %v2774_v63 = vld [vmem:[#allocation2 + $0x740] sm:$0xff] }
 0x48b   : > { %4192 = vmatprep.subr.bf16.mxu0 %v3423_v42  ;;  %v7853_v39 = vpack.c.bf16 %v2517_v22, %v2501_v21  ;;  %v3455_v42 = vunpack.c.l.s8.bf16 %v2743_v32  ;;  %v3494_v17 = vunpack.c.h.s8.bf16 %v2758_v9  ;;  %v2638_v21 = vld [vmem:[#allocation2 + $0x300] sm:$0xff]  ;;  %v2775_v32 = vld [vmem:[#allocation2 + $0x748] sm:$0xff] }
 0x48c   : > { %v2766_v22 = vld [vmem:[#allocation2 + $0x700] sm:$0xff] }
 0x48d   : > { %4107 = vmatpush1.bf16.msra.mxu1 %v3166_v24  ;;  %v3214_v24 = vunpack.c.l.s8.bf16 %v2622_v59  ;;  %v2654_v59 = vld [vmem:[#allocation2 + $0x380] sm:$0xff] }
 0x48e   : > { %4193 = vmatpush1.bf16.msra.mxu0 %v3422_v62  ;;  %4108 = vmatprep.subr.bf16.mxu1 %v3175_v0  ;;  %v3470_v62 = vunpack.c.l.s8.bf16 %v2750_v60  ;;  %v3223_v0 = vunpack.c.h.s8.bf16 %v2623_v54  ;;  %v2655_v54 = vld [vmem:[#allocation2 + $0x388] sm:$0xff]  ;;  %v2782_v60 = vld [vmem:[#allocation2 + $0x780] sm:$0xff]  ;;  %v3286_v9 = vunpack.c.h.s8.bf16 %v2654_v59 }
 0x48f   : > { %4194 = vmatprep.subr.bf16.mxu0 %v3431_v2  ;;  %v3479_v2 = vunpack.c.h.s8.bf16 %v2751_v55  ;;  %v2783_v55 = vld [vmem:[#allocation2 + $0x788] sm:$0xff] }
 0x491   : > { %4109 = vmatpush1.bf16.msra.mxu1 %v3174_v11  ;;  %v3239_v11 = vunpack.c.h.s8.bf16 %v2631_v3  ;;  %v3543_v3 = vunpack.c.h.s8.bf16 %v2783_v55 }
 0x492   : > { %4195 = vmatpush1.bf16.msra.mxu0 %v3430_v37  ;;  %4121 = vmatprep.subr.bf16.mxu1 %v3183_v14  ;;  %v3495_v37 = vunpack.c.h.s8.bf16 %v2759_v36  ;;  %v2639_v14 = vld [vmem:[#allocation2 + $0x308] sm:$0xff] }
 0x493   : > { %4207 = vmatprep.subr.bf16.mxu0 %v3439_v15  ;;  %v2767_v15 = vld [vmem:[#allocation2 + $0x708] sm:$0xff]  ;;  %v3247_v19 = vunpack.c.l.s8.bf16 %v2639_v14 }
 0x494   : > { %4111 = vmatmul.mubr.bf16.vlgmr.msra.gmra.mrb[0].mxu1 %v7847_v23  ;;  %v3503_v20 = vunpack.c.l.s8.bf16 %v2767_v15  ;;  %v2663_v36 = vld [vmem:[#allocation2 + $0x3c8] sm:$0xff] }
 0x495   : > { %4197 = vmatmul.mubr.bf16.vlgmr.msra.gmra.mrb[0].mxu0 %v7849_v25  ;;  %4122 = vmatpush1.bf16.msra.mxu1 %v3182_v26  ;;  %v3246_v26 = vunpack.c.l.s8.bf16 %v2638_v21 }
 0x496   : > { %4208 = vmatpush1.bf16.msra.mxu0 %v3438_v27  ;;  %4123 = vmatprep.subr.bf16.mxu1 %v3191_v28  ;;  %v3502_v27 = vunpack.c.l.s8.bf16 %v2766_v22  ;;  %v3255_v28 = vunpack.c.h.s8.bf16 %v2639_v14  ;;  %v2790_v14 = vld [vmem:[#allocation2 + $0x7c0] sm:$0xff] }
 0x497   : > { %4209 = vmatprep.subr.bf16.mxu0 %v3447_v30  ;;  %4153 = vmatprep.mubr.bf16.mxu1 %v7851_v38  ;;  %v3511_v30 = vunpack.c.h.s8.bf16 %v2767_v15 }
 0x498   : > { %4239 = vmatprep.mubr.bf16.mxu0 %v7853_v39 }
 0x499   : > { %4124 = vmatpush1.bf16.msra.mxu1 %v3190_v29  ;;  %v3254_v29 = vunpack.c.h.s8.bf16 %v2638_v21  ;;  %v3303_v21 = vunpack.c.h.s8.bf16 %v2663_v36 }
 0x49a   : > { %4210 = vmatpush1.bf16.msra.mxu0 %v3446_v40  ;;  %4125 = vmatprep.subr.bf16.mxu1 %v3199_v1  ;;  %v3510_v40 = vunpack.c.h.s8.bf16 %v2766_v22  ;;  %v3263_v1 = vunpack.c.l.s8.bf16 %v2647_v31 }
 0x49b   : > { %4211 = vmatprep.subr.bf16.mxu0 %v3455_v42  ;;  %v3519_v42 = vunpack.c.l.s8.bf16 %v2775_v32 }
 0x49d   : > { %4126 = vmatpush1.bf16.msra.mxu1 %v3198_v46  ;;  %v3262_v46 = vunpack.c.l.s8.bf16 %v2646_v43 }
 0x49e   : > { %4212 = vmatpush1.bf16.msra.mxu0 %v3454_v47  ;;  %4127 = vmatprep.subr.bf16.mxu1 %v3207_v48  ;;  %v3518_v47 = vunpack.c.l.s8.bf16 %v2774_v63  ;;  %v3271_v48 = vunpack.c.h.s8.bf16 %v2647_v31 }
 0x49f   : > { %4213 = vmatprep.subr.bf16.mxu0 %v3463_v53  ;;  %v3527_v53 = vunpack.c.h.s8.bf16 %v2775_v32  ;;  %v3558_v32 = vunpack.c.h.s8.bf16 %v2790_v14 }
 0x4a1   : > { %4128 = vmatpush1.bf16.msra.mxu1 %v3206_v56  ;;  %v3270_v56 = vunpack.c.h.s8.bf16 %v2646_v43 }
 0x4a2   : > { %4214 = vmatpush1.bf16.msra.mxu0 %v3462_v57  ;;  %4129 = vmatprep.subr.bf16.mxu1 %v3215_v58  ;;  %v3526_v57 = vunpack.c.h.s8.bf16 %v2774_v63  ;;  %v3279_v58 = vunpack.c.l.s8.bf16 %v2655_v54 }
 0x4a3   : > { %4215 = vmatprep.subr.bf16.mxu0 %v3471_v49  ;;  %v3535_v49 = vunpack.c.l.s8.bf16 %v2783_v55  ;;  %v2553_v55 = vld [vmem:[#allocation2 + $0x58] sm:$0xff] }
 0x4a5   : > { %4130 = vmatpush1.bf16.msra.mxu1 %v3214_v24  ;;  %v7859_v24 = vld [vmem:[#allocation8 + $0x8] sm:$0xff] }
 0x4a6   : > { %4216 = vmatpush1.bf16.msra.mxu0 %v3470_v62  ;;  %4131 = vmatprep.subr.bf16.mxu1 %v3223_v0  ;;  %v3278_v62 = vunpack.c.l.s8.bf16 %v2654_v59  ;;  %v3534_v0 = vunpack.c.l.s8.bf16 %v2782_v60  ;;  %v3073_v59 = vunpack.c.l.s8.bf16 %v2553_v55 }
 0x4a7   : > { %4217 = vmatprep.subr.bf16.mxu0 %v3479_v2  ;;  %v3287_v2 = vunpack.c.h.s8.bf16 %v2655_v54  ;;  %v2807_v54 = vld [vmem:[#allocation2 + $0x848] sm:$0xff] }
 0x4a9   : > { %4132 = vmatpush1.bf16.msra.mxu1 %v3222_v4  ;;  %v2791_v4 = vld [vmem:[#allocation2 + $0x7c8] sm:$0xff] }
 0x4aa   : > { %4218 = vmatpush1.bf16.msra.mxu0 %v3478_v45  ;;  %4133 = vmatprep.subr.bf16.mxu1 %v3231_v5  ;;  %v2305_v45 = vrot.slane %v7859_v24, %v7762_v34  ;;  %v2239_v5 = vld [vmem:[#allocation4 + $0x48] sm:$0xff]  ;;  %v3559_v22 = vunpack.c.h.s8.bf16 %v2791_v4 }
 0x4ab   : > { %4219 = vmatprep.subr.bf16.mxu0 %v3487_v6  ;;  %v2255_v6 = vld [vmem:[#allocation4 + $0xc8] sm:$0xff] }
 0x4ac   : > { %v2355_v15 = vmul.f32 %v2305_v45, %v2239_v5 }
 0x4ad   : > { %4134 = vmatpush1.bf16.msra.mxu1 %v3230_v52  ;;  %v3542_v52 = vunpack.c.h.s8.bf16 %v2782_v60  ;;  %v2806_v60 = vld [vmem:[#allocation2 + $0x840] sm:$0xff] }
 0x4ae   : > { %4220 = vmatpush1.bf16.msra.mxu0 %v3486_v13  ;;  %4135 = vmatprep.subr.bf16.mxu1 %v3239_v11  ;;  %v3295_v13 = vunpack.c.l.s8.bf16 %v2663_v36  ;;  %v3551_v11 = vunpack.c.l.s8.bf16 %v2791_v4  ;;  %v3081_v36 = vunpack.c.h.s8.bf16 %v2553_v55  ;;  %v2815_v4 = vld [vmem:[#allocation2 + $0x888] sm:$0xff]  ;;  %v3590_v5 = vunpack.c.h.s8.bf16 %v2806_v60 }
 0x4af   : > { %4221 = vmatprep.subr.bf16.mxu0 %v3495_v37  ;;  %v2662_v37 = vld [vmem:[#allocation2 + $0x3c0] sm:$0xff] }
 0x4b0   : > { %v3302_v31 = vunpack.c.h.s8.bf16 %v2662_v37 }
 0x4b1   : > { %4136 = vmatpush1.bf16.msra.mxu1 %v3238_v16  ;;  %v2371_v16 = vmul.f32 %v2305_v45, %v2255_v6  ;;  %v2561_v45 = vld [vmem:[#allocation2 + $0x98] sm:$0xff] }
 0x4b2   : > { %4222 = vmatpush1.bf16.msra.mxu0 %v3494_v17  ;;  %4137 = vmatprep.subr.bf16.mxu1 %v3247_v19  ;;  %v2421_v17 = vrot.slane %v7863_v8, %v7762_v34  ;;  %v3294_v19 = vunpack.c.l.s8.bf16 %v2662_v37 }
 0x4b3   : > { %4223 = vmatprep.subr.bf16.mxu0 %v3503_v20  ;;  %v3550_v20 = vunpack.c.l.s8.bf16 %v2790_v14 }
 0x4b5   : > { %4138 = vmatpush1.bf16.msra.mxu1 %v3246_v26  ;;  %v2799_v26 = vld [vmem:[#allocation2 + $0x808] sm:$0xff] }
 0x4b6   : > { %4224 = vmatpush1.bf16.msra.mxu0 %v3502_v27  ;;  %4139 = vmatprep.subr.bf16.mxu1 %v3255_v28  ;;  %v2545_v27 = vld [vmem:[#allocation2 + $0x18] sm:$0xff]  ;;  %v2471_v28 = vadd.f32 %v2421_v17, %v2355_v15  ;;  %v3607_v15 = vunpack.c.h.s8.bf16 %v2815_v4 }
 0x4b7   : > { %4225 = vmatprep.subr.bf16.mxu0 %v3511_v30  ;;  %v2487_v30 = vadd.f32 %v2421_v17, %v2371_v16  ;;  %v3097_v16 = vunpack.c.h.s8.bf16 %v2561_v45  ;;  %v2823_v17 = vld [vmem:[#allocation2 + $0x8c8] sm:$0xff] }
 0x4b8   : > { %v2503_v43 = vmax.f32 %v2471_v28, 0.0  ;;  %v2568_v28 = vld [vmem:[#allocation2 + $0xd0] sm:$0xff] }
 0x4b9   : > { %4140 = vmatpush1.bf16.msra.mxu1 %v3254_v29  ;;  %v3567_v29 = vunpack.c.l.s8.bf16 %v2799_v26  ;;  %v2519_v63 = vmax.f32 %v2487_v30, 0.0 }
 0x4ba   : > { %4226 = vmatpush1.bf16.msra.mxu0 %v3510_v40  ;;  %4141 = vmatprep.subr.bf16.mxu1 %v3263_v1  ;;  %v3057_v40 = vunpack.c.l.s8.bf16 %v2545_v27  ;;  %v2798_v1 = vld [vmem:[#allocation2 + $0x800] sm:$0xff] }
 0x4bb   : > { %4227 = vmatprep.subr.bf16.mxu0 %v3519_v42  ;;  %v2544_v42 = vld [vmem:[#allocation2 + $0x10] sm:$0xff] }
 0x4bd   : > { %4142 = vmatpush1.bf16.msra.mxu1 %v3262_v46  ;;  %v3566_v46 = vunpack.c.l.s8.bf16 %v2798_v1 }
 0x4be   : > { %4228 = vmatpush1.bf16.msra.mxu0 %v3518_v47  ;;  %4143 = vmatprep.subr.bf16.mxu1 %v3271_v48  ;;  %v3056_v47 = vunpack.c.l.s8.bf16 %v2544_v42  ;;  %v3575_v48 = vunpack.c.h.s8.bf16 %v2799_v26 }
 0x4bf   : > { %4229 = vmatprep.subr.bf16.mxu0 %v3527_v53  ;;  %v3065_v53 = vunpack.c.h.s8.bf16 %v2545_v27  ;;  %v2822_v27 = vld [vmem:[#allocation2 + $0x8c0] sm:$0xff] }
 0x4c0   : > { %v3614_v30 = vunpack.c.l.s8.bf16 %v2822_v27 }
 0x4c1   : > { %4144 = vmatpush1.bf16.msra.mxu1 %v3270_v56  ;;  %v7867_v56 = vpack.c.bf16 %v2519_v63, %v2503_v43  ;;  %v3112_v43 = vunpack.c.h.s8.bf16 %v2568_v28 }
 0x4c2   : > { %4230 = vmatpush1.bf16.msra.mxu0 %v3526_v57  ;;  %4145 = vmatprep.subr.bf16.mxu1 %v3279_v58  ;;  %v3574_v57 = vunpack.c.h.s8.bf16 %v2798_v1  ;;  %v3064_v58 = vunpack.c.h.s8.bf16 %v2544_v42  ;;  %v2577_v1 = vld [vmem:[#allocation2 + $0x118] sm:$0xff]  ;;  %v3622_v42 = vunpack.c.h.s8.bf16 %v2822_v27  ;;  %v2855_v27 = vld [vmem:[#allocation2 + $0x9c8] sm:$0xff] }
 0x4c3   : > { %4231 = vmatprep.subr.bf16.mxu0 %v3535_v49  ;;  %v3583_v49 = vunpack.c.l.s8.bf16 %v2807_v54 }
 0x4c5   : > { %4146 = vmatpush1.bf16.msra.mxu1 %v3278_v62  ;;  %v2552_v62 = vld [vmem:[#allocation2 + $0x50] sm:$0xff] }
 0x4c6   : > { %4232 = vmatpush1.bf16.msra.mxu0 %v3534_v0  ;;  %4147 = vmatprep.subr.bf16.mxu1 %v3287_v2  ;;  %v3582_v0 = vunpack.c.l.s8.bf16 %v2806_v60  ;;  %v3072_v2 = vunpack.c.l.s8.bf16 %v2552_v62  ;;  %v3080_v6 = vunpack.c.h.s8.bf16 %v2552_v62 }
 0x4c7   : > { %4233 = vmatprep.subr.bf16.mxu0 %v3543_v3  ;;  %v3591_v3 = vunpack.c.h.s8.bf16 %v2807_v54 }
 0x4c9   : > { %4148 = vmatpush1.bf16.msra.mxu1 %v3286_v9  ;;  %v3599_v9 = vunpack.c.l.s8.bf16 %v2815_v4 }
 0x4ca   : > { %4234 = vmatpush1.bf16.msra.mxu0 %v3542_v52  ;;  %4149 = vmatprep.subr.bf16.mxu1 %v3295_v13  ;;  %v3089_v52 = vunpack.c.l.s8.bf16 %v2561_v45  ;;  %v2814_v13 = vld [vmem:[#allocation2 + $0x880] sm:$0xff] }
 0x4cb   : > { %4235 = vmatprep.subr.bf16.mxu0 %v3551_v11  ;;  %v2560_v11 = vld [vmem:[#allocation2 + $0x90] sm:$0xff]  ;;  %v3598_v37 = vunpack.c.l.s8.bf16 %v2814_v13 }
 0x4cc   : > { %v3088_v14 = vunpack.c.l.s8.bf16 %v2560_v11 }
 0x4cd   : > { %4150 = vmatpush1.bf16.msra.mxu1 %v3294_v19  ;;  %v2569_v19 = vld [vmem:[#allocation2 + $0xd8] sm:$0xff] }
 0x4ce   : > { %4236 = vmatpush1.bf16.msra.mxu0 %v3550_v20  ;;  %4151 = vmatprep.subr.bf16.mxu1 %v3303_v21  ;;  %v3606_v20 = vunpack.c.h.s8.bf16 %v2814_v13  ;;  %v3096_v21 = vunpack.c.h.s8.bf16 %v2560_v11  ;;  %v3105_v26 = vunpack.c.l.s8.bf16 %v2569_v19 }
 0x4cf   : > { %4237 = vmatprep.subr.bf16.mxu0 %v3559_v22  ;;  %v3615_v22 = vunpack.c.l.s8.bf16 %v2823_v17 }
 0x4d1   : > { %4152 = vmatpush1.bf16.msra.mxu1 %v3302_v31  ;;  %v3104_v31 = vunpack.c.l.s8.bf16 %v2568_v28  ;;  %v2601_v28 = vld [vmem:[#allocation2 + $0x1d8] sm:$0xff] }
 0x4d2   : > { %4238 = vmatpush1.bf16.msra.mxu0 %v3558_v32  ;;  %4422 = vmatprep.subr.bf16.mxu1 %v3057_v40  ;;  %v3623_v32 = vunpack.c.h.s8.bf16 %v2823_v17  ;;  %v2831_v40 = vld [vmem:[#allocation2 + $0x908] sm:$0xff] }
 0x4d3   : > { %4250 = vmatprep.subr.bf16.mxu0 %v3567_v29  ;;  %v3113_v29 = vunpack.c.h.s8.bf16 %v2569_v19  ;;  %v3631_v63 = vunpack.c.l.s8.bf16 %v2831_v40  ;;  %v3639_v55 = vunpack.c.h.s8.bf16 %v2831_v40  ;;  %v2241_v40 = vld [vmem:[#allocation4 + $0x58] sm:$0xff] }
 0x4d4   : > { %4154 = vmatmul.mubr.bf16.vlgmr.msra.gmra.mrb[0].mxu1 %v7838_v18 }
 0x4d5   : > { %4240 = vmatmul.mubr.bf16.vlgmr.msra.gmra.mrb[0].mxu0 %v7845_v61  ;;  %4423 = vmatpush1.bf16.msra.mxu1 %v3056_v47  ;;  %v2830_v47 = vld [vmem:[#allocation2 + $0x900] sm:$0xff] }
 0x4d6   : > { %4251 = vmatpush1.bf16.msra.mxu0 %v3566_v46  ;;  %4424 = vmatprep.subr.bf16.mxu1 %v3065_v53  ;;  %v3121_v46 = vunpack.c.l.s8.bf16 %v2577_v1  ;;  %v3630_v53 = vunpack.c.l.s8.bf16 %v2830_v47 }
 0x4d7   : > { %4252 = vmatprep.subr.bf16.mxu0 %v3575_v48  ;;  %4282 = vmatprep.mubr.bf16.mxu0 %v7867_v56  ;;  %v2576_v48 = vld [vmem:[#allocation2 + $0x110] sm:$0xff] }
 0x4d8   : > { %4454 = vmatprep.mubr.bf16.mxu1 %v7779_v10  ;;  %v3120_v54 = vunpack.c.l.s8.bf16 %v2576_v48  ;;  %v3128_v60 = vunpack.c.h.s8.bf16 %v2576_v48  ;;  %v2600_v48 = vld [vmem:[#allocation2 + $0x1d0] sm:$0xff] }
 0x4d9   : > { %4425 = vmatpush1.bf16.msra.mxu1 %v3064_v58  ;;  %v2839_v58 = vld [vmem:[#allocation2 + $0x948] sm:$0xff] }
 0x4da   : > { %4253 = vmatpush1.bf16.msra.mxu0 %v3574_v57  ;;  %4426 = vmatprep.subr.bf16.mxu1 %v3073_v59  ;;  %v3129_v57 = vunpack.c.h.s8.bf16 %v2577_v1  ;;  %v3638_v59 = vunpack.c.h.s8.bf16 %v2830_v47  ;;  %v3647_v62 = vunpack.c.l.s8.bf16 %v2839_v58  ;;  %v3655_v45 = vunpack.c.h.s8.bf16 %v2839_v58  ;;  %v2257_v1 = vld [vmem:[#allocation4 + $0xd8] sm:$0xff]  ;;  %v2854_v47 = vld [vmem:[#allocation2 + $0x9c0] sm:$0xff] }
 0x4db   : > { %4254 = vmatprep.subr.bf16.mxu0 %v3583_v49  ;;  %v2585_v49 = vld [vmem:[#allocation2 + $0x158] sm:$0xff] }
 0x4dd   : > { %4427 = vmatpush1.bf16.msra.mxu1 %v3072_v2  ;;  %v2838_v2 = vld [vmem:[#allocation2 + $0x940] sm:$0xff] }
 0x4de   : > { %4255 = vmatpush1.bf16.msra.mxu0 %v3582_v0  ;;  %4428 = vmatprep.subr.bf16.mxu1 %v3081_v36  ;;  %v3137_v0 = vunpack.c.l.s8.bf16 %v2585_v49  ;;  %v3646_v36 = vunpack.c.l.s8.bf16 %v2838_v2 }
 0x4df   : > { %4256 = vmatprep.subr.bf16.mxu0 %v3591_v3  ;;  %v2584_v3 = vld [vmem:[#allocation2 + $0x150] sm:$0xff] }
 0x4e0   : > { %v3136_v4 = vunpack.c.l.s8.bf16 %v2584_v3  ;;  %v3144_v13 = vunpack.c.h.s8.bf16 %v2584_v3 }
 0x4e1   : > { %4429 = vmatpush1.bf16.msra.mxu1 %v3080_v6  ;;  %v2847_v6 = vld [vmem:[#allocation2 + $0x988] sm:$0xff] }
 0x4e2   : > { %4257 = vmatpush1.bf16.msra.mxu0 %v3590_v5  ;;  %4430 = vmatprep.subr.bf16.mxu1 %v3089_v52  ;;  %v3145_v5 = vunpack.c.h.s8.bf16 %v2585_v49  ;;  %v3654_v52 = vunpack.c.h.s8.bf16 %v2838_v2  ;;  %v3663_v11 = vunpack.c.l.s8.bf16 %v2847_v6  ;;  %v3678_v49 = vunpack.c.l.s8.bf16 %v2854_v47  ;;  %v2609_v2 = vld [vmem:[#allocation2 + $0x218] sm:$0xff] }
 0x4e3   : > { %4258 = vmatprep.subr.bf16.mxu0 %v3599_v9  ;;  %v2593_v9 = vld [vmem:[#allocation2 + $0x198] sm:$0xff] }
 0x4e5   : > { %4431 = vmatpush1.bf16.msra.mxu1 %v3088_v14  ;;  %v2846_v14 = vld [vmem:[#allocation2 + $0x980] sm:$0xff] }
 0x4e6   : > { %4259 = vmatpush1.bf16.msra.mxu0 %v3598_v37  ;;  %4432 = vmatprep.subr.bf16.mxu1 %v3097_v16  ;;  %v3153_v37 = vunpack.c.l.s8.bf16 %v2593_v9  ;;  %v2301_v16 = vrot.slane %v7859_v24, %v7791_v41  ;;  %v3662_v17 = vunpack.c.l.s8.bf16 %v2846_v14 }
 0x4e7   : > { %4260 = vmatprep.subr.bf16.mxu0 %v3607_v15  ;;  %v2592_v15 = vld [vmem:[#allocation2 + $0x190] sm:$0xff] }
 0x4e8   : > { %v3152_v19 = vunpack.c.l.s8.bf16 %v2592_v15 }
 0x4e9   : > { %4433 = vmatpush1.bf16.msra.mxu1 %v3096_v21  ;;  %v2254_v21 = vld [vmem:[#allocation4 + $0xc0] sm:$0xff] }
 0x4ea   : > { %4261 = vmatpush1.bf16.msra.mxu0 %v3606_v20  ;;  %4434 = vmatprep.subr.bf16.mxu1 %v3105_v26  ;;  %v2238_v20 = vld [vmem:[#allocation4 + $0x40] sm:$0xff]  ;;  %v3161_v26 = vunpack.c.h.s8.bf16 %v2593_v9 }
 0x4eb   : > { %4262 = vmatprep.subr.bf16.mxu0 %v3615_v22  ;;  %v3671_v22 = vunpack.c.h.s8.bf16 %v2847_v6  ;;  %v3176_v6 = vunpack.c.h.s8.bf16 %v2600_v48 }
 0x4ed   : > { %4435 = vmatpush1.bf16.msra.mxu1 %v3104_v31  ;;  %v2354_v31 = vmul.f32 %v2301_v16, %v2238_v20  ;;  %v3193_v20 = vunpack.c.h.s8.bf16 %v2609_v2 }
 0x4ee   : > { %4263 = vmatpush1.bf16.msra.mxu0 %v3614_v30  ;;  %4436 = vmatprep.subr.bf16.mxu1 %v3113_v29  ;;  %v2313_v30 = vrot.slane %v7859_v24, %v7810_v50  ;;  %v2417_v29 = vrot.slane %v7863_v8, %v7791_v41 }
 0x4ef   : > { %4264 = vmatprep.subr.bf16.mxu0 %v3623_v32  ;;  %v2370_v32 = vmul.f32 %v2301_v16, %v2254_v21  ;;  %v2871_v21 = vld [vmem:[#allocation2 + $0xa48] sm:$0xff] }
 0x4f1   : > { %4437 = vmatpush1.bf16.msra.mxu1 %v3112_v43  ;;  %v3160_v43 = vunpack.c.h.s8.bf16 %v2592_v15  ;;  %v2486_v58 = vadd.f32 %v2417_v29, %v2370_v32  ;;  %v2870_v32 = vld [vmem:[#allocation2 + $0xa40] sm:$0xff] }
 0x4f2   : > { %4265 = vmatpush1.bf16.msra.mxu0 %v3622_v42  ;;  %4438 = vmatprep.subr.bf16.mxu1 %v3121_v46  ;;  %v3670_v42 = vunpack.c.h.s8.bf16 %v2846_v14  ;;  %v3169_v46 = vunpack.c.l.s8.bf16 %v2601_v28 }
 0x4f3   : > { %4266 = vmatprep.subr.bf16.mxu0 %v3631_v63  ;;  %v3679_v63 = vunpack.c.l.s8.bf16 %v2855_v27 }
 0x4f5   : > { %4439 = vmatpush1.bf16.msra.mxu1 %v3120_v54  ;;  %v2373_v54 = vmul.f32 %v2313_v30, %v2257_v1 }
 0x4f6   : > { %4267 = vmatpush1.bf16.msra.mxu0 %v3630_v53  ;;  %4440 = vmatprep.subr.bf16.mxu1 %v3129_v57  ;;  %v2357_v53 = vmul.f32 %v2313_v30, %v2241_v40  ;;  %v2470_v57 = vadd.f32 %v2417_v29, %v2354_v31  ;;  %v3711_v30 = vunpack.c.l.s8.bf16 %v2871_v21  ;;  %v2616_v29 = vld [vmem:[#allocation2 + $0x250] sm:$0xff]  ;;  %v3710_v40 = vunpack.c.l.s8.bf16 %v2870_v32 }
 0x4f7   : > { %4268 = vmatprep.subr.bf16.mxu0 %v3639_v55  ;;  %v2429_v55 = vrot.slane %v7863_v8, %v7810_v50  ;;  %v3200_v1 = vunpack.c.l.s8.bf16 %v2616_v29 }
 0x4f9   : > { %4441 = vmatpush1.bf16.msra.mxu1 %v3128_v60  ;;  %v3687_v60 = vunpack.c.h.s8.bf16 %v2855_v27  ;;  %v2473_v3 = vadd.f32 %v2429_v55, %v2357_v53 }
 0x4fa   : > { %4269 = vmatpush1.bf16.msra.mxu0 %v3638_v59  ;;  %4442 = vmatprep.subr.bf16.mxu1 %v3137_v0  ;;  %v3168_v59 = vunpack.c.l.s8.bf16 %v2600_v48  ;;  %v2863_v0 = vld [vmem:[#allocation2 + $0xa08] sm:$0xff]  ;;  %v3208_v48 = vunpack.c.h.s8.bf16 %v2616_v29 }
 0x4fb   : > { %4270 = vmatprep.subr.bf16.mxu0 %v3647_v62  ;;  %v3177_v62 = vunpack.c.h.s8.bf16 %v2601_v28  ;;  %v3695_v9 = vunpack.c.l.s8.bf16 %v2863_v0 }
 0x4fd   : > { %4443 = vmatpush1.bf16.msra.mxu1 %v3136_v4  ;;  %v2502_v4 = vmax.f32 %v2470_v57, 0.0  ;;  %v2624_v57 = vld [vmem:[#allocation2 + $0x290] sm:$0xff] }
 0x4fe   : > { %4271 = vmatpush1.bf16.msra.mxu0 %v3646_v36  ;;  %4444 = vmatprep.subr.bf16.mxu1 %v3145_v5  ;;  %v2489_v36 = vadd.f32 %v2429_v55, %v2373_v54  ;;  %v3686_v5 = vunpack.c.h.s8.bf16 %v2854_v47  ;;  %v3718_v47 = vunpack.c.h.s8.bf16 %v2870_v32  ;;  %v2878_v55 = vld [vmem:[#allocation2 + $0xa80] sm:$0xff]  ;;  %v2649_v32 = vld [vmem:[#allocation2 + $0x358] sm:$0xff] }
 0x4ff   : > { %4272 = vmatprep.subr.bf16.mxu0 %v3655_v45  ;;  %v2518_v45 = vmax.f32 %v2486_v58, 0.0  ;;  %v3726_v58 = vunpack.c.l.s8.bf16 %v2878_v55 }
 0x500   : > { %v2521_v14 = vmax.f32 %v2489_v36, 0.0 }
 0x501   : > { %4445 = vmatpush1.bf16.msra.mxu1 %v3144_v13  ;;  %v2862_v13 = vld [vmem:[#allocation2 + $0xa00] sm:$0xff]  ;;  %v7881_v15 = vpack.c.bf16 %v2518_v45, %v2502_v4 }
 0x502   : > { %4273 = vmatpush1.bf16.msra.mxu0 %v3654_v52  ;;  %4446 = vmatprep.subr.bf16.mxu1 %v3153_v37  ;;  %v3185_v52 = vunpack.c.l.s8.bf16 %v2609_v2  ;;  %v2505_v37 = vmax.f32 %v2473_v3, 0.0  ;;  %v3694_v16 = vunpack.c.l.s8.bf16 %v2862_v13  ;;  %v3702_v27 = vunpack.c.h.s8.bf16 %v2862_v13  ;;  %v2886_v45 = vld [vmem:[#allocation2 + $0xac0] sm:$0xff] }
 0x503   : > { %4274 = vmatprep.subr.bf16.mxu0 %v3663_v11  ;;  %v2608_v11 = vld [vmem:[#allocation2 + $0x210] sm:$0xff]  ;;  %v3734_v2 = vunpack.c.h.s8.bf16 %v2878_v55  ;;  %v3224_v3 = vunpack.c.h.s8.bf16 %v2624_v57  ;;  %v2657_v55 = vld [vmem:[#allocation2 + $0x398] sm:$0xff] }
 0x504   : > { %v3192_v28 = vunpack.c.h.s8.bf16 %v2608_v11 }
 0x505   : > { %4447 = vmatpush1.bf16.msra.mxu1 %v3152_v19  ;;  %v3703_v19 = vunpack.c.h.s8.bf16 %v2863_v0  ;;  %v2633_v0 = vld [vmem:[#allocation2 + $0x2d8] sm:$0xff] }
 0x506   : > { %4275 = vmatpush1.bf16.msra.mxu0 %v3662_v17  ;;  %4448 = vmatprep.subr.bf16.mxu1 %v3161_v26  ;;  %v3184_v17 = vunpack.c.l.s8.bf16 %v2608_v11  ;;  %v7883_v26 = vpack.c.bf16 %v2521_v14, %v2505_v37  ;;  %v3233_v4 = vunpack.c.l.s8.bf16 %v2633_v0  ;;  %v3241_v13 = vunpack.c.h.s8.bf16 %v2633_v0  ;;  %v2895_v11 = vld [vmem:[#allocation2 + $0xb08] sm:$0xff]  ;;  %v2641_v37 = vld [vmem:[#allocation2 + $0x318] sm:$0xff] }
 0x507   : > { %4276 = vmatprep.subr.bf16.mxu0 %v3671_v22  ;;  %v2617_v22 = vld [vmem:[#allocation2 + $0x258] sm:$0xff]  ;;  %v3750_v14 = vunpack.c.h.s8.bf16 %v2886_v45  ;;  %v2309_v0 = vrot.slane %v7859_v24, %v7786_v33 }
 0x508   : > { %v3201_v31 = vunpack.c.l.s8.bf16 %v2617_v22 }
 0x509   : > { %4449 = vmatpush1.bf16.msra.mxu1 %v3160_v43  ;;  %v3209_v43 = vunpack.c.h.s8.bf16 %v2617_v22 }
 0x50a   : > { %4277 = vmatpush1.bf16.msra.mxu0 %v3670_v42  ;;  %4450 = vmatprep.subr.bf16.mxu1 %v3169_v46  ;;  %v3719_v42 = vunpack.c.h.s8.bf16 %v2871_v21  ;;  %v2625_v46 = vld [vmem:[#allocation2 + $0x298] sm:$0xff]  ;;  %v2640_v21 = vld [vmem:[#allocation2 + $0x310] sm:$0xff] }
 0x50b   : > { %4278 = vmatprep.subr.bf16.mxu0 %v3679_v63  ;;  %v2879_v63 = vld [vmem:[#allocation2 + $0xa88] sm:$0xff]  ;;  %v3217_v54 = vunpack.c.l.s8.bf16 %v2625_v46 }
 0x50c   : > { %v3727_v53 = vunpack.c.l.s8.bf16 %v2879_v63 }
 0x50d   : > { %4451 = vmatpush1.bf16.msra.mxu1 %v3168_v59  ;;  %v3735_v59 = vunpack.c.h.s8.bf16 %v2879_v63  ;;  %v2648_v63 = vld [vmem:[#allocation2 + $0x350] sm:$0xff] }
 0x50e   : > { %4279 = vmatpush1.bf16.msra.mxu0 %v3678_v49  ;;  %4452 = vmatprep.subr.bf16.mxu1 %v3177_v62  ;;  %v3216_v49 = vunpack.c.l.s8.bf16 %v2624_v57  ;;  %v2887_v62 = vld [vmem:[#allocation2 + $0xac8] sm:$0xff] }
 0x50f   : > { %4280 = vmatprep.subr.bf16.mxu0 %v3687_v60  ;;  %v3225_v60 = vunpack.c.h.s8.bf16 %v2625_v46  ;;  %v3743_v36 = vunpack.c.l.s8.bf16 %v2887_v62 }
 0x511   : > { %4453 = vmatpush1.bf16.msra.mxu1 %v3176_v6  ;;  %v3742_v6 = vunpack.c.l.s8.bf16 %v2886_v45 }
 0x512   : > { %4281 = vmatpush1.bf16.msra.mxu0 %v3686_v5  ;;  %4465 = vmatprep.subr.bf16.mxu1 %v3185_v52  ;;  %v2632_v5 = vld [vmem:[#allocation2 + $0x2d0] sm:$0xff]  ;;  %v3751_v52 = vunpack.c.h.s8.bf16 %v2887_v62 }
 0x513   : > { %4293 = vmatprep.subr.bf16.mxu0 %v3695_v9  ;;  %v3232_v9 = vunpack.c.l.s8.bf16 %v2632_v5  ;;  %v2656_v62 = vld [vmem:[#allocation2 + $0x390] sm:$0xff] }
 0x514   : > { %4455 = vmatmul.mubr.bf16.vlgmr.msra.gmra.mrb[4].mxu1 %v7847_v23 }
 0x515   : > { %4283 = vmatmul.mubr.bf16.vlgmr.msra.gmra.mrb[0].mxu0 %v7881_v15  ;;  %4466 = vmatpush1.bf16.msra.mxu1 %v3184_v17  ;;  %v3759_v17 = vunpack.c.l.s8.bf16 %v2895_v11 }
 0x516   : > { %4294 = vmatpush1.bf16.msra.mxu0 %v3694_v16  ;;  %4467 = vmatprep.subr.bf16.mxu1 %v3193_v20  ;;  %v3240_v16 = vunpack.c.h.s8.bf16 %v2632_v5  ;;  %v2894_v20 = vld [vmem:[#allocation2 + $0xb00] sm:$0xff]  ;;  %v3289_v5 = vunpack.c.h.s8.bf16 %v2657_v55 }
 0x517   : > { %4295 = vmatprep.subr.bf16.mxu0 %v3703_v19  ;;  %4325 = vmatprep.mubr.bf16.mxu0 %v7883_v26  ;;  %v3249_v19 = vunpack.c.l.s8.bf16 %v2641_v37  ;;  %v3758_v22 = vunpack.c.l.s8.bf16 %v2894_v20  ;;  %v3766_v29 = vunpack.c.h.s8.bf16 %v2894_v20 }
 0x518   : > { %4497 = vmatprep.mubr.bf16.mxu1 %v7851_v38 }
 0x519   : > { %4468 = vmatpush1.bf16.msra.mxu1 %v3192_v28  ;;  %v3767_v28 = vunpack.c.h.s8.bf16 %v2895_v11 }
 0x51a   : > { %4296 = vmatpush1.bf16.msra.mxu0 %v3702_v27  ;;  %4469 = vmatprep.subr.bf16.mxu1 %v3201_v31  ;;  %v3248_v27 = vunpack.c.l.s8.bf16 %v2640_v21  ;;  %v2903_v31 = vld [vmem:[#allocation2 + $0xb48] sm:$0xff] }
 0x51b   : > { %4297 = vmatprep.subr.bf16.mxu0 %v3711_v30  ;;  %v3257_v30 = vunpack.c.h.s8.bf16 %v2641_v37  ;;  %v2425_v37 = vrot.slane %v7863_v8, %v7786_v33 }
 0x51d   : > { %4470 = vmatpush1.bf16.msra.mxu1 %v3200_v1  ;;  %v3775_v1 = vunpack.c.l.s8.bf16 %v2903_v31 }
 0x51e   : > { %4298 = vmatpush1.bf16.msra.mxu0 %v3710_v40  ;;  %4471 = vmatprep.subr.bf16.mxu1 %v3209_v43  ;;  %v3256_v40 = vunpack.c.h.s8.bf16 %v2640_v21  ;;  %v2902_v43 = vld [vmem:[#allocation2 + $0xb40] sm:$0xff] }
 0x51f   : > { %4299 = vmatprep.subr.bf16.mxu0 %v3719_v42  ;;  %v3265_v42 = vunpack.c.l.s8.bf16 %v2649_v32  ;;  %v3774_v46 = vunpack.c.l.s8.bf16 %v2902_v43  ;;  %v3782_v57 = vunpack.c.h.s8.bf16 %v2902_v43  ;;  %v2927_v43 = vld [vmem:[#allocation2 + $0xc08] sm:$0xff] }
 0x521   : > { %4472 = vmatpush1.bf16.msra.mxu1 %v3208_v48  ;;  %v3783_v48 = vunpack.c.h.s8.bf16 %v2903_v31 }
 0x522   : > { %4300 = vmatpush1.bf16.msra.mxu0 %v3718_v47  ;;  %4473 = vmatprep.subr.bf16.mxu1 %v3217_v54  ;;  %v3264_v47 = vunpack.c.l.s8.bf16 %v2648_v63  ;;  %v2911_v54 = vld [vmem:[#allocation2 + $0xb88] sm:$0xff] }
 0x523   : > { %4301 = vmatprep.subr.bf16.mxu0 %v3727_v53  ;;  %v3273_v53 = vunpack.c.h.s8.bf16 %v2649_v32  ;;  %v3799_v45 = vunpack.c.h.s8.bf16 %v2911_v54 }
 0x525   : > { %4474 = vmatpush1.bf16.msra.mxu1 %v3216_v49  ;;  %v3791_v49 = vunpack.c.l.s8.bf16 %v2911_v54 }
 0x526   : > { %4302 = vmatpush1.bf16.msra.mxu0 %v3726_v58  ;;  %4475 = vmatprep.subr.bf16.mxu1 %v3225_v60  ;;  %v3272_v58 = vunpack.c.h.s8.bf16 %v2648_v63  ;;  %v2910_v60 = vld [vmem:[#allocation2 + $0xb80] sm:$0xff]  ;;  %v2673_v63 = vld [vmem:[#allocation2 + $0x418] sm:$0xff] }
 0x527   : > { %4303 = vmatprep.subr.bf16.mxu0 %v3735_v59  ;;  %v3281_v59 = vunpack.c.l.s8.bf16 %v2657_v55  ;;  %v3823_v55 = vunpack.c.l.s8.bf16 %v2927_v43 }
 0x529   : > { %4476 = vmatpush1.bf16.msra.mxu1 %v3224_v3  ;;  %v3280_v3 = vunpack.c.l.s8.bf16 %v2656_v62 }
 0x52a   : > { %4304 = vmatpush1.bf16.msra.mxu0 %v3734_v2  ;;  %4477 = vmatprep.subr.bf16.mxu1 %v3233_v4  ;;  %v3790_v2 = vunpack.c.l.s8.bf16 %v2910_v60  ;;  %v2256_v4 = vld [vmem:[#allocation4 + $0xd0] sm:$0xff] }
 0x52b   : > { %4305 = vmatprep.subr.bf16.mxu0 %v3743_v36  ;;  %v2240_v36 = vld [vmem:[#allocation4 + $0x50] sm:$0xff]  ;;  %v2372_v11 = vmul.f32 %v2309_v0, %v2256_v4  ;;  %v2935_v4 = vld [vmem:[#allocation2 + $0xc48] sm:$0xff] }
 0x52d   : > { %4478 = vmatpush1.bf16.msra.mxu1 %v3232_v9  ;;  %v2665_v9 = vld [vmem:[#allocation2 + $0x3d8] sm:$0xff]  ;;  %v2488_v32 = vadd.f32 %v2425_v37, %v2372_v11  ;;  %v2934_v11 = vld [vmem:[#allocation2 + $0xc40] sm:$0xff] }
 0x52e   : > { %4306 = vmatpush1.bf16.msra.mxu0 %v3742_v6  ;;  %4479 = vmatprep.subr.bf16.mxu1 %v3241_v13  ;;  %v2919_v6 = vld [vmem:[#allocation2 + $0xbc8] sm:$0xff]  ;;  %v2356_v13 = vmul.f32 %v2309_v0, %v2240_v36  ;;  %v3297_v21 = vunpack.c.l.s8.bf16 %v2665_v9  ;;  %v3321_v36 = vunpack.c.h.s8.bf16 %v2673_v63 }
 0x52f   : > { %4307 = vmatprep.subr.bf16.mxu0 %v3751_v52  ;;  %v2321_v52 = vrot.slane %v7859_v24, %v7765_v35  ;;  %v3807_v20 = vunpack.c.l.s8.bf16 %v2919_v6  ;;  %v2437_v24 = vrot.slane %v7863_v8, %v7765_v35 }
 0x530   : > { %v2472_v31 = vadd.f32 %v2425_v37, %v2356_v13  ;;  %v2680_v37 = vld [vmem:[#allocation2 + $0x450] sm:$0xff] }
 0x531   : > { %4480 = vmatpush1.bf16.msra.mxu1 %v3240_v16  ;;  %v2259_v16 = vld [vmem:[#allocation4 + $0xe8] sm:$0xff] }
 0x532   : > { %4308 = vmatpush1.bf16.msra.mxu0 %v3750_v14  ;;  %4481 = vmatprep.subr.bf16.mxu1 %v3249_v19  ;;  %v2243_v14 = vld [vmem:[#allocation4 + $0x68] sm:$0xff]  ;;  %v3288_v19 = vunpack.c.h.s8.bf16 %v2656_v62 }
 0x533   : > { %4309 = vmatprep.subr.bf16.mxu0 %v3759_v17  ;;  %v3798_v17 = vunpack.c.h.s8.bf16 %v2910_v60 }
 0x535   : > { %4482 = vmatpush1.bf16.msra.mxu1 %v3248_v27  ;;  %v2664_v27 = vld [vmem:[#allocation2 + $0x3d0] sm:$0xff] }
 0x536   : > { %4310 = vmatpush1.bf16.msra.mxu0 %v3758_v22  ;;  %4483 = vmatprep.subr.bf16.mxu1 %v3257_v30  ;;  %v2918_v22 = vld [vmem:[#allocation2 + $0xbc0] sm:$0xff]  ;;  %v2375_v30 = vmul.f32 %v2321_v52, %v2259_v16  ;;  %v3304_v8 = vunpack.c.h.s8.bf16 %v2664_v27  ;;  %v3328_v16 = vunpack.c.l.s8.bf16 %v2680_v37 }
 0x537   : > { %4311 = vmatprep.subr.bf16.mxu0 %v3767_v28  ;;  %v2359_v28 = vmul.f32 %v2321_v52, %v2243_v14  ;;  %v3814_v54 = vunpack.c.h.s8.bf16 %v2918_v22  ;;  %v3839_v52 = vunpack.c.l.s8.bf16 %v2935_v4  ;;  %v3838_v14 = vunpack.c.l.s8.bf16 %v2934_v11 }
 0x539   : > { %4484 = vmatpush1.bf16.msra.mxu1 %v3256_v40  ;;  %v3296_v40 = vunpack.c.l.s8.bf16 %v2664_v27  ;;  %v3336_v27 = vunpack.c.h.s8.bf16 %v2680_v37 }
 0x53a   : > { %4312 = vmatpush1.bf16.msra.mxu0 %v3766_v29  ;;  %4485 = vmatprep.subr.bf16.mxu1 %v3265_v42  ;;  %v3806_v29 = vunpack.c.l.s8.bf16 %v2918_v22  ;;  %v3305_v42 = vunpack.c.h.s8.bf16 %v2665_v9  ;;  %v3846_v22 = vunpack.c.h.s8.bf16 %v2934_v11  ;;  %v2713_v11 = vld [vmem:[#allocation2 + $0x558] sm:$0xff] }
 0x53b   : > { %4313 = vmatprep.subr.bf16.mxu0 %v3775_v1  ;;  %v3815_v1 = vunpack.c.h.s8.bf16 %v2919_v6 }
 0x53d   : > { %4486 = vmatpush1.bf16.msra.mxu1 %v3264_v47  ;;  %v2491_v47 = vadd.f32 %v2437_v24, %v2375_v30 }
 0x53e   : > { %4314 = vmatpush1.bf16.msra.mxu0 %v3774_v46  ;;  %4487 = vmatprep.subr.bf16.mxu1 %v3273_v53  ;;  %v2475_v46 = vadd.f32 %v2437_v24, %v2359_v28  ;;  %v2520_v53 = vmax.f32 %v2488_v32, 0.0  ;;  %v2942_v24 = vld [vmem:[#allocation2 + $0xc80] sm:$0xff] }
 0x53f   : > { %4315 = vmatprep.subr.bf16.mxu0 %v3783_v48  ;;  %v2504_v48 = vmax.f32 %v2472_v31, 0.0  ;;  %v2523_v60 = vmax.f32 %v2491_v47, 0.0  ;;  %v2688_v31 = vld [vmem:[#allocation2 + $0x490] sm:$0xff]  ;;  %v3854_v32 = vunpack.c.l.s8.bf16 %v2942_v24 }
 0x541   : > { %4488 = vmatpush1.bf16.msra.mxu1 %v3272_v58  ;;  %v2926_v58 = vld [vmem:[#allocation2 + $0xc00] sm:$0xff]  ;;  %v7897_v62 = vpack.c.bf16 %v2520_v53, %v2504_v48 }
 0x542   : > { %4316 = vmatpush1.bf16.msra.mxu0 %v3782_v57  ;;  %4489 = vmatprep.subr.bf16.mxu1 %v3281_v59  ;;  %v3313_v57 = vunpack.c.l.s8.bf16 %v2673_v63  ;;  %v2507_v59 = vmax.f32 %v2475_v46, 0.0  ;;  %v3822_v0 = vunpack.c.l.s8.bf16 %v2926_v58  ;;  %v3830_v6 = vunpack.c.h.s8.bf16 %v2926_v58  ;;  %v2950_v53 = vld [vmem:[#allocation2 + $0xcc0] sm:$0xff] }
 0x543   : > { %4317 = vmatprep.subr.bf16.mxu0 %v3791_v49  ;;  %v2672_v49 = vld [vmem:[#allocation2 + $0x410] sm:$0xff]  ;;  %v3862_v63 = vunpack.c.h.s8.bf16 %v2942_v24  ;;  %v3352_v46 = vunpack.c.h.s8.bf16 %v2688_v31  ;;  %v2721_v24 = vld [vmem:[#allocation2 + $0x598] sm:$0xff] }
 0x544   : > { %v3320_v9 = vunpack.c.h.s8.bf16 %v2672_v49 }
 0x545   : > { %4490 = vmatpush1.bf16.msra.mxu1 %v3280_v3  ;;  %v3831_v3 = vunpack.c.h.s8.bf16 %v2927_v43  ;;  %v2697_v43 = vld [vmem:[#allocation2 + $0x4d8] sm:$0xff] }
 0x546   : > { %4318 = vmatpush1.bf16.msra.mxu0 %v3790_v2  ;;  %4491 = vmatprep.subr.bf16.mxu1 %v3289_v5  ;;  %v3312_v2 = vunpack.c.l.s8.bf16 %v2672_v49  ;;  %v7899_v5 = vpack.c.bf16 %v2523_v60, %v2507_v59  ;;  %v3361_v48 = vunpack.c.l.s8.bf16 %v2697_v43  ;;  %v3369_v58 = vunpack.c.h.s8.bf16 %v2697_v43  ;;  %v2959_v49 = vld [vmem:[#allocation2 + $0xd08] sm:$0xff]  ;;  %v2705_v59 = vld [vmem:[#allocation2 + $0x518] sm:$0xff] }
 0x547   : > { %4319 = vmatprep.subr.bf16.mxu0 %v3799_v45  ;;  %v2681_v45 = vld [vmem:[#allocation2 + $0x458] sm:$0xff]  ;;  %v3878_v60 = vunpack.c.h.s8.bf16 %v2950_v53  ;;  %v7905_v43 = vld [vmem:[#allocation8 + $0x8] sm:$0xff] }
 0x548   : > { %v3329_v13 = vunpack.c.l.s8.bf16 %v2681_v45 }
 0x549   : > { %4492 = vmatpush1.bf16.msra.mxu1 %v3288_v19  ;;  %v3337_v19 = vunpack.c.h.s8.bf16 %v2681_v45 }
 0x54a   : > { %4320 = vmatpush1.bf16.msra.mxu0 %v3798_v17  ;;  %4493 = vmatprep.subr.bf16.mxu1 %v3297_v21  ;;  %v3847_v17 = vunpack.c.h.s8.bf16 %v2935_v4  ;;  %v2689_v21 = vld [vmem:[#allocation2 + $0x498] sm:$0xff]  ;;  %v2704_v4 = vld [vmem:[#allocation2 + $0x510] sm:$0xff] }
 0x54b   : > { %4321 = vmatprep.subr.bf16.mxu0 %v3807_v20  ;;  %v2943_v20 = vld [vmem:[#allocation2 + $0xc88] sm:$0xff]  ;;  %v3345_v30 = vunpack.c.l.s8.bf16 %v2689_v21 }
 0x54c   : > { %v3855_v28 = vunpack.c.l.s8.bf16 %v2943_v20 }
 0x54d   : > { %4494 = vmatpush1.bf16.msra.mxu1 %v3296_v40  ;;  %v3863_v40 = vunpack.c.h.s8.bf16 %v2943_v20  ;;  %v2712_v20 = vld [vmem:[#allocation2 + $0x550] sm:$0xff] }
 0x54e   : > { %4322 = vmatpush1.bf16.msra.mxu0 %v3806_v29  ;;  %4495 = vmatprep.subr.bf16.mxu1 %v3305_v42  ;;  %v3344_v29 = vunpack.c.l.s8.bf16 %v2688_v31  ;;  %v2951_v42 = vld [vmem:[#allocation2 + $0xcc8] sm:$0xff] }
 0x54f   : > { %4323 = vmatprep.subr.bf16.mxu0 %v3815_v1  ;;  %v3353_v1 = vunpack.c.h.s8.bf16 %v2689_v21  ;;  %v3871_v47 = vunpack.c.l.s8.bf16 %v2951_v42 }
 0x551   : > { %4496 = vmatpush1.bf16.msra.mxu1 %v3304_v8  ;;  %v3870_v8 = vunpack.c.l.s8.bf16 %v2950_v53  ;;  %v2258_v53 = vld [vmem:[#allocation4 + $0xe0] sm:$0xff] }
 0x552   : > { %4324 = vmatpush1.bf16.msra.mxu0 %v3814_v54  ;;  %4508 = vmatprep.subr.bf16.mxu1 %v3313_v57  ;;  %v2696_v54 = vld [vmem:[#allocation2 + $0x4d0] sm:$0xff]  ;;  %v3879_v57 = vunpack.c.h.s8.bf16 %v2951_v42 }
 0x553   : > { %4336 = vmatprep.subr.bf16.mxu0 %v3823_v55  ;;  %v3360_v55 = vunpack.c.l.s8.bf16 %v2696_v54  ;;  %v2720_v42 = vld [vmem:[#allocation2 + $0x590] sm:$0xff] }
 0x554   : > { %4498 = vmatmul.mubr.bf16.vlgmr.msra.gmra.mrb[4].mxu1 %v7838_v18 }
 0x555   : > { %4326 = vmatmul.mubr.bf16.vlgmr.msra.gmra.mrb[0].mxu0 %v7897_v62  ;;  %4509 = vmatpush1.bf16.msra.mxu1 %v3312_v2  ;;  %v3887_v2 = vunpack.c.l.s8.bf16 %v2959_v49 }
 0x556   : > { %4337 = vmatpush1.bf16.msra.mxu0 %v3822_v0  ;;  %4510 = vmatprep.subr.bf16.mxu1 %v3321_v36  ;;  %v3368_v0 = vunpack.c.h.s8.bf16 %v2696_v54  ;;  %v2958_v36 = vld [vmem:[#allocation2 + $0xd00] sm:$0xff] }
 0x557   : > { %4338 = vmatprep.subr.bf16.mxu0 %v3831_v3  ;;  %4368 = vmatprep.mubr.bf16.mxu0 %v7899_v5  ;;  %v3377_v3 = vunpack.c.l.s8.bf16 %v2705_v59  ;;  %v3886_v45 = vunpack.c.l.s8.bf16 %v2958_v36  ;;  %v3894_v37 = vunpack.c.h.s8.bf16 %v2958_v36 }
 0x558   : > { %4540 = vmatprep.mubr.bf16.mxu1 %v7781_v12 }
 0x559   : > { %4511 = vmatpush1.bf16.msra.mxu1 %v3320_v9  ;;  %v3895_v9 = vunpack.c.h.s8.bf16 %v2959_v49 }
 0x55a   : > { %4339 = vmatpush1.bf16.msra.mxu0 %v3830_v6  ;;  %4512 = vmatprep.subr.bf16.mxu1 %v3329_v13  ;;  %v3376_v6 = vunpack.c.l.s8.bf16 %v2704_v4  ;;  %v2967_v13 = vld [vmem:[#allocation2 + $0xd48] sm:$0xff] }
 0x55b   : > { %4340 = vmatprep.subr.bf16.mxu0 %v3839_v52  ;;  %v3385_v52 = vunpack.c.h.s8.bf16 %v2705_v59 }
 0x55d   : > { %4513 = vmatpush1.bf16.msra.mxu1 %v3328_v16  ;;  %v3903_v16 = vunpack.c.l.s8.bf16 %v2967_v13 }
 0x55e   : > { %4341 = vmatpush1.bf16.msra.mxu0 %v3838_v14  ;;  %4514 = vmatprep.subr.bf16.mxu1 %v3337_v19  ;;  %v3384_v14 = vunpack.c.h.s8.bf16 %v2704_v4  ;;  %v2966_v19 = vld [vmem:[#allocation2 + $0xd40] sm:$0xff]  ;;  %v3416_v4 = vunpack.c.h.s8.bf16 %v2720_v42 }
 0x55f   : > { %4342 = vmatprep.subr.bf16.mxu0 %v3847_v17  ;;  %v3393_v17 = vunpack.c.l.s8.bf16 %v2713_v11  ;;  %v3902_v21 = vunpack.c.l.s8.bf16 %v2966_v19  ;;  %v3910_v31 = vunpack.c.h.s8.bf16 %v2966_v19 }
 0x561   : > { %4515 = vmatpush1.bf16.msra.mxu1 %v3336_v27  ;;  %v3911_v27 = vunpack.c.h.s8.bf16 %v2967_v13 }
 0x562   : > { %4343 = vmatpush1.bf16.msra.mxu0 %v3846_v22  ;;  %4516 = vmatprep.subr.bf16.mxu1 %v3345_v30  ;;  %v3392_v22 = vunpack.c.l.s8.bf16 %v2712_v20  ;;  %v2975_v30 = vld [vmem:[#allocation2 + $0xd88] sm:$0xff] }
 0x563   : > { %4344 = vmatprep.subr.bf16.mxu0 %v3855_v28  ;;  %v3401_v28 = vunpack.c.h.s8.bf16 %v2713_v11  ;;  %v3927_v54 = vunpack.c.h.s8.bf16 %v2975_v30 }
 0x565   : > { %4517 = vmatpush1.bf16.msra.mxu1 %v3344_v29  ;;  %v3919_v29 = vunpack.c.l.s8.bf16 %v2975_v30 }
 0x566   : > { %4345 = vmatpush1.bf16.msra.mxu0 %v3854_v32  ;;  %4518 = vmatprep.subr.bf16.mxu1 %v3353_v1  ;;  %v3400_v32 = vunpack.c.h.s8.bf16 %v2712_v20  ;;  %v2974_v1 = vld [vmem:[#allocation2 + $0xd80] sm:$0xff] }
 0x567   : > { %4346 = vmatprep.subr.bf16.mxu0 %v3863_v40  ;;  %v3409_v40 = vunpack.c.l.s8.bf16 %v2721_v24  ;;  %v3926_v36 = vunpack.c.h.s8.bf16 %v2974_v1 }
 0x569   : > { %4519 = vmatpush1.bf16.msra.mxu1 %v3352_v46  ;;  %v3918_v46 = vunpack.c.l.s8.bf16 %v2974_v1 }
 0x56a   : > { %4347 = vmatpush1.bf16.msra.mxu0 %v3862_v63  ;;  %4520 = vmatprep.subr.bf16.mxu1 %v3361_v48  ;;  %v2317_v63 = vrot.slane %v7905_v43, %v7798_v44  ;;  %v2242_v48 = vld [vmem:[#allocation4 + $0x60] sm:$0xff] }
 0x56b   : > { %4348 = vmatprep.subr.bf16.mxu0 %v3871_v47  ;;  %v3408_v47 = vunpack.c.l.s8.bf16 %v2720_v42  ;;  %v2990_v42 = vld [vmem:[#allocation2 + $0xe00] sm:$0xff] }
 0x56c   : > { %v2358_v49 = vmul.f32 %v2317_v63, %v2242_v48  ;;  %v2374_v59 = vmul.f32 %v2317_v63, %v2258_v53  ;;  %v2736_v63 = vld [vmem:[#allocation2 + $0x610] sm:$0xff]  ;;  %v3950_v53 = vunpack.c.l.s8.bf16 %v2990_v42 }
 0x56d   : > { %4521 = vmatpush1.bf16.msra.mxu1 %v3360_v55  ;;  %v2983_v55 = vld [vmem:[#allocation2 + $0xdc8] sm:$0xff] }
 0x56e   : > { %4349 = vmatpush1.bf16.msra.mxu0 %v3870_v8  ;;  %4522 = vmatprep.subr.bf16.mxu1 %v3369_v58  ;;  %v3417_v8 = vunpack.c.h.s8.bf16 %v2721_v24  ;;  %v2329_v58 = vrot.slane %v7905_v43, %v7813_v51  ;;  %v3943_v20 = vunpack.c.h.s8.bf16 %v2983_v55 }
 0x56f   : > { %4350 = vmatprep.subr.bf16.mxu0 %v3879_v57  ;;  %v2729_v57 = vld [vmem:[#allocation2 + $0x5d8] sm:$0xff] }
 0x571   : > { %4523 = vmatpush1.bf16.msra.mxu1 %v3368_v0 }
 0x572   : > { %4351 = vmatpush1.bf16.msra.mxu0 %v3878_v60  ;;  %4524 = vmatprep.subr.bf16.mxu1 %v3377_v3  ;;  %v7911_v60 = vld [vmem:[#allocation10 + $0x8] sm:$0xff] }
 0x573   : > { %4352 = vmatprep.subr.bf16.mxu0 %v3887_v2  ;;  %v2433_v0 = vrot.slane %v7911_v60, %v7798_v44  ;;  %v2245_v2 = vld [vmem:[#allocation4 + $0x78] sm:$0xff] }
 0x574   : > { %v2261_v3 = vld [vmem:[#allocation4 + $0xf8] sm:$0xff]  ;;  %v2361_v13 = vmul.f32 %v2329_v58, %v2245_v2 }
 0x575   : > { %4525 = vmatpush1.bf16.msra.mxu1 %v3376_v6  ;;  %v3425_v6 = vunpack.c.l.s8.bf16 %v2729_v57  ;;  %v2377_v11 = vmul.f32 %v2329_v58, %v2261_v3  ;;  %v2745_v58 = vld [vmem:[#allocation2 + $0x658] sm:$0xff] }
 0x576   : > { %4353 = vmatpush1.bf16.msra.mxu0 %v3886_v45  ;;  %4526 = vmatprep.subr.bf16.mxu1 %v3385_v52  ;;  %v3935_v45 = vunpack.c.l.s8.bf16 %v2983_v55  ;;  %v2728_v52 = vld [vmem:[#allocation2 + $0x5d0] sm:$0xff]  ;;  %v3457_v3 = vunpack.c.l.s8.bf16 %v2745_v58 }
 0x577   : > { %4354 = vmatprep.subr.bf16.mxu0 %v3895_v9  ;;  %v2982_v9 = vld [vmem:[#allocation2 + $0xdc0] sm:$0xff]  ;;  %v3424_v19 = vunpack.c.l.s8.bf16 %v2728_v52 }
 0x579   : > { %4527 = vmatpush1.bf16.msra.mxu1 %v3384_v14  ;;  %v2474_v14 = vadd.f32 %v2433_v0, %v2358_v49 }
 0x57a   : > { %4355 = vmatpush1.bf16.msra.mxu0 %v3894_v37  ;;  %4528 = vmatprep.subr.bf16.mxu1 %v3393_v17  ;;  %v2445_v37 = vrot.slane %v7911_v60, %v7813_v51  ;;  %v3934_v17 = vunpack.c.l.s8.bf16 %v2982_v9 }
 0x57b   : > { %4356 = vmatprep.subr.bf16.mxu0 %v3903_v16  ;;  %v2490_v16 = vadd.f32 %v2433_v0, %v2374_v59  ;;  %v2506_v24 = vmax.f32 %v2474_v14, 0.0  ;;  %v3958_v59 = vunpack.c.h.s8.bf16 %v2990_v42  ;;  %v3448_v0 = vunpack.c.h.s8.bf16 %v2736_v63  ;;  %v2760_v42 = vld [vmem:[#allocation2 + $0x6d0] sm:$0xff] }
 0x57c   : > { %v2493_v30 = vadd.f32 %v2445_v37, %v2377_v11  ;;  %v2753_v11 = vld [vmem:[#allocation2 + $0x698] sm:$0xff] }
 0x57d   : > { %4529 = vmatpush1.bf16.msra.mxu1 %v3392_v22  ;;  %v2991_v22 = vld [vmem:[#allocation2 + $0xe08] sm:$0xff] }
 0x57e   : > { %4357 = vmatpush1.bf16.msra.mxu0 %v3902_v21  ;;  %4530 = vmatprep.subr.bf16.mxu1 %v3401_v28  ;;  %v3433_v21 = vunpack.c.h.s8.bf16 %v2729_v57  ;;  %v2477_v28 = vadd.f32 %v2445_v37, %v2361_v13  ;;  %v2999_v57 = vld [vmem:[#allocation2 + $0xe48] sm:$0xff] }
 0x57f   : > { %4358 = vmatprep.subr.bf16.mxu0 %v3911_v27  ;;  %v2737_v27 = vld [vmem:[#allocation2 + $0x618] sm:$0xff]  ;;  %v3967_v2 = vunpack.c.l.s8.bf16 %v2999_v57  ;;  %v3007_v13 = vld [vmem:[#allocation2 + $0xe88] sm:$0xff] }
 0x580   : > { %v3441_v1 = vunpack.c.l.s8.bf16 %v2737_v27  ;;  %v3449_v55 = vunpack.c.h.s8.bf16 %v2737_v27  ;;  %v3991_v27 = vunpack.c.h.s8.bf16 %v3007_v13 }
 0x581   : > { %4531 = vmatpush1.bf16.msra.mxu1 %v3400_v32  ;;  %v3942_v32 = vunpack.c.h.s8.bf16 %v2982_v9  ;;  %v3975_v9 = vunpack.c.h.s8.bf16 %v2999_v57 }
 0x582   : > { %4359 = vmatpush1.bf16.msra.mxu0 %v3910_v31  ;;  %4532 = vmatprep.subr.bf16.mxu1 %v3409_v40  ;;  %v2522_v31 = vmax.f32 %v2490_v16, 0.0  ;;  %v3951_v40 = vunpack.c.l.s8.bf16 %v2991_v22  ;;  %v3983_v16 = vunpack.c.l.s8.bf16 %v3007_v13 }
 0x583   : > { %4360 = vmatprep.subr.bf16.mxu0 %v3919_v29  ;;  %v3432_v29 = vunpack.c.h.s8.bf16 %v2728_v52  ;;  %v3465_v52 = vunpack.c.h.s8.bf16 %v2745_v58  ;;  %v3023_v58 = vld [vmem:[#allocation2 + $0xf08] sm:$0xff] }
 0x584   : > { %v7917_v48 = vpack.c.bf16 %v2522_v31, %v2506_v24  ;;  %v2761_v24 = vld [vmem:[#allocation2 + $0x6d8] sm:$0xff] }
 0x585   : > { %4533 = vmatpush1.bf16.msra.mxu1 %v3408_v47  ;;  %v2525_v47 = vmax.f32 %v2493_v30, 0.0  ;;  %v3015_v30 = vld [vmem:[#allocation2 + $0xec8] sm:$0xff]  ;;  %v3497_v57 = vunpack.c.h.s8.bf16 %v2761_v24 }
 0x586   : > { %4361 = vmatpush1.bf16.msra.mxu0 %v3918_v46  ;;  %4534 = vmatprep.subr.bf16.mxu1 %v3417_v8  ;;  %v2509_v46 = vmax.f32 %v2477_v28, 0.0  ;;  %v3959_v8 = vunpack.c.h.s8.bf16 %v2991_v22  ;;  %v3481_v28 = vunpack.c.h.s8.bf16 %v2753_v11 }
 0x587   : > { %4362 = vmatprep.subr.bf16.mxu0 %v3927_v54  ;;  %v3440_v54 = vunpack.c.l.s8.bf16 %v2736_v63 }
 0x588   : > { %v7919_v49 = vpack.c.bf16 %v2525_v47, %v2509_v46 }
 0x589   : > { %4535 = vmatpush1.bf16.msra.mxu1 %v3416_v4  ;;  %v2744_v4 = vld [vmem:[#allocation2 + $0x650] sm:$0xff] }
 0x58a   : > { %4363 = vmatpush1.bf16.msra.mxu0 %v3926_v36  ;;  %4536 = vmatprep.subr.bf16.mxu1 %v3425_v6  ;;  %v2998_v36 = vld [vmem:[#allocation2 + $0xe40] sm:$0xff]  ;;  %v3456_v6 = vunpack.c.l.s8.bf16 %v2744_v4  ;;  %v3464_v14 = vunpack.c.h.s8.bf16 %v2744_v4 }
 0x58b   : > { %4364 = vmatprep.subr.bf16.mxu0 %v3935_v45  ;;  %v3966_v45 = vunpack.c.l.s8.bf16 %v2998_v36  ;;  %v3974_v37 = vunpack.c.h.s8.bf16 %v2998_v36  ;;  %v3022_v4 = vld [vmem:[#allocation2 + $0xf00] sm:$0xff] }
 0x58d   : > { %4537 = vmatpush1.bf16.msra.mxu1 %v3424_v19  ;;  %v3006_v19 = vld [vmem:[#allocation2 + $0xe80] sm:$0xff] }
 0x58e   : > { %4365 = vmatpush1.bf16.msra.mxu0 %v3934_v17  ;;  %4538 = vmatprep.subr.bf16.mxu1 %v3433_v21  ;;  %v3473_v17 = vunpack.c.l.s8.bf16 %v2753_v11  ;;  %v3982_v21 = vunpack.c.l.s8.bf16 %v3006_v19  ;;  %v3990_v31 = vunpack.c.h.s8.bf16 %v3006_v19  ;;  %v3031_v11 = vld [vmem:[#allocation2 + $0xf48] sm:$0xff] }
 0x58f   : > { %4366 = vmatprep.subr.bf16.mxu0 %v3943_v20  ;;  %v2752_v20 = vld [vmem:[#allocation2 + $0x690] sm:$0xff] }
 0x590   : > { %v3472_v22 = vunpack.c.l.s8.bf16 %v2752_v20 }
 0x591   : > { %4539 = vmatpush1.bf16.msra.mxu1 %v3432_v29  ;;  %v3999_v29 = vunpack.c.l.s8.bf16 %v3015_v30 }
 0x592   : > { %4367 = vmatpush1.bf16.msra.mxu0 %v3942_v32  ;;  %4551 = vmatprep.subr.bf16.mxu1 %v3441_v1  ;;  %v3480_v32 = vunpack.c.h.s8.bf16 %v2752_v20  ;;  %v3014_v1 = vld [vmem:[#allocation2 + $0xec0] sm:$0xff] }
 0x593   : > { %4379 = vmatprep.subr.bf16.mxu0 %v3951_v40  ;;  %v3489_v40 = vunpack.c.l.s8.bf16 %v2761_v24  ;;  %v3030_v20 = vld [vmem:[#allocation2 + $0xf40] sm:$0xff]  ;;  %v3039_v24 = vld [vmem:[#allocation2 + $0xf88] sm:$0xff] }
 0x594   : > { %4541 = vmatmul.mubr.bf16.vlgmr.msra.gmra.mrb[4].mxu1 %v7849_v25 }
 0x595   : > { %4369 = vmatmul.mubr.bf16.vlgmr.msra.gmra.mrb[0].mxu0 %v7917_v48  ;;  %4552 = vmatpush1.bf16.msra.mxu1 %v3440_v54  ;;  %v3488_v54 = vunpack.c.l.s8.bf16 %v2760_v42 }
 0x596   : > { %4380 = vmatpush1.bf16.msra.mxu0 %v3950_v53  ;;  %4553 = vmatprep.subr.bf16.mxu1 %v3449_v55  ;;  %v3998_v53 = vunpack.c.l.s8.bf16 %v3014_v1  ;;  %v4007_v55 = vunpack.c.h.s8.bf16 %v3015_v30 }
 0x597   : > { %4381 = vmatprep.subr.bf16.mxu0 %v3959_v8  ;;  %4411 = vmatprep.mubr.bf16.mxu0 %v7919_v49 }
 0x598   : > { %4583 = vmatprep.mubr.bf16.mxu1 %v7853_v39 }
 0x599   : > { %4554 = vmatpush1.bf16.msra.mxu1 %v3448_v0  ;;  %v4006_v0 = vunpack.c.h.s8.bf16 %v3014_v1 }
 0x59a   : > { %4382 = vmatpush1.bf16.msra.mxu0 %v3958_v59  ;;  %4555 = vmatprep.subr.bf16.mxu1 %v3457_v3  ;;  %v2769_v59 = vld [vmem:[#allocation2 + $0x718] sm:$0xff]  ;;  %v4015_v3 = vunpack.c.l.s8.bf16 %v3023_v58 }
 0x59b   : > { %4383 = vmatprep.subr.bf16.mxu0 %v3967_v2  ;;  %v3496_v2 = vunpack.c.h.s8.bf16 %v2760_v42  ;;  %v3505_v36 = vunpack.c.l.s8.bf16 %v2769_v59  ;;  %v3513_v13 = vunpack.c.h.s8.bf16 %v2769_v59  ;;  %v3038_v42 = vld [vmem:[#allocation2 + $0xf80] sm:$0xff]  ;;  %v2260_v59 = vld [vmem:[#allocation4 + $0xf0] sm:$0xff] }
 0x59d   : > { %4556 = vmatpush1.bf16.msra.mxu1 %v3456_v6  ;;  %v4014_v6 = vunpack.c.l.s8.bf16 %v3022_v4 }
 0x59e   : > { %4384 = vmatpush1.bf16.msra.mxu0 %v3966_v45  ;;  %4557 = vmatprep.subr.bf16.mxu1 %v3465_v52  ;;  %v2768_v45 = vld [vmem:[#allocation2 + $0x710] sm:$0xff]  ;;  %v4023_v52 = vunpack.c.h.s8.bf16 %v3023_v58 }
 0x59f   : > { %4385 = vmatprep.subr.bf16.mxu0 %v3975_v9  ;;  %v3504_v9 = vunpack.c.l.s8.bf16 %v2768_v45  ;;  %v2244_v58 = vld [vmem:[#allocation4 + $0x70] sm:$0xff] }
 0x5a1   : > { %4558 = vmatpush1.bf16.msra.mxu1 %v3464_v14  ;;  %v4022_v14 = vunpack.c.h.s8.bf16 %v3022_v4 }
 0x5a2   : > { %4386 = vmatpush1.bf16.msra.mxu0 %v3974_v37  ;;  %4559 = vmatprep.subr.bf16.mxu1 %v3473_v17  ;;  %v2777_v37 = vld [vmem:[#allocation2 + $0x758] sm:$0xff]  ;;  %v4031_v17 = vunpack.c.l.s8.bf16 %v3031_v11 }
 0x5a3   : > { %4387 = vmatprep.subr.bf16.mxu0 %v3983_v16  ;;  %v3512_v16 = vunpack.c.h.s8.bf16 %v2768_v45  ;;  %v3521_v19 = vunpack.c.l.s8.bf16 %v2777_v37  ;;  %v3529_v30 = vunpack.c.h.s8.bf16 %v2777_v37  ;;  %v2792_v37 = vld [vmem:[#allocation2 + $0x7d0] sm:$0xff] }
 0x5a5   : > { %4560 = vmatpush1.bf16.msra.mxu1 %v3472_v22  ;;  %v4030_v22 = vunpack.c.l.s8.bf16 %v3030_v20 }
 0x5a6   : > { %4388 = vmatpush1.bf16.msra.mxu0 %v3982_v21  ;;  %4561 = vmatprep.subr.bf16.mxu1 %v3481_v28  ;;  %v2776_v21 = vld [vmem:[#allocation2 + $0x750] sm:$0xff]  ;;  %v4039_v28 = vunpack.c.h.s8.bf16 %v3031_v11  ;;  %v3046_v11 = vld [vmem:[#allocation2 + $0xfc0] sm:$0xff] }
 0x5a7   : > { %4389 = vmatprep.subr.bf16.mxu0 %v3991_v27  ;;  %v7925_v63 = vpop.f32.mrb[0].mxu1  ;;  %v3520_v27 = vunpack.c.l.s8.bf16 %v2776_v21 }
 0x5a8   : > { %v7927_v46 = vpop.f32.mrb[1].mxu1 }
 0x5a9   : > { %v7929_v47 = vpop.f32.mrb[2].mxu1  ;;  %4562 = vmatpush1.bf16.msra.mxu1 %v3480_v32  ;;  %v4038_v32 = vunpack.c.h.s8.bf16 %v3030_v20 }
 0x5aa   : > { %4390 = vmatpush1.bf16.msra.mxu0 %v3990_v31  ;;  %v7931_v8 = vpop.f32.mrb[3].mxu1  ;;  %4563 = vmatprep.subr.bf16.mxu1 %v3489_v40  ;;  %v2785_v31 = vld [vmem:[#allocation2 + $0x798] sm:$0xff]  ;;  %v4047_v40 = vunpack.c.l.s8.bf16 %v3039_v24 }
 0x5ab   : > { %4391 = vmatprep.subr.bf16.mxu0 %v3999_v29  ;;  %v3528_v29 = vunpack.c.h.s8.bf16 %v2776_v21  ;;  %v3537_v1 = vunpack.c.l.s8.bf16 %v2785_v31  ;;  %v2801_v21 = vld [vmem:[#allocation2 + $0x818] sm:$0xff] }
 0x5ad   : > { %4564 = vmatpush1.bf16.msra.mxu1 %v3488_v54  ;;  %v2325_v54 = vrot.slane %v7905_v43, %v7805_v7  ;;  %v4054_v43 = vunpack.c.h.s8.bf16 %v3038_v42 }
 0x5ae   : > { %4392 = vmatpush1.bf16.msra.mxu0 %v3998_v53  ;;  %4565 = vmatprep.subr.bf16.mxu1 %v3497_v57  ;;  %v2784_v53 = vld [vmem:[#allocation2 + $0x790] sm:$0xff] }
 0x5af   : > { %4393 = vmatprep.subr.bf16.mxu0 %v4007_v55  ;;  %v4046_v55 = vunpack.c.l.s8.bf16 %v3038_v42  ;;  %v3536_v57 = vunpack.c.l.s8.bf16 %v2784_v53  ;;  %v2360_v4 = vmul.f32 %v2325_v54, %v2244_v58  ;;  %v2376_v45 = vmul.f32 %v2325_v54, %v2260_v59  ;;  %v2555_v58 = vld [vmem:[#allocation2 + $0x68] sm:$0xff] }
 0x5b0   : > { %v3577_v54 = vunpack.c.h.s8.bf16 %v2801_v21 }
 0x5b1   : > { %4566 = vmatpush1.bf16.msra.mxu1 %v3496_v2  ;;  %v3545_v2 = vunpack.c.h.s8.bf16 %v2785_v31  ;;  %v3569_v31 = vunpack.c.l.s8.bf16 %v2801_v21 }
 0x5b2   : > { %4394 = vmatpush1.bf16.msra.mxu0 %v4006_v0  ;;  %4567 = vmatprep.subr.bf16.mxu1 %v3505_v36  ;;  %v4055_v0 = vunpack.c.h.s8.bf16 %v3039_v24  ;;  %v2793_v36 = vld [vmem:[#allocation2 + $0x7d8] sm:$0xff]  ;;  %v3560_v24 = vunpack.c.h.s8.bf16 %v2792_v37 }
 0x5b3   : > { %4395 = vmatprep.subr.bf16.mxu0 %v4015_v3  ;;  %v3047_v3 = vld [vmem:[#allocation2 + $0xfc8] sm:$0xff] }
 0x5b4   : > { %v4071_v20 = vunpack.c.h.s8.bf16 %v3047_v3 }
 0x5b5   : > { %4568 = vmatpush1.bf16.msra.mxu1 %v3504_v9  ;;  %v3544_v9 = vunpack.c.h.s8.bf16 %v2784_v53 }
 0x5b6   : > { %4396 = vmatpush1.bf16.msra.mxu0 %v4014_v6  ;;  %4569 = vmatprep.subr.bf16.mxu1 %v3513_v13  ;;  %v2441_v6 = vrot.slane %v7911_v60, %v7805_v7  ;;  %v3553_v13 = vunpack.c.l.s8.bf16 %v2793_v36  ;;  %v3561_v60 = vunpack.c.h.s8.bf16 %v2793_v36  ;;  %v2808_v36 = vld [vmem:[#allocation2 + $0x850] sm:$0xff] }
 0x5b7   : > { %4397 = vmatprep.subr.bf16.mxu0 %v4023_v52  ;;  %v4063_v52 = vunpack.c.l.s8.bf16 %v3047_v3  ;;  %v3075_v3 = vunpack.c.l.s8.bf16 %v2555_v58 }
 0x5b9   : > { %4570 = vmatpush1.bf16.msra.mxu1 %v3512_v16  ;;  %v2492_v16 = vadd.f32 %v2441_v6, %v2376_v45  ;;  %v3584_v45 = vunpack.c.l.s8.bf16 %v2808_v36 }
 0x5ba   : > { %4398 = vmatpush1.bf16.msra.mxu0 %v4022_v14  ;;  %4571 = vmatprep.subr.bf16.mxu1 %v3521_v19  ;;  %v2476_v14 = vadd.f32 %v2441_v6, %v2360_v4  ;;  %v3552_v19 = vunpack.c.l.s8.bf16 %v2792_v37  ;;  %v2554_v4 = vld [vmem:[#allocation2 + $0x60] sm:$0xff] }
 0x5bb   : > { %4399 = vmatprep.subr.bf16.mxu0 %v4031_v17  ;;  %v4062_v17 = vunpack.c.l.s8.bf16 %v3046_v11  ;;  %v3074_v6 = vunpack.c.l.s8.bf16 %v2554_v4  ;;  %v3082_v37 = vunpack.c.h.s8.bf16 %v2554_v4  ;;  %v2578_v4 = vld [vmem:[#allocation2 + $0x120] sm:$0xff] }
 0x5bd   : > { %4572 = vmatpush1.bf16.msra.mxu1 %v3520_v27  ;;  %v2508_v27 = vmax.f32 %v2476_v14, 0.0 }
 0x5be   : > { %4400 = vmatpush1.bf16.msra.mxu0 %v4030_v22  ;;  %4573 = vmatprep.subr.bf16.mxu1 %v3529_v30  ;;  %v2547_v22 = vld [vmem:[#allocation2 + $0x28] sm:$0xff]  ;;  %v4070_v30 = vunpack.c.h.s8.bf16 %v3046_v11  ;;  %v3592_v11 = vunpack.c.h.s8.bf16 %v2808_v36  ;;  %v2832_v36 = vld [vmem:[#allocation2 + $0x910] sm:$0xff] }
 0x5bf   : > { %4401 = vmatprep.subr.bf16.mxu0 %v4039_v28  ;;  %v2524_v28 = vmax.f32 %v2492_v16, 0.0 }
 0x5c1   : > { %4574 = vmatpush1.bf16.msra.mxu1 %v3528_v29  ;;  %v2800_v29 = vld [vmem:[#allocation2 + $0x810] sm:$0xff] }
 0x5c2   : > { %4402 = vmatpush1.bf16.msra.mxu0 %v4038_v32  ;;  %4575 = vmatprep.subr.bf16.mxu1 %v3537_v1  ;;  %v3059_v32 = vunpack.c.l.s8.bf16 %v2547_v22  ;;  %v7937_v1 = vpack.c.bf16 %v2524_v28, %v2508_v27  ;;  %v3568_v42 = vunpack.c.l.s8.bf16 %v2800_v29  ;;  %v3576_v59 = vunpack.c.h.s8.bf16 %v2800_v29  ;;  %v2825_v27 = vld [vmem:[#allocation2 + $0x8d8] sm:$0xff]  ;;  %v2571_v28 = vld [vmem:[#allocation2 + $0xe8] sm:$0xff]  ;;  %v2824_v29 = vld [vmem:[#allocation2 + $0x8d0] sm:$0xff] }
 0x5c3   : > { %4403 = vmatprep.subr.bf16.mxu0 %v4047_v40  ;;  %v2546_v40 = vld [vmem:[#allocation2 + $0x20] sm:$0xff] }
 0x5c4   : > { %v3058_v53 = vunpack.c.l.s8.bf16 %v2546_v40 }
 0x5c5   : > { %4576 = vmatpush1.bf16.msra.mxu1 %v3536_v57  ;;  %v2809_v57 = vld [vmem:[#allocation2 + $0x858] sm:$0xff] }
 0x5c6   : > { %4404 = vmatpush1.bf16.msra.mxu0 %v4046_v55  ;;  %4577 = vmatprep.subr.bf16.mxu1 %v3545_v2  ;;  %v3067_v55 = vunpack.c.h.s8.bf16 %v2547_v22  ;;  %v3585_v2 = vunpack.c.l.s8.bf16 %v2809_v57 }
 0x5c7   : > { %4405 = vmatprep.subr.bf16.mxu0 %v4055_v0  ;;  %v3066_v0 = vunpack.c.h.s8.bf16 %v2546_v40  ;;  %v2570_v40 = vld [vmem:[#allocation2 + $0xe0] sm:$0xff] }
 0x5c9   : > { %4578 = vmatpush1.bf16.msra.mxu1 %v3544_v9  ;;  %v3083_v9 = vunpack.c.h.s8.bf16 %v2555_v58  ;;  %v2579_v58 = vld [vmem:[#allocation2 + $0x128] sm:$0xff] }
 0x5ca   : > { %4406 = vmatpush1.bf16.msra.mxu0 %v4054_v43  ;;  %4579 = vmatprep.subr.bf16.mxu1 %v3553_v13  ;;  %v3593_v43 = vunpack.c.h.s8.bf16 %v2809_v57  ;;  %v2563_v13 = vld [vmem:[#allocation2 + $0xa8] sm:$0xff]  ;;  %v2833_v57 = vld [vmem:[#allocation2 + $0x918] sm:$0xff] }
 0x5cb   : > { %4407 = vmatprep.subr.bf16.mxu0 %v4063_v52  ;;  %v2817_v52 = vld [vmem:[#allocation2 + $0x898] sm:$0xff]  ;;  %v3091_v16 = vunpack.c.l.s8.bf16 %v2563_v13  ;;  %v3099_v22 = vunpack.c.h.s8.bf16 %v2563_v13  ;;  %v2587_v13 = vld [vmem:[#allocation2 + $0x168] sm:$0xff] }
 0x5cc   : > { %v3601_v14 = vunpack.c.l.s8.bf16 %v2817_v52  ;;  %v3609_v21 = vunpack.c.h.s8.bf16 %v2817_v52  ;;  %v2841_v52 = vld [vmem:[#allocation2 + $0x958] sm:$0xff] }
 0x5cd   : > { %4580 = vmatpush1.bf16.msra.mxu1 %v3552_v19  ;;  %v2562_v19 = vld [vmem:[#allocation2 + $0xa0] sm:$0xff] }
 0x5ce   : > { %4408 = vmatpush1.bf16.msra.mxu0 %v4062_v17  ;;  %4581 = vmatprep.subr.bf16.mxu1 %v3561_v60  ;;  %v2816_v17 = vld [vmem:[#allocation2 + $0x890] sm:$0xff]  ;;  %v3090_v60 = vunpack.c.l.s8.bf16 %v2562_v19 }
 0x5cf   : > { %4409 = vmatprep.subr.bf16.mxu0 %v4071_v20  ;;  %v3600_v20 = vunpack.c.l.s8.bf16 %v2816_v17 }
 0x5d1   : > { %4582 = vmatpush1.bf16.msra.mxu1 %v3560_v24  ;;  %v3098_v24 = vunpack.c.h.s8.bf16 %v2562_v19  ;;  %v2586_v19 = vld [vmem:[#allocation2 + $0x160] sm:$0xff] }
 0x5d2   : > { %4410 = vmatpush1.bf16.msra.mxu0 %v4070_v30  ;;  %4594 = vmatprep.subr.bf16.mxu1 %v3569_v31  ;;  %v3608_v30 = vunpack.c.h.s8.bf16 %v2816_v17  ;;  %v3617_v31 = vunpack.c.l.s8.bf16 %v2825_v27  ;;  %v2840_v17 = vld [vmem:[#allocation2 + $0x950] sm:$0xff] }
 0x5d3   : > { %4766 = vmatprep.subr.bf16.mxu0 %v3059_v32  ;;  %v3107_v32 = vunpack.c.l.s8.bf16 %v2571_v28 }
 0x5d4   : > { %4584 = vmatmul.mubr.bf16.vlgmr.msra.gmra.mrb[4].mxu1 %v7845_v61 }
 0x5d5   : > { %4412 = vmatmul.mubr.bf16.vlgmr.msra.gmra.mrb[0].mxu0 %v7937_v1  ;;  %4595 = vmatpush1.bf16.msra.mxu1 %v3568_v42  ;;  %v3616_v42 = vunpack.c.l.s8.bf16 %v2824_v29 }
 0x5d6   : > { %4767 = vmatpush1.bf16.msra.mxu0 %v3058_v53  ;;  %4596 = vmatprep.subr.bf16.mxu1 %v3577_v54  ;;  %v3106_v53 = vunpack.c.l.s8.bf16 %v2570_v40  ;;  %v3625_v54 = vunpack.c.h.s8.bf16 %v2825_v27  ;;  %v2849_v27 = vld [vmem:[#allocation2 + $0x998] sm:$0xff] }
 0x5d7   : > { %4768 = vmatprep.subr.bf16.mxu0 %v3067_v55  ;;  %4626 = vmatprep.mubr.bf16.mxu1 %v7867_v56  ;;  %v3115_v55 = vunpack.c.h.s8.bf16 %v2571_v28  ;;  %v2595_v28 = vld [vmem:[#allocation2 + $0x1a8] sm:$0xff] }
 0x5d8   : > { %4798 = vmatprep.mubr.bf16.mxu0 %v7779_v10 }
 0x5d9   : > { %4597 = vmatpush1.bf16.msra.mxu1 %v3576_v59  ;;  %v3624_v59 = vunpack.c.h.s8.bf16 %v2824_v29  ;;  %v2848_v29 = vld [vmem:[#allocation2 + $0x990] sm:$0xff] }
 0x5da   : > { %4769 = vmatpush1.bf16.msra.mxu0 %v3066_v0  ;;  %4598 = vmatprep.subr.bf16.mxu1 %v3585_v2  ;;  %v3114_v0 = vunpack.c.h.s8.bf16 %v2570_v40  ;;  %v3633_v2 = vunpack.c.l.s8.bf16 %v2833_v57  ;;  %v2594_v40 = vld [vmem:[#allocation2 + $0x1a0] sm:$0xff] }
 0x5db   : > { %4770 = vmatprep.subr.bf16.mxu0 %v3075_v3  ;;  %v3123_v3 = vunpack.c.l.s8.bf16 %v2579_v58 }
 0x5dd   : > { %4599 = vmatpush1.bf16.msra.mxu1 %v3584_v45  ;;  %v3632_v45 = vunpack.c.l.s8.bf16 %v2832_v36 }
 0x5de   : > { %4771 = vmatpush1.bf16.msra.mxu0 %v3074_v6  ;;  %4600 = vmatprep.subr.bf16.mxu1 %v3593_v43  ;;  %v3122_v6 = vunpack.c.l.s8.bf16 %v2578_v4  ;;  %v3641_v43 = vunpack.c.h.s8.bf16 %v2833_v57  ;;  %v2857_v57 = vld [vmem:[#allocation2 + $0x9d8] sm:$0xff] }
 0x5df   : > { %4772 = vmatprep.subr.bf16.mxu0 %v3083_v9  ;;  %v3131_v9 = vunpack.c.h.s8.bf16 %v2579_v58  ;;  %v2603_v58 = vld [vmem:[#allocation2 + $0x1e8] sm:$0xff] }
 0x5e1   : > { %4601 = vmatpush1.bf16.msra.mxu1 %v3592_v11  ;;  %v3640_v11 = vunpack.c.h.s8.bf16 %v2832_v36  ;;  %v2856_v36 = vld [vmem:[#allocation2 + $0x9d0] sm:$0xff] }
 0x5e2   : > { %4773 = vmatpush1.bf16.msra.mxu0 %v3082_v37  ;;  %4602 = vmatprep.subr.bf16.mxu1 %v3601_v14  ;;  %v3130_v37 = vunpack.c.h.s8.bf16 %v2578_v4  ;;  %v3649_v14 = vunpack.c.l.s8.bf16 %v2841_v52  ;;  %v2602_v4 = vld [vmem:[#allocation2 + $0x1e0] sm:$0xff] }
 0x5e3   : > { %4774 = vmatprep.subr.bf16.mxu0 %v3091_v16  ;;  %v3139_v16 = vunpack.c.l.s8.bf16 %v2587_v13 }
 0x5e5   : > { %4603 = vmatpush1.bf16.msra.mxu1 %v3600_v20  ;;  %v3648_v20 = vunpack.c.l.s8.bf16 %v2840_v17 }
 0x5e6   : > { %4775 = vmatpush1.bf16.msra.mxu0 %v3090_v60  ;;  %4604 = vmatprep.subr.bf16.mxu1 %v3609_v21  ;;  %v3138_v60 = vunpack.c.l.s8.bf16 %v2586_v19  ;;  %v3657_v21 = vunpack.c.h.s8.bf16 %v2841_v52  ;;  %v2865_v52 = vld [vmem:[#allocation2 + $0xa18] sm:$0xff] }
 0x5e7   : > { %4776 = vmatprep.subr.bf16.mxu0 %v3099_v22  ;;  %v3147_v22 = vunpack.c.h.s8.bf16 %v2587_v13  ;;  %v2611_v13 = vld [vmem:[#allocation2 + $0x228] sm:$0xff] }
 0x5e9   : > { %4605 = vmatpush1.bf16.msra.mxu1 %v3608_v30  ;;  %v3656_v30 = vunpack.c.h.s8.bf16 %v2840_v17  ;;  %v2864_v17 = vld [vmem:[#allocation2 + $0xa10] sm:$0xff] }
 0x5ea   : > { %4777 = vmatpush1.bf16.msra.mxu0 %v3098_v24  ;;  %4606 = vmatprep.subr.bf16.mxu1 %v3617_v31  ;;  %v3146_v24 = vunpack.c.h.s8.bf16 %v2586_v19  ;;  %v3665_v31 = vunpack.c.l.s8.bf16 %v2849_v27  ;;  %v2610_v19 = vld [vmem:[#allocation2 + $0x220] sm:$0xff] }
 0x5eb   : > { %4778 = vmatprep.subr.bf16.mxu0 %v3107_v32  ;;  %v3155_v32 = vunpack.c.l.s8.bf16 %v2595_v28 }
 0x5ed   : > { %4607 = vmatpush1.bf16.msra.mxu1 %v3616_v42  ;;  %v3664_v42 = vunpack.c.l.s8.bf16 %v2848_v29 }
 0x5ee   : > { %4779 = vmatpush1.bf16.msra.mxu0 %v3106_v53  ;;  %4608 = vmatprep.subr.bf16.mxu1 %v3625_v54  ;;  %v3154_v53 = vunpack.c.l.s8.bf16 %v2594_v40  ;;  %v3673_v54 = vunpack.c.h.s8.bf16 %v2849_v27  ;;  %v2873_v27 = vld [vmem:[#allocation2 + $0xa58] sm:$0xff] }
 0x5ef   : > { %4780 = vmatprep.subr.bf16.mxu0 %v3115_v55  ;;  %v3163_v55 = vunpack.c.h.s8.bf16 %v2595_v28  ;;  %v2619_v28 = vld [vmem:[#allocation2 + $0x268] sm:$0xff] }
 0x5f1   : > { %4609 = vmatpush1.bf16.msra.mxu1 %v3624_v59  ;;  %v3672_v59 = vunpack.c.h.s8.bf16 %v2848_v29  ;;  %v2872_v29 = vld [vmem:[#allocation2 + $0xa50] sm:$0xff] }
 0x5f2   : > { %4781 = vmatpush1.bf16.msra.mxu0 %v3114_v0  ;;  %4610 = vmatprep.subr.bf16.mxu1 %v3633_v2  ;;  %v3162_v0 = vunpack.c.h.s8.bf16 %v2594_v40  ;;  %v3681_v2 = vunpack.c.l.s8.bf16 %v2857_v57  ;;  %v2618_v40 = vld [vmem:[#allocation2 + $0x260] sm:$0xff] }
 0x5f3   : > { %4782 = vmatprep.subr.bf16.mxu0 %v3123_v3  ;;  %v3171_v3 = vunpack.c.l.s8.bf16 %v2603_v58 }
 0x5f5   : > { %4611 = vmatpush1.bf16.msra.mxu1 %v3632_v45  ;;  %v3680_v45 = vunpack.c.l.s8.bf16 %v2856_v36 }
 0x5f6   : > { %4783 = vmatpush1.bf16.msra.mxu0 %v3122_v6  ;;  %4612 = vmatprep.subr.bf16.mxu1 %v3641_v43  ;;  %v3170_v6 = vunpack.c.l.s8.bf16 %v2602_v4  ;;  %v3689_v43 = vunpack.c.h.s8.bf16 %v2857_v57  ;;  %v2881_v57 = vld [vmem:[#allocation2 + $0xa98] sm:$0xff] }
 0x5f7   : > { %4784 = vmatprep.subr.bf16.mxu0 %v3131_v9  ;;  %v3179_v9 = vunpack.c.h.s8.bf16 %v2603_v58  ;;  %v2627_v58 = vld [vmem:[#allocation2 + $0x2a8] sm:$0xff] }
 0x5f9   : > { %4613 = vmatpush1.bf16.msra.mxu1 %v3640_v11  ;;  %v3688_v11 = vunpack.c.h.s8.bf16 %v2856_v36  ;;  %v2880_v36 = vld [vmem:[#allocation2 + $0xa90] sm:$0xff] }
 0x5fa   : > { %4785 = vmatpush1.bf16.msra.mxu0 %v3130_v37  ;;  %4614 = vmatprep.subr.bf16.mxu1 %v3649_v14  ;;  %v3178_v37 = vunpack.c.h.s8.bf16 %v2602_v4  ;;  %v3697_v14 = vunpack.c.l.s8.bf16 %v2865_v52  ;;  %v2626_v4 = vld [vmem:[#allocation2 + $0x2a0] sm:$0xff] }
 0x5fb   : > { %4786 = vmatprep.subr.bf16.mxu0 %v3139_v16  ;;  %v3187_v16 = vunpack.c.l.s8.bf16 %v2611_v13 }
 0x5fd   : > { %4615 = vmatpush1.bf16.msra.mxu1 %v3648_v20  ;;  %v3696_v20 = vunpack.c.l.s8.bf16 %v2864_v17 }
 0x5fe   : > { %4787 = vmatpush1.bf16.msra.mxu0 %v3138_v60  ;;  %4616 = vmatprep.subr.bf16.mxu1 %v3657_v21  ;;  %v3186_v60 = vunpack.c.l.s8.bf16 %v2610_v19  ;;  %v3705_v21 = vunpack.c.h.s8.bf16 %v2865_v52  ;;  %v2889_v52 = vld [vmem:[#allocation2 + $0xad8] sm:$0xff] }
 0x5ff   : > { %4788 = vmatprep.subr.bf16.mxu0 %v3147_v22  ;;  %v3195_v22 = vunpack.c.h.s8.bf16 %v2611_v13  ;;  %v2635_v13 = vld [vmem:[#allocation2 + $0x2e8] sm:$0xff] }
 0x601   : > { %4617 = vmatpush1.bf16.msra.mxu1 %v3656_v30  ;;  %v3704_v30 = vunpack.c.h.s8.bf16 %v2864_v17  ;;  %v2888_v17 = vld [vmem:[#allocation2 + $0xad0] sm:$0xff] }
 0x602   : > { %4789 = vmatpush1.bf16.msra.mxu0 %v3146_v24  ;;  %4618 = vmatprep.subr.bf16.mxu1 %v3665_v31  ;;  %v3194_v24 = vunpack.c.h.s8.bf16 %v2610_v19  ;;  %v3713_v31 = vunpack.c.l.s8.bf16 %v2873_v27  ;;  %v2634_v19 = vld [vmem:[#allocation2 + $0x2e0] sm:$0xff] }
 0x603   : > { %4790 = vmatprep.subr.bf16.mxu0 %v3155_v32  ;;  %v3203_v32 = vunpack.c.l.s8.bf16 %v2619_v28 }
 0x605   : > { %4619 = vmatpush1.bf16.msra.mxu1 %v3664_v42  ;;  %v3712_v42 = vunpack.c.l.s8.bf16 %v2872_v29 }
 0x606   : > { %4791 = vmatpush1.bf16.msra.mxu0 %v3154_v53  ;;  %4620 = vmatprep.subr.bf16.mxu1 %v3673_v54  ;;  %v3202_v53 = vunpack.c.l.s8.bf16 %v2618_v40  ;;  %v3721_v54 = vunpack.c.h.s8.bf16 %v2873_v27  ;;  %v2897_v27 = vld [vmem:[#allocation2 + $0xb18] sm:$0xff] }
 0x607   : > { %4792 = vmatprep.subr.bf16.mxu0 %v3163_v55  ;;  %v3211_v55 = vunpack.c.h.s8.bf16 %v2619_v28  ;;  %v2643_v28 = vld [vmem:[#allocation2 + $0x328] sm:$0xff] }
 0x609   : > { %4621 = vmatpush1.bf16.msra.mxu1 %v3672_v59  ;;  %v3720_v59 = vunpack.c.h.s8.bf16 %v2872_v29  ;;  %v2896_v29 = vld [vmem:[#allocation2 + $0xb10] sm:$0xff] }
 0x60a   : > { %4793 = vmatpush1.bf16.msra.mxu0 %v3162_v0  ;;  %4622 = vmatprep.subr.bf16.mxu1 %v3681_v2  ;;  %v3210_v0 = vunpack.c.h.s8.bf16 %v2618_v40  ;;  %v3729_v2 = vunpack.c.l.s8.bf16 %v2881_v57  ;;  %v2642_v40 = vld [vmem:[#allocation2 + $0x320] sm:$0xff] }
 0x60b   : > { %4794 = vmatprep.subr.bf16.mxu0 %v3171_v3  ;;  %v3219_v3 = vunpack.c.l.s8.bf16 %v2627_v58 }
 0x60d   : > { %4623 = vmatpush1.bf16.msra.mxu1 %v3680_v45  ;;  %v3728_v45 = vunpack.c.l.s8.bf16 %v2880_v36 }
 0x60e   : > { %4795 = vmatpush1.bf16.msra.mxu0 %v3170_v6  ;;  %4624 = vmatprep.subr.bf16.mxu1 %v3689_v43  ;;  %v3218_v6 = vunpack.c.l.s8.bf16 %v2626_v4  ;;  %v3737_v43 = vunpack.c.h.s8.bf16 %v2881_v57  ;;  %v2905_v57 = vld [vmem:[#allocation2 + $0xb58] sm:$0xff] }
 0x60f   : > { %4796 = vmatprep.subr.bf16.mxu0 %v3179_v9  ;;  %v3227_v9 = vunpack.c.h.s8.bf16 %v2627_v58  ;;  %v2651_v58 = vld [vmem:[#allocation2 + $0x368] sm:$0xff] }
 0x611   : > { %4625 = vmatpush1.bf16.msra.mxu1 %v3688_v11  ;;  %v3736_v11 = vunpack.c.h.s8.bf16 %v2880_v36  ;;  %v2904_v36 = vld [vmem:[#allocation2 + $0xb50] sm:$0xff] }
 0x612   : > { %4797 = vmatpush1.bf16.msra.mxu0 %v3178_v37  ;;  %4637 = vmatprep.subr.bf16.mxu1 %v3697_v14  ;;  %v3226_v37 = vunpack.c.h.s8.bf16 %v2626_v4  ;;  %v3745_v14 = vunpack.c.l.s8.bf16 %v2889_v52  ;;  %v2650_v4 = vld [vmem:[#allocation2 + $0x360] sm:$0xff] }
 0x613   : > { %4809 = vmatprep.subr.bf16.mxu0 %v3187_v16  ;;  %v3235_v16 = vunpack.c.l.s8.bf16 %v2635_v13 }
 0x614   : > { %4627 = vmatmul.mubr.bf16.vlgmr.msra.gmra.mrb[4].mxu1 %v7881_v15 }
 0x615   : > { %4799 = vmatmul.mubr.bf16.vlgmr.msra.gmra.mrb[4].mxu0 %v7847_v23  ;;  %4638 = vmatpush1.bf16.msra.mxu1 %v3696_v20  ;;  %v3744_v20 = vunpack.c.l.s8.bf16 %v2888_v17 }
 0x616   : > { %4810 = vmatpush1.bf16.msra.mxu0 %v3186_v60  ;;  %4639 = vmatprep.subr.bf16.mxu1 %v3705_v21  ;;  %v3234_v60 = vunpack.c.l.s8.bf16 %v2634_v19  ;;  %v3753_v21 = vunpack.c.h.s8.bf16 %v2889_v52  ;;  %v2913_v52 = vld [vmem:[#allocation2 + $0xb98] sm:$0xff] }
 0x617   : > { %4811 = vmatprep.subr.bf16.mxu0 %v3195_v22  ;;  %4669 = vmatprep.mubr.bf16.mxu1 %v7883_v26  ;;  %v3243_v22 = vunpack.c.h.s8.bf16 %v2635_v13  ;;  %v2659_v13 = vld [vmem:[#allocation2 + $0x3a8] sm:$0xff] }
 0x618   : > { %4841 = vmatprep.mubr.bf16.mxu0 %v7851_v38 }
 0x619   : > { %4640 = vmatpush1.bf16.msra.mxu1 %v3704_v30  ;;  %v3752_v30 = vunpack.c.h.s8.bf16 %v2888_v17  ;;  %v2912_v17 = vld [vmem:[#allocation2 + $0xb90] sm:$0xff] }
 0x61a   : > { %4812 = vmatpush1.bf16.msra.mxu0 %v3194_v24  ;;  %4641 = vmatprep.subr.bf16.mxu1 %v3713_v31  ;;  %v3242_v24 = vunpack.c.h.s8.bf16 %v2634_v19  ;;  %v3761_v31 = vunpack.c.l.s8.bf16 %v2897_v27  ;;  %v2658_v19 = vld [vmem:[#allocation2 + $0x3a0] sm:$0xff] }
 0x61b   : > { %4813 = vmatprep.subr.bf16.mxu0 %v3203_v32  ;;  %v3251_v32 = vunpack.c.l.s8.bf16 %v2643_v28 }
 0x61d   : > { %4642 = vmatpush1.bf16.msra.mxu1 %v3712_v42  ;;  %v3760_v42 = vunpack.c.l.s8.bf16 %v2896_v29 }
 0x61e   : > { %4814 = vmatpush1.bf16.msra.mxu0 %v3202_v53  ;;  %4643 = vmatprep.subr.bf16.mxu1 %v3721_v54  ;;  %v3250_v53 = vunpack.c.l.s8.bf16 %v2642_v40  ;;  %v3769_v54 = vunpack.c.h.s8.bf16 %v2897_v27  ;;  %v2921_v27 = vld [vmem:[#allocation2 + $0xbd8] sm:$0xff] }
 0x61f   : > { %4815 = vmatprep.subr.bf16.mxu0 %v3211_v55  ;;  %v3259_v55 = vunpack.c.h.s8.bf16 %v2643_v28  ;;  %v2667_v28 = vld [vmem:[#allocation2 + $0x3e8] sm:$0xff] }
 0x621   : > { %4644 = vmatpush1.bf16.msra.mxu1 %v3720_v59  ;;  %v3768_v59 = vunpack.c.h.s8.bf16 %v2896_v29  ;;  %v2920_v29 = vld [vmem:[#allocation2 + $0xbd0] sm:$0xff] }
 0x622   : > { %4816 = vmatpush1.bf16.msra.mxu0 %v3210_v0  ;;  %4645 = vmatprep.subr.bf16.mxu1 %v3729_v2  ;;  %v3258_v0 = vunpack.c.h.s8.bf16 %v2642_v40  ;;  %v3777_v2 = vunpack.c.l.s8.bf16 %v2905_v57  ;;  %v2666_v40 = vld [vmem:[#allocation2 + $0x3e0] sm:$0xff] }
 0x623   : > { %4817 = vmatprep.subr.bf16.mxu0 %v3219_v3  ;;  %v3267_v3 = vunpack.c.l.s8.bf16 %v2651_v58 }
 0x625   : > { %4646 = vmatpush1.bf16.msra.mxu1 %v3728_v45  ;;  %v3776_v45 = vunpack.c.l.s8.bf16 %v2904_v36 }
 0x626   : > { %4818 = vmatpush1.bf16.msra.mxu0 %v3218_v6  ;;  %4647 = vmatprep.subr.bf16.mxu1 %v3737_v43  ;;  %v3266_v6 = vunpack.c.l.s8.bf16 %v2650_v4  ;;  %v3785_v43 = vunpack.c.h.s8.bf16 %v2905_v57  ;;  %v2929_v57 = vld [vmem:[#allocation2 + $0xc18] sm:$0xff] }
 0x627   : > { %4819 = vmatprep.subr.bf16.mxu0 %v3227_v9  ;;  %v3275_v9 = vunpack.c.h.s8.bf16 %v2651_v58  ;;  %v2675_v58 = vld [vmem:[#allocation2 + $0x428] sm:$0xff] }
 0x629   : > { %4648 = vmatpush1.bf16.msra.mxu1 %v3736_v11  ;;  %v3784_v11 = vunpack.c.h.s8.bf16 %v2904_v36  ;;  %v2928_v36 = vld [vmem:[#allocation2 + $0xc10] sm:$0xff] }
 0x62a   : > { %4820 = vmatpush1.bf16.msra.mxu0 %v3226_v37  ;;  %4649 = vmatprep.subr.bf16.mxu1 %v3745_v14  ;;  %v3274_v37 = vunpack.c.h.s8.bf16 %v2650_v4  ;;  %v3793_v14 = vunpack.c.l.s8.bf16 %v2913_v52  ;;  %v2674_v4 = vld [vmem:[#allocation2 + $0x420] sm:$0xff] }
 0x62b   : > { %4821 = vmatprep.subr.bf16.mxu0 %v3235_v16  ;;  %v3283_v16 = vunpack.c.l.s8.bf16 %v2659_v13 }
 0x62d   : > { %4650 = vmatpush1.bf16.msra.mxu1 %v3744_v20  ;;  %v3792_v20 = vunpack.c.l.s8.bf16 %v2912_v17 }
 0x62e   : > { %4822 = vmatpush1.bf16.msra.mxu0 %v3234_v60  ;;  %4651 = vmatprep.subr.bf16.mxu1 %v3753_v21  ;;  %v3282_v60 = vunpack.c.l.s8.bf16 %v2658_v19  ;;  %v3801_v21 = vunpack.c.h.s8.bf16 %v2913_v52  ;;  %v2937_v52 = vld [vmem:[#allocation2 + $0xc58] sm:$0xff] }
 0x62f   : > { %4823 = vmatprep.subr.bf16.mxu0 %v3243_v22  ;;  %v3291_v22 = vunpack.c.h.s8.bf16 %v2659_v13  ;;  %v2683_v13 = vld [vmem:[#allocation2 + $0x468] sm:$0xff] }
 0x631   : > { %4652 = vmatpush1.bf16.msra.mxu1 %v3752_v30  ;;  %v3800_v30 = vunpack.c.h.s8.bf16 %v2912_v17  ;;  %v2936_v17 = vld [vmem:[#allocation2 + $0xc50] sm:$0xff] }
 0x632   : > { %4824 = vmatpush1.bf16.msra.mxu0 %v3242_v24  ;;  %4653 = vmatprep.subr.bf16.mxu1 %v3761_v31  ;;  %v3290_v24 = vunpack.c.h.s8.bf16 %v2658_v19  ;;  %v3809_v31 = vunpack.c.l.s8.bf16 %v2921_v27  ;;  %v2682_v19 = vld [vmem:[#allocation2 + $0x460] sm:$0xff] }
 0x633   : > { %4825 = vmatprep.subr.bf16.mxu0 %v3251_v32  ;;  %v3299_v32 = vunpack.c.l.s8.bf16 %v2667_v28 }
 0x635   : > { %4654 = vmatpush1.bf16.msra.mxu1 %v3760_v42  ;;  %v3808_v42 = vunpack.c.l.s8.bf16 %v2920_v29 }
 0x636   : > { %4826 = vmatpush1.bf16.msra.mxu0 %v3250_v53  ;;  %4655 = vmatprep.subr.bf16.mxu1 %v3769_v54  ;;  %v3298_v53 = vunpack.c.l.s8.bf16 %v2666_v40  ;;  %v3817_v54 = vunpack.c.h.s8.bf16 %v2921_v27  ;;  %v2945_v27 = vld [vmem:[#allocation2 + $0xc98] sm:$0xff] }
 0x637   : > { %4827 = vmatprep.subr.bf16.mxu0 %v3259_v55  ;;  %v3307_v55 = vunpack.c.h.s8.bf16 %v2667_v28  ;;  %v2691_v28 = vld [vmem:[#allocation2 + $0x4a8] sm:$0xff] }
 0x639   : > { %4656 = vmatpush1.bf16.msra.mxu1 %v3768_v59  ;;  %v3816_v59 = vunpack.c.h.s8.bf16 %v2920_v29  ;;  %v2944_v29 = vld [vmem:[#allocation2 + $0xc90] sm:$0xff] }
 0x63a   : > { %4828 = vmatpush1.bf16.msra.mxu0 %v3258_v0  ;;  %4657 = vmatprep.subr.bf16.mxu1 %v3777_v2  ;;  %v3306_v0 = vunpack.c.h.s8.bf16 %v2666_v40  ;;  %v3825_v2 = vunpack.c.l.s8.bf16 %v2929_v57  ;;  %v2690_v40 = vld [vmem:[#allocation2 + $0x4a0] sm:$0xff] }
 0x63b   : > { %4829 = vmatprep.subr.bf16.mxu0 %v3267_v3  ;;  %v3315_v3 = vunpack.c.l.s8.bf16 %v2675_v58 }
 0x63d   : > { %4658 = vmatpush1.bf16.msra.mxu1 %v3776_v45  ;;  %v3824_v45 = vunpack.c.l.s8.bf16 %v2928_v36 }
 0x63e   : > { %4830 = vmatpush1.bf16.msra.mxu0 %v3266_v6  ;;  %4659 = vmatprep.subr.bf16.mxu1 %v3785_v43  ;;  %v3314_v6 = vunpack.c.l.s8.bf16 %v2674_v4  ;;  %v3833_v43 = vunpack.c.h.s8.bf16 %v2929_v57  ;;  %v2953_v57 = vld [vmem:[#allocation2 + $0xcd8] sm:$0xff] }
 0x63f   : > { %4831 = vmatprep.subr.bf16.mxu0 %v3275_v9  ;;  %v3323_v9 = vunpack.c.h.s8.bf16 %v2675_v58  ;;  %v2699_v58 = vld [vmem:[#allocation2 + $0x4e8] sm:$0xff] }
 0x641   : > { %4660 = vmatpush1.bf16.msra.mxu1 %v3784_v11  ;;  %v3832_v11 = vunpack.c.h.s8.bf16 %v2928_v36  ;;  %v2952_v36 = vld [vmem:[#allocation2 + $0xcd0] sm:$0xff] }
 0x642   : > { %4832 = vmatpush1.bf16.msra.mxu0 %v3274_v37  ;;  %4661 = vmatprep.subr.bf16.mxu1 %v3793_v14  ;;  %v3322_v37 = vunpack.c.h.s8.bf16 %v2674_v4  ;;  %v3841_v14 = vunpack.c.l.s8.bf16 %v2937_v52  ;;  %v2698_v4 = vld [vmem:[#allocation2 + $0x4e0] sm:$0xff] }
 0x643   : > { %4833 = vmatprep.subr.bf16.mxu0 %v3283_v16  ;;  %v3331_v16 = vunpack.c.l.s8.bf16 %v2683_v13 }
 0x645   : > { %4662 = vmatpush1.bf16.msra.mxu1 %v3792_v20  ;;  %v3840_v20 = vunpack.c.l.s8.bf16 %v2936_v17 }
 0x646   : > { %4834 = vmatpush1.bf16.msra.mxu0 %v3282_v60  ;;  %4663 = vmatprep.subr.bf16.mxu1 %v3801_v21  ;;  %v3330_v60 = vunpack.c.l.s8.bf16 %v2682_v19  ;;  %v3849_v21 = vunpack.c.h.s8.bf16 %v2937_v52  ;;  %v2961_v52 = vld [vmem:[#allocation2 + $0xd18] sm:$0xff] }
 0x647   : > { %4835 = vmatprep.subr.bf16.mxu0 %v3291_v22  ;;  %v3339_v22 = vunpack.c.h.s8.bf16 %v2683_v13  ;;  %v2707_v13 = vld [vmem:[#allocation2 + $0x528] sm:$0xff] }
 0x649   : > { %4664 = vmatpush1.bf16.msra.mxu1 %v3800_v30  ;;  %v3848_v30 = vunpack.c.h.s8.bf16 %v2936_v17  ;;  %v2960_v17 = vld [vmem:[#allocation2 + $0xd10] sm:$0xff] }
 0x64a   : > { %4836 = vmatpush1.bf16.msra.mxu0 %v3290_v24  ;;  %4665 = vmatprep.subr.bf16.mxu1 %v3809_v31  ;;  %v3338_v24 = vunpack.c.h.s8.bf16 %v2682_v19  ;;  %v3857_v31 = vunpack.c.l.s8.bf16 %v2945_v27  ;;  %v2706_v19 = vld [vmem:[#allocation2 + $0x520] sm:$0xff] }
 0x64b   : > { %4837 = vmatprep.subr.bf16.mxu0 %v3299_v32  ;;  %v3347_v32 = vunpack.c.l.s8.bf16 %v2691_v28 }
 0x64d   : > { %4666 = vmatpush1.bf16.msra.mxu1 %v3808_v42  ;;  %v3856_v42 = vunpack.c.l.s8.bf16 %v2944_v29 }
 0x64e   : > { %4838 = vmatpush1.bf16.msra.mxu0 %v3298_v53  ;;  %4667 = vmatprep.subr.bf16.mxu1 %v3817_v54  ;;  %v3346_v53 = vunpack.c.l.s8.bf16 %v2690_v40  ;;  %v3865_v54 = vunpack.c.h.s8.bf16 %v2945_v27  ;;  %v2969_v27 = vld [vmem:[#allocation2 + $0xd58] sm:$0xff] }
 0x64f   : > { %4839 = vmatprep.subr.bf16.mxu0 %v3307_v55  ;;  %v3355_v55 = vunpack.c.h.s8.bf16 %v2691_v28  ;;  %v2715_v28 = vld [vmem:[#allocation2 + $0x568] sm:$0xff] }
 0x651   : > { %4668 = vmatpush1.bf16.msra.mxu1 %v3816_v59  ;;  %v3864_v59 = vunpack.c.h.s8.bf16 %v2944_v29  ;;  %v2968_v29 = vld [vmem:[#allocation2 + $0xd50] sm:$0xff] }
 0x652   : > { %4840 = vmatpush1.bf16.msra.mxu0 %v3306_v0  ;;  %4680 = vmatprep.subr.bf16.mxu1 %v3825_v2  ;;  %v3354_v0 = vunpack.c.h.s8.bf16 %v2690_v40  ;;  %v3873_v2 = vunpack.c.l.s8.bf16 %v2953_v57  ;;  %v2714_v40 = vld [vmem:[#allocation2 + $0x560] sm:$0xff] }
 0x653   : > { %4852 = vmatprep.subr.bf16.mxu0 %v3315_v3  ;;  %v3363_v3 = vunpack.c.l.s8.bf16 %v2699_v58 }
 0x654   : > { %4670 = vmatmul.mubr.bf16.vlgmr.msra.gmra.mrb[4].mxu1 %v7897_v62 }
 0x655   : > { %4842 = vmatmul.mubr.bf16.vlgmr.msra.gmra.mrb[4].mxu0 %v7838_v18  ;;  %4681 = vmatpush1.bf16.msra.mxu1 %v3824_v45  ;;  %v3872_v45 = vunpack.c.l.s8.bf16 %v2952_v36 }
 0x656   : > { %4853 = vmatpush1.bf16.msra.mxu0 %v3314_v6  ;;  %4682 = vmatprep.subr.bf16.mxu1 %v3833_v43  ;;  %v3362_v6 = vunpack.c.l.s8.bf16 %v2698_v4  ;;  %v3881_v43 = vunpack.c.h.s8.bf16 %v2953_v57  ;;  %v2977_v57 = vld [vmem:[#allocation2 + $0xd98] sm:$0xff] }
 0x657   : > { %4854 = vmatprep.subr.bf16.mxu0 %v3323_v9  ;;  %4712 = vmatprep.mubr.bf16.mxu1 %v7899_v5  ;;  %v3371_v9 = vunpack.c.h.s8.bf16 %v2699_v58  ;;  %v2723_v58 = vld [vmem:[#allocation2 + $0x5a8] sm:$0xff] }
 0x658   : > { %4884 = vmatprep.mubr.bf16.mxu0 %v7781_v12 }
 0x659   : > { %4683 = vmatpush1.bf16.msra.mxu1 %v3832_v11  ;;  %v3880_v11 = vunpack.c.h.s8.bf16 %v2952_v36  ;;  %v2976_v36 = vld [vmem:[#allocation2 + $0xd90] sm:$0xff] }
 0x65a   : > { %4855 = vmatpush1.bf16.msra.mxu0 %v3322_v37  ;;  %4684 = vmatprep.subr.bf16.mxu1 %v3841_v14  ;;  %v3370_v37 = vunpack.c.h.s8.bf16 %v2698_v4  ;;  %v3889_v14 = vunpack.c.l.s8.bf16 %v2961_v52  ;;  %v2722_v4 = vld [vmem:[#allocation2 + $0x5a0] sm:$0xff] }
 0x65b   : > { %4856 = vmatprep.subr.bf16.mxu0 %v3331_v16  ;;  %v3379_v16 = vunpack.c.l.s8.bf16 %v2707_v13 }
 0x65d   : > { %4685 = vmatpush1.bf16.msra.mxu1 %v3840_v20  ;;  %v3888_v20 = vunpack.c.l.s8.bf16 %v2960_v17 }
 0x65e   : > { %4857 = vmatpush1.bf16.msra.mxu0 %v3330_v60  ;;  %4686 = vmatprep.subr.bf16.mxu1 %v3849_v21  ;;  %v3378_v60 = vunpack.c.l.s8.bf16 %v2706_v19  ;;  %v3897_v21 = vunpack.c.h.s8.bf16 %v2961_v52  ;;  %v2985_v52 = vld [vmem:[#allocation2 + $0xdd8] sm:$0xff] }
 0x65f   : > { %4858 = vmatprep.subr.bf16.mxu0 %v3339_v22  ;;  %v3387_v22 = vunpack.c.h.s8.bf16 %v2707_v13  ;;  %v2731_v13 = vld [vmem:[#allocation2 + $0x5e8] sm:$0xff] }
 0x661   : > { %4687 = vmatpush1.bf16.msra.mxu1 %v3848_v30  ;;  %v3896_v30 = vunpack.c.h.s8.bf16 %v2960_v17  ;;  %v2984_v17 = vld [vmem:[#allocation2 + $0xdd0] sm:$0xff] }
 0x662   : > { %4859 = vmatpush1.bf16.msra.mxu0 %v3338_v24  ;;  %4688 = vmatprep.subr.bf16.mxu1 %v3857_v31  ;;  %v3386_v24 = vunpack.c.h.s8.bf16 %v2706_v19  ;;  %v3905_v31 = vunpack.c.l.s8.bf16 %v2969_v27  ;;  %v2730_v19 = vld [vmem:[#allocation2 + $0x5e0] sm:$0xff] }
 0x663   : > { %4860 = vmatprep.subr.bf16.mxu0 %v3347_v32  ;;  %v3395_v32 = vunpack.c.l.s8.bf16 %v2715_v28 }
 0x665   : > { %4689 = vmatpush1.bf16.msra.mxu1 %v3856_v42  ;;  %v3904_v42 = vunpack.c.l.s8.bf16 %v2968_v29 }
 0x666   : > { %4861 = vmatpush1.bf16.msra.mxu0 %v3346_v53  ;;  %4690 = vmatprep.subr.bf16.mxu1 %v3865_v54  ;;  %v3394_v53 = vunpack.c.l.s8.bf16 %v2714_v40  ;;  %v3913_v54 = vunpack.c.h.s8.bf16 %v2969_v27  ;;  %v2993_v27 = vld [vmem:[#allocation2 + $0xe18] sm:$0xff] }
 0x667   : > { %4862 = vmatprep.subr.bf16.mxu0 %v3355_v55  ;;  %v3403_v55 = vunpack.c.h.s8.bf16 %v2715_v28  ;;  %v2739_v28 = vld [vmem:[#allocation2 + $0x628] sm:$0xff] }
 0x669   : > { %4691 = vmatpush1.bf16.msra.mxu1 %v3864_v59  ;;  %v3912_v59 = vunpack.c.h.s8.bf16 %v2968_v29  ;;  %v2992_v29 = vld [vmem:[#allocation2 + $0xe10] sm:$0xff] }
 0x66a   : > { %4863 = vmatpush1.bf16.msra.mxu0 %v3354_v0  ;;  %4692 = vmatprep.subr.bf16.mxu1 %v3873_v2  ;;  %v3402_v0 = vunpack.c.h.s8.bf16 %v2714_v40  ;;  %v3921_v2 = vunpack.c.l.s8.bf16 %v2977_v57  ;;  %v2738_v40 = vld [vmem:[#allocation2 + $0x620] sm:$0xff] }
 0x66b   : > { %4864 = vmatprep.subr.bf16.mxu0 %v3363_v3  ;;  %v3411_v3 = vunpack.c.l.s8.bf16 %v2723_v58 }
 0x66d   : > { %4693 = vmatpush1.bf16.msra.mxu1 %v3872_v45  ;;  %v3920_v45 = vunpack.c.l.s8.bf16 %v2976_v36 }
 0x66e   : > { %4865 = vmatpush1.bf16.msra.mxu0 %v3362_v6  ;;  %4694 = vmatprep.subr.bf16.mxu1 %v3881_v43  ;;  %v3410_v6 = vunpack.c.l.s8.bf16 %v2722_v4  ;;  %v3929_v43 = vunpack.c.h.s8.bf16 %v2977_v57  ;;  %v3001_v57 = vld [vmem:[#allocation2 + $0xe58] sm:$0xff] }
 0x66f   : > { %4866 = vmatprep.subr.bf16.mxu0 %v3371_v9  ;;  %v3419_v9 = vunpack.c.h.s8.bf16 %v2723_v58  ;;  %v2747_v58 = vld [vmem:[#allocation2 + $0x668] sm:$0xff] }
 0x671   : > { %4695 = vmatpush1.bf16.msra.mxu1 %v3880_v11  ;;  %v3928_v11 = vunpack.c.h.s8.bf16 %v2976_v36  ;;  %v3000_v36 = vld [vmem:[#allocation2 + $0xe50] sm:$0xff] }
 0x672   : > { %4867 = vmatpush1.bf16.msra.mxu0 %v3370_v37  ;;  %4696 = vmatprep.subr.bf16.mxu1 %v3889_v14  ;;  %v3418_v37 = vunpack.c.h.s8.bf16 %v2722_v4  ;;  %v3937_v14 = vunpack.c.l.s8.bf16 %v2985_v52  ;;  %v2746_v4 = vld [vmem:[#allocation2 + $0x660] sm:$0xff] }
 0x673   : > { %4868 = vmatprep.subr.bf16.mxu0 %v3379_v16  ;;  %v3427_v16 = vunpack.c.l.s8.bf16 %v2731_v13 }
 0x675   : > { %4697 = vmatpush1.bf16.msra.mxu1 %v3888_v20  ;;  %v3936_v20 = vunpack.c.l.s8.bf16 %v2984_v17 }
 0x676   : > { %4869 = vmatpush1.bf16.msra.mxu0 %v3378_v60  ;;  %4698 = vmatprep.subr.bf16.mxu1 %v3897_v21  ;;  %v3426_v60 = vunpack.c.l.s8.bf16 %v2730_v19  ;;  %v3945_v21 = vunpack.c.h.s8.bf16 %v2985_v52  ;;  %v3009_v52 = vld [vmem:[#allocation2 + $0xe98] sm:$0xff] }
 0x677   : > { %4870 = vmatprep.subr.bf16.mxu0 %v3387_v22  ;;  %v3435_v22 = vunpack.c.h.s8.bf16 %v2731_v13  ;;  %v2755_v13 = vld [vmem:[#allocation2 + $0x6a8] sm:$0xff] }
 0x679   : > { %4699 = vmatpush1.bf16.msra.mxu1 %v3896_v30  ;;  %v3944_v30 = vunpack.c.h.s8.bf16 %v2984_v17  ;;  %v3008_v17 = vld [vmem:[#allocation2 + $0xe90] sm:$0xff] }
 0x67a   : > { %4871 = vmatpush1.bf16.msra.mxu0 %v3386_v24  ;;  %4700 = vmatprep.subr.bf16.mxu1 %v3905_v31  ;;  %v3434_v24 = vunpack.c.h.s8.bf16 %v2730_v19  ;;  %v3953_v31 = vunpack.c.l.s8.bf16 %v2993_v27  ;;  %v2754_v19 = vld [vmem:[#allocation2 + $0x6a0] sm:$0xff] }
 0x67b   : > { %4872 = vmatprep.subr.bf16.mxu0 %v3395_v32  ;;  %v3443_v32 = vunpack.c.l.s8.bf16 %v2739_v28 }
 0x67d   : > { %4701 = vmatpush1.bf16.msra.mxu1 %v3904_v42  ;;  %v3952_v42 = vunpack.c.l.s8.bf16 %v2992_v29 }
 0x67e   : > { %4873 = vmatpush1.bf16.msra.mxu0 %v3394_v53  ;;  %4702 = vmatprep.subr.bf16.mxu1 %v3913_v54  ;;  %v3442_v53 = vunpack.c.l.s8.bf16 %v2738_v40  ;;  %v3961_v54 = vunpack.c.h.s8.bf16 %v2993_v27  ;;  %v5454_v27 = vld [vmem:[#allocation11] sm:$0xff] }
 0x67f   : > { %4874 = vmatprep.subr.bf16.mxu0 %v3403_v55  ;;  %v3451_v55 = vunpack.c.h.s8.bf16 %v2739_v28  ;;  %v3017_v28 = vld [vmem:[#allocation2 + $0xed8] sm:$0xff] }
 0x681   : > { %4703 = vmatpush1.bf16.msra.mxu1 %v3912_v59  ;;  %v3960_v59 = vunpack.c.h.s8.bf16 %v2992_v29  ;;  %v5459_v29 = vrot.slane %v5454_v27, %v7791_v41 }
 0x682   : > { %4875 = vmatpush1.bf16.msra.mxu0 %v3402_v0  ;;  %4704 = vmatprep.subr.bf16.mxu1 %v3921_v2  ;;  %v3450_v0 = vunpack.c.h.s8.bf16 %v2738_v40  ;;  %v3969_v2 = vunpack.c.l.s8.bf16 %v3001_v57  ;;  %v4001_v40 = vunpack.c.l.s8.bf16 %v3017_v28 }
 0x683   : > { %4876 = vmatprep.subr.bf16.mxu0 %v3411_v3  ;;  %v3459_v3 = vunpack.c.l.s8.bf16 %v2747_v58 }
 0x685   : > { %4705 = vmatpush1.bf16.msra.mxu1 %v3920_v45  ;;  %v3968_v45 = vunpack.c.l.s8.bf16 %v3000_v36 }
 0x686   : > { %4877 = vmatpush1.bf16.msra.mxu0 %v3410_v6  ;;  %4706 = vmatprep.subr.bf16.mxu1 %v3929_v43  ;;  %v3458_v6 = vunpack.c.l.s8.bf16 %v2746_v4  ;;  %v3977_v43 = vunpack.c.h.s8.bf16 %v3001_v57  ;;  %v5463_v57 = vrot.slane %v5454_v27, %v7762_v34  ;;  %v3024_v27 = vld [vmem:[#allocation2 + $0xf10] sm:$0xff] }
 0x687   : > { %4878 = vmatprep.subr.bf16.mxu0 %v3419_v9  ;;  %v3467_v9 = vunpack.c.h.s8.bf16 %v2747_v58 }
 0x689   : > { %4707 = vmatpush1.bf16.msra.mxu1 %v3928_v11  ;;  %v3976_v11 = vunpack.c.h.s8.bf16 %v3000_v36 }
 0x68a   : > { %4879 = vmatpush1.bf16.msra.mxu0 %v3418_v37  ;;  %4708 = vmatprep.subr.bf16.mxu1 %v3937_v14  ;;  %v3466_v37 = vunpack.c.h.s8.bf16 %v2746_v4  ;;  %v3985_v14 = vunpack.c.l.s8.bf16 %v3009_v52 }
 0x68b   : > { %4880 = vmatprep.subr.bf16.mxu0 %v3427_v16  ;;  %v3475_v16 = vunpack.c.l.s8.bf16 %v2755_v13 }
 0x68d   : > { %4709 = vmatpush1.bf16.msra.mxu1 %v3936_v20  ;;  %v3984_v20 = vunpack.c.l.s8.bf16 %v3008_v17 }
 0x68e   : > { %4881 = vmatpush1.bf16.msra.mxu0 %v3426_v60  ;;  %4710 = vmatprep.subr.bf16.mxu1 %v3945_v21  ;;  %v3474_v60 = vunpack.c.l.s8.bf16 %v2754_v19  ;;  %v3993_v21 = vunpack.c.h.s8.bf16 %v3009_v52  ;;  %v4009_v52 = vunpack.c.h.s8.bf16 %v3017_v28  ;;  %v2770_v28 = vld [vmem:[#allocation2 + $0x720] sm:$0xff] }
 0x68f   : > { %4882 = vmatprep.subr.bf16.mxu0 %v3435_v22  ;;  %v3483_v22 = vunpack.c.h.s8.bf16 %v2755_v13 }
 0x691   : > { %4711 = vmatpush1.bf16.msra.mxu1 %v3944_v30  ;;  %v2763_v30 = vld [vmem:[#allocation2 + $0x6e8] sm:$0xff] }
 0x692   : > { %4883 = vmatpush1.bf16.msra.mxu0 %v3434_v24  ;;  %4723 = vmatprep.subr.bf16.mxu1 %v3953_v31  ;;  %v5512_v24 = vld [vmem:[#allocation13] sm:$0xff]  ;;  %v3992_v31 = vunpack.c.h.s8.bf16 %v3008_v17 }
 0x693   : > { %4895 = vmatprep.subr.bf16.mxu0 %v3443_v32  ;;  %v3482_v32 = vunpack.c.h.s8.bf16 %v2754_v19 }
 0x694   : > { %4713 = vmatmul.mubr.bf16.vlgmr.msra.gmra.mrb[4].mxu1 %v7917_v48 }
 0x695   : > { %4885 = vmatmul.mubr.bf16.vlgmr.msra.gmra.mrb[4].mxu0 %v7849_v25  ;;  %4724 = vmatpush1.bf16.msra.mxu1 %v3952_v42  ;;  %v3491_v42 = vunpack.c.l.s8.bf16 %v2763_v30 }
 0x696   : > { %4896 = vmatpush1.bf16.msra.mxu0 %v3442_v53  ;;  %4725 = vmatprep.subr.bf16.mxu1 %v3961_v54  ;;  %v3016_v53 = vld [vmem:[#allocation2 + $0xed0] sm:$0xff]  ;;  %v2762_v54 = vld [vmem:[#allocation2 + $0x6e0] sm:$0xff] }
 0x697   : > { %4897 = vmatprep.subr.bf16.mxu0 %v3451_v55  ;;  %4755 = vmatprep.mubr.bf16.mxu1 %v7919_v49  ;;  %v4000_v4 = vunpack.c.l.s8.bf16 %v3016_v53 }
 0x698   : > { %4927 = vmatprep.mubr.bf16.mxu0 %v7853_v39 }
 0x699   : > { %4726 = vmatpush1.bf16.msra.mxu1 %v3960_v59  ;;  %v5517_v59 = vrot.slane %v5512_v24, %v7791_v41 }
 0x69a   : > { %4898 = vmatpush1.bf16.msra.mxu0 %v3450_v0  ;;  %4727 = vmatprep.subr.bf16.mxu1 %v3969_v2 }
 0x69b   : > { %4899 = vmatprep.subr.bf16.mxu0 %v3459_v3  ;;  %v5521_v3 = vrot.slane %v5512_v24, %v7762_v34 }
 0x69d   : > { %4728 = vmatpush1.bf16.msra.mxu1 %v3968_v45  ;;  %v3490_v45 = vunpack.c.l.s8.bf16 %v2762_v54 }
 0x69e   : > { %4900 = vmatpush1.bf16.msra.mxu0 %v3458_v6  ;;  %4729 = vmatprep.subr.bf16.mxu1 %v3977_v43 }
 0x69f   : > { %4901 = vmatprep.subr.bf16.mxu0 %v3467_v9 }
 0x6a1   : > { %4730 = vmatpush1.bf16.msra.mxu1 %v3976_v11 }
 0x6a2   : > { %4902 = vmatpush1.bf16.msra.mxu0 %v3466_v37  ;;  %4731 = vmatprep.subr.bf16.mxu1 %v3985_v14  ;;  %v3025_v37 = vld [vmem:[#allocation2 + $0xf18] sm:$0xff] }
 0x6a3   : > { %4903 = vmatprep.subr.bf16.mxu0 %v3475_v16 }
 0x6a5   : > { %4732 = vmatpush1.bf16.msra.mxu1 %v3984_v20  ;;  %v4008_v20 = vunpack.c.h.s8.bf16 %v3016_v53  ;;  %v4025_v53 = vunpack.c.h.s8.bf16 %v3025_v37 }
 0x6a6   : > { %4904 = vmatpush1.bf16.msra.mxu0 %v3474_v60  ;;  %4733 = vmatprep.subr.bf16.mxu1 %v3993_v21  ;;  %v3498_v60 = vunpack.c.h.s8.bf16 %v2762_v54 }
 0x6a7   : > { %4905 = vmatprep.subr.bf16.mxu0 %v3483_v22 }
 0x6a8   : > { %v4413_v55 = vpop.f32.mrb[0].mxu0 }
 0x6a9   : > { %v6340_v58 = vadd.f32 %v4413_v55, %v7925_v63  ;;  %v4415_v0 = vpop.f32.mrb[1].mxu0  ;;  %4734 = vmatpush1.bf16.msra.mxu1 %v3992_v31  ;;  %v3499_v63 = vunpack.c.h.s8.bf16 %v2763_v30  ;;  %v3033_v55 = vld [vmem:[#allocation2 + $0xf58] sm:$0xff] }
 0x6aa   : > { %v6341_v2 = vadd.f32 %v4415_v0, %v7927_v46  ;;  %v4417_v36 = vpop.f32.mrb[2].mxu0  ;;  %4906 = vmatpush1.bf16.msra.mxu0 %v3482_v32  ;;  %4735 = vmatprep.subr.bf16.mxu1 %v4001_v40  ;;  %v2771_v46 = vld [vmem:[#allocation2 + $0x728] sm:$0xff]  ;;  %v3506_v40 = vunpack.c.l.s8.bf16 %v2770_v28  ;;  %v3514_v0 = vunpack.c.h.s8.bf16 %v2770_v28 }
 0x6ab   : > { %v5496_v6 = vmul.f32 %v6340_v58, %v5459_v29  ;;  %v6342_v43 = vadd.f32 %v4417_v36, %v7929_v47  ;;  %v4419_v9 = vpop.f32.mrb[3].mxu0  ;;  %4907 = vmatprep.subr.bf16.mxu0 %v3491_v42  ;;  %v4017_v47 = vunpack.c.l.s8.bf16 %v3025_v37  ;;  %v3507_v22 = vunpack.c.l.s8.bf16 %v2771_v46  ;;  %v3032_v36 = vld [vmem:[#allocation2 + $0xf50] sm:$0xff] }
 0x6ac   : > { %v5497_v13 = vmul.f32 %v6341_v2, %v5463_v57  ;;  %v6343_v11 = vadd.f32 %v4419_v9, %v7931_v8  ;;  %v3515_v54 = vunpack.c.h.s8.bf16 %v2771_v46  ;;  %v4033_v2 = vunpack.c.l.s8.bf16 %v3033_v55 }
 0x6ad   : > { %v5554_v14 = vadd.f32 %v5517_v59, %v5496_v6  ;;  %v5504_v16 = vmul.f32 %v6342_v43, %v5459_v29  ;;  %4736 = vmatpush1.bf16.msra.mxu1 %v4000_v4  ;;  %v4016_v29 = vunpack.c.l.s8.bf16 %v3024_v27  ;;  %v2778_v4 = vld [vmem:[#allocation2 + $0x760] sm:$0xff]  ;;  %v4041_v43 = vunpack.c.h.s8.bf16 %v3033_v55 }
 0x6ae   : > { %v5555_v17 = vadd.f32 %v5521_v3, %v5497_v13  ;;  %v5505_v19 = vmul.f32 %v6343_v11, %v5463_v57  ;;  %4908 = vmatpush1.bf16.msra.mxu0 %v3490_v45  ;;  %4737 = vmatprep.subr.bf16.mxu1 %v4009_v52  ;;  %v2779_v57 = vld [vmem:[#allocation2 + $0x768] sm:$0xff]  ;;  %v4032_v45 = vunpack.c.l.s8.bf16 %v3032_v36  ;;  %v3522_v6 = vunpack.c.l.s8.bf16 %v2778_v4  ;;  %v3041_v52 = vld [vmem:[#allocation2 + $0xf98] sm:$0xff] }
 0x6af   : > { %v5562_v21 = vadd.f32 %v5517_v59, %v5504_v16  ;;  %4909 = vmatprep.subr.bf16.mxu0 %v3499_v63  ;;  %v5570_v24 = vmax.f32 %v5554_v14, 0.0  ;;  %v4024_v59 = vunpack.c.h.s8.bf16 %v3024_v27  ;;  %v3531_v9 = vunpack.c.h.s8.bf16 %v2779_v57  ;;  %v2787_v63 = vld [vmem:[#allocation2 + $0x7a8] sm:$0xff]  ;;  %v3040_v14 = vld [vmem:[#allocation2 + $0xf90] sm:$0xff]  ;;  %v2786_v16 = vld [vmem:[#allocation2 + $0x7a0] sm:$0xff] }
 0x6b0   : > { %v5563_v30 = vadd.f32 %v5521_v3, %v5505_v19  ;;  %v5571_v31 = vmax.f32 %v5555_v17, 0.0  ;;  %v3523_v3 = vunpack.c.l.s8.bf16 %v2779_v57  ;;  %v4040_v13 = vunpack.c.h.s8.bf16 %v3032_v36 }
 0x6b1   : > { %v5578_v8 = vmax.f32 %v5562_v21, 0.0  ;;  %4738 = vmatpush1.bf16.msra.mxu1 %v4008_v20  ;;  %v3530_v11 = vunpack.c.h.s8.bf16 %v2778_v4  ;;  %v4049_v37 = vunpack.c.l.s8.bf16 %v3041_v52  ;;  %v3539_v46 = vunpack.c.l.s8.bf16 %v2787_v63  ;;  %v3049_v21 = vld [vmem:[#allocation2 + $0xfd8] sm:$0xff] }
 0x6b2   : > { %v5579_v32 = vmax.f32 %v5563_v30, 0.0  ;;  %4910 = vmatpush1.bf16.msra.mxu0 %v3498_v60  ;;  %4739 = vmatprep.subr.bf16.mxu1 %v4017_v47  ;;  %v4048_v17 = vunpack.c.l.s8.bf16 %v3040_v14  ;;  %v3538_v19 = vunpack.c.l.s8.bf16 %v2786_v16  ;;  %v4057_v20 = vunpack.c.h.s8.bf16 %v3041_v52  ;;  %v2795_v47 = vld [vmem:[#allocation2 + $0x7e8] sm:$0xff] }
 0x6b3   : > { %v7963_v42 = vpack.c.bf16 %v5578_v8, %v5570_v24  ;;  %4911 = vmatprep.subr.bf16.mxu0 %v3507_v22  ;;  %v3547_v60 = vunpack.c.h.s8.bf16 %v2787_v63  ;;  %v4056_v22 = vunpack.c.h.s8.bf16 %v3040_v14  ;;  %v3546_v27 = vunpack.c.h.s8.bf16 %v2786_v16  ;;  %v3048_v24 = vld [vmem:[#allocation2 + $0xfd0] sm:$0xff]  ;;  %v2794_v8 = vld [vmem:[#allocation2 + $0x7e0] sm:$0xff] }
 0x6b4   : > { %v7965_v58 = vpack.c.bf16 %v5579_v32, %v5571_v31  ;;  %v4065_v28 = vunpack.c.l.s8.bf16 %v3049_v21  ;;  %v3555_v30 = vunpack.c.l.s8.bf16 %v2795_v47  ;;  %v4064_v31 = vunpack.c.l.s8.bf16 %v3048_v24 }
 0x6b5   : > { %4740 = vmatpush1.bf16.msra.mxu1 %v4016_v29  ;;  %v3554_v32 = vunpack.c.l.s8.bf16 %v2794_v8  ;;  %v4073_v29 = vunpack.c.h.s8.bf16 %v3049_v21  ;;  %v4072_v55 = vunpack.c.h.s8.bf16 %v3048_v24  ;;  %v3562_v57 = vunpack.c.h.s8.bf16 %v2794_v8 }
 0x6b6   : > { %4912 = vmatpush1.bf16.msra.mxu0 %v3506_v40  ;;  %4741 = vmatprep.subr.bf16.mxu1 %v4025_v53  ;;  %v3563_v40 = vunpack.c.h.s8.bf16 %v2795_v47  ;;  %v2803_v53 = vld [vmem:[#allocation2 + $0x828] sm:$0xff] }
 0x6b7   : > { %4913 = vmatprep.subr.bf16.mxu0 %v3515_v54  ;;  %v2549_v54 = vld [vmem:[#allocation2 + $0x38] sm:$0xff] }
 0x6b9   : > { %4742 = vmatpush1.bf16.msra.mxu1 %v4024_v59  ;;  %v3571_v59 = vunpack.c.l.s8.bf16 %v2803_v53 }
 0x6ba   : > { %4914 = vmatpush1.bf16.msra.mxu0 %v3514_v0  ;;  %4743 = vmatprep.subr.bf16.mxu1 %v4033_v2  ;;  %v3061_v0 = vunpack.c.l.s8.bf16 %v2549_v54  ;;  %v2802_v2 = vld [vmem:[#allocation2 + $0x820] sm:$0xff] }
 0x6bb   : > { %4915 = vmatprep.subr.bf16.mxu0 %v3523_v3  ;;  %v2548_v3 = vld [vmem:[#allocation2 + $0x30] sm:$0xff]  ;;  %v3570_v36 = vunpack.c.l.s8.bf16 %v2802_v2  ;;  %v3578_v52 = vunpack.c.h.s8.bf16 %v2802_v2 }
 0x6bc   : > { %v3060_v4 = vunpack.c.l.s8.bf16 %v2548_v3  ;;  %v3068_v63 = vunpack.c.h.s8.bf16 %v2548_v3 }
 0x6bd   : > { %4744 = vmatpush1.bf16.msra.mxu1 %v4032_v45  ;;  %v3579_v45 = vunpack.c.h.s8.bf16 %v2803_v53 }
 0x6be   : > { %4916 = vmatpush1.bf16.msra.mxu0 %v3522_v6  ;;  %4745 = vmatprep.subr.bf16.mxu1 %v4041_v43  ;;  %v3069_v6 = vunpack.c.h.s8.bf16 %v2549_v54  ;;  %v2811_v43 = vld [vmem:[#allocation2 + $0x868] sm:$0xff] }
 0x6bf   : > { %4917 = vmatprep.subr.bf16.mxu0 %v3531_v9  ;;  %v2557_v9 = vld [vmem:[#allocation2 + $0x78] sm:$0xff] }
 0x6c1   : > { %4746 = vmatpush1.bf16.msra.mxu1 %v4040_v13  ;;  %v3587_v13 = vunpack.c.l.s8.bf16 %v2811_v43 }
 0x6c2   : > { %4918 = vmatpush1.bf16.msra.mxu0 %v3530_v11  ;;  %4747 = vmatprep.subr.bf16.mxu1 %v4049_v37  ;;  %v3077_v11 = vunpack.c.l.s8.bf16 %v2557_v9  ;;  %v2810_v37 = vld [vmem:[#allocation2 + $0x860] sm:$0xff] }
 0x6c3   : > { %4919 = vmatprep.subr.bf16.mxu0 %v3539_v46  ;;  %v2556_v46 = vld [vmem:[#allocation2 + $0x70] sm:$0xff]  ;;  %v3586_v14 = vunpack.c.l.s8.bf16 %v2810_v37  ;;  %v3594_v21 = vunpack.c.h.s8.bf16 %v2810_v37 }
 0x6c4   : > { %v3076_v16 = vunpack.c.l.s8.bf16 %v2556_v46  ;;  %v3084_v47 = vunpack.c.h.s8.bf16 %v2556_v46 }
 0x6c5   : > { %4748 = vmatpush1.bf16.msra.mxu1 %v4048_v17  ;;  %v3595_v17 = vunpack.c.h.s8.bf16 %v2811_v43 }
 0x6c6   : > { %4920 = vmatpush1.bf16.msra.mxu0 %v3538_v19  ;;  %4749 = vmatprep.subr.bf16.mxu1 %v4057_v20  ;;  %v3085_v19 = vunpack.c.h.s8.bf16 %v2557_v9  ;;  %v2819_v20 = vld [vmem:[#allocation2 + $0x8a8] sm:$0xff] }
 0x6c7   : > { %4921 = vmatprep.subr.bf16.mxu0 %v3547_v60  ;;  %v2565_v60 = vld [vmem:[#allocation2 + $0xb8] sm:$0xff]  ;;  %v3611_v8 = vunpack.c.h.s8.bf16 %v2819_v20 }
 0x6c9   : > { %4750 = vmatpush1.bf16.msra.mxu1 %v4056_v22  ;;  %v3603_v22 = vunpack.c.l.s8.bf16 %v2819_v20 }
 0x6ca   : > { %4922 = vmatpush1.bf16.msra.mxu0 %v3546_v27  ;;  %4751 = vmatprep.subr.bf16.mxu1 %v4065_v28  ;;  %v3093_v27 = vunpack.c.l.s8.bf16 %v2565_v60  ;;  %v2818_v28 = vld [vmem:[#allocation2 + $0x8a0] sm:$0xff] }
 0x6cb   : > { %4923 = vmatprep.subr.bf16.mxu0 %v3555_v30  ;;  %v3602_v30 = vunpack.c.l.s8.bf16 %v2818_v28 }
 0x6cd   : > { %4752 = vmatpush1.bf16.msra.mxu1 %v4064_v31  ;;  %v3101_v31 = vunpack.c.h.s8.bf16 %v2565_v60 }
 0x6ce   : > { %4924 = vmatpush1.bf16.msra.mxu0 %v3554_v32  ;;  %4753 = vmatprep.subr.bf16.mxu1 %v4073_v29  ;;  %v2827_v32 = vld [vmem:[#allocation2 + $0x8e8] sm:$0xff]  ;;  %v2573_v29 = vld [vmem:[#allocation2 + $0xf8] sm:$0xff] }
 0x6cf   : > { %4925 = vmatprep.subr.bf16.mxu0 %v3563_v40  ;;  %v3610_v40 = vunpack.c.h.s8.bf16 %v2818_v28  ;;  %v3619_v54 = vunpack.c.l.s8.bf16 %v2827_v32  ;;  %v3627_v3 = vunpack.c.h.s8.bf16 %v2827_v32 }
 0x6d1   : > { %4754 = vmatpush1.bf16.msra.mxu1 %v4072_v55  ;;  %v3109_v55 = vunpack.c.l.s8.bf16 %v2573_v29 }
 0x6d2   : > { %4926 = vmatpush1.bf16.msra.mxu0 %v3562_v57  ;;  %5110 = vmatprep.subr.bf16.mxu1 %v3061_v0  ;;  %v2826_v57 = vld [vmem:[#allocation2 + $0x8e0] sm:$0xff] }
 0x6d3   : > { %4938 = vmatprep.subr.bf16.mxu0 %v3571_v59  ;;  %v2572_v59 = vld [vmem:[#allocation2 + $0xf0] sm:$0xff]  ;;  %v3618_v0 = vunpack.c.l.s8.bf16 %v2826_v57 }
 0x6d4   : > { %4756 = vmatmul.mubr.bf16.vlgmr.msra.gmra.mrb[4].mxu1 %v7937_v1  ;;  %v3108_v2 = vunpack.c.l.s8.bf16 %v2572_v59  ;;  %v3116_v43 = vunpack.c.h.s8.bf16 %v2572_v59 }
 0x6d5   : > { %4928 = vmatmul.mubr.bf16.vlgmr.msra.gmra.mrb[4].mxu0 %v7845_v61  ;;  %5111 = vmatpush1.bf16.msra.mxu1 %v3060_v4  ;;  %v2835_v4 = vld [vmem:[#allocation2 + $0x928] sm:$0xff] }
 0x6d6   : > { %4939 = vmatpush1.bf16.msra.mxu0 %v3570_v36  ;;  %5112 = vmatprep.subr.bf16.mxu1 %v3069_v6  ;;  %v3117_v36 = vunpack.c.h.s8.bf16 %v2573_v29  ;;  %v3626_v6 = vunpack.c.h.s8.bf16 %v2826_v57  ;;  %v3635_v9 = vunpack.c.l.s8.bf16 %v2835_v4  ;;  %v3643_v46 = vunpack.c.h.s8.bf16 %v2835_v4 }
 0x6d7   : > { %4940 = vmatprep.subr.bf16.mxu0 %v3579_v45  ;;  %4970 = vmatprep.mubr.bf16.mxu0 %v7867_v56  ;;  %v2581_v45 = vld [vmem:[#allocation2 + $0x138] sm:$0xff] }
 0x6d8   : > { %5142 = vmatprep.mubr.bf16.mxu1 %v7779_v10  ;;  %v2564_v10 = vld [vmem:[#allocation2 + $0xb0] sm:$0xff] }
 0x6d9   : > { %5113 = vmatpush1.bf16.msra.mxu1 %v3068_v63  ;;  %v3092_v24 = vunpack.c.l.s8.bf16 %v2564_v10  ;;  %v3100_v53 = vunpack.c.h.s8.bf16 %v2564_v10  ;;  %v2834_v63 = vld [vmem:[#allocation2 + $0x920] sm:$0xff] }
 0x6da   : > { %4941 = vmatpush1.bf16.msra.mxu0 %v3578_v52  ;;  %5114 = vmatprep.subr.bf16.mxu1 %v3077_v11  ;;  %v3125_v52 = vunpack.c.l.s8.bf16 %v2581_v45  ;;  %v3634_v11 = vunpack.c.l.s8.bf16 %v2834_v63 }
 0x6db   : > { %4942 = vmatprep.subr.bf16.mxu0 %v3587_v13  ;;  %v2580_v13 = vld [vmem:[#allocation2 + $0x130] sm:$0xff] }
 0x6dc   : > { %v3124_v37 = vunpack.c.l.s8.bf16 %v2580_v13  ;;  %v3132_v20 = vunpack.c.h.s8.bf16 %v2580_v13 }
 0x6dd   : > { %5115 = vmatpush1.bf16.msra.mxu1 %v3076_v16  ;;  %v2843_v16 = vld [vmem:[#allocation2 + $0x968] sm:$0xff] }
 0x6de   : > { %4943 = vmatpush1.bf16.msra.mxu0 %v3586_v14  ;;  %5116 = vmatprep.subr.bf16.mxu1 %v3085_v19  ;;  %v3133_v14 = vunpack.c.h.s8.bf16 %v2581_v45  ;;  %v3642_v19 = vunpack.c.h.s8.bf16 %v2834_v63  ;;  %v3651_v60 = vunpack.c.l.s8.bf16 %v2843_v16  ;;  %v3659_v10 = vunpack.c.h.s8.bf16 %v2843_v16 }
 0x6df   : > { %4944 = vmatprep.subr.bf16.mxu0 %v3595_v17  ;;  %v2589_v17 = vld [vmem:[#allocation2 + $0x178] sm:$0xff] }
 0x6e1   : > { %5117 = vmatpush1.bf16.msra.mxu1 %v3084_v47  ;;  %v2842_v47 = vld [vmem:[#allocation2 + $0x960] sm:$0xff] }
 0x6e2   : > { %4945 = vmatpush1.bf16.msra.mxu0 %v3594_v21  ;;  %5118 = vmatprep.subr.bf16.mxu1 %v3093_v27  ;;  %v3141_v21 = vunpack.c.l.s8.bf16 %v2589_v17  ;;  %v3650_v27 = vunpack.c.l.s8.bf16 %v2842_v47 }
 0x6e3   : > { %4946 = vmatprep.subr.bf16.mxu0 %v3603_v22  ;;  %v2588_v22 = vld [vmem:[#allocation2 + $0x170] sm:$0xff] }
 0x6e4   : > { %v3140_v28 = vunpack.c.l.s8.bf16 %v2588_v22  ;;  %v3148_v32 = vunpack.c.h.s8.bf16 %v2588_v22 }
 0x6e5   : > { %5119 = vmatpush1.bf16.msra.mxu1 %v3092_v24  ;;  %v2851_v24 = vld [vmem:[#allocation2 + $0x9a8] sm:$0xff] }
 0x6e6   : > { %4947 = vmatpush1.bf16.msra.mxu0 %v3602_v30  ;;  %5120 = vmatprep.subr.bf16.mxu1 %v3101_v31  ;;  %v3149_v30 = vunpack.c.h.s8.bf16 %v2589_v17  ;;  %v3658_v31 = vunpack.c.h.s8.bf16 %v2842_v47  ;;  %v3667_v29 = vunpack.c.l.s8.bf16 %v2851_v24  ;;  %v3675_v59 = vunpack.c.h.s8.bf16 %v2851_v24 }
 0x6e7   : > { %4948 = vmatprep.subr.bf16.mxu0 %v3611_v8  ;;  %v2597_v8 = vld [vmem:[#allocation2 + $0x1b8] sm:$0xff] }
 0x6e9   : > { %5121 = vmatpush1.bf16.msra.mxu1 %v3100_v53  ;;  %v2850_v53 = vld [vmem:[#allocation2 + $0x9a0] sm:$0xff] }
 0x6ea   : > { %4949 = vmatpush1.bf16.msra.mxu0 %v3610_v40  ;;  %5122 = vmatprep.subr.bf16.mxu1 %v3109_v55  ;;  %v3157_v40 = vunpack.c.l.s8.bf16 %v2597_v8  ;;  %v3666_v55 = vunpack.c.l.s8.bf16 %v2850_v53 }
 0x6eb   : > { %4950 = vmatprep.subr.bf16.mxu0 %v3619_v54  ;;  %v2596_v54 = vld [vmem:[#allocation2 + $0x1b0] sm:$0xff] }
 0x6ec   : > { %v3156_v57 = vunpack.c.l.s8.bf16 %v2596_v54  ;;  %v3164_v4 = vunpack.c.h.s8.bf16 %v2596_v54 }
 0x6ed   : > { %5123 = vmatpush1.bf16.msra.mxu1 %v3108_v2  ;;  %v2859_v2 = vld [vmem:[#allocation2 + $0x9e8] sm:$0xff] }
 0x6ee   : > { %4951 = vmatpush1.bf16.msra.mxu0 %v3618_v0  ;;  %5124 = vmatprep.subr.bf16.mxu1 %v3117_v36  ;;  %v3165_v0 = vunpack.c.h.s8.bf16 %v2597_v8  ;;  %v3674_v36 = vunpack.c.h.s8.bf16 %v2850_v53  ;;  %v3683_v45 = vunpack.c.l.s8.bf16 %v2859_v2  ;;  %v3691_v13 = vunpack.c.h.s8.bf16 %v2859_v2 }
 0x6ef   : > { %4952 = vmatprep.subr.bf16.mxu0 %v3627_v3  ;;  %v2605_v3 = vld [vmem:[#allocation2 + $0x1f8] sm:$0xff] }
 0x6f1   : > { %5125 = vmatpush1.bf16.msra.mxu1 %v3116_v43  ;;  %v2858_v43 = vld [vmem:[#allocation2 + $0x9e0] sm:$0xff] }
 0x6f2   : > { %4953 = vmatpush1.bf16.msra.mxu0 %v3626_v6  ;;  %5126 = vmatprep.subr.bf16.mxu1 %v3125_v52  ;;  %v3173_v6 = vunpack.c.l.s8.bf16 %v2605_v3  ;;  %v3682_v52 = vunpack.c.l.s8.bf16 %v2858_v43 }
 0x6f3   : > { %4954 = vmatprep.subr.bf16.mxu0 %v3635_v9  ;;  %v2604_v9 = vld [vmem:[#allocation2 + $0x1f0] sm:$0xff] }
 0x6f4   : > { %v3172_v63 = vunpack.c.l.s8.bf16 %v2604_v9  ;;  %v3180_v16 = vunpack.c.h.s8.bf16 %v2604_v9  ;;  %v2891_v9 = vld [vmem:[#allocation2 + $0xae8] sm:$0xff] }
 0x6f5   : > { %5127 = vmatpush1.bf16.msra.mxu1 %v3124_v37  ;;  %v2867_v37 = vld [vmem:[#allocation2 + $0xa28] sm:$0xff] }
 0x6f6   : > { %4955 = vmatpush1.bf16.msra.mxu0 %v3634_v11  ;;  %5128 = vmatprep.subr.bf16.mxu1 %v3133_v14  ;;  %v3181_v11 = vunpack.c.h.s8.bf16 %v2605_v3  ;;  %v3690_v14 = vunpack.c.h.s8.bf16 %v2858_v43  ;;  %v3699_v17 = vunpack.c.l.s8.bf16 %v2867_v37  ;;  %v3707_v22 = vunpack.c.h.s8.bf16 %v2867_v37 }
 0x6f7   : > { %4956 = vmatprep.subr.bf16.mxu0 %v3643_v46  ;;  %v2613_v46 = vld [vmem:[#allocation2 + $0x238] sm:$0xff] }
 0x6f9   : > { %5129 = vmatpush1.bf16.msra.mxu1 %v3132_v20  ;;  %v2866_v20 = vld [vmem:[#allocation2 + $0xa20] sm:$0xff] }
 0x6fa   : > { %4957 = vmatpush1.bf16.msra.mxu0 %v3642_v19  ;;  %5130 = vmatprep.subr.bf16.mxu1 %v3141_v21  ;;  %v3189_v19 = vunpack.c.l.s8.bf16 %v2613_v46  ;;  %v3698_v21 = vunpack.c.l.s8.bf16 %v2866_v20 }
 0x6fb   : > { %4958 = vmatprep.subr.bf16.mxu0 %v3651_v60  ;;  %v2612_v60 = vld [vmem:[#allocation2 + $0x230] sm:$0xff] }
 0x6fc   : > { %v3188_v47 = vunpack.c.l.s8.bf16 %v2612_v60  ;;  %v3196_v24 = vunpack.c.h.s8.bf16 %v2612_v60  ;;  %v2899_v60 = vld [vmem:[#allocation2 + $0xb28] sm:$0xff] }
 0x6fd   : > { %5131 = vmatpush1.bf16.msra.mxu1 %v3140_v28  ;;  %v2875_v28 = vld [vmem:[#allocation2 + $0xa68] sm:$0xff] }
 0x6fe   : > { %4959 = vmatpush1.bf16.msra.mxu0 %v3650_v27  ;;  %5132 = vmatprep.subr.bf16.mxu1 %v3149_v30  ;;  %v3197_v27 = vunpack.c.h.s8.bf16 %v2613_v46  ;;  %v3706_v30 = vunpack.c.h.s8.bf16 %v2866_v20  ;;  %v3715_v8 = vunpack.c.l.s8.bf16 %v2875_v28  ;;  %v2890_v46 = vld [vmem:[#allocation2 + $0xae0] sm:$0xff] }
 0x6ff   : > { %4960 = vmatprep.subr.bf16.mxu0 %v3659_v10  ;;  %v2621_v10 = vld [vmem:[#allocation2 + $0x278] sm:$0xff] }
 0x700   : > { %v3213_v54 = vunpack.c.h.s8.bf16 %v2621_v10 }
 0x701   : > { %5133 = vmatpush1.bf16.msra.mxu1 %v3148_v32  ;;  %v2874_v32 = vld [vmem:[#allocation2 + $0xa60] sm:$0xff] }
 0x702   : > { %4961 = vmatpush1.bf16.msra.mxu0 %v3658_v31  ;;  %5134 = vmatprep.subr.bf16.mxu1 %v3157_v40  ;;  %v3205_v31 = vunpack.c.l.s8.bf16 %v2621_v10  ;;  %v3714_v40 = vunpack.c.l.s8.bf16 %v2874_v32  ;;  %v2898_v10 = vld [vmem:[#allocation2 + $0xb20] sm:$0xff] }
 0x703   : > { %4962 = vmatprep.subr.bf16.mxu0 %v3667_v29  ;;  %v2620_v29 = vld [vmem:[#allocation2 + $0x270] sm:$0xff] }
 0x704   : > { %v3204_v53 = vunpack.c.l.s8.bf16 %v2620_v29 }
 0x705   : > { %5135 = vmatpush1.bf16.msra.mxu1 %v3156_v57  ;;  %v2629_v57 = vld [vmem:[#allocation2 + $0x2b8] sm:$0xff] }
 0x706   : > { %4963 = vmatpush1.bf16.msra.mxu0 %v3666_v55  ;;  %5136 = vmatprep.subr.bf16.mxu1 %v3165_v0  ;;  %v2883_v55 = vld [vmem:[#allocation2 + $0xaa8] sm:$0xff]  ;;  %v3212_v0 = vunpack.c.h.s8.bf16 %v2620_v29  ;;  %v3221_v3 = vunpack.c.l.s8.bf16 %v2629_v57  ;;  %v3229_v43 = vunpack.c.h.s8.bf16 %v2629_v57  ;;  %v2906_v57 = vld [vmem:[#allocation2 + $0xb60] sm:$0xff] }
 0x707   : > { %4964 = vmatprep.subr.bf16.mxu0 %v3675_v59  ;;  %v3722_v59 = vunpack.c.h.s8.bf16 %v2874_v32  ;;  %v3731_v2 = vunpack.c.l.s8.bf16 %v2883_v55  ;;  %v2907_v29 = vld [vmem:[#allocation2 + $0xb68] sm:$0xff] }
 0x709   : > { %5137 = vmatpush1.bf16.msra.mxu1 %v3164_v4 }
 0x70a   : > { %4965 = vmatpush1.bf16.msra.mxu0 %v3674_v36  ;;  %5138 = vmatprep.subr.bf16.mxu1 %v3173_v6  ;;  %v2882_v36 = vld [vmem:[#allocation2 + $0xaa0] sm:$0xff]  ;;  %v3739_v6 = vunpack.c.h.s8.bf16 %v2883_v55 }
 0x70b   : > { %4966 = vmatprep.subr.bf16.mxu0 %v3683_v45  ;;  %v3730_v4 = vunpack.c.l.s8.bf16 %v2882_v36 }
 0x70d   : > { %5139 = vmatpush1.bf16.msra.mxu1 %v3172_v63  ;;  %v3738_v63 = vunpack.c.h.s8.bf16 %v2882_v36 }
 0x70e   : > { %4967 = vmatpush1.bf16.msra.mxu0 %v3682_v52  ;;  %5140 = vmatprep.subr.bf16.mxu1 %v3181_v11  ;;  %v2637_v52 = vld [vmem:[#allocation2 + $0x2f8] sm:$0xff]  ;;  %v3747_v11 = vunpack.c.l.s8.bf16 %v2891_v9 }
 0x70f   : > { %4968 = vmatprep.subr.bf16.mxu0 %v3691_v13  ;;  %v3237_v37 = vunpack.c.l.s8.bf16 %v2637_v52  ;;  %v3245_v20 = vunpack.c.h.s8.bf16 %v2637_v52  ;;  %v2914_v52 = vld [vmem:[#allocation2 + $0xba0] sm:$0xff] }
 0x711   : > { %5141 = vmatpush1.bf16.msra.mxu1 %v3180_v16  ;;  %v3746_v16 = vunpack.c.l.s8.bf16 %v2890_v46 }
 0x712   : > { %4969 = vmatpush1.bf16.msra.mxu0 %v3690_v14  ;;  %5153 = vmatprep.subr.bf16.mxu1 %v3189_v19  ;;  %v2636_v14 = vld [vmem:[#allocation2 + $0x2f0] sm:$0xff]  ;;  %v3755_v19 = vunpack.c.h.s8.bf16 %v2891_v9 }
 0x713   : > { %4981 = vmatprep.subr.bf16.mxu0 %v3699_v17  ;;  %v3236_v17 = vunpack.c.l.s8.bf16 %v2636_v14 }
 0x714   : > { %5143 = vmatmul.mubr.bf16.vlgmr.msra.gmra.mrb[8].mxu1 %v7847_v23  ;;  %v3723_v23 = vunpack.c.h.s8.bf16 %v2875_v28 }
 0x715   : > { %4971 = vmatmul.mubr.bf16.vlgmr.msra.gmra.mrb[4].mxu0 %v7881_v15  ;;  %5154 = vmatpush1.bf16.msra.mxu1 %v3188_v47  ;;  %v3754_v47 = vunpack.c.h.s8.bf16 %v2890_v46 }
 0x716   : > { %4982 = vmatpush1.bf16.msra.mxu0 %v3698_v21  ;;  %5155 = vmatprep.subr.bf16.mxu1 %v3197_v27  ;;  %v2645_v21 = vld [vmem:[#allocation2 + $0x338] sm:$0xff]  ;;  %v3763_v27 = vunpack.c.l.s8.bf16 %v2899_v60 }
 0x717   : > { %4983 = vmatprep.subr.bf16.mxu0 %v3707_v22  ;;  %5013 = vmatprep.mubr.bf16.mxu0 %v7883_v26  ;;  %v3244_v22 = vunpack.c.h.s8.bf16 %v2636_v14  ;;  %v3253_v28 = vunpack.c.l.s8.bf16 %v2645_v21  ;;  %v3261_v32 = vunpack.c.h.s8.bf16 %v2645_v21  ;;  %v2923_v14 = vld [vmem:[#allocation2 + $0xbe8] sm:$0xff]  ;;  %v2922_v21 = vld [vmem:[#allocation2 + $0xbe0] sm:$0xff] }
 0x718   : > { %5185 = vmatprep.mubr.bf16.mxu1 %v7851_v38  ;;  %v2628_v38 = vld [vmem:[#allocation2 + $0x2b0] sm:$0xff] }
 0x719   : > { %5156 = vmatpush1.bf16.msra.mxu1 %v3196_v24  ;;  %v3220_v45 = vunpack.c.l.s8.bf16 %v2628_v38  ;;  %v3228_v13 = vunpack.c.h.s8.bf16 %v2628_v38  ;;  %v3762_v24 = vunpack.c.l.s8.bf16 %v2898_v10  ;;  %v2915_v38 = vld [vmem:[#allocation2 + $0xba8] sm:$0xff] }
 0x71a   : > { %4984 = vmatpush1.bf16.msra.mxu0 %v3706_v30  ;;  %5157 = vmatprep.subr.bf16.mxu1 %v3205_v31  ;;  %v2644_v30 = vld [vmem:[#allocation2 + $0x330] sm:$0xff]  ;;  %v3771_v31 = vunpack.c.h.s8.bf16 %v2899_v60 }
 0x71b   : > { %4985 = vmatprep.subr.bf16.mxu0 %v3715_v8  ;;  %v3252_v8 = vunpack.c.l.s8.bf16 %v2644_v30 }
 0x71d   : > { %5158 = vmatpush1.bf16.msra.mxu1 %v3204_v53  ;;  %v3770_v53 = vunpack.c.h.s8.bf16 %v2898_v10 }
 0x71e   : > { %4986 = vmatpush1.bf16.msra.mxu0 %v3714_v40  ;;  %5159 = vmatprep.subr.bf16.mxu1 %v3213_v54  ;;  %v2653_v40 = vld [vmem:[#allocation2 + $0x378] sm:$0xff]  ;;  %v3779_v54 = vunpack.c.l.s8.bf16 %v2907_v29 }
 0x71f   : > { %4987 = vmatprep.subr.bf16.mxu0 %v3723_v23  ;;  %v3260_v23 = vunpack.c.h.s8.bf16 %v2644_v30  ;;  %v3269_v55 = vunpack.c.l.s8.bf16 %v2653_v40  ;;  %v3277_v36 = vunpack.c.h.s8.bf16 %v2653_v40  ;;  %v2931_v30 = vld [vmem:[#allocation2 + $0xc28] sm:$0xff]  ;;  %v2930_v40 = vld [vmem:[#allocation2 + $0xc20] sm:$0xff] }
 0x721   : > { %5160 = vmatpush1.bf16.msra.mxu1 %v3212_v0  ;;  %v3778_v0 = vunpack.c.l.s8.bf16 %v2906_v57 }
 0x722   : > { %4988 = vmatpush1.bf16.msra.mxu0 %v3722_v59  ;;  %5161 = vmatprep.subr.bf16.mxu1 %v3221_v3  ;;  %v2652_v59 = vld [vmem:[#allocation2 + $0x370] sm:$0xff]  ;;  %v3787_v3 = vunpack.c.h.s8.bf16 %v2907_v29 }
 0x723   : > { %4989 = vmatprep.subr.bf16.mxu0 %v3731_v2  ;;  %v3268_v2 = vunpack.c.l.s8.bf16 %v2652_v59 }
 0x725   : > { %5162 = vmatpush1.bf16.msra.mxu1 %v3220_v45  ;;  %v3786_v45 = vunpack.c.h.s8.bf16 %v2906_v57 }
 0x726   : > { %4990 = vmatpush1.bf16.msra.mxu0 %v3730_v4  ;;  %5163 = vmatprep.subr.bf16.mxu1 %v3229_v43  ;;  %v2661_v4 = vld [vmem:[#allocation2 + $0x3b8] sm:$0xff]  ;;  %v3795_v43 = vunpack.c.l.s8.bf16 %v2915_v38 }
 0x727   : > { %4991 = vmatprep.subr.bf16.mxu0 %v3739_v6  ;;  %v3276_v6 = vunpack.c.h.s8.bf16 %v2652_v59  ;;  %v3285_v9 = vunpack.c.l.s8.bf16 %v2661_v4  ;;  %v3293_v46 = vunpack.c.h.s8.bf16 %v2661_v4  ;;  %v2939_v59 = vld [vmem:[#allocation2 + $0xc68] sm:$0xff]  ;;  %v2938_v4 = vld [vmem:[#allocation2 + $0xc60] sm:$0xff] }
 0x729   : > { %5164 = vmatpush1.bf16.msra.mxu1 %v3228_v13  ;;  %v3794_v13 = vunpack.c.l.s8.bf16 %v2914_v52 }
 0x72a   : > { %4992 = vmatpush1.bf16.msra.mxu0 %v3738_v63  ;;  %5165 = vmatprep.subr.bf16.mxu1 %v3237_v37  ;;  %v2660_v63 = vld [vmem:[#allocation2 + $0x3b0] sm:$0xff]  ;;  %v3803_v37 = vunpack.c.h.s8.bf16 %v2915_v38 }
 0x72b   : > { %4993 = vmatprep.subr.bf16.mxu0 %v3747_v11  ;;  %v3284_v11 = vunpack.c.l.s8.bf16 %v2660_v63 }
 0x72d   : > { %5166 = vmatpush1.bf16.msra.mxu1 %v3236_v17  ;;  %v3802_v17 = vunpack.c.h.s8.bf16 %v2914_v52  ;;  %v2947_v52 = vld [vmem:[#allocation2 + $0xca8] sm:$0xff] }
 0x72e   : > { %4994 = vmatpush1.bf16.msra.mxu0 %v3746_v16  ;;  %5167 = vmatprep.subr.bf16.mxu1 %v3245_v20  ;;  %v2669_v16 = vld [vmem:[#allocation2 + $0x3f8] sm:$0xff]  ;;  %v3811_v20 = vunpack.c.l.s8.bf16 %v2923_v14 }
 0x72f   : > { %4995 = vmatprep.subr.bf16.mxu0 %v3755_v19  ;;  %v3292_v19 = vunpack.c.h.s8.bf16 %v2660_v63  ;;  %v3301_v60 = vunpack.c.l.s8.bf16 %v2669_v16  ;;  %v3309_v10 = vunpack.c.h.s8.bf16 %v2669_v16  ;;  %v2693_v63 = vld [vmem:[#allocation2 + $0x4b8] sm:$0xff] }
 0x731   : > { %5168 = vmatpush1.bf16.msra.mxu1 %v3244_v22  ;;  %v3810_v22 = vunpack.c.l.s8.bf16 %v2922_v21 }
 0x732   : > { %4996 = vmatpush1.bf16.msra.mxu0 %v3754_v47  ;;  %5169 = vmatprep.subr.bf16.mxu1 %v3253_v28  ;;  %v2668_v47 = vld [vmem:[#allocation2 + $0x3f0] sm:$0xff]  ;;  %v3819_v28 = vunpack.c.h.s8.bf16 %v2923_v14  ;;  %v2946_v14 = vld [vmem:[#allocation2 + $0xca0] sm:$0xff] }
 0x733   : > { %4997 = vmatprep.subr.bf16.mxu0 %v3763_v27  ;;  %v3300_v27 = vunpack.c.l.s8.bf16 %v2668_v47  ;;  %v3858_v16 = vunpack.c.l.s8.bf16 %v2946_v14 }
 0x735   : > { %5170 = vmatpush1.bf16.msra.mxu1 %v3252_v8  ;;  %v3818_v8 = vunpack.c.h.s8.bf16 %v2922_v21  ;;  %v2701_v21 = vld [vmem:[#allocation2 + $0x4f8] sm:$0xff] }
 0x736   : > { %4998 = vmatpush1.bf16.msra.mxu0 %v3762_v24  ;;  %5171 = vmatprep.subr.bf16.mxu1 %v3261_v32  ;;  %v2677_v24 = vld [vmem:[#allocation2 + $0x438] sm:$0xff]  ;;  %v3827_v32 = vunpack.c.l.s8.bf16 %v2931_v30 }
 0x737   : > { %4999 = vmatprep.subr.bf16.mxu0 %v3771_v31  ;;  %v3308_v31 = vunpack.c.h.s8.bf16 %v2668_v47  ;;  %v3317_v29 = vunpack.c.l.s8.bf16 %v2677_v24  ;;  %v3325_v57 = vunpack.c.h.s8.bf16 %v2677_v24  ;;  %v3866_v47 = vunpack.c.h.s8.bf16 %v2946_v14  ;;  %v2725_v14 = vld [vmem:[#allocation2 + $0x5b8] sm:$0xff] }
 0x739   : > { %5172 = vmatpush1.bf16.msra.mxu1 %v3260_v23  ;;  %v3826_v23 = vunpack.c.l.s8.bf16 %v2930_v40 }
 0x73a   : > { %5000 = vmatpush1.bf16.msra.mxu0 %v3770_v53  ;;  %5173 = vmatprep.subr.bf16.mxu1 %v3269_v55  ;;  %v2676_v53 = vld [vmem:[#allocation2 + $0x430] sm:$0xff]  ;;  %v3835_v55 = vunpack.c.h.s8.bf16 %v2931_v30 }
 0x73b   : > { %5001 = vmatprep.subr.bf16.mxu0 %v3779_v54  ;;  %v3316_v54 = vunpack.c.l.s8.bf16 %v2676_v53  ;;  %v2700_v30 = vld [vmem:[#allocation2 + $0x4f0] sm:$0xff] }
 0x73d   : > { %5174 = vmatpush1.bf16.msra.mxu1 %v3268_v2  ;;  %v3834_v2 = vunpack.c.h.s8.bf16 %v2930_v40  ;;  %v2709_v40 = vld [vmem:[#allocation2 + $0x538] sm:$0xff] }
 0x73e   : > { %5002 = vmatpush1.bf16.msra.mxu0 %v3778_v0  ;;  %5175 = vmatprep.subr.bf16.mxu1 %v3277_v36  ;;  %v2685_v0 = vld [vmem:[#allocation2 + $0x478] sm:$0xff]  ;;  %v3843_v36 = vunpack.c.l.s8.bf16 %v2939_v59 }
 0x73f   : > { %5003 = vmatprep.subr.bf16.mxu0 %v3787_v3  ;;  %v3324_v3 = vunpack.c.h.s8.bf16 %v2676_v53  ;;  %v3333_v38 = vunpack.c.l.s8.bf16 %v2685_v0 }
 0x741   : > { %5176 = vmatpush1.bf16.msra.mxu1 %v3276_v6  ;;  %v3842_v6 = vunpack.c.l.s8.bf16 %v2938_v4 }
 0x742   : > { %5004 = vmatpush1.bf16.msra.mxu0 %v3786_v45  ;;  %5177 = vmatprep.subr.bf16.mxu1 %v3285_v9  ;;  %v2684_v45 = vld [vmem:[#allocation2 + $0x470] sm:$0xff]  ;;  %v3341_v9 = vunpack.c.h.s8.bf16 %v2685_v0 }
 0x743   : > { %5005 = vmatprep.subr.bf16.mxu0 %v3795_v43  ;;  %v3332_v43 = vunpack.c.l.s8.bf16 %v2684_v45 }
 0x745   : > { %5178 = vmatpush1.bf16.msra.mxu1 %v3284_v11  ;;  %v3340_v11 = vunpack.c.h.s8.bf16 %v2684_v45 }
 0x746   : > { %5006 = vmatpush1.bf16.msra.mxu0 %v3794_v13  ;;  %5179 = vmatprep.subr.bf16.mxu1 %v3293_v46  ;;  %v3850_v13 = vunpack.c.h.s8.bf16 %v2938_v4  ;;  %v3349_v46 = vunpack.c.l.s8.bf16 %v2693_v63  ;;  %v2717_v4 = vld [vmem:[#allocation2 + $0x578] sm:$0xff] }
 0x747   : > { %5007 = vmatprep.subr.bf16.mxu0 %v3803_v37  ;;  %v3859_v37 = vunpack.c.l.s8.bf16 %v2947_v52 }
 0x749   : > { %5180 = vmatpush1.bf16.msra.mxu1 %v3292_v19  ;;  %v3867_v19 = vunpack.c.h.s8.bf16 %v2947_v52  ;;  %v2716_v52 = vld [vmem:[#allocation2 + $0x570] sm:$0xff] }
 0x74a   : > { %5008 = vmatpush1.bf16.msra.mxu0 %v3802_v17  ;;  %5181 = vmatprep.subr.bf16.mxu1 %v3301_v60  ;;  %v2955_v60 = vld [vmem:[#allocation2 + $0xce8] sm:$0xff] }
 0x74b   : > { %5009 = vmatprep.subr.bf16.mxu0 %v3811_v20  ;;  %v3357_v20 = vunpack.c.h.s8.bf16 %v2693_v63 }
 0x74d   : > { %5182 = vmatpush1.bf16.msra.mxu1 %v3300_v27  ;;  %v3875_v27 = vunpack.c.l.s8.bf16 %v2955_v60 }
 0x74e   : > { %5010 = vmatpush1.bf16.msra.mxu0 %v3810_v22  ;;  %5183 = vmatprep.subr.bf16.mxu1 %v3309_v10  ;;  %v2954_v10 = vld [vmem:[#allocation2 + $0xce0] sm:$0xff] }
 0x74f   : > { %5011 = vmatprep.subr.bf16.mxu0 %v3819_v28  ;;  %v3365_v28 = vunpack.c.l.s8.bf16 %v2701_v21  ;;  %v3874_v24 = vunpack.c.l.s8.bf16 %v2954_v10  ;;  %v3882_v53 = vunpack.c.h.s8.bf16 %v2954_v10  ;;  %v2733_v10 = vld [vmem:[#allocation2 + $0x5f8] sm:$0xff] }
 0x751   : > { %5184 = vmatpush1.bf16.msra.mxu1 %v3308_v31  ;;  %v3883_v31 = vunpack.c.h.s8.bf16 %v2955_v60  ;;  %v2724_v60 = vld [vmem:[#allocation2 + $0x5b0] sm:$0xff] }
 0x752   : > { %5012 = vmatpush1.bf16.msra.mxu0 %v3818_v8  ;;  %5196 = vmatprep.subr.bf16.mxu1 %v3317_v29  ;;  %v3364_v8 = vunpack.c.l.s8.bf16 %v2700_v30  ;;  %v2963_v29 = vld [vmem:[#allocation2 + $0xd28] sm:$0xff] }
 0x753   : > { %5024 = vmatprep.subr.bf16.mxu0 %v3827_v32  ;;  %v3373_v32 = vunpack.c.h.s8.bf16 %v2701_v21 }
 0x754   : > { %5186 = vmatmul.mubr.bf16.vlgmr.msra.gmra.mrb[8].mxu1 %v7838_v18  ;;  %v3851_v18 = vunpack.c.h.s8.bf16 %v2939_v59  ;;  %v2708_v59 = vld [vmem:[#allocation2 + $0x530] sm:$0xff] }
 0x755   : > { %5014 = vmatmul.mubr.bf16.vlgmr.msra.gmra.mrb[4].mxu0 %v7897_v62  ;;  %5197 = vmatpush1.bf16.msra.mxu1 %v3316_v54  ;;  %v3891_v54 = vunpack.c.l.s8.bf16 %v2963_v29 }
 0x756   : > { %5025 = vmatpush1.bf16.msra.mxu0 %v3826_v23  ;;  %5198 = vmatprep.subr.bf16.mxu1 %v3325_v57  ;;  %v3372_v23 = vunpack.c.h.s8.bf16 %v2700_v30  ;;  %v2962_v57 = vld [vmem:[#allocation2 + $0xd20] sm:$0xff] }
 0x757   : > { %5026 = vmatprep.subr.bf16.mxu0 %v3835_v55  ;;  %5056 = vmatprep.mubr.bf16.mxu0 %v7899_v5  ;;  %v3381_v55 = vunpack.c.l.s8.bf16 %v2709_v40  ;;  %v3890_v0 = vunpack.c.l.s8.bf16 %v2962_v57  ;;  %v3898_v45 = vunpack.c.h.s8.bf16 %v2962_v57  ;;  %v2741_v57 = vld [vmem:[#allocation2 + $0x638] sm:$0xff] }
 0x758   : > { %5228 = vmatprep.mubr.bf16.mxu1 %v7781_v12  ;;  %v2692_v12 = vld [vmem:[#allocation2 + $0x4b0] sm:$0xff] }
 0x759   : > { %5199 = vmatpush1.bf16.msra.mxu1 %v3324_v3  ;;  %v3348_v17 = vunpack.c.l.s8.bf16 %v2692_v12  ;;  %v3356_v22 = vunpack.c.h.s8.bf16 %v2692_v12  ;;  %v3899_v3 = vunpack.c.h.s8.bf16 %v2963_v29  ;;  %v2732_v29 = vld [vmem:[#allocation2 + $0x5f0] sm:$0xff] }
 0x75a   : > { %5027 = vmatpush1.bf16.msra.mxu0 %v3834_v2  ;;  %5200 = vmatprep.subr.bf16.mxu1 %v3333_v38  ;;  %v3380_v2 = vunpack.c.l.s8.bf16 %v2708_v59  ;;  %v2971_v38 = vld [vmem:[#allocation2 + $0xd68] sm:$0xff] }
 0x75b   : > { %5028 = vmatprep.subr.bf16.mxu0 %v3843_v36  ;;  %v3389_v36 = vunpack.c.h.s8.bf16 %v2709_v40 }
 0x75d   : > { %5201 = vmatpush1.bf16.msra.mxu1 %v3332_v43  ;;  %v3907_v43 = vunpack.c.l.s8.bf16 %v2971_v38 }
 0x75e   : > { %5029 = vmatpush1.bf16.msra.mxu0 %v3842_v6  ;;  %5202 = vmatprep.subr.bf16.mxu1 %v3341_v9  ;;  %v3388_v6 = vunpack.c.h.s8.bf16 %v2708_v59  ;;  %v2970_v9 = vld [vmem:[#allocation2 + $0xd60] sm:$0xff] }
 0x75f   : > { %5030 = vmatprep.subr.bf16.mxu0 %v3851_v18  ;;  %v3397_v18 = vunpack.c.l.s8.bf16 %v2717_v4  ;;  %v3906_v63 = vunpack.c.l.s8.bf16 %v2970_v9  ;;  %v3914_v12 = vunpack.c.h.s8.bf16 %v2970_v9  ;;  %v2749_v9 = vld [vmem:[#allocation2 + $0x678] sm:$0xff] }
 0x761   : > { %5203 = vmatpush1.bf16.msra.mxu1 %v3340_v11  ;;  %v3915_v11 = vunpack.c.h.s8.bf16 %v2971_v38  ;;  %v2740_v38 = vld [vmem:[#allocation2 + $0x630] sm:$0xff] }
 0x762   : > { %5031 = vmatpush1.bf16.msra.mxu0 %v3850_v13  ;;  %5204 = vmatprep.subr.bf16.mxu1 %v3349_v46  ;;  %v3396_v13 = vunpack.c.l.s8.bf16 %v2716_v52  ;;  %v2979_v46 = vld [vmem:[#allocation2 + $0xda8] sm:$0xff] }
 0x763   : > { %5032 = vmatprep.subr.bf16.mxu0 %v3859_v37  ;;  %v3405_v37 = vunpack.c.h.s8.bf16 %v2717_v4 }
 0x765   : > { %5205 = vmatpush1.bf16.msra.mxu1 %v3348_v17  ;;  %v3923_v17 = vunpack.c.l.s8.bf16 %v2979_v46 }
 0x766   : > { %5033 = vmatpush1.bf16.msra.mxu0 %v3858_v16  ;;  %5206 = vmatprep.subr.bf16.mxu1 %v3357_v20  ;;  %v3404_v16 = vunpack.c.h.s8.bf16 %v2716_v52  ;;  %v2978_v20 = vld [vmem:[#allocation2 + $0xda0] sm:$0xff] }
 0x767   : > { %5034 = vmatprep.subr.bf16.mxu0 %v3867_v19  ;;  %v3413_v19 = vunpack.c.l.s8.bf16 %v2725_v14  ;;  %v3922_v21 = vunpack.c.l.s8.bf16 %v2978_v20  ;;  %v3930_v30 = vunpack.c.h.s8.bf16 %v2978_v20 }
 0x769   : > { %5207 = vmatpush1.bf16.msra.mxu1 %v3356_v22  ;;  %v3931_v22 = vunpack.c.h.s8.bf16 %v2979_v46  ;;  %v2748_v46 = vld [vmem:[#allocation2 + $0x670] sm:$0xff] }
 0x76a   : > { %5035 = vmatpush1.bf16.msra.mxu0 %v3866_v47  ;;  %5208 = vmatprep.subr.bf16.mxu1 %v3365_v28  ;;  %v3412_v47 = vunpack.c.l.s8.bf16 %v2724_v60  ;;  %v2987_v28 = vld [vmem:[#allocation2 + $0xde8] sm:$0xff] }
 0x76b   : > { %5036 = vmatprep.subr.bf16.mxu0 %v3875_v27  ;;  %v3421_v27 = vunpack.c.h.s8.bf16 %v2725_v14 }
 0x76d   : > { %5209 = vmatpush1.bf16.msra.mxu1 %v3364_v8  ;;  %v3939_v8 = vunpack.c.l.s8.bf16 %v2987_v28 }
 0x76e   : > { %5037 = vmatpush1.bf16.msra.mxu0 %v3874_v24  ;;  %5210 = vmatprep.subr.bf16.mxu1 %v3373_v32  ;;  %v3420_v24 = vunpack.c.h.s8.bf16 %v2724_v60  ;;  %v2986_v32 = vld [vmem:[#allocation2 + $0xde0] sm:$0xff]  ;;  %v3468_v60 = vunpack.c.h.s8.bf16 %v2748_v46 }
 0x76f   : > { %5038 = vmatprep.subr.bf16.mxu0 %v3883_v31  ;;  %v3429_v31 = vunpack.c.l.s8.bf16 %v2733_v10  ;;  %v3938_v40 = vunpack.c.l.s8.bf16 %v2986_v32  ;;  %v3946_v59 = vunpack.c.h.s8.bf16 %v2986_v32 }
 0x771   : > { %5211 = vmatpush1.bf16.msra.mxu1 %v3372_v23  ;;  %v3947_v23 = vunpack.c.h.s8.bf16 %v2987_v28 }
 0x772   : > { %5039 = vmatpush1.bf16.msra.mxu0 %v3882_v53  ;;  %5212 = vmatprep.subr.bf16.mxu1 %v3381_v55  ;;  %v3428_v53 = vunpack.c.l.s8.bf16 %v2732_v29  ;;  %v2995_v55 = vld [vmem:[#allocation2 + $0xe28] sm:$0xff] }
 0x773   : > { %5040 = vmatprep.subr.bf16.mxu0 %v3891_v54  ;;  %v3437_v54 = vunpack.c.h.s8.bf16 %v2733_v10 }
 0x775   : > { %5213 = vmatpush1.bf16.msra.mxu1 %v3380_v2  ;;  %v3955_v2 = vunpack.c.l.s8.bf16 %v2995_v55 }
 0x776   : > { %5041 = vmatpush1.bf16.msra.mxu0 %v3890_v0  ;;  %5214 = vmatprep.subr.bf16.mxu1 %v3389_v36  ;;  %v3436_v0 = vunpack.c.h.s8.bf16 %v2732_v29  ;;  %v2994_v36 = vld [vmem:[#allocation2 + $0xe20] sm:$0xff] }
 0x777   : > { %5042 = vmatprep.subr.bf16.mxu0 %v3899_v3  ;;  %v3445_v3 = vunpack.c.l.s8.bf16 %v2741_v57  ;;  %v3954_v4 = vunpack.c.l.s8.bf16 %v2994_v36  ;;  %v3962_v52 = vunpack.c.h.s8.bf16 %v2994_v36 }
 0x779   : > { %5215 = vmatpush1.bf16.msra.mxu1 %v3388_v6  ;;  %v3963_v6 = vunpack.c.h.s8.bf16 %v2995_v55 }
 0x77a   : > { %5043 = vmatpush1.bf16.msra.mxu0 %v3898_v45  ;;  %5216 = vmatprep.subr.bf16.mxu1 %v3397_v18  ;;  %v3444_v45 = vunpack.c.l.s8.bf16 %v2740_v38  ;;  %v3003_v18 = vld [vmem:[#allocation2 + $0xe68] sm:$0xff] }
 0x77b   : > { %5044 = vmatprep.subr.bf16.mxu0 %v3907_v43  ;;  %v3453_v43 = vunpack.c.h.s8.bf16 %v2741_v57 }
 0x77d   : > { %5217 = vmatpush1.bf16.msra.mxu1 %v3396_v13  ;;  %v3971_v13 = vunpack.c.l.s8.bf16 %v3003_v18 }
 0x77e   : > { %5045 = vmatpush1.bf16.msra.mxu0 %v3906_v63  ;;  %5218 = vmatprep.subr.bf16.mxu1 %v3405_v37  ;;  %v3452_v63 = vunpack.c.h.s8.bf16 %v2740_v38  ;;  %v3002_v37 = vld [vmem:[#allocation2 + $0xe60] sm:$0xff] }
 0x77f   : > { %5046 = vmatprep.subr.bf16.mxu0 %v3915_v11  ;;  %v3461_v11 = vunpack.c.l.s8.bf16 %v2749_v9  ;;  %v3970_v14 = vunpack.c.l.s8.bf16 %v3002_v37  ;;  %v3978_v20 = vunpack.c.h.s8.bf16 %v3002_v37  ;;  %v3027_v37 = vld [vmem:[#allocation2 + $0xf28] sm:$0xff] }
 0x781   : > { %5219 = vmatpush1.bf16.msra.mxu1 %v3404_v16  ;;  %v3469_v16 = vunpack.c.h.s8.bf16 %v2749_v9 }
 0x782   : > { %5047 = vmatpush1.bf16.msra.mxu0 %v3914_v12  ;;  %5220 = vmatprep.subr.bf16.mxu1 %v3413_v19  ;;  %v3460_v12 = vunpack.c.l.s8.bf16 %v2748_v46  ;;  %v2757_v19 = vld [vmem:[#allocation2 + $0x6b8] sm:$0xff] }
 0x783   : > { %5048 = vmatprep.subr.bf16.mxu0 %v3923_v17  ;;  %v3011_v17 = vld [vmem:[#allocation2 + $0xea8] sm:$0xff]  ;;  %v2773_v46 = vld [vmem:[#allocation2 + $0x738] sm:$0xff] }
 0x784   : > { %v3995_v10 = vunpack.c.h.s8.bf16 %v3011_v17 }
 0x785   : > { %5221 = vmatpush1.bf16.msra.mxu1 %v3412_v47  ;;  %v3477_v47 = vunpack.c.l.s8.bf16 %v2757_v19 }
 0x786   : > { %5049 = vmatpush1.bf16.msra.mxu0 %v3922_v21  ;;  %5222 = vmatprep.subr.bf16.mxu1 %v3421_v27  ;;  %v3987_v21 = vunpack.c.l.s8.bf16 %v3011_v17 }
 0x787   : > { %5050 = vmatprep.subr.bf16.mxu0 %v3931_v22  ;;  %v3010_v22 = vld [vmem:[#allocation2 + $0xea0] sm:$0xff] }
 0x788   : > { %v3986_v27 = vunpack.c.l.s8.bf16 %v3010_v22 }
 0x789   : > { %5223 = vmatpush1.bf16.msra.mxu1 %v3420_v24  ;;  %v3019_v24 = vld [vmem:[#allocation2 + $0xee8] sm:$0xff] }
 0x78a   : > { %5051 = vmatpush1.bf16.msra.mxu0 %v3930_v30  ;;  %5224 = vmatprep.subr.bf16.mxu1 %v3429_v31  ;;  %v3485_v30 = vunpack.c.h.s8.bf16 %v2757_v19  ;;  %v6619_v31 = vld [vmem:[#allocation11] sm:$0xff]  ;;  %v4003_v55 = vunpack.c.l.s8.bf16 %v3019_v24  ;;  %v4019_v19 = vunpack.c.l.s8.bf16 %v3027_v37 }
 0x78b   : > { %5052 = vmatprep.subr.bf16.mxu0 %v3939_v8  ;;  %v2765_v8 = vld [vmem:[#allocation2 + $0x6f8] sm:$0xff]  ;;  %v5467_v32 = vrot.slane %v6619_v31, %v7786_v33  ;;  %v5471_v29 = vrot.slane %v6619_v31, %v7810_v50 }
 0x78c   : > { %v3493_v57 = vunpack.c.l.s8.bf16 %v2765_v8  ;;  %v2781_v31 = vld [vmem:[#allocation2 + $0x778] sm:$0xff] }
 0x78d   : > { %5225 = vmatpush1.bf16.msra.mxu1 %v3428_v53 }
 0x78e   : > { %5053 = vmatpush1.bf16.msra.mxu0 %v3938_v40  ;;  %5226 = vmatprep.subr.bf16.mxu1 %v3437_v54  ;;  %v3994_v40 = vunpack.c.h.s8.bf16 %v3010_v22 }
 0x78f   : > { %5054 = vmatprep.subr.bf16.mxu0 %v3947_v23  ;;  %v6620_v23 = vld [vmem:[#allocation13] sm:$0xff] }
 0x790   : > { %v5525_v54 = vrot.slane %v6620_v23, %v7786_v33 }
 0x791   : > { %5227 = vmatpush1.bf16.msra.mxu1 %v3436_v0  ;;  %v2764_v0 = vld [vmem:[#allocation2 + $0x6f0] sm:$0xff] }
 0x792   : > { %5055 = vmatpush1.bf16.msra.mxu0 %v3946_v59  ;;  %5239 = vmatprep.subr.bf16.mxu1 %v3445_v3  ;;  %v3018_v59 = vld [vmem:[#allocation2 + $0xee0] sm:$0xff]  ;;  %v5529_v3 = vrot.slane %v6620_v23, %v7810_v50 }
 0x793   : > { %5067 = vmatprep.subr.bf16.mxu0 %v3955_v2  ;;  %v3034_v23 = vld [vmem:[#allocation2 + $0xf60] sm:$0xff] }
 0x794   : > { %5229 = vmatmul.mubr.bf16.vlgmr.msra.gmra.mrb[8].mxu1 %v7849_v25  ;;  %v3979_v25 = vunpack.c.h.s8.bf16 %v3003_v18 }
 0x795   : > { %5057 = vmatmul.mubr.bf16.vlgmr.msra.gmra.mrb[4].mxu0 %v7917_v48  ;;  %5240 = vmatpush1.bf16.msra.mxu1 %v3444_v45 }
 0x796   : > { %5068 = vmatpush1.bf16.msra.mxu0 %v3954_v4  ;;  %5241 = vmatprep.subr.bf16.mxu1 %v3453_v43  ;;  %v3492_v43 = vunpack.c.l.s8.bf16 %v2764_v0 }
 0x797   : > { %5069 = vmatprep.subr.bf16.mxu0 %v3963_v6  ;;  %5099 = vmatprep.mubr.bf16.mxu0 %v7919_v49  ;;  %v4002_v6 = vunpack.c.l.s8.bf16 %v3018_v59 }
 0x798   : > { %5271 = vmatprep.mubr.bf16.mxu1 %v7853_v39  ;;  %v2756_v39 = vld [vmem:[#allocation2 + $0x6b0] sm:$0xff] }
 0x799   : > { %5242 = vmatpush1.bf16.msra.mxu1 %v3452_v63  ;;  %v3476_v28 = vunpack.c.l.s8.bf16 %v2756_v39  ;;  %v3484_v53 = vunpack.c.h.s8.bf16 %v2756_v39  ;;  %v3501_v63 = vunpack.c.h.s8.bf16 %v2765_v8  ;;  %v3035_v8 = vld [vmem:[#allocation2 + $0xf68] sm:$0xff] }
 0x79a   : > { %5070 = vmatpush1.bf16.msra.mxu0 %v3962_v52  ;;  %5243 = vmatprep.subr.bf16.mxu1 %v3461_v11  ;;  %v4011_v52 = vunpack.c.h.s8.bf16 %v3019_v24  ;;  %v3517_v24 = vunpack.c.h.s8.bf16 %v2773_v46 }
 0x79b   : > { %5071 = vmatprep.subr.bf16.mxu0 %v3971_v13 }
 0x79d   : > { %5244 = vmatpush1.bf16.msra.mxu1 %v3460_v12  ;;  %v4010_v12 = vunpack.c.h.s8.bf16 %v3018_v59  ;;  %v4043_v59 = vunpack.c.h.s8.bf16 %v3035_v8 }
 0x79e   : > { %5072 = vmatpush1.bf16.msra.mxu0 %v3970_v14  ;;  %5245 = vmatprep.subr.bf16.mxu1 %v3469_v16 }
 0x79f   : > { %5073 = vmatprep.subr.bf16.mxu0 %v3979_v25  ;;  %v3500_v25 = vunpack.c.h.s8.bf16 %v2764_v0  ;;  %v3533_v0 = vunpack.c.h.s8.bf16 %v2781_v31 }
 0x7a1   : > { %5246 = vmatpush1.bf16.msra.mxu1 %v3468_v60  ;;  %v3026_v60 = vld [vmem:[#allocation2 + $0xf20] sm:$0xff] }
 0x7a2   : > { %5074 = vmatpush1.bf16.msra.mxu0 %v3978_v20  ;;  %5247 = vmatprep.subr.bf16.mxu1 %v3477_v47  ;;  %v3509_v20 = vunpack.c.l.s8.bf16 %v2773_v46 }
 0x7a3   : > { %5075 = vmatprep.subr.bf16.mxu0 %v3987_v21  ;;  %v2772_v21 = vld [vmem:[#allocation2 + $0x730] sm:$0xff] }
 0x7a5   : > { %5248 = vmatpush1.bf16.msra.mxu1 %v3476_v28  ;;  %v3508_v28 = vunpack.c.l.s8.bf16 %v2772_v21 }
 0x7a6   : > { %5076 = vmatpush1.bf16.msra.mxu0 %v3986_v27  ;;  %5249 = vmatprep.subr.bf16.mxu1 %v3485_v30  ;;  %v4018_v27 = vunpack.c.l.s8.bf16 %v3026_v60  ;;  %v4027_v30 = vunpack.c.h.s8.bf16 %v3027_v37 }
 0x7a7   : > { %5077 = vmatprep.subr.bf16.mxu0 %v3995_v10  ;;  %v4757_v2 = vpop.f32.mrb[4].mxu1 }
 0x7a8   : > { %v5498_v36 = vmul.f32 %v5467_v32, %v4757_v2  ;;  %v4759_v38 = vpop.f32.mrb[5].mxu1  ;;  %v3043_v2 = vld [vmem:[#allocation2 + $0xfa8] sm:$0xff] }
 0x7a9   : > { %v5499_v4 = vmul.f32 %v5471_v29, %v4759_v38  ;;  %v4761_v45 = vpop.f32.mrb[6].mxu1  ;;  %5250 = vmatpush1.bf16.msra.mxu1 %v3484_v53  ;;  %v3525_v53 = vunpack.c.l.s8.bf16 %v2781_v31 }
 0x7aa   : > { %5078 = vmatpush1.bf16.msra.mxu0 %v3994_v40  ;;  %v5556_v18 = vadd.f32 %v5525_v54, %v5498_v36  ;;  %v5506_v9 = vmul.f32 %v5467_v32, %v4761_v45  ;;  %v4763_v33 = vpop.f32.mrb[7].mxu1  ;;  %5251 = vmatprep.subr.bf16.mxu1 %v3493_v57  ;;  %v4026_v32 = vunpack.c.h.s8.bf16 %v3026_v60  ;;  %v4035_v40 = vunpack.c.l.s8.bf16 %v3035_v8  ;;  %v5595_v60 = vld [vmem:[#allocation14 + $0x8] sm:$0xff] }
 0x7ab   : > { %5079 = vmatprep.subr.bf16.mxu0 %v4003_v55  ;;  %v5557_v13 = vadd.f32 %v5529_v3, %v5499_v4  ;;  %v5507_v11 = vmul.f32 %v5471_v29, %v4763_v33  ;;  %v3516_v29 = vunpack.c.h.s8.bf16 %v2772_v21  ;;  %v4034_v55 = vunpack.c.l.s8.bf16 %v3034_v23 }
 0x7ac   : > { %v5564_v50 = vadd.f32 %v5525_v54, %v5506_v9  ;;  %v5572_v16 = vmax.f32 %v5556_v18, 0.0  ;;  %v2780_v54 = vld [vmem:[#allocation2 + $0x770] sm:$0xff]  ;;  %v4042_v36 = vunpack.c.h.s8.bf16 %v3034_v23  ;;  %v4051_v4 = vunpack.c.l.s8.bf16 %v3043_v2 }
 0x7ad   : > { %v5565_v14 = vadd.f32 %v5529_v3, %v5507_v11  ;;  %5252 = vmatpush1.bf16.msra.mxu1 %v3492_v43  ;;  %v5573_v47 = vmax.f32 %v5557_v13, 0.0  ;;  %v3524_v57 = vunpack.c.l.s8.bf16 %v2780_v54  ;;  %v2789_v3 = vld [vmem:[#allocation2 + $0x7b8] sm:$0xff]  ;;  %v3532_v38 = vunpack.c.h.s8.bf16 %v2780_v54  ;;  %v2788_v43 = vld [vmem:[#allocation2 + $0x7b0] sm:$0xff] }
 0x7ae   : > { %5080 = vmatpush1.bf16.msra.mxu0 %v4002_v6  ;;  %v5580_v17 = vmax.f32 %v5564_v50, 0.0  ;;  %5253 = vmatprep.subr.bf16.mxu1 %v3501_v63  ;;  %v3541_v45 = vunpack.c.l.s8.bf16 %v2789_v3  ;;  %v3042_v6 = vld [vmem:[#allocation2 + $0xfa0] sm:$0xff]  ;;  %v3540_v9 = vunpack.c.l.s8.bf16 %v2788_v43  ;;  %v4059_v33 = vunpack.c.h.s8.bf16 %v3043_v2  ;;  %v3051_v63 = vld [vmem:[#allocation2 + $0xfe8] sm:$0xff]  ;;  %v2797_v13 = vld [vmem:[#allocation2 + $0x7f8] sm:$0xff] }
 0x7af   : > { %5081 = vmatprep.subr.bf16.mxu0 %v4011_v52  ;;  %v5581_v22 = vmax.f32 %v5565_v14, 0.0  ;;  %v4050_v18 = vunpack.c.l.s8.bf16 %v3042_v6  ;;  %v3549_v52 = vunpack.c.h.s8.bf16 %v2789_v3  ;;  %v4058_v11 = vunpack.c.h.s8.bf16 %v3042_v6  ;;  %v3050_v14 = vld [vmem:[#allocation2 + $0xfe0] sm:$0xff] }
 0x7b0   : > { %v7987_v39 = vpack.c.bf16 %v5580_v17, %v5572_v16  ;;  %v3548_v37 = vunpack.c.h.s8.bf16 %v2788_v43  ;;  %v4067_v46 = vunpack.c.l.s8.bf16 %v3051_v63  ;;  %v3557_v50 = vunpack.c.l.s8.bf16 %v2797_v13  ;;  %v2820_v43 = vld [vmem:[#allocation2 + $0x8b0] sm:$0xff] }
 0x7b1   : > { %5254 = vmatpush1.bf16.msra.mxu1 %v3500_v25  ;;  %v7989_v10 = vpack.c.bf16 %v5581_v22, %v5573_v47  ;;  %v4066_v25 = vunpack.c.l.s8.bf16 %v3050_v14  ;;  %v4075_v17 = vunpack.c.h.s8.bf16 %v3051_v63  ;;  %v4074_v21 = vunpack.c.h.s8.bf16 %v3050_v14  ;;  %v2829_v63 = vld [vmem:[#allocation2 + $0x8f8] sm:$0xff]  ;;  %v2828_v14 = vld [vmem:[#allocation2 + $0x8f0] sm:$0xff] }
 0x7b2   : > { %5082 = vmatpush1.bf16.msra.mxu0 %v4010_v12  ;;  %5255 = vmatprep.subr.bf16.mxu1 %v3509_v20  ;;  %v2796_v12 = vld [vmem:[#allocation2 + $0x7f0] sm:$0xff]  ;;  %v2805_v20 = vld [vmem:[#allocation2 + $0x838] sm:$0xff] }
 0x7b3   : > { %5083 = vmatprep.subr.bf16.mxu0 %v4019_v19  ;;  %v3556_v16 = vunpack.c.l.s8.bf16 %v2796_v12  ;;  %v3565_v19 = vunpack.c.h.s8.bf16 %v2797_v13  ;;  %v3564_v47 = vunpack.c.h.s8.bf16 %v2796_v12  ;;  %v3573_v22 = vunpack.c.l.s8.bf16 %v2805_v20  ;;  %v5601_v13 = vld [vmem:[#allocation14 + $0x38] sm:$0xff]  ;;  %v5600_v12 = vld [vmem:[#allocation14 + $0x30] sm:$0xff] }
 0x7b4   : > { %v3581_v31 = vunpack.c.h.s8.bf16 %v2805_v20  ;;  %v2837_v20 = vld [vmem:[#allocation2 + $0x938] sm:$0xff] }
 0x7b5   : > { %5256 = vmatpush1.bf16.msra.mxu1 %v3508_v28  ;;  %v2804_v28 = vld [vmem:[#allocation2 + $0x830] sm:$0xff] }
 0x7b6   : > { %5084 = vmatpush1.bf16.msra.mxu0 %v4018_v27  ;;  %5257 = vmatprep.subr.bf16.mxu1 %v3517_v24  ;;  %v5659_v27 = vunpack.c.l.s8.bf16 %v5595_v60  ;;  %v3572_v24 = vunpack.c.l.s8.bf16 %v2804_v28 }
 0x7b7   : > { %5085 = vmatprep.subr.bf16.mxu0 %v4027_v30  ;;  %v5594_v30 = vld [vmem:[#allocation14] sm:$0xff] }
 0x7b8   : > { %v5658_v8 = vunpack.c.l.s8.bf16 %v5594_v30  ;;  %v5660_v23 = vunpack.c.h.s8.bf16 %v5594_v30  ;;  %v5602_v30 = vld [vmem:[#allocation14 + $0x40] sm:$0xff] }
 0x7b9   : > { %5258 = vmatpush1.bf16.msra.mxu1 %v3516_v29  ;;  %v2813_v29 = vld [vmem:[#allocation2 + $0x878] sm:$0xff] }
 0x7ba   : > { %5086 = vmatpush1.bf16.msra.mxu0 %v4026_v32  ;;  %5259 = vmatprep.subr.bf16.mxu1 %v3525_v53  ;;  %v5661_v32 = vunpack.c.h.s8.bf16 %v5595_v60  ;;  %v3580_v53 = vunpack.c.h.s8.bf16 %v2804_v28  ;;  %v3589_v54 = vunpack.c.l.s8.bf16 %v2813_v29  ;;  %v5603_v60 = vld [vmem:[#allocation14 + $0x48] sm:$0xff]  ;;  %v2836_v28 = vld [vmem:[#allocation2 + $0x930] sm:$0xff] }
 0x7bb   : > { %5087 = vmatprep.subr.bf16.mxu0 %v4035_v40  ;;  %v5597_v40 = vld [vmem:[#allocation14 + $0x18] sm:$0xff] }
 0x7bc   : > { %v5665_v3 = vunpack.c.h.s8.bf16 %v5597_v40 }
 0x7bd   : > { %5260 = vmatpush1.bf16.msra.mxu1 %v3524_v57  ;;  %v2812_v57 = vld [vmem:[#allocation2 + $0x870] sm:$0xff] }
 0x7be   : > { %5088 = vmatpush1.bf16.msra.mxu0 %v4034_v55  ;;  %5261 = vmatprep.subr.bf16.mxu1 %v3533_v0  ;;  %v5663_v55 = vunpack.c.l.s8.bf16 %v5597_v40  ;;  %v3588_v0 = vunpack.c.l.s8.bf16 %v2812_v57  ;;  %v5605_v40 = vld [vmem:[#allocation14 + $0x58] sm:$0xff] }
 0x7bf   : > { %5089 = vmatprep.subr.bf16.mxu0 %v4043_v59  ;;  %v5596_v59 = vld [vmem:[#allocation14 + $0x10] sm:$0xff] }
 0x7c0   : > { %v5662_v2 = vunpack.c.l.s8.bf16 %v5596_v59 }
 0x7c1   : > { %5262 = vmatpush1.bf16.msra.mxu1 %v3532_v38  ;;  %v5599_v38 = vld [vmem:[#allocation14 + $0x28] sm:$0xff] }
 0x7c2   : > { %5090 = vmatpush1.bf16.msra.mxu0 %v4042_v36  ;;  %5263 = vmatprep.subr.bf16.mxu1 %v3541_v45  ;;  %v2821_v36 = vld [vmem:[#allocation2 + $0x8b8] sm:$0xff]  ;;  %v5667_v6 = vunpack.c.l.s8.bf16 %v5599_v38 }
 0x7c3   : > { %5091 = vmatprep.subr.bf16.mxu0 %v4051_v4  ;;  %v5664_v4 = vunpack.c.h.s8.bf16 %v5596_v59  ;;  %v3605_v45 = vunpack.c.l.s8.bf16 %v2821_v36  ;;  %v5604_v59 = vld [vmem:[#allocation14 + $0x50] sm:$0xff] }
 0x7c5   : > { %5264 = vmatpush1.bf16.msra.mxu1 %v3540_v9 }
 0x7c6   : > { %5092 = vmatpush1.bf16.msra.mxu0 %v4050_v18  ;;  %5265 = vmatprep.subr.bf16.mxu1 %v3549_v52  ;;  %v3604_v18 = vunpack.c.l.s8.bf16 %v2820_v43  ;;  %v5669_v52 = vunpack.c.h.s8.bf16 %v5599_v38  ;;  %v5607_v38 = vld [vmem:[#allocation14 + $0x68] sm:$0xff] }
 0x7c7   : > { %5093 = vmatprep.subr.bf16.mxu0 %v4059_v33  ;;  %v3613_v33 = vunpack.c.h.s8.bf16 %v2821_v36  ;;  %v2853_v36 = vld [vmem:[#allocation2 + $0x9b8] sm:$0xff] }
 0x7c9   : > { %5266 = vmatpush1.bf16.msra.mxu1 %v3548_v37 }
 0x7ca   : > { %5094 = vmatpush1.bf16.msra.mxu0 %v4058_v11  ;;  %5267 = vmatprep.subr.bf16.mxu1 %v3557_v50  ;;  %v3612_v11 = vunpack.c.h.s8.bf16 %v2820_v43  ;;  %v5671_v50 = vunpack.c.l.s8.bf16 %v5601_v13  ;;  %v2852_v43 = vld [vmem:[#allocation2 + $0x9b0] sm:$0xff] }
 0x7cb   : > { %5095 = vmatprep.subr.bf16.mxu0 %v4067_v46  ;;  %v3621_v46 = vunpack.c.l.s8.bf16 %v2829_v63 }
 0x7cd   : > { %5268 = vmatpush1.bf16.msra.mxu1 %v3556_v16  ;;  %v5670_v16 = vunpack.c.l.s8.bf16 %v5600_v12 }
 0x7ce   : > { %5096 = vmatpush1.bf16.msra.mxu0 %v4066_v25  ;;  %5269 = vmatprep.subr.bf16.mxu1 %v3565_v19  ;;  %v3620_v25 = vunpack.c.l.s8.bf16 %v2828_v14  ;;  %v5673_v19 = vunpack.c.h.s8.bf16 %v5601_v13  ;;  %v5609_v13 = vld [vmem:[#allocation14 + $0x78] sm:$0xff] }
 0x7cf   : > { %5097 = vmatprep.subr.bf16.mxu0 %v4075_v17  ;;  %v3629_v17 = vunpack.c.h.s8.bf16 %v2829_v63  ;;  %v2861_v63 = vld [vmem:[#allocation2 + $0x9f8] sm:$0xff] }
 0x7d1   : > { %5270 = vmatpush1.bf16.msra.mxu1 %v3564_v47  ;;  %v5672_v47 = vunpack.c.h.s8.bf16 %v5600_v12  ;;  %v5608_v12 = vld [vmem:[#allocation14 + $0x70] sm:$0xff] }
 0x7d2   : > { %5098 = vmatpush1.bf16.msra.mxu0 %v4074_v21  ;;  %5282 = vmatprep.subr.bf16.mxu1 %v3573_v22  ;;  %v3628_v21 = vunpack.c.h.s8.bf16 %v2828_v14  ;;  %v3637_v22 = vunpack.c.l.s8.bf16 %v2837_v20  ;;  %v2860_v14 = vld [vmem:[#allocation2 + $0x9f0] sm:$0xff] }
 0x7d3   : > { %5786 = vmatprep.subr.bf16.mxu0 %v5659_v27  ;;  %v5675_v27 = vunpack.c.l.s8.bf16 %v5603_v60 }
 0x7d4   : > { %5272 = vmatmul.mubr.bf16.vlgmr.msra.gmra.mrb[8].mxu1 %v7845_v61  ;;  %v3597_v61 = vunpack.c.h.s8.bf16 %v2813_v29  ;;  %v2845_v29 = vld [vmem:[#allocation2 + $0x978] sm:$0xff] }
 0x7d5   : > { %5100 = vmatmul.mubr.bf16.vlgmr.msra.gmra.mrb[4].mxu0 %v7937_v1  ;;  %5283 = vmatpush1.bf16.msra.mxu1 %v3572_v24  ;;  %v3636_v24 = vunpack.c.l.s8.bf16 %v2836_v28 }
 0x7d6   : > { %5787 = vmatpush1.bf16.msra.mxu0 %v5658_v8  ;;  %5818 = vmatprep.mubr.bf16.mxu0 %v7965_v58  ;;  %v3596_v58 = vunpack.c.h.s8.bf16 %v2812_v57  ;;  %v5674_v8 = vunpack.c.l.s8.bf16 %v5602_v30  ;;  %v2844_v57 = vld [vmem:[#allocation2 + $0x970] sm:$0xff] }
 0x7d7   : > { %5284 = vmatprep.subr.bf16.mxu1 %v3581_v31  ;;  %5788 = vmatprep.subr.bf16.mxu0 %v5661_v32  ;;  %v3645_v31 = vunpack.c.h.s8.bf16 %v2837_v20  ;;  %v5677_v32 = vunpack.c.h.s8.bf16 %v5603_v60  ;;  %v2869_v20 = vld [vmem:[#allocation2 + $0xa38] sm:$0xff] }
 0x7d8   : > { %5314 = vmatprep.mubr.bf16.mxu1 %v7867_v56  ;;  %v5598_v56 = vld [vmem:[#allocation14 + $0x20] sm:$0xff]  ;;  %v5611_v60 = vld [vmem:[#allocation14 + $0x88] sm:$0xff] }
 0x7d9   : > { %5285 = vmatpush1.bf16.msra.mxu1 %v3580_v53  ;;  %v5666_v9 = vunpack.c.l.s8.bf16 %v5598_v56  ;;  %v5668_v37 = vunpack.c.h.s8.bf16 %v5598_v56  ;;  %v3644_v53 = vunpack.c.h.s8.bf16 %v2836_v28  ;;  %v5606_v56 = vld [vmem:[#allocation14 + $0x60] sm:$0xff] }
 0x7da   : > { %5789 = vmatpush1.bf16.msra.mxu0 %v5660_v23  ;;  %5286 = vmatprep.subr.bf16.mxu1 %v3589_v54  ;;  %v5676_v23 = vunpack.c.h.s8.bf16 %v5602_v30  ;;  %v3653_v54 = vunpack.c.l.s8.bf16 %v2845_v29  ;;  %v2868_v28 = vld [vmem:[#allocation2 + $0xa30] sm:$0xff] }
 0x7db   : > { %5790 = vmatprep.subr.bf16.mxu0 %v5663_v55  ;;  %v5679_v55 = vunpack.c.l.s8.bf16 %v5605_v40  ;;  %v5610_v30 = vld [vmem:[#allocation14 + $0x80] sm:$0xff] }
 0x7dd   : > { %5287 = vmatpush1.bf16.msra.mxu1 %v3588_v0  ;;  %v3652_v0 = vunpack.c.l.s8.bf16 %v2844_v57 }
 0x7de   : > { %5791 = vmatpush1.bf16.msra.mxu0 %v5662_v2  ;;  %5288 = vmatprep.subr.bf16.mxu1 %v3597_v61  ;;  %v5678_v2 = vunpack.c.l.s8.bf16 %v5604_v59  ;;  %v3661_v61 = vunpack.c.h.s8.bf16 %v2845_v29  ;;  %v2877_v29 = vld [vmem:[#allocation2 + $0xa78] sm:$0xff] }
 0x7df   : > { %5792 = vmatprep.subr.bf16.mxu0 %v5665_v3  ;;  %v5681_v3 = vunpack.c.h.s8.bf16 %v5605_v40  ;;  %v5613_v40 = vld [vmem:[#allocation14 + $0x98] sm:$0xff] }
 0x7e1   : > { %5289 = vmatpush1.bf16.msra.mxu1 %v3596_v58  ;;  %v3660_v58 = vunpack.c.h.s8.bf16 %v2844_v57  ;;  %v2876_v57 = vld [vmem:[#allocation2 + $0xa70] sm:$0xff] }
 0x7e2   : > { %5793 = vmatpush1.bf16.msra.mxu0 %v5664_v4  ;;  %5290 = vmatprep.subr.bf16.mxu1 %v3605_v45  ;;  %v5680_v4 = vunpack.c.h.s8.bf16 %v5604_v59  ;;  %v3669_v45 = vunpack.c.l.s8.bf16 %v2853_v36  ;;  %v5612_v59 = vld [vmem:[#allocation14 + $0x90] sm:$0xff] }
 0x7e3   : > { %5794 = vmatprep.subr.bf16.mxu0 %v5667_v6  ;;  %v5683_v6 = vunpack.c.l.s8.bf16 %v5607_v38 }
 0x7e5   : > { %5291 = vmatpush1.bf16.msra.mxu1 %v3604_v18  ;;  %v3668_v18 = vunpack.c.l.s8.bf16 %v2852_v43 }
 0x7e6   : > { %5795 = vmatpush1.bf16.msra.mxu0 %v5666_v9  ;;  %5292 = vmatprep.subr.bf16.mxu1 %v3613_v33  ;;  %v5682_v9 = vunpack.c.l.s8.bf16 %v5606_v56  ;;  %v3677_v33 = vunpack.c.h.s8.bf16 %v2853_v36  ;;  %v5696_v36 = vunpack.c.h.s8.bf16 %v5612_v59 }
 0x7e7   : > { %5796 = vmatprep.subr.bf16.mxu0 %v5669_v52  ;;  %v5685_v52 = vunpack.c.h.s8.bf16 %v5607_v38 }
 0x7e9   : > { %5293 = vmatpush1.bf16.msra.mxu1 %v3612_v11  ;;  %v3676_v11 = vunpack.c.h.s8.bf16 %v2852_v43 }
 0x7ea   : > { %5797 = vmatpush1.bf16.msra.mxu0 %v5668_v37  ;;  %5294 = vmatprep.subr.bf16.mxu1 %v3621_v46  ;;  %v5684_v37 = vunpack.c.h.s8.bf16 %v5606_v56  ;;  %v3685_v46 = vunpack.c.l.s8.bf16 %v2861_v63 }
 0x7eb   : > { %5798 = vmatprep.subr.bf16.mxu0 %v5671_v50  ;;  %v5687_v50 = vunpack.c.l.s8.bf16 %v5609_v13 }
 0x7ed   : > { %5295 = vmatpush1.bf16.msra.mxu1 %v3620_v25  ;;  %v3684_v25 = vunpack.c.l.s8.bf16 %v2860_v14 }
 0x7ee   : > { %5799 = vmatpush1.bf16.msra.mxu0 %v5670_v16  ;;  %5296 = vmatprep.subr.bf16.mxu1 %v3629_v17  ;;  %v5686_v16 = vunpack.c.l.s8.bf16 %v5608_v12  ;;  %v3693_v17 = vunpack.c.h.s8.bf16 %v2861_v63 }
 0x7ef   : > { %5800 = vmatprep.subr.bf16.mxu0 %v5673_v19  ;;  %v5689_v19 = vunpack.c.h.s8.bf16 %v5609_v13 }
 0x7f1   : > { %5297 = vmatpush1.bf16.msra.mxu1 %v3628_v21  ;;  %v3692_v21 = vunpack.c.h.s8.bf16 %v2860_v14 }
 0x7f2   : > { %5801 = vmatpush1.bf16.msra.mxu0 %v5672_v47  ;;  %5298 = vmatprep.subr.bf16.mxu1 %v3637_v22  ;;  %v5688_v47 = vunpack.c.h.s8.bf16 %v5608_v12  ;;  %v3701_v22 = vunpack.c.l.s8.bf16 %v2869_v20 }
 0x7f3   : > { %5802 = vmatprep.subr.bf16.mxu0 %v5675_v27  ;;  %v5691_v27 = vunpack.c.l.s8.bf16 %v5611_v60 }
 0x7f5   : > { %5299 = vmatpush1.bf16.msra.mxu1 %v3636_v24  ;;  %v3700_v24 = vunpack.c.l.s8.bf16 %v2868_v28 }
 0x7f6   : > { %5803 = vmatpush1.bf16.msra.mxu0 %v5674_v8  ;;  %5300 = vmatprep.subr.bf16.mxu1 %v3645_v31  ;;  %v5690_v8 = vunpack.c.l.s8.bf16 %v5610_v30  ;;  %v3709_v31 = vunpack.c.h.s8.bf16 %v2869_v20 }
 0x7f7   : > { %5804 = vmatprep.subr.bf16.mxu0 %v5677_v32  ;;  %v5693_v32 = vunpack.c.h.s8.bf16 %v5611_v60 }
 0x7f9   : > { %5301 = vmatpush1.bf16.msra.mxu1 %v3644_v53  ;;  %v3708_v53 = vunpack.c.h.s8.bf16 %v2868_v28 }
 0x7fa   : > { %5805 = vmatpush1.bf16.msra.mxu0 %v5676_v23  ;;  %5302 = vmatprep.subr.bf16.mxu1 %v3653_v54  ;;  %v5692_v23 = vunpack.c.h.s8.bf16 %v5610_v30  ;;  %v3717_v54 = vunpack.c.l.s8.bf16 %v2877_v29 }
 0x7fb   : > { %5806 = vmatprep.subr.bf16.mxu0 %v5679_v55  ;;  %v5695_v55 = vunpack.c.l.s8.bf16 %v5613_v40 }
 0x7fd   : > { %5303 = vmatpush1.bf16.msra.mxu1 %v3652_v0  ;;  %v3716_v0 = vunpack.c.l.s8.bf16 %v2876_v57 }
 0x7fe   : > { %5807 = vmatpush1.bf16.msra.mxu0 %v5678_v2  ;;  %5304 = vmatprep.subr.bf16.mxu1 %v3661_v61  ;;  %v5697_v2 = vunpack.c.h.s8.bf16 %v5613_v40  ;;  %v2885_v61 = vld [vmem:[#allocation2 + $0xab8] sm:$0xff] }
 0x7ff   : > { %5808 = vmatprep.subr.bf16.mxu0 %v5681_v3  ;;  %v5615_v3 = vld [vmem:[#allocation14 + $0xa8] sm:$0xff]  ;;  %v3733_v38 = vunpack.c.l.s8.bf16 %v2885_v61  ;;  %v3741_v43 = vunpack.c.h.s8.bf16 %v2885_v61 }
 0x800   : > { %v5701_v56 = vunpack.c.h.s8.bf16 %v5615_v3 }
 0x801   : > { %5305 = vmatpush1.bf16.msra.mxu1 %v3660_v58  ;;  %v5699_v58 = vunpack.c.l.s8.bf16 %v5615_v3 }
 0x802   : > { %5809 = vmatpush1.bf16.msra.mxu0 %v5680_v4  ;;  %5306 = vmatprep.subr.bf16.mxu1 %v3669_v45  ;;  %v2884_v4 = vld [vmem:[#allocation2 + $0xab0] sm:$0xff] }
 0x803   : > { %5810 = vmatprep.subr.bf16.mxu0 %v5683_v6  ;;  %v3732_v45 = vunpack.c.l.s8.bf16 %v2884_v4 }
 0x805   : > { %5307 = vmatpush1.bf16.msra.mxu1 %v3668_v18  ;;  %v2893_v18 = vld [vmem:[#allocation2 + $0xaf8] sm:$0xff] }
 0x806   : > { %5811 = vmatpush1.bf16.msra.mxu0 %v5682_v9  ;;  %5308 = vmatprep.subr.bf16.mxu1 %v3677_v33  ;;  %v5617_v9 = vld [vmem:[#allocation14 + $0xb8] sm:$0xff]  ;;  %v3740_v33 = vunpack.c.h.s8.bf16 %v2884_v4  ;;  %v3749_v63 = vunpack.c.l.s8.bf16 %v2893_v18  ;;  %v3757_v14 = vunpack.c.h.s8.bf16 %v2893_v18 }
 0x807   : > { %5812 = vmatprep.subr.bf16.mxu0 %v5685_v52  ;;  %v5703_v13 = vunpack.c.l.s8.bf16 %v5617_v9  ;;  %v5705_v12 = vunpack.c.h.s8.bf16 %v5617_v9 }
 0x809   : > { %5309 = vmatpush1.bf16.msra.mxu1 %v3676_v11  ;;  %v2892_v11 = vld [vmem:[#allocation2 + $0xaf0] sm:$0xff] }
 0x80a   : > { %5813 = vmatpush1.bf16.msra.mxu0 %v5684_v37  ;;  %5310 = vmatprep.subr.bf16.mxu1 %v3685_v46  ;;  %v5616_v37 = vld [vmem:[#allocation14 + $0xb0] sm:$0xff]  ;;  %v3748_v46 = vunpack.c.l.s8.bf16 %v2892_v11 }
 0x80b   : > { %5814 = vmatprep.subr.bf16.mxu0 %v5687_v50  ;;  %v5702_v50 = vunpack.c.l.s8.bf16 %v5616_v37 }
 0x80d   : > { %5311 = vmatpush1.bf16.msra.mxu1 %v3684_v25  ;;  %v2901_v25 = vld [vmem:[#allocation2 + $0xb38] sm:$0xff] }
 0x80e   : > { %5815 = vmatpush1.bf16.msra.mxu0 %v5686_v16  ;;  %5312 = vmatprep.subr.bf16.mxu1 %v3693_v17  ;;  %v5619_v16 = vld [vmem:[#allocation14 + $0xc8] sm:$0xff]  ;;  %v3756_v17 = vunpack.c.h.s8.bf16 %v2892_v11  ;;  %v3765_v20 = vunpack.c.l.s8.bf16 %v2901_v25  ;;  %v3773_v28 = vunpack.c.h.s8.bf16 %v2901_v25 }
 0x80f   : > { %5816 = vmatprep.subr.bf16.mxu0 %v5689_v19  ;;  %v5704_v19 = vunpack.c.h.s8.bf16 %v5616_v37  ;;  %v5707_v60 = vunpack.c.l.s8.bf16 %v5619_v16  ;;  %v5709_v30 = vunpack.c.h.s8.bf16 %v5619_v16  ;;  %v2932_v16 = vld [vmem:[#allocation2 + $0xc30] sm:$0xff] }
 0x811   : > { %5313 = vmatpush1.bf16.msra.mxu1 %v3692_v21  ;;  %v2900_v21 = vld [vmem:[#allocation2 + $0xb30] sm:$0xff] }
 0x812   : > { %5817 = vmatpush1.bf16.msra.mxu0 %v5688_v47  ;;  %5325 = vmatprep.subr.bf16.mxu1 %v3701_v22  ;;  %v5618_v47 = vld [vmem:[#allocation14 + $0xc0] sm:$0xff]  ;;  %v3764_v22 = vunpack.c.l.s8.bf16 %v2900_v21 }
 0x813   : > { %5829 = vmatprep.subr.bf16.mxu0 %v5691_v27  ;;  %v5706_v27 = vunpack.c.l.s8.bf16 %v5618_v47 }
 0x814   : > { %5315 = vmatmul.mubr.bf16.vlgmr.msra.gmra.mrb[8].mxu1 %v7881_v15  ;;  %v3725_v15 = vunpack.c.h.s8.bf16 %v2877_v29 }
 0x815   : > { %5819 = vmatmul.mubr.bf16.vlgmr.msra.gmra.mrb[8].mxu0 %v7963_v42  ;;  %5326 = vmatpush1.bf16.msra.mxu1 %v3700_v24  ;;  %v5694_v42 = vunpack.c.l.s8.bf16 %v5612_v59  ;;  %v2909_v24 = vld [vmem:[#allocation2 + $0xb78] sm:$0xff] }
 0x816   : > { %5830 = vmatpush1.bf16.msra.mxu0 %v5690_v8  ;;  %5861 = vmatprep.mubr.bf16.mxu0 %v7989_v10  ;;  %v3724_v10 = vunpack.c.h.s8.bf16 %v2876_v57  ;;  %v5621_v8 = vld [vmem:[#allocation14 + $0xd8] sm:$0xff]  ;;  %v3781_v29 = vunpack.c.l.s8.bf16 %v2909_v24  ;;  %v3789_v57 = vunpack.c.h.s8.bf16 %v2909_v24 }
 0x817   : > { %5327 = vmatprep.subr.bf16.mxu1 %v3709_v31  ;;  %5831 = vmatprep.subr.bf16.mxu0 %v5693_v32  ;;  %v3772_v31 = vunpack.c.h.s8.bf16 %v2900_v21  ;;  %v5708_v32 = vunpack.c.h.s8.bf16 %v5618_v47  ;;  %v5711_v40 = vunpack.c.l.s8.bf16 %v5621_v8  ;;  %v5713_v59 = vunpack.c.h.s8.bf16 %v5621_v8  ;;  %v2940_v8 = vld [vmem:[#allocation2 + $0xc70] sm:$0xff] }
 0x818   : > { %5357 = vmatprep.mubr.bf16.mxu1 %v7883_v26  ;;  %v5614_v26 = vld [vmem:[#allocation14 + $0xa0] sm:$0xff] }
 0x819   : > { %5328 = vmatpush1.bf16.msra.mxu1 %v3708_v53  ;;  %v5698_v6 = vunpack.c.l.s8.bf16 %v5614_v26  ;;  %v5700_v52 = vunpack.c.h.s8.bf16 %v5614_v26  ;;  %v2908_v53 = vld [vmem:[#allocation2 + $0xb70] sm:$0xff] }
 0x81a   : > { %5832 = vmatpush1.bf16.msra.mxu0 %v5692_v23  ;;  %5329 = vmatprep.subr.bf16.mxu1 %v3717_v54  ;;  %v5620_v23 = vld [vmem:[#allocation14 + $0xd0] sm:$0xff]  ;;  %v3780_v54 = vunpack.c.l.s8.bf16 %v2908_v53 }
 0x81b   : > { %5833 = vmatprep.subr.bf16.mxu0 %v5695_v55  ;;  %v5710_v55 = vunpack.c.l.s8.bf16 %v5620_v23 }
 0x81d   : > { %5330 = vmatpush1.bf16.msra.mxu1 %v3716_v0  ;;  %v2917_v0 = vld [vmem:[#allocation2 + $0xbb8] sm:$0xff] }
 0x81e   : > { %5834 = vmatpush1.bf16.msra.mxu0 %v5694_v42  ;;  %5331 = vmatprep.subr.bf16.mxu1 %v3725_v15  ;;  %v5623_v42 = vld [vmem:[#allocation14 + $0xe8] sm:$0xff]  ;;  %v3788_v15 = vunpack.c.h.s8.bf16 %v2908_v53  ;;  %v3797_v61 = vunpack.c.l.s8.bf16 %v2917_v0  ;;  %v3805_v4 = vunpack.c.h.s8.bf16 %v2917_v0 }
 0x81f   : > { %5835 = vmatprep.subr.bf16.mxu0 %v5697_v2  ;;  %v5712_v2 = vunpack.c.h.s8.bf16 %v5620_v23  ;;  %v5715_v3 = vunpack.c.l.s8.bf16 %v5623_v42  ;;  %v5717_v26 = vunpack.c.h.s8.bf16 %v5623_v42  ;;  %v2949_v53 = vld [vmem:[#allocation2 + $0xcb8] sm:$0xff] }
 0x820   : > { %v5631_v23 = vld [vmem:[#allocation14 + $0x128] sm:$0xff] }
 0x821   : > { %5332 = vmatpush1.bf16.msra.mxu1 %v3724_v10  ;;  %v2916_v10 = vld [vmem:[#allocation2 + $0xbb0] sm:$0xff]  ;;  %v5731_v0 = vunpack.c.l.s8.bf16 %v5631_v23 }
 0x822   : > { %5836 = vmatpush1.bf16.msra.mxu0 %v5696_v36  ;;  %5333 = vmatprep.subr.bf16.mxu1 %v3733_v38  ;;  %v5622_v36 = vld [vmem:[#allocation14 + $0xe0] sm:$0xff]  ;;  %v3796_v38 = vunpack.c.l.s8.bf16 %v2916_v10 }
 0x823   : > { %5837 = vmatprep.subr.bf16.mxu0 %v5699_v58  ;;  %v5714_v58 = vunpack.c.l.s8.bf16 %v5622_v36 }
 0x825   : > { %5334 = vmatpush1.bf16.msra.mxu1 %v3732_v45  ;;  %v2925_v45 = vld [vmem:[#allocation2 + $0xbf8] sm:$0xff] }
 0x826   : > { %5838 = vmatpush1.bf16.msra.mxu0 %v5698_v6  ;;  %5335 = vmatprep.subr.bf16.mxu1 %v3741_v43  ;;  %v5625_v6 = vld [vmem:[#allocation14 + $0xf8] sm:$0xff]  ;;  %v3804_v43 = vunpack.c.h.s8.bf16 %v2916_v10  ;;  %v3813_v18 = vunpack.c.l.s8.bf16 %v2925_v45  ;;  %v3821_v11 = vunpack.c.h.s8.bf16 %v2925_v45  ;;  %v5632_v45 = vld [vmem:[#allocation14 + $0x130] sm:$0xff] }
 0x827   : > { %5839 = vmatprep.subr.bf16.mxu0 %v5701_v56  ;;  %v5716_v56 = vunpack.c.h.s8.bf16 %v5622_v36  ;;  %v5719_v9 = vunpack.c.l.s8.bf16 %v5625_v6  ;;  %v5721_v37 = vunpack.c.h.s8.bf16 %v5625_v6  ;;  %v5633_v10 = vld [vmem:[#allocation14 + $0x138] sm:$0xff] }
 0x829   : > { %5336 = vmatpush1.bf16.msra.mxu1 %v3740_v33  ;;  %v2924_v33 = vld [vmem:[#allocation2 + $0xbf0] sm:$0xff] }
 0x82a   : > { %5840 = vmatpush1.bf16.msra.mxu0 %v5700_v52  ;;  %5337 = vmatprep.subr.bf16.mxu1 %v3749_v63  ;;  %v5624_v52 = vld [vmem:[#allocation14 + $0xf0] sm:$0xff]  ;;  %v3812_v63 = vunpack.c.l.s8.bf16 %v2924_v33 }
 0x82b   : > { %5841 = vmatprep.subr.bf16.mxu0 %v5703_v13  ;;  %v5718_v13 = vunpack.c.l.s8.bf16 %v5624_v52 }
 0x82d   : > { %5338 = vmatpush1.bf16.msra.mxu1 %v3748_v46  ;;  %v2933_v46 = vld [vmem:[#allocation2 + $0xc38] sm:$0xff] }
 0x82e   : > { %5842 = vmatpush1.bf16.msra.mxu0 %v5702_v50  ;;  %5339 = vmatprep.subr.bf16.mxu1 %v3757_v14  ;;  %v5627_v50 = vld [vmem:[#allocation14 + $0x108] sm:$0xff]  ;;  %v3820_v14 = vunpack.c.h.s8.bf16 %v2924_v33  ;;  %v3829_v25 = vunpack.c.l.s8.bf16 %v2933_v46  ;;  %v3837_v21 = vunpack.c.h.s8.bf16 %v2933_v46  ;;  %v5634_v46 = vld [vmem:[#allocation14 + $0x140] sm:$0xff] }
 0x82f   : > { %5843 = vmatprep.subr.bf16.mxu0 %v5705_v12  ;;  %v5720_v12 = vunpack.c.h.s8.bf16 %v5624_v52  ;;  %v5725_v47 = vunpack.c.h.s8.bf16 %v5627_v50  ;;  %v5635_v33 = vld [vmem:[#allocation14 + $0x148] sm:$0xff] }
 0x831   : > { %5340 = vmatpush1.bf16.msra.mxu1 %v3756_v17  ;;  %v5723_v17 = vunpack.c.l.s8.bf16 %v5627_v50 }
 0x832   : > { %5844 = vmatpush1.bf16.msra.mxu0 %v5704_v19  ;;  %5341 = vmatprep.subr.bf16.mxu1 %v3765_v20  ;;  %v5626_v19 = vld [vmem:[#allocation14 + $0x100] sm:$0xff]  ;;  %v3828_v20 = vunpack.c.l.s8.bf16 %v2932_v16 }
 0x833   : > { %5845 = vmatprep.subr.bf16.mxu0 %v5707_v60  ;;  %v5722_v60 = vunpack.c.l.s8.bf16 %v5626_v19 }
 0x835   : > { %5342 = vmatpush1.bf16.msra.mxu1 %v3764_v22  ;;  %v2941_v22 = vld [vmem:[#allocation2 + $0xc78] sm:$0xff] }
 0x836   : > { %5846 = vmatpush1.bf16.msra.mxu0 %v5706_v27  ;;  %5343 = vmatprep.subr.bf16.mxu1 %v3773_v28  ;;  %v5629_v27 = vld [vmem:[#allocation14 + $0x118] sm:$0xff]  ;;  %v3836_v28 = vunpack.c.h.s8.bf16 %v2932_v16  ;;  %v3845_v24 = vunpack.c.l.s8.bf16 %v2941_v22  ;;  %v2973_v16 = vld [vmem:[#allocation2 + $0xd78] sm:$0xff] }
 0x837   : > { %5847 = vmatprep.subr.bf16.mxu0 %v5709_v30  ;;  %v5724_v30 = vunpack.c.h.s8.bf16 %v5626_v19 }
 0x839   : > { %5344 = vmatpush1.bf16.msra.mxu1 %v3772_v31  ;;  %v5727_v31 = vunpack.c.l.s8.bf16 %v5629_v27 }
 0x83a   : > { %5848 = vmatpush1.bf16.msra.mxu0 %v5708_v32  ;;  %5345 = vmatprep.subr.bf16.mxu1 %v3781_v29  ;;  %v5628_v32 = vld [vmem:[#allocation14 + $0x110] sm:$0xff]  ;;  %v3844_v29 = vunpack.c.l.s8.bf16 %v2940_v8 }
 0x83b   : > { %5849 = vmatprep.subr.bf16.mxu0 %v5711_v40  ;;  %v5726_v40 = vunpack.c.l.s8.bf16 %v5628_v32 }
 0x83d   : > { %5346 = vmatpush1.bf16.msra.mxu1 %v3780_v54  ;;  %v3852_v54 = vunpack.c.h.s8.bf16 %v2940_v8  ;;  %v2981_v8 = vld [vmem:[#allocation2 + $0xdb8] sm:$0xff] }
 0x83e   : > { %5850 = vmatpush1.bf16.msra.mxu0 %v5710_v55  ;;  %5347 = vmatprep.subr.bf16.mxu1 %v3789_v57  ;;  %v5728_v55 = vunpack.c.h.s8.bf16 %v5628_v32  ;;  %v3861_v57 = vunpack.c.l.s8.bf16 %v2949_v53 }
 0x83f   : > { %5851 = vmatprep.subr.bf16.mxu0 %v5713_v59  ;;  %v2948_v59 = vld [vmem:[#allocation2 + $0xcb0] sm:$0xff] }
 0x840   : > { %v3860_v42 = vunpack.c.l.s8.bf16 %v2948_v59  ;;  %v3868_v36 = vunpack.c.h.s8.bf16 %v2948_v59  ;;  %v2989_v59 = vld [vmem:[#allocation2 + $0xdf8] sm:$0xff] }
 0x841   : > { %5348 = vmatpush1.bf16.msra.mxu1 %v3788_v15 }
 0x842   : > { %5852 = vmatpush1.bf16.msra.mxu0 %v5712_v2  ;;  %5349 = vmatprep.subr.bf16.mxu1 %v3797_v61  ;;  %v3869_v2 = vunpack.c.h.s8.bf16 %v2949_v53  ;;  %v5733_v61 = vunpack.c.h.s8.bf16 %v5631_v23  ;;  %v5638_v53 = vld [vmem:[#allocation14 + $0x160] sm:$0xff] }
 0x843   : > { %5853 = vmatprep.subr.bf16.mxu0 %v5715_v3  ;;  %v2957_v3 = vld [vmem:[#allocation2 + $0xcf8] sm:$0xff] }
 0x845   : > { %5350 = vmatpush1.bf16.msra.mxu1 %v3796_v38 }
 0x846   : > { %5854 = vmatpush1.bf16.msra.mxu0 %v5714_v58  ;;  %5351 = vmatprep.subr.bf16.mxu1 %v3805_v4  ;;  %v3877_v58 = vunpack.c.l.s8.bf16 %v2957_v3  ;;  %v2956_v4 = vld [vmem:[#allocation2 + $0xcf0] sm:$0xff] }
 0x847   : > { %5855 = vmatprep.subr.bf16.mxu0 %v5717_v26  ;;  %v5735_v26 = vunpack.c.l.s8.bf16 %v5633_v10  ;;  %v3876_v6 = vunpack.c.l.s8.bf16 %v2956_v4  ;;  %v3884_v52 = vunpack.c.h.s8.bf16 %v2956_v4  ;;  %v2997_v4 = vld [vmem:[#allocation2 + $0xe38] sm:$0xff] }
 0x849   : > { %5352 = vmatpush1.bf16.msra.mxu1 %v3804_v43  ;;  %v5734_v43 = vunpack.c.l.s8.bf16 %v5632_v45 }
 0x84a   : > { %5856 = vmatpush1.bf16.msra.mxu0 %v5716_v56  ;;  %5353 = vmatprep.subr.bf16.mxu1 %v3813_v18  ;;  %v3885_v56 = vunpack.c.h.s8.bf16 %v2957_v3  ;;  %v5737_v18 = vunpack.c.h.s8.bf16 %v5633_v10  ;;  %v5640_v3 = vld [vmem:[#allocation14 + $0x170] sm:$0xff] }
 0x84b   : > { %5857 = vmatprep.subr.bf16.mxu0 %v5719_v9  ;;  %v2965_v9 = vld [vmem:[#allocation2 + $0xd38] sm:$0xff] }
 0x84d   : > { %5354 = vmatpush1.bf16.msra.mxu1 %v3812_v63  ;;  %v5736_v63 = vunpack.c.h.s8.bf16 %v5632_v45 }
 0x84e   : > { %5858 = vmatpush1.bf16.msra.mxu0 %v5718_v13  ;;  %5355 = vmatprep.subr.bf16.mxu1 %v3821_v11  ;;  %v3893_v13 = vunpack.c.l.s8.bf16 %v2965_v9  ;;  %v2964_v11 = vld [vmem:[#allocation2 + $0xd30] sm:$0xff] }
 0x84f   : > { %5859 = vmatprep.subr.bf16.mxu0 %v5721_v37  ;;  %v5739_v37 = vunpack.c.l.s8.bf16 %v5635_v33  ;;  %v3892_v50 = vunpack.c.l.s8.bf16 %v2964_v11  ;;  %v3900_v19 = vunpack.c.h.s8.bf16 %v2964_v11  ;;  %v3004_v11 = vld [vmem:[#allocation2 + $0xe70] sm:$0xff] }
 0x851   : > { %5356 = vmatpush1.bf16.msra.mxu1 %v3820_v14  ;;  %v5738_v14 = vunpack.c.l.s8.bf16 %v5634_v46 }
 0x852   : > { %5860 = vmatpush1.bf16.msra.mxu0 %v5720_v12  ;;  %5368 = vmatprep.subr.bf16.mxu1 %v3829_v25  ;;  %v3901_v12 = vunpack.c.h.s8.bf16 %v2965_v9  ;;  %v5741_v25 = vunpack.c.h.s8.bf16 %v5635_v33  ;;  %v3965_v33 = vunpack.c.h.s8.bf16 %v2997_v4 }
 0x853   : > { %5872 = vmatprep.subr.bf16.mxu0 %v5723_v17  ;;  %v5637_v17 = vld [vmem:[#allocation14 + $0x158] sm:$0xff] }
 0x854   : > { %5358 = vmatmul.mubr.bf16.vlgmr.msra.gmra.mrb[8].mxu1 %v7897_v62  ;;  %v5729_v62 = vunpack.c.h.s8.bf16 %v5629_v27 }
 0x855   : > { %5862 = vmatmul.mubr.bf16.vlgmr.msra.gmra.mrb[8].mxu0 %v7987_v39  ;;  %5369 = vmatpush1.bf16.msra.mxu1 %v3828_v20  ;;  %v3853_v39 = vunpack.c.h.s8.bf16 %v2941_v22  ;;  %v5740_v20 = vunpack.c.h.s8.bf16 %v5634_v46  ;;  %v5636_v22 = vld [vmem:[#allocation14 + $0x150] sm:$0xff] }
 0x856   : > { %5873 = vmatpush1.bf16.msra.mxu0 %v5722_v60  ;;  %5370 = vmatprep.subr.bf16.mxu1 %v3837_v21  ;;  %v3909_v60 = vunpack.c.l.s8.bf16 %v2973_v16  ;;  %v2972_v21 = vld [vmem:[#allocation2 + $0xd70] sm:$0xff] }
 0x857   : > { %5874 = vmatprep.subr.bf16.mxu0 %v5725_v47  ;;  %5400 = vmatprep.mubr.bf16.mxu1 %v7899_v5  ;;  %v5630_v5 = vld [vmem:[#allocation14 + $0x120] sm:$0xff]  ;;  %v5743_v47 = vunpack.c.l.s8.bf16 %v5637_v17  ;;  %v3908_v27 = vunpack.c.l.s8.bf16 %v2972_v21  ;;  %v3916_v32 = vunpack.c.h.s8.bf16 %v2972_v21  ;;  %v8013_v21 = vld [vmem:[#allocation13] sm:$0xff] }
 0x858   : > { %v5730_v15 = vunpack.c.l.s8.bf16 %v5630_v5  ;;  %v5732_v38 = vunpack.c.h.s8.bf16 %v5630_v5 }
 0x859   : > { %5371 = vmatpush1.bf16.msra.mxu1 %v3836_v28  ;;  %v5742_v28 = vunpack.c.l.s8.bf16 %v5636_v22 }
 0x85a   : > { %5875 = vmatpush1.bf16.msra.mxu0 %v5724_v30  ;;  %5372 = vmatprep.subr.bf16.mxu1 %v3845_v24  ;;  %v3917_v30 = vunpack.c.h.s8.bf16 %v2973_v16  ;;  %v5745_v24 = vunpack.c.h.s8.bf16 %v5637_v17  ;;  %v3021_v17 = vld [vmem:[#allocation2 + $0xef8] sm:$0xff] }
 0x85b   : > { %5876 = vmatprep.subr.bf16.mxu0 %v5727_v31  ;;  %v5639_v31 = vld [vmem:[#allocation14 + $0x168] sm:$0xff] }
 0x85d   : > { %5373 = vmatpush1.bf16.msra.mxu1 %v3844_v29  ;;  %v5744_v29 = vunpack.c.h.s8.bf16 %v5636_v22  ;;  %v4005_v22 = vunpack.c.l.s8.bf16 %v3021_v17 }
 0x85e   : > { %5877 = vmatpush1.bf16.msra.mxu0 %v5726_v40  ;;  %5374 = vmatprep.subr.bf16.mxu1 %v3853_v39  ;;  %v3925_v40 = vunpack.c.l.s8.bf16 %v2981_v8  ;;  %v2980_v39 = vld [vmem:[#allocation2 + $0xdb0] sm:$0xff] }
 0x85f   : > { %5878 = vmatprep.subr.bf16.mxu0 %v5729_v62  ;;  %v5747_v62 = vunpack.c.l.s8.bf16 %v5639_v31  ;;  %v3924_v23 = vunpack.c.l.s8.bf16 %v2980_v39  ;;  %v3932_v5 = vunpack.c.h.s8.bf16 %v2980_v39 }
 0x861   : > { %5375 = vmatpush1.bf16.msra.mxu1 %v3852_v54  ;;  %v5746_v54 = vunpack.c.l.s8.bf16 %v5638_v53 }
 0x862   : > { %5879 = vmatpush1.bf16.msra.mxu0 %v5728_v55  ;;  %5376 = vmatprep.subr.bf16.mxu1 %v3861_v57  ;;  %v3933_v55 = vunpack.c.h.s8.bf16 %v2981_v8  ;;  %v5749_v57 = vunpack.c.h.s8.bf16 %v5639_v31 }
 0x863   : > { %5880 = vmatprep.subr.bf16.mxu0 %v5731_v0  ;;  %v5641_v0 = vld [vmem:[#allocation14 + $0x178] sm:$0xff] }
 0x865   : > { %5377 = vmatpush1.bf16.msra.mxu1 %v3860_v42  ;;  %v5748_v42 = vunpack.c.h.s8.bf16 %v5638_v53  ;;  %v4013_v53 = vunpack.c.h.s8.bf16 %v3021_v17 }
 0x866   : > { %5881 = vmatpush1.bf16.msra.mxu0 %v5730_v15  ;;  %5378 = vmatprep.subr.bf16.mxu1 %v3869_v2  ;;  %v3941_v15 = vunpack.c.l.s8.bf16 %v2989_v59  ;;  %v2988_v2 = vld [vmem:[#allocation2 + $0xdf0] sm:$0xff] }
 0x867   : > { %5882 = vmatprep.subr.bf16.mxu0 %v5733_v61  ;;  %v5751_v61 = vunpack.c.l.s8.bf16 %v5641_v0  ;;  %v3940_v10 = vunpack.c.l.s8.bf16 %v2988_v2  ;;  %v3948_v45 = vunpack.c.h.s8.bf16 %v2988_v2 }
 0x869   : > { %5379 = vmatpush1.bf16.msra.mxu1 %v3868_v36  ;;  %v5750_v36 = vunpack.c.l.s8.bf16 %v5640_v3 }
 0x86a   : > { %5883 = vmatpush1.bf16.msra.mxu0 %v5732_v38  ;;  %5380 = vmatprep.subr.bf16.mxu1 %v3877_v58  ;;  %v3949_v38 = vunpack.c.h.s8.bf16 %v2989_v59  ;;  %v5753_v58 = vunpack.c.h.s8.bf16 %v5641_v0 }
 0x86b   : > { %5884 = vmatprep.subr.bf16.mxu0 %v5735_v26  ;;  %v8002_v26 = vld [vmem:[#allocation14 + $0x188] sm:$0xff] }
 0x86d   : > { %5381 = vmatpush1.bf16.msra.mxu1 %v3876_v6  ;;  %v5752_v6 = vunpack.c.h.s8.bf16 %v5640_v3 }
 0x86e   : > { %5885 = vmatpush1.bf16.msra.mxu0 %v5734_v43  ;;  %5382 = vmatprep.subr.bf16.mxu1 %v3885_v56  ;;  %v3957_v43 = vunpack.c.l.s8.bf16 %v2997_v4  ;;  %v2996_v56 = vld [vmem:[#allocation2 + $0xe30] sm:$0xff]  ;;  %v5757_v4 = vunpack.c.h.s8.bf16 %v8002_v26 }
 0x86f   : > { %5886 = vmatprep.subr.bf16.mxu0 %v5737_v18  ;;  %v5755_v18 = vunpack.c.l.s8.bf16 %v8002_v26  ;;  %v3956_v9 = vunpack.c.l.s8.bf16 %v2996_v56 }
 0x871   : > { %5383 = vmatpush1.bf16.msra.mxu1 %v3884_v52  ;;  %v3005_v52 = vld [vmem:[#allocation2 + $0xe78] sm:$0xff] }
 0x872   : > { %5887 = vmatpush1.bf16.msra.mxu0 %v5736_v63  ;;  %5384 = vmatprep.subr.bf16.mxu1 %v3893_v13  ;;  %v3964_v63 = vunpack.c.h.s8.bf16 %v2996_v56  ;;  %v3973_v13 = vunpack.c.l.s8.bf16 %v3005_v52  ;;  %v3981_v46 = vunpack.c.h.s8.bf16 %v3005_v52  ;;  %v5644_v52 = vld [vmem:[#allocation14 + $0x190] sm:$0xff] }
 0x873   : > { %5888 = vmatprep.subr.bf16.mxu0 %v5739_v37  ;;  %v3972_v37 = vunpack.c.l.s8.bf16 %v3004_v11 }
 0x875   : > { %5385 = vmatpush1.bf16.msra.mxu1 %v3892_v50  ;;  %v3013_v50 = vld [vmem:[#allocation2 + $0xeb8] sm:$0xff] }
 0x876   : > { %5889 = vmatpush1.bf16.msra.mxu0 %v5738_v14  ;;  %5386 = vmatprep.subr.bf16.mxu1 %v3901_v12  ;;  %v3980_v14 = vunpack.c.h.s8.bf16 %v3004_v11  ;;  %v3989_v12 = vunpack.c.l.s8.bf16 %v3013_v50 }
 0x877   : > { %5890 = vmatprep.subr.bf16.mxu0 %v5741_v25  ;;  %v3012_v25 = vld [vmem:[#allocation2 + $0xeb0] sm:$0xff] }
 0x878   : > { %v3988_v16 = vunpack.c.l.s8.bf16 %v3012_v25 }
 0x879   : > { %5387 = vmatpush1.bf16.msra.mxu1 %v3900_v19  ;;  %v8007_v19 = vld [vmem:[#allocation11] sm:$0xff] }
 0x87a   : > { %5891 = vmatpush1.bf16.msra.mxu0 %v5740_v20  ;;  %5388 = vmatprep.subr.bf16.mxu1 %v3909_v60  ;;  %v5479_v20 = vrot.slane %v8007_v19, %v7765_v35  ;;  %v3996_v60 = vunpack.c.h.s8.bf16 %v3012_v25  ;;  %v3044_v25 = vld [vmem:[#allocation2 + $0xfb0] sm:$0xff] }
 0x87b   : > { %5892 = vmatprep.subr.bf16.mxu0 %v5743_v47  ;;  %v5533_v47 = vrot.slane %v8013_v21, %v7798_v44  ;;  %v4052_v17 = vunpack.c.l.s8.bf16 %v3044_v25 }
 0x87d   : > { %5389 = vmatpush1.bf16.msra.mxu1 %v3908_v27  ;;  %v3020_v27 = vld [vmem:[#allocation2 + $0xef0] sm:$0xff] }
 0x87e   : > { %5893 = vmatpush1.bf16.msra.mxu0 %v5742_v28  ;;  %5390 = vmatprep.subr.bf16.mxu1 %v3917_v30  ;;  %v5537_v30 = vrot.slane %v8013_v21, %v7765_v35  ;;  %v4012_v59 = vunpack.c.h.s8.bf16 %v3020_v27 }
 0x87f   : > { %5894 = vmatprep.subr.bf16.mxu0 %v5745_v24 }
 0x881   : > { %5391 = vmatpush1.bf16.msra.mxu1 %v3916_v32 }
 0x882   : > { %5895 = vmatpush1.bf16.msra.mxu0 %v5744_v29  ;;  %5392 = vmatprep.subr.bf16.mxu1 %v3925_v40  ;;  %v4004_v29 = vunpack.c.l.s8.bf16 %v3020_v27  ;;  %v4060_v27 = vunpack.c.h.s8.bf16 %v3044_v25 }
 0x883   : > { %5896 = vmatprep.subr.bf16.mxu0 %v5747_v62 }
 0x885   : > { %5393 = vmatpush1.bf16.msra.mxu1 %v3924_v23 }
 0x886   : > { %5897 = vmatpush1.bf16.msra.mxu0 %v5746_v54  ;;  %5394 = vmatprep.subr.bf16.mxu1 %v3933_v55  ;;  %v3029_v54 = vld [vmem:[#allocation2 + $0xf38] sm:$0xff] }
 0x887   : > { %5898 = vmatprep.subr.bf16.mxu0 %v5749_v57 }
 0x889   : > { %5395 = vmatpush1.bf16.msra.mxu1 %v3932_v5  ;;  %v4021_v5 = vunpack.c.l.s8.bf16 %v3029_v54 }
 0x88a   : > { %5899 = vmatpush1.bf16.msra.mxu0 %v5748_v42  ;;  %5396 = vmatprep.subr.bf16.mxu1 %v3941_v15  ;;  %v3028_v42 = vld [vmem:[#allocation2 + $0xf30] sm:$0xff] }
 0x88b   : > { %5900 = vmatprep.subr.bf16.mxu0 %v5751_v61  ;;  %v5642_v15 = vld [vmem:[#allocation14 + $0x180] sm:$0xff] }
 0x88c   : > { %v5756_v56 = vunpack.c.h.s8.bf16 %v5642_v15 }
 0x88d   : > { %5397 = vmatpush1.bf16.msra.mxu1 %v3940_v10 }
 0x88e   : > { %5901 = vmatpush1.bf16.msra.mxu0 %v5750_v36  ;;  %5398 = vmatprep.subr.bf16.mxu1 %v3949_v38  ;;  %v4020_v36 = vunpack.c.l.s8.bf16 %v3028_v42  ;;  %v5754_v38 = vunpack.c.l.s8.bf16 %v5642_v15 }
 0x88f   : > { %5902 = vmatprep.subr.bf16.mxu0 %v5753_v58  ;;  %v4029_v58 = vunpack.c.h.s8.bf16 %v3029_v54  ;;  %v5650_v54 = vld [vmem:[#allocation14 + $0x1c0] sm:$0xff] }
 0x891   : > { %5399 = vmatpush1.bf16.msra.mxu1 %v3948_v45  ;;  %v3037_v45 = vld [vmem:[#allocation2 + $0xf78] sm:$0xff] }
 0x892   : > { %5903 = vmatpush1.bf16.msra.mxu0 %v5752_v6  ;;  %5411 = vmatprep.subr.bf16.mxu1 %v3957_v43  ;;  %v5645_v6 = vld [vmem:[#allocation14 + $0x198] sm:$0xff]  ;;  %v4028_v43 = vunpack.c.h.s8.bf16 %v3028_v42  ;;  %v4045_v26 = vunpack.c.h.s8.bf16 %v3037_v45 }
 0x893   : > { %5915 = vmatprep.subr.bf16.mxu0 %v5755_v18  ;;  %v4037_v18 = vunpack.c.l.s8.bf16 %v3037_v45  ;;  %v5761_v11 = vunpack.c.h.s8.bf16 %v5645_v6  ;;  %v5656_v45 = vld [vmem:[#allocation14 + $0x1f0] sm:$0xff] }
 0x894   : > { %5401 = vmatmul.mubr.bf16.vlgmr.msra.gmra.mrb[8].mxu1 %v7917_v48  ;;  %v3997_v48 = vunpack.c.h.s8.bf16 %v3013_v50 }
 0x895   : > { %5412 = vmatpush1.bf16.msra.mxu1 %v3956_v9  ;;  %5443 = vmatprep.mubr.bf16.mxu1 %v7919_v49  ;;  %v5475_v49 = vrot.slane %v8007_v19, %v7798_v44  ;;  %v3036_v9 = vld [vmem:[#allocation2 + $0xf70] sm:$0xff] }
 0x896   : > { %5413 = vmatprep.subr.bf16.mxu1 %v3965_v33  ;;  %v5759_v33 = vunpack.c.l.s8.bf16 %v5645_v6  ;;  %v4044_v50 = vunpack.c.h.s8.bf16 %v3036_v9  ;;  %v5782_v6 = vunpack.c.l.s8.bf16 %v5656_v45 }
 0x899   : > { %5414 = vmatpush1.bf16.msra.mxu1 %v3964_v63  ;;  %v4036_v63 = vunpack.c.l.s8.bf16 %v3036_v9  ;;  %v5996_v9 = vld [vmem:[#allocation19] sm:$0xff] }
 0x89a   : > { %5415 = vmatprep.subr.bf16.mxu1 %v3973_v13  ;;  %v5758_v13 = vunpack.c.l.s8.bf16 %v5644_v52 }
 0x89d   : > { %5416 = vmatpush1.bf16.msra.mxu1 %v3972_v37  ;;  %v3045_v37 = vld [vmem:[#allocation2 + $0xfb8] sm:$0xff] }
 0x89e   : > { %5417 = vmatprep.subr.bf16.mxu1 %v3981_v46  ;;  %v5647_v46 = vld [vmem:[#allocation14 + $0x1a8] sm:$0xff] }
 0x8a1   : > { %5418 = vmatpush1.bf16.msra.mxu1 %v3980_v14  ;;  %v5760_v14 = vunpack.c.h.s8.bf16 %v5644_v52  ;;  %v6004_v52 = vunpack.c.l.s8.bf16 %v5996_v9 }
 0x8a2   : > { %5419 = vmatprep.subr.bf16.mxu1 %v3989_v12  ;;  %v4053_v12 = vunpack.c.l.s8.bf16 %v3045_v37 }
 0x8a5   : > { %5420 = vmatpush1.bf16.msra.mxu1 %v3988_v16  ;;  %v5763_v16 = vunpack.c.l.s8.bf16 %v5647_v46 }
 0x8a6   : > { %5421 = vmatprep.subr.bf16.mxu1 %v3997_v48  ;;  %v5646_v48 = vld [vmem:[#allocation14 + $0x1a0] sm:$0xff] }
 0x8a8   : > { %v5101_v28 = vpop.f32.mrb[4].mxu0 }
 0x8a9   : > { %v5500_v24 = vmul.f32 %v5475_v49, %v5101_v28  ;;  %v5103_v8 = vpop.f32.mrb[5].mxu0  ;;  %5422 = vmatpush1.bf16.msra.mxu1 %v3996_v60  ;;  %v5765_v60 = vunpack.c.h.s8.bf16 %v5647_v46  ;;  %v5764_v28 = vunpack.c.h.s8.bf16 %v5646_v48 }
 0x8aa   : > { %v5501_v31 = vmul.f32 %v5479_v20, %v5103_v8  ;;  %v5105_v32 = vpop.f32.mrb[6].mxu0  ;;  %5423 = vmatprep.subr.bf16.mxu1 %v4005_v22  ;;  %v5649_v22 = vld [vmem:[#allocation14 + $0x1b8] sm:$0xff] }
 0x8ab   : > { %v5558_v40 = vadd.f32 %v5533_v47, %v5500_v24  ;;  %v5508_v39 = vmul.f32 %v5475_v49, %v5105_v32  ;;  %v5107_v62 = vpop.f32.mrb[7].mxu0  ;;  %v5762_v49 = vunpack.c.l.s8.bf16 %v5646_v48  ;;  %v3052_v24 = vld [vmem:[#allocation2 + $0xff0] sm:$0xff]  ;;  %v5767_v8 = vunpack.c.l.s8.bf16 %v5649_v22 }
 0x8ac   : > { %v5559_v23 = vadd.f32 %v5537_v30, %v5501_v31  ;;  %v5509_v44 = vmul.f32 %v5479_v20, %v5107_v62  ;;  %v4061_v20 = vunpack.c.h.s8.bf16 %v3045_v37  ;;  %v5648_v31 = vld [vmem:[#allocation14 + $0x1b0] sm:$0xff]  ;;  %v4068_v32 = vunpack.c.l.s8.bf16 %v3052_v24  ;;  %v5651_v62 = vld [vmem:[#allocation14 + $0x1c8] sm:$0xff] }
 0x8ad   : > { %v5566_v55 = vadd.f32 %v5533_v47, %v5508_v39  ;;  %5424 = vmatpush1.bf16.msra.mxu1 %v4004_v29  ;;  %v5574_v0 = vmax.f32 %v5558_v40, 0.0  ;;  %v3053_v47 = vld [vmem:[#allocation2 + $0xff8] sm:$0xff]  ;;  %v5766_v29 = vunpack.c.l.s8.bf16 %v5648_v31  ;;  %v5769_v39 = vunpack.c.h.s8.bf16 %v5649_v22 }
 0x8ae   : > { %v5567_v57 = vadd.f32 %v5537_v30, %v5509_v44  ;;  %5425 = vmatprep.subr.bf16.mxu1 %v4013_v53  ;;  %v5575_v2 = vmax.f32 %v5559_v23, 0.0  ;;  %v4069_v30 = vunpack.c.l.s8.bf16 %v3053_v47  ;;  %v4077_v40 = vunpack.c.h.s8.bf16 %v3053_v47  ;;  %v5997_v37 = vld [vmem:[#allocation19 + $0x8] sm:$0xff] }
 0x8af   : > { %v5582_v35 = vmax.f32 %v5566_v55, 0.0  ;;  %v4076_v53 = vunpack.c.h.s8.bf16 %v3052_v24  ;;  %v5768_v23 = vunpack.c.h.s8.bf16 %v5648_v31  ;;  %v5771_v44 = vunpack.c.l.s8.bf16 %v5651_v62 }
 0x8b0   : > { %v5583_v61 = vmax.f32 %v5567_v57, 0.0  ;;  %v5770_v55 = vunpack.c.l.s8.bf16 %v5650_v54  ;;  %v5773_v57 = vunpack.c.h.s8.bf16 %v5651_v62  ;;  %v6006_v46 = vunpack.c.l.s8.bf16 %v5997_v37 }
 0x8b1   : > { %v5590_v3 = vpack.c.bf16 %v5582_v35, %v5574_v0  ;;  %5426 = vmatpush1.bf16.msra.mxu1 %v4012_v59  ;;  %v5653_v59 = vld [vmem:[#allocation14 + $0x1d8] sm:$0xff]  ;;  %v5772_v0 = vunpack.c.h.s8.bf16 %v5650_v54  ;;  %v5545_v47 = vrot.slane %v8013_v21, %v7813_v51 }
 0x8b2   : > { %v5591_v10 = vpack.c.bf16 %v5583_v61, %v5575_v2  ;;  %5427 = vmatprep.subr.bf16.mxu1 %v4021_v5  ;;  %v5775_v35 = vunpack.c.l.s8.bf16 %v5653_v59  ;;  %v5652_v5 = vld [vmem:[#allocation14 + $0x1d0] sm:$0xff]  ;;  %v5777_v15 = vunpack.c.h.s8.bf16 %v5653_v59  ;;  %v5655_v2 = vld [vmem:[#allocation14 + $0x1e8] sm:$0xff]  ;;  %v6003_v54 = vld [vmem:[#allocation19 + $0x38] sm:$0xff] }
 0x8b3   : > { %v5774_v42 = vunpack.c.l.s8.bf16 %v5652_v5  ;;  %v5776_v61 = vunpack.c.h.s8.bf16 %v5652_v5  ;;  %v5958_v5 = vld [vmem:[#allocation16] sm:$0x3] }
 0x8b4   : > { %5904 = vmatprep.mubr.bf16.mxu0 %v5591_v10  ;;  %v5654_v10 = vld [vmem:[#allocation14 + $0x1e0] sm:$0xff] }
 0x8b5   : > { %5905 = vmatmul.mubr.bf16.vlgmr.msra.gmra.mrb[8].mxu0 %v5590_v3  ;;  %5428 = vmatpush1.bf16.msra.mxu1 %v4020_v36  ;;  %v5779_v3 = vunpack.c.l.s8.bf16 %v5655_v2  ;;  %v5778_v36 = vunpack.c.l.s8.bf16 %v5654_v10 }
 0x8b6   : > { %5916 = vmatpush1.bf16.msra.mxu0 %v5754_v38  ;;  %5429 = vmatprep.subr.bf16.mxu1 %v4029_v58  ;;  %v5780_v38 = vunpack.c.h.s8.bf16 %v5654_v10  ;;  %v5657_v58 = vld [vmem:[#allocation14 + $0x1f8] sm:$0xff] }
 0x8b7   : > { %5917 = vmatprep.subr.bf16.mxu0 %v5757_v4  ;;  %v5783_v4 = vunpack.c.l.s8.bf16 %v5657_v58 }
 0x8b9   : > { %5430 = vmatpush1.bf16.msra.mxu1 %v4028_v43  ;;  %v5785_v43 = vunpack.c.h.s8.bf16 %v5657_v58 }
 0x8ba   : > { %5918 = vmatpush1.bf16.msra.mxu0 %v5756_v56  ;;  %5431 = vmatprep.subr.bf16.mxu1 %v4037_v18  ;;  %v5784_v56 = vunpack.c.h.s8.bf16 %v5656_v45  ;;  %v6000_v18 = vld [vmem:[#allocation19 + $0x20] sm:$0xff] }
 0x8bb   : > { %5919 = vmatprep.subr.bf16.mxu0 %v5759_v33  ;;  %v6012_v33 = vunpack.c.l.s8.bf16 %v6000_v18 }
 0x8bd   : > { %5432 = vmatpush1.bf16.msra.mxu1 %v4036_v63  ;;  %v6013_v63 = vunpack.c.h.s8.bf16 %v6000_v18 }
 0x8be   : > { %5920 = vmatpush1.bf16.msra.mxu0 %v5758_v13  ;;  %5433 = vmatprep.subr.bf16.mxu1 %v4045_v26  ;;  %v6001_v13 = vld [vmem:[#allocation19 + $0x28] sm:$0xff]  ;;  %v6005_v26 = vunpack.c.h.s8.bf16 %v5996_v9 }
 0x8bf   : > { %5921 = vmatprep.subr.bf16.mxu0 %v5761_v11  ;;  %v6014_v11 = vunpack.c.l.s8.bf16 %v6001_v13 }
 0x8c1   : > { %5434 = vmatpush1.bf16.msra.mxu1 %v4044_v50  ;;  %v6015_v50 = vunpack.c.h.s8.bf16 %v6001_v13 }
 0x8c2   : > { %5922 = vmatpush1.bf16.msra.mxu0 %v5760_v14  ;;  %5435 = vmatprep.subr.bf16.mxu1 %v4053_v12  ;;  %v6002_v14 = vld [vmem:[#allocation19 + $0x30] sm:$0xff]  ;;  %v6007_v12 = vunpack.c.h.s8.bf16 %v5997_v37  ;;  %v6278_v37 = vld [vmem:[#allocation20] ss:$0 sm:$0xff] }
 0x8c3   : > { %5923 = vmatprep.subr.bf16.mxu0 %v5763_v16  ;;  %v6016_v25 = vunpack.c.l.s8.bf16 %v6002_v14  ;;  %v5998_v16 = vld [vmem:[#allocation19 + $0x10] sm:$0xff] }
 0x8c4   : > { %v6008_v48 = vunpack.c.l.s8.bf16 %v5998_v16 }
 0x8c5   : > { %5436 = vmatpush1.bf16.msra.mxu1 %v4052_v17  ;;  %v5483_v17 = vrot.slane %v8007_v19, %v7805_v7 }
 0x8c6   : > { %5924 = vmatpush1.bf16.msra.mxu0 %v5762_v49  ;;  %5437 = vmatprep.subr.bf16.mxu1 %v4061_v20  ;;  %v5487_v49 = vrot.slane %v8007_v19, %v7813_v51  ;;  %v5541_v20 = vrot.slane %v8013_v21, %v7805_v7  ;;  %v6017_v51 = vunpack.c.h.s8.bf16 %v6002_v14  ;;  %v6009_v21 = vunpack.c.h.s8.bf16 %v5998_v16  ;;  %v6279_v14 = vld [vmem:[#allocation22] ss:$0 sm:$0xff] }
 0x8c7   : > { %5925 = vmatprep.subr.bf16.mxu0 %v5765_v60 }
 0x8c9   : > { %5438 = vmatpush1.bf16.msra.mxu1 %v4060_v27 }
 0x8ca   : > { %5926 = vmatpush1.bf16.msra.mxu0 %v5764_v28  ;;  %5439 = vmatprep.subr.bf16.mxu1 %v4069_v30 }
 0x8cb   : > { %5927 = vmatprep.subr.bf16.mxu0 %v5767_v8 }
 0x8cd   : > { %5440 = vmatpush1.bf16.msra.mxu1 %v4068_v32 }
 0x8ce   : > { %5928 = vmatpush1.bf16.msra.mxu0 %v5766_v29  ;;  %5441 = vmatprep.subr.bf16.mxu1 %v4077_v40 }
 0x8cf   : > { %5929 = vmatprep.subr.bf16.mxu0 %v5769_v39 }
 0x8d1   : > { %5442 = vmatpush1.bf16.msra.mxu1 %v4076_v53 }
 0x8d2   : > { %5930 = vmatpush1.bf16.msra.mxu0 %v5768_v23  ;;  %6286 = vmatprep.subr.bf16.mxu1 %v6012_v33 }
 0x8d3   : > { %5931 = vmatprep.subr.bf16.mxu0 %v5771_v44 }
 0x8d4   : > { %5444 = vmatmul.mubr.bf16.vlgmr.msra.gmra.mrb[8].mxu1 %v7937_v1  ;;  %v5781_v1 = vunpack.c.h.s8.bf16 %v5655_v2  ;;  %v5967_v2 = vrot.slane %v5958_v5, %v7762_v34 }
 0x8d5   : > { %6287 = vmatpush3.bf16.msra.mxu1 %v6004_v52 }
 0x8d6   : > { %5932 = vmatpush1.bf16.msra.mxu0 %v5770_v55  ;;  %6288 = vmatprep.subr.bf16.mxu1 %v6013_v63  ;;  %v6018_v55 = vunpack.c.l.s8.bf16 %v6003_v54 }
 0x8d7   : > { %5933 = vmatprep.subr.bf16.mxu0 %v5773_v57  ;;  %v5999_v57 = vld [vmem:[#allocation19 + $0x18] sm:$0xff] }
 0x8d8   : > { %v6010_v59 = vunpack.c.l.s8.bf16 %v5999_v57 }
 0x8d9   : > { %6289 = vmatpush3.bf16.msra.mxu1 %v6005_v26 }
 0x8da   : > { %5934 = vmatpush1.bf16.msra.mxu0 %v5772_v0  ;;  %6290 = vmatprep.subr.bf16.mxu1 %v6014_v11  ;;  %v6019_v0 = vunpack.c.h.s8.bf16 %v6003_v54 }
 0x8db   : > { %5935 = vmatprep.subr.bf16.mxu0 %v5775_v35  ;;  %v6011_v35 = vunpack.c.h.s8.bf16 %v5999_v57 }
 0x8dd   : > { %6291 = vmatpush3.bf16.msra.mxu1 %v6006_v46 }
 0x8de   : > { %5936 = vmatpush1.bf16.msra.mxu0 %v5774_v42  ;;  %6292 = vmatprep.subr.bf16.mxu1 %v6015_v50  ;;  %v5974_v42 = vld [vmem:[#allocation17] sm:$0x3] }
 0x8df   : > { %5937 = vmatprep.subr.bf16.mxu0 %v5777_v15  ;;  %v5963_v15 = vrot.slane %v5958_v5, %v7791_v41  ;;  %v5983_v10 = vrot.slane %v5974_v42, %v7762_v34 }
 0x8e1   : > { %6293 = vmatpush3.bf16.msra.mxu1 %v6007_v12 }
 0x8e2   : > { %5938 = vmatpush1.bf16.msra.mxu0 %v5776_v61  ;;  %6294 = vmatprep.subr.bf16.mxu1 %v6016_v25  ;;  %v5979_v61 = vrot.slane %v5974_v42, %v7791_v41 }
 0x8e3   : > { %5939 = vmatprep.subr.bf16.mxu0 %v5779_v3 }
 0x8e5   : > { %6295 = vmatpush3.bf16.msra.mxu1 %v6008_v48 }
 0x8e6   : > { %5940 = vmatpush1.bf16.msra.mxu0 %v5778_v36  ;;  %6296 = vmatprep.subr.bf16.mxu1 %v6017_v51 }
 0x8e7   : > { %5941 = vmatprep.subr.bf16.mxu0 %v5781_v1 }
 0x8e9   : > { %6297 = vmatpush3.bf16.msra.mxu1 %v6009_v21 }
 0x8ea   : > { %5942 = vmatpush1.bf16.msra.mxu0 %v5780_v38  ;;  %6298 = vmatprep.subr.bf16.mxu1 %v6018_v55 }
 0x8eb   : > { %5943 = vmatprep.subr.bf16.mxu0 %v5783_v4 }
 0x8ed   : > { %6299 = vmatpush3.bf16.msra.mxu1 %v6010_v59 }
 0x8ee   : > { %5944 = vmatpush1.bf16.msra.mxu0 %v5782_v6  ;;  %6300 = vmatprep.subr.bf16.mxu1 %v6019_v0 }
 0x8ef   : > { %5945 = vmatprep.subr.bf16.mxu0 %v5785_v43 }
 0x8f1   : > { %6301 = vmatpush3.bf16.msra.mxu1 %v6011_v35 }
 0x8f2   : > { %5946 = vmatpush1.bf16.msra.mxu0 %v5784_v56 }
 0x9a7   : > { %v5445_v60 = vpop.f32.mrb[8].mxu1 }
 0x9a8   : > { %v5502_v22 = vmul.f32 %v5483_v17, %v5445_v60  ;;  %v5447_v27 = vpop.f32.mrb[9].mxu1 }
 0x9a9   : > { %v5503_v28 = vmul.f32 %v5487_v49, %v5447_v27  ;;  %v5449_v30 = vpop.f32.mrb[10].mxu1 }
 0x9aa   : > { %v5560_v24 = vadd.f32 %v5541_v20, %v5502_v22  ;;  %v5510_v8 = vmul.f32 %v5483_v17, %v5449_v30  ;;  %v5451_v31 = vpop.f32.mrb[11].mxu1 }
 0x9ab   : > { %v5561_v32 = vadd.f32 %v5545_v47, %v5503_v28  ;;  %v5511_v29 = vmul.f32 %v5487_v49, %v5451_v31 }
 0x9ac   : > { %v5568_v40 = vadd.f32 %v5541_v20, %v5510_v8  ;;  %v5576_v62 = vmax.f32 %v5560_v24, 0.0 }
 0x9ad   : > { %v5569_v39 = vadd.f32 %v5545_v47, %v5511_v29  ;;  %v5577_v53 = vmax.f32 %v5561_v32, 0.0 }
 0x9ae   : > { %v5584_v19 = vmax.f32 %v5568_v40, 0.0 }
 0x9af   : > { %v5585_v23 = vmax.f32 %v5569_v39, 0.0 }
 0x9b0   : > { %v5592_v7 = vpack.c.bf16 %v5584_v19, %v5576_v62 }
 0x9b1   : > { %v5593_v44 = vpack.c.bf16 %v5585_v23, %v5577_v53 }
 0x9b3   : > { %5947 = vmatprep.mubr.bf16.mxu0 %v5593_v44 }
 0x9b4   : > { %5948 = vmatmul.mubr.bf16.vlgmr.msra.gmra.mrb[8].mxu0 %v5592_v7 }
 0xa87   : > { %v5949_v3 = vpop.f32.mrb[8].mxu0 }
 0xa88   : > { %v5970_v36 = vmul.f32 %v5963_v15, %v5949_v3  ;;  %v5951_v1 = vpop.f32.mrb[9].mxu0 }
 0xa89   : > { %v5971_v38 = vmul.f32 %v5967_v2, %v5951_v1  ;;  %v5953_v58 = vpop.f32.mrb[10].mxu0 }
 0xa8a   : > { %v5986_v4 = vadd.f32 %v5979_v61, %v5970_v36  ;;  %v5972_v45 = vmul.f32 %v5963_v15, %v5953_v58  ;;  %v5955_v6 = vpop.f32.mrb[11].mxu0 }
 0xa8b   : > { %v5987_v43 = vadd.f32 %v5983_v10, %v5971_v38  ;;  %v5973_v56 = vmul.f32 %v5967_v2, %v5955_v6 }
 0xa8c   : > { %v5988_v18 = vadd.f32 %v5979_v61, %v5972_v45  ;;  %v5990_v33 = vmax.f32 %v5986_v4, 0.0 }
 0xa8d   : > { %v5989_v9 = vadd.f32 %v5983_v10, %v5973_v56  ;;  %v5991_v63 = vmax.f32 %v5987_v43, 0.0 }
 0xa8e   : > { %v5992_v52 = vmax.f32 %v5988_v18, 0.0 }
 0xa8f   : > { %v5993_v13 = vmax.f32 %v5989_v9, 0.0 }
 0xa90   : > { %v5994_v26 = vpack.c.bf16 %v5992_v52, %v5990_v33 }
 0xa91   : > { %v5995_v41 = vpack.c.bf16 %v5993_v13, %v5991_v63 }
 0xa93   : > { %6052 = vmatprep.mubr.bf16.mxu1 %v5995_v41 }
 0xa94   : > { %6053 = vmatmul.mubr.bf16.vlgmr.msra.gmra.mrb[12].mxu1 %v5994_v26 }
 0xb67   : > { %v6302_v34 = vpop.f32.mrb[12].mxu1 }
 0xb68   : > { %v6303_v11 = vpop.f32.mrb[13].mxu1 }
 0xb69   : > { %v6304_v46 = vadd.f32 %v6303_v11, %v6302_v34  ;;  %v6305_v50 = vpop.f32.mrb[14].mxu1 }
 0xb6a   : > { %v6306_v12 = vpop.f32.mrb[15].mxu1 }
 0xb6b   : > { %v6068_v25 = vmul.f32 %v6304_v46, %v6278_v37  ;;  %v6307_v16 = vadd.f32 %v6306_v12, %v6305_v50 }
 0xb6d   : > { %v6077_v48 = vadd.f32 %v6279_v14, %v6068_v25  ;;  %v6069_v17 = vmul.f32 %v6307_v16, %v6278_v37 }
 0xb6f   : > { %6079 = vst [vmem:[%s8118_s30] sm:$0xff] %v6077_v48  ;;  %v6078_v49 = vadd.f32 %v6279_v14, %v6069_v17 }
 0xb71   : > { %6080 = vst [vmem:[%s8118_s30 + $0x8] sm:$0xff] %v6078_v49 }
 0xb72 PF: > { %s8119_s28 = sld [smem:[#allocation36_spill]]  ;;  %s8120_s25 = sld [smem:[#allocation34_spill]] }
 0xb73   : > { %s8121_s17 = sld [smem:[#allocation37_spill]]  ;;  %s8122_s26 = smov %s7005_s27 }
 0xb78   : > { %p28_p11 = scmp.ge.s32.totalorder %s8119_s28, 5  }
 0xb79   : > { %s8123_s27 = smov %s8121_s17 }
 0xb7a   :  { %30 = sbr.rel (!%p28_p11) target bundleno = 13 (0xd), region = 187 }
 0xb81   :  { %6092 = vsyncpa [#allocation7], 1 }
 0xb82   :  { %6094 = vsyncpa [#allocation7 + $0x1], 1 }
 0xb83   :  { %6095 = vsyncpa [#allocation9], 1 }
 0xb84   :  { %6096 = vsyncpa [#allocation12], 1 }
 0xb85   :  { %6097 = vsyncpa [#allocation15], 1 }
 0xb86   :  { %6098 = vsyncpa [#allocation18], 1 }
 0xb87   :  { %6099 = vsyncpa [#allocation21], 1 }
 0xb88   :  { %6100 = vsyncmov [#allocation3] }
 0xb8b   :  { %s6101_s12 = vpop.sfrf %6100 }
 0xb8c   :  { %p6282_p13 = scmp.ne.s32.totalorder %s6101_s12, 0 }
 0xb8e   :  { %6105 = shalt.err (%p6282_p13)  }

</bundles_post_ra>
